<compile_context>
chip_gen: v7x
topology: tpu7x:2x2x1
jax: 0.10.0
libtpu: 0.0.40
codegen_flags: <defaults>
</compile_context>

<pallas_src>
import functools

import jax
import jax.numpy as jnp
from jax.experimental import pallas as pl
from jax.experimental.pallas import tpu as pltpu

EPS = 1e-5


# ----------------------------- Pallas kernels ------------------------------

def _conv_stats_kernel(a_ref, w_ref, m_ref, y_ref, s_ref, q_ref, *, wp, mout, cin):
    """3x3 'same' conv as 9 shifted matmuls on the flat padded layout, plus
    per-image per-channel sum / sum-of-squares for training-mode BatchNorm.

    a_ref: (P', cin)   flat spatially-padded input (+2 safety rows)
    w_ref: (9, cin, cout)
    m_ref: (mout, 1)   1.0 on valid columns, 0.0 on the 2 junk columns per row
    y_ref: (mout, cout) pre-BN conv output (junk columns zeroed)
    s_ref, q_ref: (8, cout) per-image sum / sum-of-squares (row-broadcast)
    """
    cout = y_ref.shape[-1]
    acc = jnp.zeros((mout, cout), jnp.float32)
    for dy in range(3):
        for dx in range(3):
            t = dy * 3 + dx
            d = dy * wp + dx                      # static flat row shift of this tap
            a = a_ref[pl.ds(d, mout), :]          # (mout, cin)
            wt = w_ref[t]                         # (cin, cout)
            if cin == 1:
                acc = acc + a * wt                # outer-product tap (VPU path)
            else:
                acc = acc + jnp.dot(a, wt, preferred_element_type=jnp.float32)
    acc = acc * m_ref[...]                        # zero the junk columns
    y_ref[...] = acc
    s = jnp.sum(acc, axis=0, keepdims=True)       # (1, cout)
    q = jnp.sum(acc * acc, axis=0, keepdims=True)
    s_ref[...] = jnp.broadcast_to(s, (8, cout))
    q_ref[...] = jnp.broadcast_to(q, (8, cout))


def _bn_relu_kernel(y_ref, sc_ref, sh_ref, m_ref, o_ref):
    """Fused BN-apply + ReLU on the junky flat layout; junk columns re-zeroed
    so the output can be reused directly as the next conv's zero padding."""
    a = jnp.maximum(y_ref[...] * sc_ref[...] + sh_ref[...], 0.0)
    o_ref[...] = a * m_ref[...]


def _bn_relu_pool_kernel(y_ref, sc_ref, sh_ref, o_ref, *, c, wo):
    """Fused BN-apply + ReLU + 2x2 maxpool.

    y_ref: (H, wo+1, 2*c) -- adjacent column pairs packed on the lane axis
    sc_ref/sh_ref: (1, 2*c) -- per-channel scale/shift duplicated for both halves
    o_ref: (H//2, wo, c)
    """
    a = jnp.maximum(y_ref[...] * sc_ref[...] + sh_ref[...], 0.0)
    m = jnp.maximum(a[:, :, :c], a[:, :, c:])     # max over W pairs -> (H, wo+1, c)
    m = m[:, :wo, :]                              # drop the junk column pair
    h = m.shape[0]
    m = m.reshape(h // 2, 2, wo, c)
    o_ref[...] = jnp.maximum(m[:, 0], m[:, 1])    # max over H pairs -> (H//2, wo, c)


# ------------------------------- Wrappers -----------------------------------

def _conv_stats(a_flat, w9, mask, H, W):
    N, P, cin = a_flat.shape
    cout = w9.shape[-1]
    wp = W + 2
    mout = H * wp
    kernel = functools.partial(_conv_stats_kernel, wp=wp, mout=mout, cin=cin)
    y, s, q = pl.pallas_call(
        kernel,
        grid=(N,),
        out_shape=(
            jax.ShapeDtypeStruct((N, mout, cout), jnp.float32),
            jax.ShapeDtypeStruct((N, 8, cout), jnp.float32),
            jax.ShapeDtypeStruct((N, 8, cout), jnp.float32),
        ),
        in_specs=[
            pl.BlockSpec((None, P, cin), lambda n: (n, 0, 0)),
            pl.BlockSpec((9, cin, cout), lambda n: (0, 0, 0)),
            pl.BlockSpec((mout, 1), lambda n: (0, 0)),
        ],
        out_specs=(
            pl.BlockSpec((None, mout, cout), lambda n: (n, 0, 0)),
            pl.BlockSpec((None, 8, cout), lambda n: (n, 0, 0)),
            pl.BlockSpec((None, 8, cout), lambda n: (n, 0, 0)),
        ),
        compiler_params=pltpu.CompilerParams(dimension_semantics=("parallel",)),
    )(a_flat, w9, mask)
    return y, s, q


def _finalize_bn(ssum, ssq, gamma, beta, count):
    """Training-mode BN: scale/shift from batch sum & sum-of-squares (tiny XLA)."""
    total = jnp.sum(ssum[:, 0, :], axis=0)
    total_sq = jnp.sum(ssq[:, 0, :], axis=0)
    mean = total / count
    var = jnp.maximum(total_sq / count - mean * mean, 0.0)
    scale = gamma * jax.lax.rsqrt(var + EPS)
    shift = beta - mean * scale
    return scale.reshape(1, -1), shift.reshape(1, -1)


def _bn_relu(y, scale, shift, mask):
    N, M, C = y.shape
    return pl.pallas_call(
        _bn_relu_kernel,
        grid=(N,),
        out_shape=jax.ShapeDtypeStruct((N, M, C), jnp.float32),
        in_specs=[
            pl.BlockSpec((None, M, C), lambda n: (n, 0, 0)),
            pl.BlockSpec((1, C), lambda n: (0, 0)),
            pl.BlockSpec((1, C), lambda n: (0, 0)),
            pl.BlockSpec((M, 1), lambda n: (0, 0)),
        ],
        out_specs=pl.BlockSpec((None, M, C), lambda n: (n, 0, 0)),
        compiler_params=pltpu.CompilerParams(dimension_semantics=("parallel",)),
    )(y, scale, shift, mask)


def _bn_relu_pool(y, scale, shift, H, W):
    N, _, C = y.shape
    wo, ho = W // 2, H // 2
    y4 = y.reshape(N, H, wo + 1, 2 * C)           # layout-preserving (free) view
    sc2 = jnp.concatenate([scale, scale], axis=-1)
    sh2 = jnp.concatenate([shift, shift], axis=-1)
    kernel = functools.partial(_bn_relu_pool_kernel, c=C, wo=wo)
    return pl.pallas_call(
        kernel,
        grid=(N,),
        out_shape=jax.ShapeDtypeStruct((N, ho, wo, C), jnp.float32),
        in_specs=[
            pl.BlockSpec((None, H, wo + 1, 2 * C), lambda n: (n, 0, 0, 0)),
            pl.BlockSpec((1, 2 * C), lambda n: (0, 0)),
            pl.BlockSpec((1, 2 * C), lambda n: (0, 0)),
        ],
        out_specs=pl.BlockSpec((None, ho, wo, C), lambda n: (n, 0, 0, 0)),
        compiler_params=pltpu.CompilerParams(dimension_semantics=("parallel",)),
    )(y4, sc2, sh2)


# --------------------------- Layout glue helpers -----------------------------

def _valid_mask(H, W):
    wp = W + 2
    cols = jnp.arange(H * wp, dtype=jnp.int32) % wp
    return (cols < W).astype(jnp.float32).reshape(H * wp, 1)


def _pad_flat_from_nhwc(x):
    """(N,H,W,C) -> (N,(H+2)*(W+2)+2,C): spatial zero-pad, row-major flatten,
    plus 2 trailing zero rows so every tap's shifted window stays in-bounds."""
    N, H, W, C = x.shape
    xp = jnp.pad(x, ((0, 0), (1, 1), (1, 1), (0, 0)))
    flat = xp.reshape(N, (H + 2) * (W + 2), C)
    return jnp.pad(flat, ((0, 0), (0, 2), (0, 0)))


def _pad_flat_from_junky(y_act, W):
    """The activated junky flat layout (junk columns already zeroed) IS the
    next conv's spatially padded input up to a constant row shift: padding
    W+3 zero rows on each side reproduces pad(x,1) flattened (+2 safety rows)."""
    return jnp.pad(y_act, ((0, 0), (W + 3, W + 3), (0, 0)))


# ------------------------------ Forward pass ---------------------------------

def vgg16bn_forward(x_nchw, p):
    N, _, Hin, Win = x_nchw.shape
    x = jnp.transpose(x_nchw, (0, 2, 3, 1))                   # NHWC, 1 channel

    # Fold torch's x.repeat(1,3,1,1) into conv1_1 (3 identical input channels);
    # conv biases skipped everywhere: they cancel exactly inside training BN.
    w11 = jnp.sum(p["w1_1"], axis=2, keepdims=True)           # (3,3,1,64)

    def layer(a_flat, w_hwio, gamma, beta, H, W, mask, pool):
        cin = a_flat.shape[-1]
        cout = w_hwio.shape[-1]
        w9 = w_hwio.reshape(9, cin, cout)
        y, s, q = _conv_stats(a_flat, w9, mask, H, W)
        scale, shift = _finalize_bn(s, q, gamma, beta, float(N * H * W))
        if pool:
            return _bn_relu_pool(y, scale, shift, H, W)       # clean NHWC, pooled
        return _bn_relu(y, scale, shift, mask)                # junky flat, junk=0

    # ----- block 1 -----
    H, W = Hin, Win
    mask1 = _valid_mask(H, W)
    a = _pad_flat_from_nhwc(x)
    act = layer(a, w11, p["g1_1"], p["be1_1"], H, W, mask1, pool=False)
    a = _pad_flat_from_junky(act, W)
    out1 = layer(a, p["w1_2"], p["g1_2"], p["be1_2"], H, W, mask1, pool=True)

    # ----- block 2 -----
    H, W = H // 2, W // 2
    mask2 = _valid_mask(H, W)
    a = _pad_flat_from_nhwc(out1)
    act = layer(a, p["w2_1"], p["g2_1"], p["be2_1"], H, W, mask2, pool=False)
    a = _pad_flat_from_junky(act, W)
    out2 = layer(a, p["w2_2"], p["g2_2"], p["be2_2"], H, W, mask2, pool=True)

    return [jnp.transpose(out1, (0, 3, 1, 2)),
            jnp.transpose(out2, (0, 3, 1, 2))]


# ------------------------- Deterministic parameters --------------------------

def init_params(key):
    ks = iter(jax.random.split(key, 32))
    p = {}

    def conv(cin, cout):
        w = jax.random.normal(next(ks), (3, 3, cin, cout), jnp.float32)
        w = w / jnp.sqrt(9.0 * cin)
        b = 0.01 * jax.random.normal(next(ks), (cout,), jnp.float32)
        return w, b

    def bn(c):
        g = 1.0 + 0.1 * jax.random.normal(next(ks), (c,), jnp.float32)
        be = 0.1 * jax.random.normal(next(ks), (c,), jnp.float32)
        return g, be

    p["w1_1"], p["b1_1"] = conv(3, 64);    p["g1_1"], p["be1_1"] = bn(64)
    p["w1_2"], p["b1_2"] = conv(64, 64);   p["g1_2"], p["be1_2"] = bn(64)
    p["w2_1"], p["b2_1"] = conv(64, 128);  p["g2_1"], p["be2_1"] = bn(128)
    p["w2_2"], p["b2_2"] = conv(128, 128); p["g2_2"], p["be2_2"] = bn(128)
    return p


# ------------------------------ JAX reference --------------------------------

def reference_forward(x_nchw, p):
    def conv_ref(x, w, b):
        y = jax.lax.conv_general_dilated(
            x, w, (1, 1), "SAME",
            dimension_numbers=("NCHW", "HWIO", "NCHW"))
        return y + b[None, :, None, None]

    def bn_relu_ref(x, g, be):
        mean = x.mean((0, 2, 3), keepdims=True)
        var = ((x - mean) ** 2).mean((0, 2, 3), keepdims=True)
        y = (x - mean) * jax.lax.rsqrt(var + EPS)
        y = y * g[None, :, None, None] + be[None, :, None, None]
        return jnp.maximum(y, 0.0)

    def pool_ref(x):
        N, C, H, W = x.shape
        return x.reshape(N, C, H // 2, 2, W // 2, 2).max((3, 5))

    x = jnp.tile(x_nchw, (1, 3, 1, 1))
    h = bn_relu_ref(conv_ref(x, p["w1_1"], p["b1_1"]), p["g1_1"], p["be1_1"])
    h = bn_relu_ref(conv_ref(h, p["w1_2"], p["b1_2"]), p["g1_2"], p["be1_2"])
    out1 = pool_ref(h)
    h = bn_relu_ref(conv_ref(out1, p["w2_1"], p["b2_1"]), p["g2_1"], p["be2_1"])
    h = bn_relu_ref(conv_ref(h, p["w2_2"], p["b2_2"]), p["g2_2"], p["be2_2"])
    out2 = pool_ref(h)
    return out1, out2


# ---------------------------------- Main -------------------------------------

if __name__ == "__main__":
    key = jax.random.PRNGKey(0)
    k_x, k_p = jax.random.split(key)
    x = jax.random.normal(k_x, (2, 1, 16, 16), jnp.float32)   # NCHW, 1 channel
    params = init_params(k_p)

    fwd = jax.jit(vgg16bn_forward)
    out1, out2 = fwd(x, params)
    jax.block_until_ready(out1)
    jax.block_until_ready(out2)

    assert out1.shape == (2, 64, 8, 8), out1.shape
    assert out2.shape == (2, 128, 4, 4), out2.shape

    ref1, ref2 = reference_forward(x, params)
    assert jnp.allclose(out1, ref1, rtol=2e-2, atol=2e-2), \
        float(jnp.max(jnp.abs(out1 - ref1)))
    assert jnp.allclose(out2, ref2, rtol=2e-2, atol=2e-2), \
        float(jnp.max(jnp.abs(out2 - ref2)))

    print("KERNEL_OK")
</pallas_src>

<mosaic_0001>
module attributes {stable_mosaic.version = 11 : i64} {
  func.func @_conv_stats_kernel(%arg0: i32, %arg1: memref<1x326x1xf32, #tpu.memory_space<vmem>>, %arg2: memref<9x1x64xf32, #tpu.memory_space<vmem>>, %arg3: memref<288x1xf32, #tpu.memory_space<vmem>>, %arg4: memref<1x288x64xf32, #tpu.memory_space<vmem>>, %arg5: memref<1x8x64xf32, #tpu.memory_space<vmem>>, %arg6: memref<1x8x64xf32, #tpu.memory_space<vmem>>) attributes {dimension_semantics = [#tpu.dimension_semantics<parallel>], iteration_bounds = array<i64: 2>, scalar_prefetch = 0 : i64, scratch_operands = 0 : i64, tpu.core_type = #tpu.core_type<tc>, window_params = [{transform_indices = @transform_0, window_bounds = array<i64: 1, 326, 1>}, {pipeline_mode = #tpu.pipeline_mode<synchronous>, transform_indices = @transform_1, window_bounds = array<i64: 9, 1, 64>}, {pipeline_mode = #tpu.pipeline_mode<synchronous>, transform_indices = @transform_2, window_bounds = array<i64: 288, 1>}, {transform_indices = @transform_3, window_bounds = array<i64: 1, 288, 64>}, {transform_indices = @transform_4, window_bounds = array<i64: 1, 8, 64>}, {transform_indices = @transform_5, window_bounds = array<i64: 1, 8, 64>}]} {
    %cst = arith.constant 0.000000e+00 : f32
    %0 = vector.broadcast %cst : f32 to vector<288x64xf32>
    %c0 = arith.constant 0 : index
    %c0_0 = arith.constant 0 : index
    %c0_1 = arith.constant 0 : index
    %1 = vector.load %arg1[%c0, %c0_0, %c0_1] : memref<1x326x1xf32, #tpu.memory_space<vmem>>, vector<1x288x1xf32>
    %2 = vector.shape_cast %1 : vector<1x288x1xf32> to vector<288x1xf32>
    %c0_2 = arith.constant 0 : index
    %c0_3 = arith.constant 0 : index
    %c0_4 = arith.constant 0 : index
    %3 = vector.load %arg2[%c0_2, %c0_3, %c0_4] : memref<9x1x64xf32, #tpu.memory_space<vmem>>, vector<1x1x64xf32>
    %4 = vector.shape_cast %3 : vector<1x1x64xf32> to vector<1x64xf32>
    %5 = vector.broadcast %2 : vector<288x1xf32> to vector<288x64xf32>
    %6 = vector.broadcast %4 : vector<1x64xf32> to vector<288x64xf32>
    %7 = arith.mulf %5, %6 : vector<288x64xf32>
    %8 = arith.addf %0, %7 : vector<288x64xf32>
    %c0_5 = arith.constant 0 : index
    %c1 = arith.constant 1 : index
    %c0_6 = arith.constant 0 : index
    %9 = vector.load %arg1[%c0_5, %c1, %c0_6] : memref<1x326x1xf32, #tpu.memory_space<vmem>>, vector<1x288x1xf32>
    %10 = vector.shape_cast %9 : vector<1x288x1xf32> to vector<288x1xf32>
    %c1_7 = arith.constant 1 : index
    %c0_8 = arith.constant 0 : index
    %c0_9 = arith.constant 0 : index
    %11 = vector.load %arg2[%c1_7, %c0_8, %c0_9] : memref<9x1x64xf32, #tpu.memory_space<vmem>>, vector<1x1x64xf32>
    %12 = vector.shape_cast %11 : vector<1x1x64xf32> to vector<1x64xf32>
    %13 = vector.broadcast %10 : vector<288x1xf32> to vector<288x64xf32>
    %14 = vector.broadcast %12 : vector<1x64xf32> to vector<288x64xf32>
    %15 = arith.mulf %13, %14 : vector<288x64xf32>
    %16 = arith.addf %8, %15 : vector<288x64xf32>
    %c0_10 = arith.constant 0 : index
    %c2 = arith.constant 2 : index
    %c0_11 = arith.constant 0 : index
    %17 = vector.load %arg1[%c0_10, %c2, %c0_11] : memref<1x326x1xf32, #tpu.memory_space<vmem>>, vector<1x288x1xf32>
    %18 = vector.shape_cast %17 : vector<1x288x1xf32> to vector<288x1xf32>
    %c2_12 = arith.constant 2 : index
    %c0_13 = arith.constant 0 : index
    %c0_14 = arith.constant 0 : index
    %19 = vector.load %arg2[%c2_12, %c0_13, %c0_14] : memref<9x1x64xf32, #tpu.memory_space<vmem>>, vector<1x1x64xf32>
    %20 = vector.shape_cast %19 : vector<1x1x64xf32> to vector<1x64xf32>
    %21 = vector.broadcast %18 : vector<288x1xf32> to vector<288x64xf32>
    %22 = vector.broadcast %20 : vector<1x64xf32> to vector<288x64xf32>
    %23 = arith.mulf %21, %22 : vector<288x64xf32>
    %24 = arith.addf %16, %23 : vector<288x64xf32>
    %c0_15 = arith.constant 0 : index
    %c18 = arith.constant 18 : index
    %c0_16 = arith.constant 0 : index
    %25 = vector.load %arg1[%c0_15, %c18, %c0_16] : memref<1x326x1xf32, #tpu.memory_space<vmem>>, vector<1x288x1xf32>
    %26 = vector.shape_cast %25 : vector<1x288x1xf32> to vector<288x1xf32>
    %c3 = arith.constant 3 : index
    %c0_17 = arith.constant 0 : index
    %c0_18 = arith.constant 0 : index
    %27 = vector.load %arg2[%c3, %c0_17, %c0_18] : memref<9x1x64xf32, #tpu.memory_space<vmem>>, vector<1x1x64xf32>
    %28 = vector.shape_cast %27 : vector<1x1x64xf32> to vector<1x64xf32>
    %29 = vector.broadcast %26 : vector<288x1xf32> to vector<288x64xf32>
    %30 = vector.broadcast %28 : vector<1x64xf32> to vector<288x64xf32>
    %31 = arith.mulf %29, %30 : vector<288x64xf32>
    %32 = arith.addf %24, %31 : vector<288x64xf32>
    %c0_19 = arith.constant 0 : index
    %c19 = arith.constant 19 : index
    %c0_20 = arith.constant 0 : index
    %33 = vector.load %arg1[%c0_19, %c19, %c0_20] : memref<1x326x1xf32, #tpu.memory_space<vmem>>, vector<1x288x1xf32>
    %34 = vector.shape_cast %33 : vector<1x288x1xf32> to vector<288x1xf32>
    %c4 = arith.constant 4 : index
    %c0_21 = arith.constant 0 : index
    %c0_22 = arith.constant 0 : index
    %35 = vector.load %arg2[%c4, %c0_21, %c0_22] : memref<9x1x64xf32, #tpu.memory_space<vmem>>, vector<1x1x64xf32>
    %36 = vector.shape_cast %35 : vector<1x1x64xf32> to vector<1x64xf32>
    %37 = vector.broadcast %34 : vector<288x1xf32> to vector<288x64xf32>
    %38 = vector.broadcast %36 : vector<1x64xf32> to vector<288x64xf32>
    %39 = arith.mulf %37, %38 : vector<288x64xf32>
    %40 = arith.addf %32, %39 : vector<288x64xf32>
    %c0_23 = arith.constant 0 : index
    %c20 = arith.constant 20 : index
    %c0_24 = arith.constant 0 : index
    %41 = vector.load %arg1[%c0_23, %c20, %c0_24] : memref<1x326x1xf32, #tpu.memory_space<vmem>>, vector<1x288x1xf32>
    %42 = vector.shape_cast %41 : vector<1x288x1xf32> to vector<288x1xf32>
    %c5 = arith.constant 5 : index
    %c0_25 = arith.constant 0 : index
    %c0_26 = arith.constant 0 : index
    %43 = vector.load %arg2[%c5, %c0_25, %c0_26] : memref<9x1x64xf32, #tpu.memory_space<vmem>>, vector<1x1x64xf32>
    %44 = vector.shape_cast %43 : vector<1x1x64xf32> to vector<1x64xf32>
    %45 = vector.broadcast %42 : vector<288x1xf32> to vector<288x64xf32>
    %46 = vector.broadcast %44 : vector<1x64xf32> to vector<288x64xf32>
    %47 = arith.mulf %45, %46 : vector<288x64xf32>
    %48 = arith.addf %40, %47 : vector<288x64xf32>
    %c0_27 = arith.constant 0 : index
    %c36 = arith.constant 36 : index
    %c0_28 = arith.constant 0 : index
    %49 = vector.load %arg1[%c0_27, %c36, %c0_28] : memref<1x326x1xf32, #tpu.memory_space<vmem>>, vector<1x288x1xf32>
    %50 = vector.shape_cast %49 : vector<1x288x1xf32> to vector<288x1xf32>
    %c6 = arith.constant 6 : index
    %c0_29 = arith.constant 0 : index
    %c0_30 = arith.constant 0 : index
    %51 = vector.load %arg2[%c6, %c0_29, %c0_30] : memref<9x1x64xf32, #tpu.memory_space<vmem>>, vector<1x1x64xf32>
    %52 = vector.shape_cast %51 : vector<1x1x64xf32> to vector<1x64xf32>
    %53 = vector.broadcast %50 : vector<288x1xf32> to vector<288x64xf32>
    %54 = vector.broadcast %52 : vector<1x64xf32> to vector<288x64xf32>
    %55 = arith.mulf %53, %54 : vector<288x64xf32>
    %56 = arith.addf %48, %55 : vector<288x64xf32>
    %c0_31 = arith.constant 0 : index
    %c37 = arith.constant 37 : index
    %c0_32 = arith.constant 0 : index
    %57 = vector.load %arg1[%c0_31, %c37, %c0_32] : memref<1x326x1xf32, #tpu.memory_space<vmem>>, vector<1x288x1xf32>
    %58 = vector.shape_cast %57 : vector<1x288x1xf32> to vector<288x1xf32>
    %c7 = arith.constant 7 : index
    %c0_33 = arith.constant 0 : index
    %c0_34 = arith.constant 0 : index
    %59 = vector.load %arg2[%c7, %c0_33, %c0_34] : memref<9x1x64xf32, #tpu.memory_space<vmem>>, vector<1x1x64xf32>
    %60 = vector.shape_cast %59 : vector<1x1x64xf32> to vector<1x64xf32>
    %61 = vector.broadcast %58 : vector<288x1xf32> to vector<288x64xf32>
    %62 = vector.broadcast %60 : vector<1x64xf32> to vector<288x64xf32>
    %63 = arith.mulf %61, %62 : vector<288x64xf32>
    %64 = arith.addf %56, %63 : vector<288x64xf32>
    %c0_35 = arith.constant 0 : index
    %c38 = arith.constant 38 : index
    %c0_36 = arith.constant 0 : index
    %65 = vector.load %arg1[%c0_35, %c38, %c0_36] : memref<1x326x1xf32, #tpu.memory_space<vmem>>, vector<1x288x1xf32>
    %66 = vector.shape_cast %65 : vector<1x288x1xf32> to vector<288x1xf32>
    %c8 = arith.constant 8 : index
    %c0_37 = arith.constant 0 : index
    %c0_38 = arith.constant 0 : index
    %67 = vector.load %arg2[%c8, %c0_37, %c0_38] : memref<9x1x64xf32, #tpu.memory_space<vmem>>, vector<1x1x64xf32>
    %68 = vector.shape_cast %67 : vector<1x1x64xf32> to vector<1x64xf32>
    %69 = vector.broadcast %66 : vector<288x1xf32> to vector<288x64xf32>
    %70 = vector.broadcast %68 : vector<1x64xf32> to vector<288x64xf32>
    %71 = arith.mulf %69, %70 : vector<288x64xf32>
    %72 = arith.addf %64, %71 : vector<288x64xf32>
    %c0_39 = arith.constant 0 : index
    %c0_40 = arith.constant 0 : index
    %73 = vector.load %arg3[%c0_39, %c0_40] : memref<288x1xf32, #tpu.memory_space<vmem>>, vector<288x1xf32>
    %74 = vector.broadcast %73 : vector<288x1xf32> to vector<288x64xf32>
    %75 = arith.mulf %72, %74 : vector<288x64xf32>
    %c0_41 = arith.constant 0 : index
    %c0_42 = arith.constant 0 : index
    %c0_43 = arith.constant 0 : index
    %76 = vector.load %arg4[%c0_41, %c0_42, %c0_43] : memref<1x288x64xf32, #tpu.memory_space<vmem>>, vector<1x288x64xf32>
    %77 = vector.shape_cast %76 : vector<1x288x64xf32> to vector<288x64xf32>
    %78 = vector.shape_cast %75 : vector<288x64xf32> to vector<1x288x64xf32>
    tpu.vector_store %arg4[%c0_41, %c0_42, %c0_43], %78 {strides = array<i32>} : memref<1x288x64xf32, #tpu.memory_space<vmem>>, vector<1x288x64xf32>,
    %cst_44 = arith.constant dense<0.000000e+00> : vector<64xf32>
    %79 = vector.multi_reduction <add>, %75, %cst_44 [0] : vector<288x64xf32> to vector<64xf32>
    %80 = vector.shape_cast %79 : vector<64xf32> to vector<1x64xf32>
    %81 = arith.mulf %75, %75 : vector<288x64xf32>
    %cst_45 = arith.constant dense<0.000000e+00> : vector<64xf32>
    %82 = vector.multi_reduction <add>, %81, %cst_45 [0] : vector<288x64xf32> to vector<64xf32>
    %83 = vector.shape_cast %82 : vector<64xf32> to vector<1x64xf32>
    %84 = vector.shape_cast %80 : vector<1x64xf32> to vector<1x64xf32>
    %85 = vector.broadcast %84 : vector<1x64xf32> to vector<8x64xf32>
    %c0_46 = arith.constant 0 : index
    %c0_47 = arith.constant 0 : index
    %c0_48 = arith.constant 0 : index
    %86 = vector.load %arg5[%c0_46, %c0_47, %c0_48] : memref<1x8x64xf32, #tpu.memory_space<vmem>>, vector<1x8x64xf32>
    %87 = vector.shape_cast %86 : vector<1x8x64xf32> to vector<8x64xf32>
    %88 = vector.shape_cast %85 : vector<8x64xf32> to vector<1x8x64xf32>
    tpu.vector_store %arg5[%c0_46, %c0_47, %c0_48], %88 {strides = array<i32>} : memref<1x8x64xf32, #tpu.memory_space<vmem>>, vector<1x8x64xf32>,
    %89 = vector.shape_cast %83 : vector<1x64xf32> to vector<1x64xf32>
    %90 = vector.broadcast %89 : vector<1x64xf32> to vector<8x64xf32>
    %c0_49 = arith.constant 0 : index
    %c0_50 = arith.constant 0 : index
    %c0_51 = arith.constant 0 : index
    %91 = vector.load %arg6[%c0_49, %c0_50, %c0_51] : memref<1x8x64xf32, #tpu.memory_space<vmem>>, vector<1x8x64xf32>
    %92 = vector.shape_cast %91 : vector<1x8x64xf32> to vector<8x64xf32>
    %93 = vector.shape_cast %90 : vector<8x64xf32> to vector<1x8x64xf32>
    tpu.vector_store %arg6[%c0_49, %c0_50, %c0_51], %93 {strides = array<i32>} : memref<1x8x64xf32, #tpu.memory_space<vmem>>, vector<1x8x64xf32>,
    return
  }
  func.func @transform_0(%arg0: i32) -> (i32, i32, i32) {
    %c0_i32 = arith.constant 0 : i32
    %c0_i32_0 = arith.constant 0 : i32
    %c0_i32_1 = arith.constant 0 : i32
    return %arg0, %c0_i32, %c0_i32_0 : i32, i32, i32
  }
  func.func @transform_1(%arg0: i32) -> (i32, i32, i32) {
    %c0_i32 = arith.constant 0 : i32
    %c0_i32_0 = arith.constant 0 : i32
    %c0_i32_1 = arith.constant 0 : i32
    %c0_i32_2 = arith.constant 0 : i32
    return %c0_i32, %c0_i32_0, %c0_i32_1 : i32, i32, i32
  }
  func.func @transform_2(%arg0: i32) -> (i32, i32) {
    %c0_i32 = arith.constant 0 : i32
    %c0_i32_0 = arith.constant 0 : i32
    %c0_i32_1 = arith.constant 0 : i32
    return %c0_i32, %c0_i32_0 : i32, i32
  }
  func.func @transform_3(%arg0: i32) -> (i32, i32, i32) {
    %c0_i32 = arith.constant 0 : i32
    %c0_i32_0 = arith.constant 0 : i32
    %c0_i32_1 = arith.constant 0 : i32
    return %arg0, %c0_i32, %c0_i32_0 : i32, i32, i32
  }
  func.func @transform_4(%arg0: i32) -> (i32, i32, i32) {
    %c0_i32 = arith.constant 0 : i32
    %c0_i32_0 = arith.constant 0 : i32
    %c0_i32_1 = arith.constant 0 : i32
    return %arg0, %c0_i32, %c0_i32_0 : i32, i32, i32
  }
  func.func @transform_5(%arg0: i32) -> (i32, i32, i32) {
    %c0_i32 = arith.constant 0 : i32
    %c0_i32_0 = arith.constant 0 : i32
    %c0_i32_1 = arith.constant 0 : i32
    return %arg0, %c0_i32, %c0_i32_0 : i32, i32, i32
  }
}

module attributes {stable_mosaic.version = 11 : i64} {
  func.func @_bn_relu_kernel(%arg0: i32, %arg1: memref<1x288x64xf32, #tpu.memory_space<vmem>>, %arg2: memref<1x64xf32, #tpu.memory_space<vmem>>, %arg3: memref<1x64xf32, #tpu.memory_space<vmem>>, %arg4: memref<288x1xf32, #tpu.memory_space<vmem>>, %arg5: memref<1x288x64xf32, #tpu.memory_space<vmem>>) attributes {dimension_semantics = [#tpu.dimension_semantics<parallel>], iteration_bounds = array<i64: 2>, scalar_prefetch = 0 : i64, scratch_operands = 0 : i64, tpu.core_type = #tpu.core_type<tc>, window_params = [{transform_indices = @transform_0, window_bounds = array<i64: 1, 288, 64>}, {pipeline_mode = #tpu.pipeline_mode<synchronous>, transform_indices = @transform_1, window_bounds = array<i64: 1, 64>}, {pipeline_mode = #tpu.pipeline_mode<synchronous>, transform_indices = @transform_2, window_bounds = array<i64: 1, 64>}, {pipeline_mode = #tpu.pipeline_mode<synchronous>, transform_indices = @transform_3, window_bounds = array<i64: 288, 1>}, {transform_indices = @transform_4, window_bounds = array<i64: 1, 288, 64>}]} {
    %c0 = arith.constant 0 : index
    %c0_0 = arith.constant 0 : index
    %c0_1 = arith.constant 0 : index
    %0 = vector.load %arg1[%c0, %c0_0, %c0_1] : memref<1x288x64xf32, #tpu.memory_space<vmem>>, vector<1x288x64xf32>
    %1 = vector.shape_cast %0 : vector<1x288x64xf32> to vector<288x64xf32>
    %c0_2 = arith.constant 0 : index
    %c0_3 = arith.constant 0 : index
    %2 = vector.load %arg2[%c0_2, %c0_3] : memref<1x64xf32, #tpu.memory_space<vmem>>, vector<1x64xf32>
    %3 = vector.broadcast %2 : vector<1x64xf32> to vector<288x64xf32>
    %4 = arith.mulf %1, %3 : vector<288x64xf32>
    %c0_4 = arith.constant 0 : index
    %c0_5 = arith.constant 0 : index
    %5 = vector.load %arg3[%c0_4, %c0_5] : memref<1x64xf32, #tpu.memory_space<vmem>>, vector<1x64xf32>
    %6 = vector.broadcast %5 : vector<1x64xf32> to vector<288x64xf32>
    %7 = arith.addf %4, %6 : vector<288x64xf32>
    %cst = arith.constant 0.000000e+00 : f32
    %8 = vector.broadcast %cst : f32 to vector<288x64xf32>
    %9 = arith.maximumf %7, %8 : vector<288x64xf32>
    %c0_6 = arith.constant 0 : index
    %c0_7 = arith.constant 0 : index
    %10 = vector.load %arg4[%c0_6, %c0_7] : memref<288x1xf32, #tpu.memory_space<vmem>>, vector<288x1xf32>
    %11 = vector.broadcast %10 : vector<288x1xf32> to vector<288x64xf32>
    %12 = arith.mulf %9, %11 : vector<288x64xf32>
    %c0_8 = arith.constant 0 : index
    %c0_9 = arith.constant 0 : index
    %c0_10 = arith.constant 0 : index
    %13 = vector.load %arg5[%c0_8, %c0_9, %c0_10] : memref<1x288x64xf32, #tpu.memory_space<vmem>>, vector<1x288x64xf32>
    %14 = vector.shape_cast %13 : vector<1x288x64xf32> to vector<288x64xf32>
    %15 = vector.shape_cast %12 : vector<288x64xf32> to vector<1x288x64xf32>
    tpu.vector_store %arg5[%c0_8, %c0_9, %c0_10], %15 {strides = array<i32>} : memref<1x288x64xf32, #tpu.memory_space<vmem>>, vector<1x288x64xf32>,
    return
  }
  func.func @transform_0(%arg0: i32) -> (i32, i32, i32) {
    %c0_i32 = arith.constant 0 : i32
    %c0_i32_0 = arith.constant 0 : i32
    %c0_i32_1 = arith.constant 0 : i32
    return %arg0, %c0_i32, %c0_i32_0 : i32, i32, i32
  }
  func.func @transform_1(%arg0: i32) -> (i32, i32) {
    %c0_i32 = arith.constant 0 : i32
    %c0_i32_0 = arith.constant 0 : i32
    %c0_i32_1 = arith.constant 0 : i32
    return %c0_i32, %c0_i32_0 : i32, i32
  }
  func.func @transform_2(%arg0: i32) -> (i32, i32) {
    %c0_i32 = arith.constant 0 : i32
    %c0_i32_0 = arith.constant 0 : i32
    %c0_i32_1 = arith.constant 0 : i32
    return %c0_i32, %c0_i32_0 : i32, i32
  }
  func.func @transform_3(%arg0: i32) -> (i32, i32) {
    %c0_i32 = arith.constant 0 : i32
    %c0_i32_0 = arith.constant 0 : i32
    %c0_i32_1 = arith.constant 0 : i32
    return %c0_i32, %c0_i32_0 : i32, i32
  }
  func.func @transform_4(%arg0: i32) -> (i32, i32, i32) {
    %c0_i32 = arith.constant 0 : i32
    %c0_i32_0 = arith.constant 0 : i32
    %c0_i32_1 = arith.constant 0 : i32
    return %arg0, %c0_i32, %c0_i32_0 : i32, i32, i32
  }
}

module attributes {stable_mosaic.version = 11 : i64} {
  func.func @_conv_stats_kernel(%arg0: i32, %arg1: memref<1x326x64xf32, #tpu.memory_space<vmem>>, %arg2: memref<9x64x64xf32, #tpu.memory_space<vmem>>, %arg3: memref<288x1xf32, #tpu.memory_space<vmem>>, %arg4: memref<1x288x64xf32, #tpu.memory_space<vmem>>, %arg5: memref<1x8x64xf32, #tpu.memory_space<vmem>>, %arg6: memref<1x8x64xf32, #tpu.memory_space<vmem>>) attributes {dimension_semantics = [#tpu.dimension_semantics<parallel>], iteration_bounds = array<i64: 2>, scalar_prefetch = 0 : i64, scratch_operands = 0 : i64, tpu.core_type = #tpu.core_type<tc>, window_params = [{transform_indices = @transform_0, window_bounds = array<i64: 1, 326, 64>}, {pipeline_mode = #tpu.pipeline_mode<synchronous>, transform_indices = @transform_1, window_bounds = array<i64: 9, 64, 64>}, {pipeline_mode = #tpu.pipeline_mode<synchronous>, transform_indices = @transform_2, window_bounds = array<i64: 288, 1>}, {transform_indices = @transform_3, window_bounds = array<i64: 1, 288, 64>}, {transform_indices = @transform_4, window_bounds = array<i64: 1, 8, 64>}, {transform_indices = @transform_5, window_bounds = array<i64: 1, 8, 64>}]} {
    %cst = arith.constant 0.000000e+00 : f32
    %0 = vector.broadcast %cst : f32 to vector<288x64xf32>
    %c0 = arith.constant 0 : index
    %c0_0 = arith.constant 0 : index
    %c0_1 = arith.constant 0 : index
    %1 = vector.load %arg1[%c0, %c0_0, %c0_1] : memref<1x326x64xf32, #tpu.memory_space<vmem>>, vector<1x288x64xf32>
    %2 = vector.shape_cast %1 : vector<1x288x64xf32> to vector<288x64xf32>
    %c0_2 = arith.constant 0 : index
    %c0_3 = arith.constant 0 : index
    %c0_4 = arith.constant 0 : index
    %3 = vector.load %arg2[%c0_2, %c0_3, %c0_4] : memref<9x64x64xf32, #tpu.memory_space<vmem>>, vector<1x64x64xf32>
    %4 = vector.shape_cast %3 : vector<1x64x64xf32> to vector<64x64xf32>
    %cst_5 = arith.constant dense<0.000000e+00> : vector<288x64xf32>
    %5 = tpu.matmul %2, %4, %cst_5 {dimension_numbers = #tpu.dot_dimension_numbers<[1], [0], [0], [1], [0, 0, 1, 1], [], []>} : vector<288x64xf32>, vector<64x64xf32>, vector<288x64xf32> -> vector<288x64xf32>
    %6 = arith.addf %0, %5 : vector<288x64xf32>
    %c0_6 = arith.constant 0 : index
    %c1 = arith.constant 1 : index
    %c0_7 = arith.constant 0 : index
    %7 = vector.load %arg1[%c0_6, %c1, %c0_7] : memref<1x326x64xf32, #tpu.memory_space<vmem>>, vector<1x288x64xf32>
    %8 = vector.shape_cast %7 : vector<1x288x64xf32> to vector<288x64xf32>
    %c1_8 = arith.constant 1 : index
    %c0_9 = arith.constant 0 : index
    %c0_10 = arith.constant 0 : index
    %9 = vector.load %arg2[%c1_8, %c0_9, %c0_10] : memref<9x64x64xf32, #tpu.memory_space<vmem>>, vector<1x64x64xf32>
    %10 = vector.shape_cast %9 : vector<1x64x64xf32> to vector<64x64xf32>
    %cst_11 = arith.constant dense<0.000000e+00> : vector<288x64xf32>
    %11 = tpu.matmul %8, %10, %cst_11 {dimension_numbers = #tpu.dot_dimension_numbers<[1], [0], [0], [1], [0, 0, 1, 1], [], []>} : vector<288x64xf32>, vector<64x64xf32>, vector<288x64xf32> -> vector<288x64xf32>
    %12 = arith.addf %6, %11 : vector<288x64xf32>
    %c0_12 = arith.constant 0 : index
    %c2 = arith.constant 2 : index
    %c0_13 = arith.constant 0 : index
    %13 = vector.load %arg1[%c0_12, %c2, %c0_13] : memref<1x326x64xf32, #tpu.memory_space<vmem>>, vector<1x288x64xf32>
    %14 = vector.shape_cast %13 : vector<1x288x64xf32> to vector<288x64xf32>
    %c2_14 = arith.constant 2 : index
    %c0_15 = arith.constant 0 : index
    %c0_16 = arith.constant 0 : index
    %15 = vector.load %arg2[%c2_14, %c0_15, %c0_16] : memref<9x64x64xf32, #tpu.memory_space<vmem>>, vector<1x64x64xf32>
    %16 = vector.shape_cast %15 : vector<1x64x64xf32> to vector<64x64xf32>
    %cst_17 = arith.constant dense<0.000000e+00> : vector<288x64xf32>
    %17 = tpu.matmul %14, %16, %cst_17 {dimension_numbers = #tpu.dot_dimension_numbers<[1], [0], [0], [1], [0, 0, 1, 1], [], []>} : vector<288x64xf32>, vector<64x64xf32>, vector<288x64xf32> -> vector<288x64xf32>
    %18 = arith.addf %12, %17 : vector<288x64xf32>
    %c0_18 = arith.constant 0 : index
    %c18 = arith.constant 18 : index
    %c0_19 = arith.constant 0 : index
    %19 = vector.load %arg1[%c0_18, %c18, %c0_19] : memref<1x326x64xf32, #tpu.memory_space<vmem>>, vector<1x288x64xf32>
    %20 = vector.shape_cast %19 : vector<1x288x64xf32> to vector<288x64xf32>
    %c3 = arith.constant 3 : index
    %c0_20 = arith.constant 0 : index
    %c0_21 = arith.constant 0 : index
    %21 = vector.load %arg2[%c3, %c0_20, %c0_21] : memref<9x64x64xf32, #tpu.memory_space<vmem>>, vector<1x64x64xf32>
    %22 = vector.shape_cast %21 : vector<1x64x64xf32> to vector<64x64xf32>
    %cst_22 = arith.constant dense<0.000000e+00> : vector<288x64xf32>
    %23 = tpu.matmul %20, %22, %cst_22 {dimension_numbers = #tpu.dot_dimension_numbers<[1], [0], [0], [1], [0, 0, 1, 1], [], []>} : vector<288x64xf32>, vector<64x64xf32>, vector<288x64xf32> -> vector<288x64xf32>
    %24 = arith.addf %18, %23 : vector<288x64xf32>
    %c0_23 = arith.constant 0 : index
    %c19 = arith.constant 19 : index
    %c0_24 = arith.constant 0 : index
    %25 = vector.load %arg1[%c0_23, %c19, %c0_24] : memref<1x326x64xf32, #tpu.memory_space<vmem>>, vector<1x288x64xf32>
    %26 = vector.shape_cast %25 : vector<1x288x64xf32> to vector<288x64xf32>
    %c4 = arith.constant 4 : index
    %c0_25 = arith.constant 0 : index
    %c0_26 = arith.constant 0 : index
    %27 = vector.load %arg2[%c4, %c0_25, %c0_26] : memref<9x64x64xf32, #tpu.memory_space<vmem>>, vector<1x64x64xf32>
    %28 = vector.shape_cast %27 : vector<1x64x64xf32> to vector<64x64xf32>
    %cst_27 = arith.constant dense<0.000000e+00> : vector<288x64xf32>
    %29 = tpu.matmul %26, %28, %cst_27 {dimension_numbers = #tpu.dot_dimension_numbers<[1], [0], [0], [1], [0, 0, 1, 1], [], []>} : vector<288x64xf32>, vector<64x64xf32>, vector<288x64xf32> -> vector<288x64xf32>
    %30 = arith.addf %24, %29 : vector<288x64xf32>
    %c0_28 = arith.constant 0 : index
    %c20 = arith.constant 20 : index
    %c0_29 = arith.constant 0 : index
    %31 = vector.load %arg1[%c0_28, %c20, %c0_29] : memref<1x326x64xf32, #tpu.memory_space<vmem>>, vector<1x288x64xf32>
    %32 = vector.shape_cast %31 : vector<1x288x64xf32> to vector<288x64xf32>
    %c5 = arith.constant 5 : index
    %c0_30 = arith.constant 0 : index
    %c0_31 = arith.constant 0 : index
    %33 = vector.load %arg2[%c5, %c0_30, %c0_31] : memref<9x64x64xf32, #tpu.memory_space<vmem>>, vector<1x64x64xf32>
    %34 = vector.shape_cast %33 : vector<1x64x64xf32> to vector<64x64xf32>
    %cst_32 = arith.constant dense<0.000000e+00> : vector<288x64xf32>
    %35 = tpu.matmul %32, %34, %cst_32 {dimension_numbers = #tpu.dot_dimension_numbers<[1], [0], [0], [1], [0, 0, 1, 1], [], []>} : vector<288x64xf32>, vector<64x64xf32>, vector<288x64xf32> -> vector<288x64xf32>
    %36 = arith.addf %30, %35 : vector<288x64xf32>
    %c0_33 = arith.constant 0 : index
    %c36 = arith.constant 36 : index
    %c0_34 = arith.constant 0 : index
    %37 = vector.load %arg1[%c0_33, %c36, %c0_34] : memref<1x326x64xf32, #tpu.memory_space<vmem>>, vector<1x288x64xf32>
    %38 = vector.shape_cast %37 : vector<1x288x64xf32> to vector<288x64xf32>
    %c6 = arith.constant 6 : index
    %c0_35 = arith.constant 0 : index
    %c0_36 = arith.constant 0 : index
    %39 = vector.load %arg2[%c6, %c0_35, %c0_36] : memref<9x64x64xf32, #tpu.memory_space<vmem>>, vector<1x64x64xf32>
    %40 = vector.shape_cast %39 : vector<1x64x64xf32> to vector<64x64xf32>
    %cst_37 = arith.constant dense<0.000000e+00> : vector<288x64xf32>
    %41 = tpu.matmul %38, %40, %cst_37 {dimension_numbers = #tpu.dot_dimension_numbers<[1], [0], [0], [1], [0, 0, 1, 1], [], []>} : vector<288x64xf32>, vector<64x64xf32>, vector<288x64xf32> -> vector<288x64xf32>
    %42 = arith.addf %36, %41 : vector<288x64xf32>
    %c0_38 = arith.constant 0 : index
    %c37 = arith.constant 37 : index
    %c0_39 = arith.constant 0 : index
    %43 = vector.load %arg1[%c0_38, %c37, %c0_39] : memref<1x326x64xf32, #tpu.memory_space<vmem>>, vector<1x288x64xf32>
    %44 = vector.shape_cast %43 : vector<1x288x64xf32> to vector<288x64xf32>
    %c7 = arith.constant 7 : index
    %c0_40 = arith.constant 0 : index
    %c0_41 = arith.constant 0 : index
    %45 = vector.load %arg2[%c7, %c0_40, %c0_41] : memref<9x64x64xf32, #tpu.memory_space<vmem>>, vector<1x64x64xf32>
    %46 = vector.shape_cast %45 : vector<1x64x64xf32> to vector<64x64xf32>
    %cst_42 = arith.constant dense<0.000000e+00> : vector<288x64xf32>
    %47 = tpu.matmul %44, %46, %cst_42 {dimension_numbers = #tpu.dot_dimension_numbers<[1], [0], [0], [1], [0, 0, 1, 1], [], []>} : vector<288x64xf32>, vector<64x64xf32>, vector<288x64xf32> -> vector<288x64xf32>
    %48 = arith.addf %42, %47 : vector<288x64xf32>
    %c0_43 = arith.constant 0 : index
    %c38 = arith.constant 38 : index
    %c0_44 = arith.constant 0 : index
    %49 = vector.load %arg1[%c0_43, %c38, %c0_44] : memref<1x326x64xf32, #tpu.memory_space<vmem>>, vector<1x288x64xf32>
    %50 = vector.shape_cast %49 : vector<1x288x64xf32> to vector<288x64xf32>
    %c8 = arith.constant 8 : index
    %c0_45 = arith.constant 0 : index
    %c0_46 = arith.constant 0 : index
    %51 = vector.load %arg2[%c8, %c0_45, %c0_46] : memref<9x64x64xf32, #tpu.memory_space<vmem>>, vector<1x64x64xf32>
    %52 = vector.shape_cast %51 : vector<1x64x64xf32> to vector<64x64xf32>
    %cst_47 = arith.constant dense<0.000000e+00> : vector<288x64xf32>
    %53 = tpu.matmul %50, %52, %cst_47 {dimension_numbers = #tpu.dot_dimension_numbers<[1], [0], [0], [1], [0, 0, 1, 1], [], []>} : vector<288x64xf32>, vector<64x64xf32>, vector<288x64xf32> -> vector<288x64xf32>
    %54 = arith.addf %48, %53 : vector<288x64xf32>
    %c0_48 = arith.constant 0 : index
    %c0_49 = arith.constant 0 : index
    %55 = vector.load %arg3[%c0_48, %c0_49] : memref<288x1xf32, #tpu.memory_space<vmem>>, vector<288x1xf32>
    %56 = vector.broadcast %55 : vector<288x1xf32> to vector<288x64xf32>
    %57 = arith.mulf %54, %56 : vector<288x64xf32>
    %c0_50 = arith.constant 0 : index
    %c0_51 = arith.constant 0 : index
    %c0_52 = arith.constant 0 : index
    %58 = vector.load %arg4[%c0_50, %c0_51, %c0_52] : memref<1x288x64xf32, #tpu.memory_space<vmem>>, vector<1x288x64xf32>
    %59 = vector.shape_cast %58 : vector<1x288x64xf32> to vector<288x64xf32>
    %60 = vector.shape_cast %57 : vector<288x64xf32> to vector<1x288x64xf32>
    tpu.vector_store %arg4[%c0_50, %c0_51, %c0_52], %60 {strides = array<i32>} : memref<1x288x64xf32, #tpu.memory_space<vmem>>, vector<1x288x64xf32>,
    %cst_53 = arith.constant dense<0.000000e+00> : vector<64xf32>
    %61 = vector.multi_reduction <add>, %57, %cst_53 [0] : vector<288x64xf32> to vector<64xf32>
    %62 = vector.shape_cast %61 : vector<64xf32> to vector<1x64xf32>
    %63 = arith.mulf %57, %57 : vector<288x64xf32>
    %cst_54 = arith.constant dense<0.000000e+00> : vector<64xf32>
    %64 = vector.multi_reduction <add>, %63, %cst_54 [0] : vector<288x64xf32> to vector<64xf32>
    %65 = vector.shape_cast %64 : vector<64xf32> to vector<1x64xf32>
    %66 = vector.shape_cast %62 : vector<1x64xf32> to vector<1x64xf32>
    %67 = vector.broadcast %66 : vector<1x64xf32> to vector<8x64xf32>
    %c0_55 = arith.constant 0 : index
    %c0_56 = arith.constant 0 : index
    %c0_57 = arith.constant 0 : index
    %68 = vector.load %arg5[%c0_55, %c0_56, %c0_57] : memref<1x8x64xf32, #tpu.memory_space<vmem>>, vector<1x8x64xf32>
    %69 = vector.shape_cast %68 : vector<1x8x64xf32> to vector<8x64xf32>
    %70 = vector.shape_cast %67 : vector<8x64xf32> to vector<1x8x64xf32>
    tpu.vector_store %arg5[%c0_55, %c0_56, %c0_57], %70 {strides = array<i32>} : memref<1x8x64xf32, #tpu.memory_space<vmem>>, vector<1x8x64xf32>,
    %71 = vector.shape_cast %65 : vector<1x64xf32> to vector<1x64xf32>
    %72 = vector.broadcast %71 : vector<1x64xf32> to vector<8x64xf32>
    %c0_58 = arith.constant 0 : index
    %c0_59 = arith.constant 0 : index
    %c0_60 = arith.constant 0 : index
    %73 = vector.load %arg6[%c0_58, %c0_59, %c0_60] : memref<1x8x64xf32, #tpu.memory_space<vmem>>, vector<1x8x64xf32>
    %74 = vector.shape_cast %73 : vector<1x8x64xf32> to vector<8x64xf32>
    %75 = vector.shape_cast %72 : vector<8x64xf32> to vector<1x8x64xf32>
    tpu.vector_store %arg6[%c0_58, %c0_59, %c0_60], %75 {strides = array<i32>} : memref<1x8x64xf32, #tpu.memory_space<vmem>>, vector<1x8x64xf32>,
    return
  }
  func.func @transform_0(%arg0: i32) -> (i32, i32, i32) {
    %c0_i32 = arith.constant 0 : i32
    %c0_i32_0 = arith.constant 0 : i32
    %c0_i32_1 = arith.constant 0 : i32
    return %arg0, %c0_i32, %c0_i32_0 : i32, i32, i32
  }
  func.func @transform_1(%arg0: i32) -> (i32, i32, i32) {
    %c0_i32 = arith.constant 0 : i32
    %c0_i32_0 = arith.constant 0 : i32
    %c0_i32_1 = arith.constant 0 : i32
    %c0_i32_2 = arith.constant 0 : i32
    return %c0_i32, %c0_i32_0, %c0_i32_1 : i32, i32, i32
  }
  func.func @transform_2(%arg0: i32) -> (i32, i32) {
    %c0_i32 = arith.constant 0 : i32
    %c0_i32_0 = arith.constant 0 : i32
    %c0_i32_1 = arith.constant 0 : i32
    return %c0_i32, %c0_i32_0 : i32, i32
  }
  func.func @transform_3(%arg0: i32) -> (i32, i32, i32) {
    %c0_i32 = arith.constant 0 : i32
    %c0_i32_0 = arith.constant 0 : i32
    %c0_i32_1 = arith.constant 0 : i32
    return %arg0, %c0_i32, %c0_i32_0 : i32, i32, i32
  }
  func.func @transform_4(%arg0: i32) -> (i32, i32, i32) {
    %c0_i32 = arith.constant 0 : i32
    %c0_i32_0 = arith.constant 0 : i32
    %c0_i32_1 = arith.constant 0 : i32
    return %arg0, %c0_i32, %c0_i32_0 : i32, i32, i32
  }
  func.func @transform_5(%arg0: i32) -> (i32, i32, i32) {
    %c0_i32 = arith.constant 0 : i32
    %c0_i32_0 = arith.constant 0 : i32
    %c0_i32_1 = arith.constant 0 : i32
    return %arg0, %c0_i32, %c0_i32_0 : i32, i32, i32
  }
}

module attributes {stable_mosaic.version = 11 : i64} {
  func.func @_bn_relu_pool_kernel(%arg0: i32, %arg1: memref<1x16x9x128xf32, #tpu.memory_space<vmem>>, %arg2: memref<1x128xf32, #tpu.memory_space<vmem>>, %arg3: memref<1x128xf32, #tpu.memory_space<vmem>>, %arg4: memref<1x8x8x64xf32, #tpu.memory_space<vmem>>) attributes {dimension_semantics = [#tpu.dimension_semantics<parallel>], iteration_bounds = array<i64: 2>, scalar_prefetch = 0 : i64, scratch_operands = 0 : i64, tpu.core_type = #tpu.core_type<tc>, window_params = [{transform_indices = @transform_0, window_bounds = array<i64: 1, 16, 9, 128>}, {pipeline_mode = #tpu.pipeline_mode<synchronous>, transform_indices = @transform_1, window_bounds = array<i64: 1, 128>}, {pipeline_mode = #tpu.pipeline_mode<synchronous>, transform_indices = @transform_2, window_bounds = array<i64: 1, 128>}, {transform_indices = @transform_3, window_bounds = array<i64: 1, 8, 8, 64>}]} {
    %c0 = arith.constant 0 : index
    %c0_0 = arith.constant 0 : index
    %c0_1 = arith.constant 0 : index
    %c0_2 = arith.constant 0 : index
    %0 = vector.load %arg1[%c0, %c0_0, %c0_1, %c0_2] : memref<1x16x9x128xf32, #tpu.memory_space<vmem>>, vector<1x16x9x128xf32>
    %1 = vector.shape_cast %0 : vector<1x16x9x128xf32> to vector<16x9x128xf32>
    %c0_3 = arith.constant 0 : index
    %c0_4 = arith.constant 0 : index
    %2 = vector.load %arg2[%c0_3, %c0_4] : memref<1x128xf32, #tpu.memory_space<vmem>>, vector<1x128xf32>
    %3 = vector.shape_cast %2 : vector<1x128xf32> to vector<1x1x128xf32>
    %4 = vector.broadcast %3 : vector<1x1x128xf32> to vector<16x9x128xf32>
    %5 = arith.mulf %1, %4 : vector<16x9x128xf32>
    %c0_5 = arith.constant 0 : index
    %c0_6 = arith.constant 0 : index
    %6 = vector.load %arg3[%c0_5, %c0_6] : memref<1x128xf32, #tpu.memory_space<vmem>>, vector<1x128xf32>
    %7 = vector.shape_cast %6 : vector<1x128xf32> to vector<1x1x128xf32>
    %8 = vector.broadcast %7 : vector<1x1x128xf32> to vector<16x9x128xf32>
    %9 = arith.addf %5, %8 : vector<16x9x128xf32>
    %cst = arith.constant 0.000000e+00 : f32
    %10 = vector.broadcast %cst : f32 to vector<16x9x128xf32>
    %11 = arith.maximumf %9, %10 : vector<16x9x128xf32>
    %12 = vector.extract_strided_slice %11 {offsets = [0, 0, 0], sizes = [16, 9, 64], strides = [1, 1, 1]} : vector<16x9x128xf32> to vector<16x9x64xf32>
    %13 = vector.extract_strided_slice %11 {offsets = [0, 0, 64], sizes = [16, 9, 64], strides = [1, 1, 1]} : vector<16x9x128xf32> to vector<16x9x64xf32>
    %14 = arith.maximumf %12, %13 : vector<16x9x64xf32>
    %15 = vector.extract_strided_slice %14 {offsets = [0, 0, 0], sizes = [16, 8, 64], strides = [1, 1, 1]} : vector<16x9x64xf32> to vector<16x8x64xf32>
    %16 = vector.shape_cast %15 : vector<16x8x64xf32> to vector<8x2x8x64xf32>
    %17 = vector.extract_strided_slice %16 {offsets = [0, 0, 0, 0], sizes = [8, 1, 8, 64], strides = [1, 1, 1, 1]} : vector<8x2x8x64xf32> to vector<8x1x8x64xf32>
    %18 = vector.shape_cast %17 : vector<8x1x8x64xf32> to vector<8x8x64xf32>
    %19 = vector.extract_strided_slice %16 {offsets = [0, 1, 0, 0], sizes = [8, 1, 8, 64], strides = [1, 1, 1, 1]} : vector<8x2x8x64xf32> to vector<8x1x8x64xf32>
    %20 = vector.shape_cast %19 : vector<8x1x8x64xf32> to vector<8x8x64xf32>
    %21 = arith.maximumf %18, %20 : vector<8x8x64xf32>
    %c0_7 = arith.constant 0 : index
    %c0_8 = arith.constant 0 : index
    %c0_9 = arith.constant 0 : index
    %c0_10 = arith.constant 0 : index
    %22 = vector.load %arg4[%c0_7, %c0_8, %c0_9, %c0_10] : memref<1x8x8x64xf32, #tpu.memory_space<vmem>>, vector<1x8x8x64xf32>
    %23 = vector.shape_cast %22 : vector<1x8x8x64xf32> to vector<8x8x64xf32>
    %24 = vector.shape_cast %21 : vector<8x8x64xf32> to vector<1x8x8x64xf32>
    tpu.vector_store %arg4[%c0_7, %c0_8, %c0_9, %c0_10], %24 {strides = array<i32>} : memref<1x8x8x64xf32, #tpu.memory_space<vmem>>, vector<1x8x8x64xf32>,
    return
  }
  func.func @transform_0(%arg0: i32) -> (i32, i32, i32, i32) {
    %c0_i32 = arith.constant 0 : i32
    %c0_i32_0 = arith.constant 0 : i32
    %c0_i32_1 = arith.constant 0 : i32
    %c0_i32_2 = arith.constant 0 : i32
    return %arg0, %c0_i32, %c0_i32_0, %c0_i32_1 : i32, i32, i32, i32
  }
  func.func @transform_1(%arg0: i32) -> (i32, i32) {
    %c0_i32 = arith.constant 0 : i32
    %c0_i32_0 = arith.constant 0 : i32
    %c0_i32_1 = arith.constant 0 : i32
    return %c0_i32, %c0_i32_0 : i32, i32
  }
  func.func @transform_2(%arg0: i32) -> (i32, i32) {
    %c0_i32 = arith.constant 0 : i32
    %c0_i32_0 = arith.constant 0 : i32
    %c0_i32_1 = arith.constant 0 : i32
    return %c0_i32, %c0_i32_0 : i32, i32
  }
  func.func @transform_3(%arg0: i32) -> (i32, i32, i32, i32) {
    %c0_i32 = arith.constant 0 : i32
    %c0_i32_0 = arith.constant 0 : i32
    %c0_i32_1 = arith.constant 0 : i32
    %c0_i32_2 = arith.constant 0 : i32
    return %arg0, %c0_i32, %c0_i32_0, %c0_i32_1 : i32, i32, i32, i32
  }
}

module attributes {stable_mosaic.version = 11 : i64} {
  func.func @_conv_stats_kernel(%arg0: i32, %arg1: memref<1x102x64xf32, #tpu.memory_space<vmem>>, %arg2: memref<9x64x128xf32, #tpu.memory_space<vmem>>, %arg3: memref<80x1xf32, #tpu.memory_space<vmem>>, %arg4: memref<1x80x128xf32, #tpu.memory_space<vmem>>, %arg5: memref<1x8x128xf32, #tpu.memory_space<vmem>>, %arg6: memref<1x8x128xf32, #tpu.memory_space<vmem>>) attributes {dimension_semantics = [#tpu.dimension_semantics<parallel>], iteration_bounds = array<i64: 2>, scalar_prefetch = 0 : i64, scratch_operands = 0 : i64, tpu.core_type = #tpu.core_type<tc>, window_params = [{transform_indices = @transform_0, window_bounds = array<i64: 1, 102, 64>}, {pipeline_mode = #tpu.pipeline_mode<synchronous>, transform_indices = @transform_1, window_bounds = array<i64: 9, 64, 128>}, {pipeline_mode = #tpu.pipeline_mode<synchronous>, transform_indices = @transform_2, window_bounds = array<i64: 80, 1>}, {transform_indices = @transform_3, window_bounds = array<i64: 1, 80, 128>}, {transform_indices = @transform_4, window_bounds = array<i64: 1, 8, 128>}, {transform_indices = @transform_5, window_bounds = array<i64: 1, 8, 128>}]} {
    %cst = arith.constant 0.000000e+00 : f32
    %0 = vector.broadcast %cst : f32 to vector<80x128xf32>
    %c0 = arith.constant 0 : index
    %c0_0 = arith.constant 0 : index
    %c0_1 = arith.constant 0 : index
    %1 = vector.load %arg1[%c0, %c0_0, %c0_1] : memref<1x102x64xf32, #tpu.memory_space<vmem>>, vector<1x80x64xf32>
    %2 = vector.shape_cast %1 : vector<1x80x64xf32> to vector<80x64xf32>
    %c0_2 = arith.constant 0 : index
    %c0_3 = arith.constant 0 : index
    %c0_4 = arith.constant 0 : index
    %3 = vector.load %arg2[%c0_2, %c0_3, %c0_4] : memref<9x64x128xf32, #tpu.memory_space<vmem>>, vector<1x64x128xf32>
    %4 = vector.shape_cast %3 : vector<1x64x128xf32> to vector<64x128xf32>
    %cst_5 = arith.constant dense<0.000000e+00> : vector<80x128xf32>
    %5 = tpu.matmul %2, %4, %cst_5 {dimension_numbers = #tpu.dot_dimension_numbers<[1], [0], [0], [1], [0, 0, 1, 1], [], []>} : vector<80x64xf32>, vector<64x128xf32>, vector<80x128xf32> -> vector<80x128xf32>
    %6 = arith.addf %0, %5 : vector<80x128xf32>
    %c0_6 = arith.constant 0 : index
    %c1 = arith.constant 1 : index
    %c0_7 = arith.constant 0 : index
    %7 = vector.load %arg1[%c0_6, %c1, %c0_7] : memref<1x102x64xf32, #tpu.memory_space<vmem>>, vector<1x80x64xf32>
    %8 = vector.shape_cast %7 : vector<1x80x64xf32> to vector<80x64xf32>
    %c1_8 = arith.constant 1 : index
    %c0_9 = arith.constant 0 : index
    %c0_10 = arith.constant 0 : index
    %9 = vector.load %arg2[%c1_8, %c0_9, %c0_10] : memref<9x64x128xf32, #tpu.memory_space<vmem>>, vector<1x64x128xf32>
    %10 = vector.shape_cast %9 : vector<1x64x128xf32> to vector<64x128xf32>
    %cst_11 = arith.constant dense<0.000000e+00> : vector<80x128xf32>
    %11 = tpu.matmul %8, %10, %cst_11 {dimension_numbers = #tpu.dot_dimension_numbers<[1], [0], [0], [1], [0, 0, 1, 1], [], []>} : vector<80x64xf32>, vector<64x128xf32>, vector<80x128xf32> -> vector<80x128xf32>
    %12 = arith.addf %6, %11 : vector<80x128xf32>
    %c0_12 = arith.constant 0 : index
    %c2 = arith.constant 2 : index
    %c0_13 = arith.constant 0 : index
    %13 = vector.load %arg1[%c0_12, %c2, %c0_13] : memref<1x102x64xf32, #tpu.memory_space<vmem>>, vector<1x80x64xf32>
    %14 = vector.shape_cast %13 : vector<1x80x64xf32> to vector<80x64xf32>
    %c2_14 = arith.constant 2 : index
    %c0_15 = arith.constant 0 : index
    %c0_16 = arith.constant 0 : index
    %15 = vector.load %arg2[%c2_14, %c0_15, %c0_16] : memref<9x64x128xf32, #tpu.memory_space<vmem>>, vector<1x64x128xf32>
    %16 = vector.shape_cast %15 : vector<1x64x128xf32> to vector<64x128xf32>
    %cst_17 = arith.constant dense<0.000000e+00> : vector<80x128xf32>
    %17 = tpu.matmul %14, %16, %cst_17 {dimension_numbers = #tpu.dot_dimension_numbers<[1], [0], [0], [1], [0, 0, 1, 1], [], []>} : vector<80x64xf32>, vector<64x128xf32>, vector<80x128xf32> -> vector<80x128xf32>
    %18 = arith.addf %12, %17 : vector<80x128xf32>
    %c0_18 = arith.constant 0 : index
    %c10 = arith.constant 10 : index
    %c0_19 = arith.constant 0 : index
    %19 = vector.load %arg1[%c0_18, %c10, %c0_19] : memref<1x102x64xf32, #tpu.memory_space<vmem>>, vector<1x80x64xf32>
    %20 = vector.shape_cast %19 : vector<1x80x64xf32> to vector<80x64xf32>
    %c3 = arith.constant 3 : index
    %c0_20 = arith.constant 0 : index
    %c0_21 = arith.constant 0 : index
    %21 = vector.load %arg2[%c3, %c0_20, %c0_21] : memref<9x64x128xf32, #tpu.memory_space<vmem>>, vector<1x64x128xf32>
    %22 = vector.shape_cast %21 : vector<1x64x128xf32> to vector<64x128xf32>
    %cst_22 = arith.constant dense<0.000000e+00> : vector<80x128xf32>
    %23 = tpu.matmul %20, %22, %cst_22 {dimension_numbers = #tpu.dot_dimension_numbers<[1], [0], [0], [1], [0, 0, 1, 1], [], []>} : vector<80x64xf32>, vector<64x128xf32>, vector<80x128xf32> -> vector<80x128xf32>
    %24 = arith.addf %18, %23 : vector<80x128xf32>
    %c0_23 = arith.constant 0 : index
    %c11 = arith.constant 11 : index
    %c0_24 = arith.constant 0 : index
    %25 = vector.load %arg1[%c0_23, %c11, %c0_24] : memref<1x102x64xf32, #tpu.memory_space<vmem>>, vector<1x80x64xf32>
    %26 = vector.shape_cast %25 : vector<1x80x64xf32> to vector<80x64xf32>
    %c4 = arith.constant 4 : index
    %c0_25 = arith.constant 0 : index
    %c0_26 = arith.constant 0 : index
    %27 = vector.load %arg2[%c4, %c0_25, %c0_26] : memref<9x64x128xf32, #tpu.memory_space<vmem>>, vector<1x64x128xf32>
    %28 = vector.shape_cast %27 : vector<1x64x128xf32> to vector<64x128xf32>
    %cst_27 = arith.constant dense<0.000000e+00> : vector<80x128xf32>
    %29 = tpu.matmul %26, %28, %cst_27 {dimension_numbers = #tpu.dot_dimension_numbers<[1], [0], [0], [1], [0, 0, 1, 1], [], []>} : vector<80x64xf32>, vector<64x128xf32>, vector<80x128xf32> -> vector<80x128xf32>
    %30 = arith.addf %24, %29 : vector<80x128xf32>
    %c0_28 = arith.constant 0 : index
    %c12 = arith.constant 12 : index
    %c0_29 = arith.constant 0 : index
    %31 = vector.load %arg1[%c0_28, %c12, %c0_29] : memref<1x102x64xf32, #tpu.memory_space<vmem>>, vector<1x80x64xf32>
    %32 = vector.shape_cast %31 : vector<1x80x64xf32> to vector<80x64xf32>
    %c5 = arith.constant 5 : index
    %c0_30 = arith.constant 0 : index
    %c0_31 = arith.constant 0 : index
    %33 = vector.load %arg2[%c5, %c0_30, %c0_31] : memref<9x64x128xf32, #tpu.memory_space<vmem>>, vector<1x64x128xf32>
    %34 = vector.shape_cast %33 : vector<1x64x128xf32> to vector<64x128xf32>
    %cst_32 = arith.constant dense<0.000000e+00> : vector<80x128xf32>
    %35 = tpu.matmul %32, %34, %cst_32 {dimension_numbers = #tpu.dot_dimension_numbers<[1], [0], [0], [1], [0, 0, 1, 1], [], []>} : vector<80x64xf32>, vector<64x128xf32>, vector<80x128xf32> -> vector<80x128xf32>
    %36 = arith.addf %30, %35 : vector<80x128xf32>
    %c0_33 = arith.constant 0 : index
    %c20 = arith.constant 20 : index
    %c0_34 = arith.constant 0 : index
    %37 = vector.load %arg1[%c0_33, %c20, %c0_34] : memref<1x102x64xf32, #tpu.memory_space<vmem>>, vector<1x80x64xf32>
    %38 = vector.shape_cast %37 : vector<1x80x64xf32> to vector<80x64xf32>
    %c6 = arith.constant 6 : index
    %c0_35 = arith.constant 0 : index
    %c0_36 = arith.constant 0 : index
    %39 = vector.load %arg2[%c6, %c0_35, %c0_36] : memref<9x64x128xf32, #tpu.memory_space<vmem>>, vector<1x64x128xf32>
    %40 = vector.shape_cast %39 : vector<1x64x128xf32> to vector<64x128xf32>
    %cst_37 = arith.constant dense<0.000000e+00> : vector<80x128xf32>
    %41 = tpu.matmul %38, %40, %cst_37 {dimension_numbers = #tpu.dot_dimension_numbers<[1], [0], [0], [1], [0, 0, 1, 1], [], []>} : vector<80x64xf32>, vector<64x128xf32>, vector<80x128xf32> -> vector<80x128xf32>
    %42 = arith.addf %36, %41 : vector<80x128xf32>
    %c0_38 = arith.constant 0 : index
    %c21 = arith.constant 21 : index
    %c0_39 = arith.constant 0 : index
    %43 = vector.load %arg1[%c0_38, %c21, %c0_39] : memref<1x102x64xf32, #tpu.memory_space<vmem>>, vector<1x80x64xf32>
    %44 = vector.shape_cast %43 : vector<1x80x64xf32> to vector<80x64xf32>
    %c7 = arith.constant 7 : index
    %c0_40 = arith.constant 0 : index
    %c0_41 = arith.constant 0 : index
    %45 = vector.load %arg2[%c7, %c0_40, %c0_41] : memref<9x64x128xf32, #tpu.memory_space<vmem>>, vector<1x64x128xf32>
    %46 = vector.shape_cast %45 : vector<1x64x128xf32> to vector<64x128xf32>
    %cst_42 = arith.constant dense<0.000000e+00> : vector<80x128xf32>
    %47 = tpu.matmul %44, %46, %cst_42 {dimension_numbers = #tpu.dot_dimension_numbers<[1], [0], [0], [1], [0, 0, 1, 1], [], []>} : vector<80x64xf32>, vector<64x128xf32>, vector<80x128xf32> -> vector<80x128xf32>
    %48 = arith.addf %42, %47 : vector<80x128xf32>
    %c0_43 = arith.constant 0 : index
    %c22 = arith.constant 22 : index
    %c0_44 = arith.constant 0 : index
    %49 = vector.load %arg1[%c0_43, %c22, %c0_44] : memref<1x102x64xf32, #tpu.memory_space<vmem>>, vector<1x80x64xf32>
    %50 = vector.shape_cast %49 : vector<1x80x64xf32> to vector<80x64xf32>
    %c8 = arith.constant 8 : index
    %c0_45 = arith.constant 0 : index
    %c0_46 = arith.constant 0 : index
    %51 = vector.load %arg2[%c8, %c0_45, %c0_46] : memref<9x64x128xf32, #tpu.memory_space<vmem>>, vector<1x64x128xf32>
    %52 = vector.shape_cast %51 : vector<1x64x128xf32> to vector<64x128xf32>
    %cst_47 = arith.constant dense<0.000000e+00> : vector<80x128xf32>
    %53 = tpu.matmul %50, %52, %cst_47 {dimension_numbers = #tpu.dot_dimension_numbers<[1], [0], [0], [1], [0, 0, 1, 1], [], []>} : vector<80x64xf32>, vector<64x128xf32>, vector<80x128xf32> -> vector<80x128xf32>
    %54 = arith.addf %48, %53 : vector<80x128xf32>
    %c0_48 = arith.constant 0 : index
    %c0_49 = arith.constant 0 : index
    %55 = vector.load %arg3[%c0_48, %c0_49] : memref<80x1xf32, #tpu.memory_space<vmem>>, vector<80x1xf32>
    %56 = vector.broadcast %55 : vector<80x1xf32> to vector<80x128xf32>
    %57 = arith.mulf %54, %56 : vector<80x128xf32>
    %c0_50 = arith.constant 0 : index
    %c0_51 = arith.constant 0 : index
    %c0_52 = arith.constant 0 : index
    %58 = vector.load %arg4[%c0_50, %c0_51, %c0_52] : memref<1x80x128xf32, #tpu.memory_space<vmem>>, vector<1x80x128xf32>
    %59 = vector.shape_cast %58 : vector<1x80x128xf32> to vector<80x128xf32>
    %60 = vector.shape_cast %57 : vector<80x128xf32> to vector<1x80x128xf32>
    tpu.vector_store %arg4[%c0_50, %c0_51, %c0_52], %60 {strides = array<i32>} : memref<1x80x128xf32, #tpu.memory_space<vmem>>, vector<1x80x128xf32>,
    %cst_53 = arith.constant dense<0.000000e+00> : vector<128xf32>
    %61 = vector.multi_reduction <add>, %57, %cst_53 [0] : vector<80x128xf32> to vector<128xf32>
    %62 = vector.shape_cast %61 : vector<128xf32> to vector<1x128xf32>
    %63 = arith.mulf %57, %57 : vector<80x128xf32>
    %cst_54 = arith.constant dense<0.000000e+00> : vector<128xf32>
    %64 = vector.multi_reduction <add>, %63, %cst_54 [0] : vector<80x128xf32> to vector<128xf32>
    %65 = vector.shape_cast %64 : vector<128xf32> to vector<1x128xf32>
    %66 = vector.shape_cast %62 : vector<1x128xf32> to vector<1x128xf32>
    %67 = vector.broadcast %66 : vector<1x128xf32> to vector<8x128xf32>
    %c0_55 = arith.constant 0 : index
    %c0_56 = arith.constant 0 : index
    %c0_57 = arith.constant 0 : index
    %68 = vector.load %arg5[%c0_55, %c0_56, %c0_57] : memref<1x8x128xf32, #tpu.memory_space<vmem>>, vector<1x8x128xf32>
    %69 = vector.shape_cast %68 : vector<1x8x128xf32> to vector<8x128xf32>
    %70 = vector.shape_cast %67 : vector<8x128xf32> to vector<1x8x128xf32>
    tpu.vector_store %arg5[%c0_55, %c0_56, %c0_57], %70 {strides = array<i32>} : memref<1x8x128xf32, #tpu.memory_space<vmem>>, vector<1x8x128xf32>,
    %71 = vector.shape_cast %65 : vector<1x128xf32> to vector<1x128xf32>
    %72 = vector.broadcast %71 : vector<1x128xf32> to vector<8x128xf32>
    %c0_58 = arith.constant 0 : index
    %c0_59 = arith.constant 0 : index
    %c0_60 = arith.constant 0 : index
    %73 = vector.load %arg6[%c0_58, %c0_59, %c0_60] : memref<1x8x128xf32, #tpu.memory_space<vmem>>, vector<1x8x128xf32>
    %74 = vector.shape_cast %73 : vector<1x8x128xf32> to vector<8x128xf32>
    %75 = vector.shape_cast %72 : vector<8x128xf32> to vector<1x8x128xf32>
    tpu.vector_store %arg6[%c0_58, %c0_59, %c0_60], %75 {strides = array<i32>} : memref<1x8x128xf32, #tpu.memory_space<vmem>>, vector<1x8x128xf32>,
    return
  }
  func.func @transform_0(%arg0: i32) -> (i32, i32, i32) {
    %c0_i32 = arith.constant 0 : i32
    %c0_i32_0 = arith.constant 0 : i32
    %c0_i32_1 = arith.constant 0 : i32
    return %arg0, %c0_i32, %c0_i32_0 : i32, i32, i32
  }
  func.func @transform_1(%arg0: i32) -> (i32, i32, i32) {
    %c0_i32 = arith.constant 0 : i32
    %c0_i32_0 = arith.constant 0 : i32
    %c0_i32_1 = arith.constant 0 : i32
    %c0_i32_2 = arith.constant 0 : i32
    return %c0_i32, %c0_i32_0, %c0_i32_1 : i32, i32, i32
  }
  func.func @transform_2(%arg0: i32) -> (i32, i32) {
    %c0_i32 = arith.constant 0 : i32
    %c0_i32_0 = arith.constant 0 : i32
    %c0_i32_1 = arith.constant 0 : i32
    return %c0_i32, %c0_i32_0 : i32, i32
  }
  func.func @transform_3(%arg0: i32) -> (i32, i32, i32) {
    %c0_i32 = arith.constant 0 : i32
    %c0_i32_0 = arith.constant 0 : i32
    %c0_i32_1 = arith.constant 0 : i32
    return %arg0, %c0_i32, %c0_i32_0 : i32, i32, i32
  }
  func.func @transform_4(%arg0: i32) -> (i32, i32, i32) {
    %c0_i32 = arith.constant 0 : i32
    %c0_i32_0 = arith.constant 0 : i32
    %c0_i32_1 = arith.constant 0 : i32
    return %arg0, %c0_i32, %c0_i32_0 : i32, i32, i32
  }
  func.func @transform_5(%arg0: i32) -> (i32, i32, i32) {
    %c0_i32 = arith.constant 0 : i32
    %c0_i32_0 = arith.constant 0 : i32
    %c0_i32_1 = arith.constant 0 : i32
    return %arg0, %c0_i32, %c0_i32_0 : i32, i32, i32
  }
}

module attributes {stable_mosaic.version = 11 : i64} {
  func.func @_bn_relu_kernel(%arg0: i32, %arg1: memref<1x80x128xf32, #tpu.memory_space<vmem>>, %arg2: memref<1x128xf32, #tpu.memory_space<vmem>>, %arg3: memref<1x128xf32, #tpu.memory_space<vmem>>, %arg4: memref<80x1xf32, #tpu.memory_space<vmem>>, %arg5: memref<1x80x128xf32, #tpu.memory_space<vmem>>) attributes {dimension_semantics = [#tpu.dimension_semantics<parallel>], iteration_bounds = array<i64: 2>, scalar_prefetch = 0 : i64, scratch_operands = 0 : i64, tpu.core_type = #tpu.core_type<tc>, window_params = [{transform_indices = @transform_0, window_bounds = array<i64: 1, 80, 128>}, {pipeline_mode = #tpu.pipeline_mode<synchronous>, transform_indices = @transform_1, window_bounds = array<i64: 1, 128>}, {pipeline_mode = #tpu.pipeline_mode<synchronous>, transform_indices = @transform_2, window_bounds = array<i64: 1, 128>}, {pipeline_mode = #tpu.pipeline_mode<synchronous>, transform_indices = @transform_3, window_bounds = array<i64: 80, 1>}, {transform_indices = @transform_4, window_bounds = array<i64: 1, 80, 128>}]} {
    %c0 = arith.constant 0 : index
    %c0_0 = arith.constant 0 : index
    %c0_1 = arith.constant 0 : index
    %0 = vector.load %arg1[%c0, %c0_0, %c0_1] : memref<1x80x128xf32, #tpu.memory_space<vmem>>, vector<1x80x128xf32>
    %1 = vector.shape_cast %0 : vector<1x80x128xf32> to vector<80x128xf32>
    %c0_2 = arith.constant 0 : index
    %c0_3 = arith.constant 0 : index
    %2 = vector.load %arg2[%c0_2, %c0_3] : memref<1x128xf32, #tpu.memory_space<vmem>>, vector<1x128xf32>
    %3 = vector.broadcast %2 : vector<1x128xf32> to vector<80x128xf32>
    %4 = arith.mulf %1, %3 : vector<80x128xf32>
    %c0_4 = arith.constant 0 : index
    %c0_5 = arith.constant 0 : index
    %5 = vector.load %arg3[%c0_4, %c0_5] : memref<1x128xf32, #tpu.memory_space<vmem>>, vector<1x128xf32>
    %6 = vector.broadcast %5 : vector<1x128xf32> to vector<80x128xf32>
    %7 = arith.addf %4, %6 : vector<80x128xf32>
    %cst = arith.constant 0.000000e+00 : f32
    %8 = vector.broadcast %cst : f32 to vector<80x128xf32>
    %9 = arith.maximumf %7, %8 : vector<80x128xf32>
    %c0_6 = arith.constant 0 : index
    %c0_7 = arith.constant 0 : index
    %10 = vector.load %arg4[%c0_6, %c0_7] : memref<80x1xf32, #tpu.memory_space<vmem>>, vector<80x1xf32>
    %11 = vector.broadcast %10 : vector<80x1xf32> to vector<80x128xf32>
    %12 = arith.mulf %9, %11 : vector<80x128xf32>
    %c0_8 = arith.constant 0 : index
    %c0_9 = arith.constant 0 : index
    %c0_10 = arith.constant 0 : index
    %13 = vector.load %arg5[%c0_8, %c0_9, %c0_10] : memref<1x80x128xf32, #tpu.memory_space<vmem>>, vector<1x80x128xf32>
    %14 = vector.shape_cast %13 : vector<1x80x128xf32> to vector<80x128xf32>
    %15 = vector.shape_cast %12 : vector<80x128xf32> to vector<1x80x128xf32>
    tpu.vector_store %arg5[%c0_8, %c0_9, %c0_10], %15 {strides = array<i32>} : memref<1x80x128xf32, #tpu.memory_space<vmem>>, vector<1x80x128xf32>,
    return
  }
  func.func @transform_0(%arg0: i32) -> (i32, i32, i32) {
    %c0_i32 = arith.constant 0 : i32
    %c0_i32_0 = arith.constant 0 : i32
    %c0_i32_1 = arith.constant 0 : i32
    return %arg0, %c0_i32, %c0_i32_0 : i32, i32, i32
  }
  func.func @transform_1(%arg0: i32) -> (i32, i32) {
    %c0_i32 = arith.constant 0 : i32
    %c0_i32_0 = arith.constant 0 : i32
    %c0_i32_1 = arith.constant 0 : i32
    return %c0_i32, %c0_i32_0 : i32, i32
  }
  func.func @transform_2(%arg0: i32) -> (i32, i32) {
    %c0_i32 = arith.constant 0 : i32
    %c0_i32_0 = arith.constant 0 : i32
    %c0_i32_1 = arith.constant 0 : i32
    return %c0_i32, %c0_i32_0 : i32, i32
  }
  func.func @transform_3(%arg0: i32) -> (i32, i32) {
    %c0_i32 = arith.constant 0 : i32
    %c0_i32_0 = arith.constant 0 : i32
    %c0_i32_1 = arith.constant 0 : i32
    return %c0_i32, %c0_i32_0 : i32, i32
  }
  func.func @transform_4(%arg0: i32) -> (i32, i32, i32) {
    %c0_i32 = arith.constant 0 : i32
    %c0_i32_0 = arith.constant 0 : i32
    %c0_i32_1 = arith.constant 0 : i32
    return %arg0, %c0_i32, %c0_i32_0 : i32, i32, i32
  }
}

module attributes {stable_mosaic.version = 11 : i64} {
  func.func @_conv_stats_kernel(%arg0: i32, %arg1: memref<1x102x128xf32, #tpu.memory_space<vmem>>, %arg2: memref<9x128x128xf32, #tpu.memory_space<vmem>>, %arg3: memref<80x1xf32, #tpu.memory_space<vmem>>, %arg4: memref<1x80x128xf32, #tpu.memory_space<vmem>>, %arg5: memref<1x8x128xf32, #tpu.memory_space<vmem>>, %arg6: memref<1x8x128xf32, #tpu.memory_space<vmem>>) attributes {dimension_semantics = [#tpu.dimension_semantics<parallel>], iteration_bounds = array<i64: 2>, scalar_prefetch = 0 : i64, scratch_operands = 0 : i64, tpu.core_type = #tpu.core_type<tc>, window_params = [{transform_indices = @transform_0, window_bounds = array<i64: 1, 102, 128>}, {pipeline_mode = #tpu.pipeline_mode<synchronous>, transform_indices = @transform_1, window_bounds = array<i64: 9, 128, 128>}, {pipeline_mode = #tpu.pipeline_mode<synchronous>, transform_indices = @transform_2, window_bounds = array<i64: 80, 1>}, {transform_indices = @transform_3, window_bounds = array<i64: 1, 80, 128>}, {transform_indices = @transform_4, window_bounds = array<i64: 1, 8, 128>}, {transform_indices = @transform_5, window_bounds = array<i64: 1, 8, 128>}]} {
    %cst = arith.constant 0.000000e+00 : f32
    %0 = vector.broadcast %cst : f32 to vector<80x128xf32>
    %c0 = arith.constant 0 : index
    %c0_0 = arith.constant 0 : index
    %c0_1 = arith.constant 0 : index
    %1 = vector.load %arg1[%c0, %c0_0, %c0_1] : memref<1x102x128xf32, #tpu.memory_space<vmem>>, vector<1x80x128xf32>
    %2 = vector.shape_cast %1 : vector<1x80x128xf32> to vector<80x128xf32>
    %c0_2 = arith.constant 0 : index
    %c0_3 = arith.constant 0 : index
    %c0_4 = arith.constant 0 : index
    %3 = vector.load %arg2[%c0_2, %c0_3, %c0_4] : memref<9x128x128xf32, #tpu.memory_space<vmem>>, vector<1x128x128xf32>
    %4 = vector.shape_cast %3 : vector<1x128x128xf32> to vector<128x128xf32>
    %cst_5 = arith.constant dense<0.000000e+00> : vector<80x128xf32>
    %5 = tpu.matmul %2, %4, %cst_5 {dimension_numbers = #tpu.dot_dimension_numbers<[1], [0], [0], [1], [0, 0, 1, 1], [], []>} : vector<80x128xf32>, vector<128x128xf32>, vector<80x128xf32> -> vector<80x128xf32>
    %6 = arith.addf %0, %5 : vector<80x128xf32>
    %c0_6 = arith.constant 0 : index
    %c1 = arith.constant 1 : index
    %c0_7 = arith.constant 0 : index
    %7 = vector.load %arg1[%c0_6, %c1, %c0_7] : memref<1x102x128xf32, #tpu.memory_space<vmem>>, vector<1x80x128xf32>
    %8 = vector.shape_cast %7 : vector<1x80x128xf32> to vector<80x128xf32>
    %c1_8 = arith.constant 1 : index
    %c0_9 = arith.constant 0 : index
    %c0_10 = arith.constant 0 : index
    %9 = vector.load %arg2[%c1_8, %c0_9, %c0_10] : memref<9x128x128xf32, #tpu.memory_space<vmem>>, vector<1x128x128xf32>
    %10 = vector.shape_cast %9 : vector<1x128x128xf32> to vector<128x128xf32>
    %cst_11 = arith.constant dense<0.000000e+00> : vector<80x128xf32>
    %11 = tpu.matmul %8, %10, %cst_11 {dimension_numbers = #tpu.dot_dimension_numbers<[1], [0], [0], [1], [0, 0, 1, 1], [], []>} : vector<80x128xf32>, vector<128x128xf32>, vector<80x128xf32> -> vector<80x128xf32>
    %12 = arith.addf %6, %11 : vector<80x128xf32>
    %c0_12 = arith.constant 0 : index
    %c2 = arith.constant 2 : index
    %c0_13 = arith.constant 0 : index
    %13 = vector.load %arg1[%c0_12, %c2, %c0_13] : memref<1x102x128xf32, #tpu.memory_space<vmem>>, vector<1x80x128xf32>
    %14 = vector.shape_cast %13 : vector<1x80x128xf32> to vector<80x128xf32>
    %c2_14 = arith.constant 2 : index
    %c0_15 = arith.constant 0 : index
    %c0_16 = arith.constant 0 : index
    %15 = vector.load %arg2[%c2_14, %c0_15, %c0_16] : memref<9x128x128xf32, #tpu.memory_space<vmem>>, vector<1x128x128xf32>
    %16 = vector.shape_cast %15 : vector<1x128x128xf32> to vector<128x128xf32>
    %cst_17 = arith.constant dense<0.000000e+00> : vector<80x128xf32>
    %17 = tpu.matmul %14, %16, %cst_17 {dimension_numbers = #tpu.dot_dimension_numbers<[1], [0], [0], [1], [0, 0, 1, 1], [], []>} : vector<80x128xf32>, vector<128x128xf32>, vector<80x128xf32> -> vector<80x128xf32>
    %18 = arith.addf %12, %17 : vector<80x128xf32>
    %c0_18 = arith.constant 0 : index
    %c10 = arith.constant 10 : index
    %c0_19 = arith.constant 0 : index
    %19 = vector.load %arg1[%c0_18, %c10, %c0_19] : memref<1x102x128xf32, #tpu.memory_space<vmem>>, vector<1x80x128xf32>
    %20 = vector.shape_cast %19 : vector<1x80x128xf32> to vector<80x128xf32>
    %c3 = arith.constant 3 : index
    %c0_20 = arith.constant 0 : index
    %c0_21 = arith.constant 0 : index
    %21 = vector.load %arg2[%c3, %c0_20, %c0_21] : memref<9x128x128xf32, #tpu.memory_space<vmem>>, vector<1x128x128xf32>
    %22 = vector.shape_cast %21 : vector<1x128x128xf32> to vector<128x128xf32>
    %cst_22 = arith.constant dense<0.000000e+00> : vector<80x128xf32>
    %23 = tpu.matmul %20, %22, %cst_22 {dimension_numbers = #tpu.dot_dimension_numbers<[1], [0], [0], [1], [0, 0, 1, 1], [], []>} : vector<80x128xf32>, vector<128x128xf32>, vector<80x128xf32> -> vector<80x128xf32>
    %24 = arith.addf %18, %23 : vector<80x128xf32>
    %c0_23 = arith.constant 0 : index
    %c11 = arith.constant 11 : index
    %c0_24 = arith.constant 0 : index
    %25 = vector.load %arg1[%c0_23, %c11, %c0_24] : memref<1x102x128xf32, #tpu.memory_space<vmem>>, vector<1x80x128xf32>
    %26 = vector.shape_cast %25 : vector<1x80x128xf32> to vector<80x128xf32>
    %c4 = arith.constant 4 : index
    %c0_25 = arith.constant 0 : index
    %c0_26 = arith.constant 0 : index
    %27 = vector.load %arg2[%c4, %c0_25, %c0_26] : memref<9x128x128xf32, #tpu.memory_space<vmem>>, vector<1x128x128xf32>
    %28 = vector.shape_cast %27 : vector<1x128x128xf32> to vector<128x128xf32>
    %cst_27 = arith.constant dense<0.000000e+00> : vector<80x128xf32>
    %29 = tpu.matmul %26, %28, %cst_27 {dimension_numbers = #tpu.dot_dimension_numbers<[1], [0], [0], [1], [0, 0, 1, 1], [], []>} : vector<80x128xf32>, vector<128x128xf32>, vector<80x128xf32> -> vector<80x128xf32>
    %30 = arith.addf %24, %29 : vector<80x128xf32>
    %c0_28 = arith.constant 0 : index
    %c12 = arith.constant 12 : index
    %c0_29 = arith.constant 0 : index
    %31 = vector.load %arg1[%c0_28, %c12, %c0_29] : memref<1x102x128xf32, #tpu.memory_space<vmem>>, vector<1x80x128xf32>
    %32 = vector.shape_cast %31 : vector<1x80x128xf32> to vector<80x128xf32>
    %c5 = arith.constant 5 : index
    %c0_30 = arith.constant 0 : index
    %c0_31 = arith.constant 0 : index
    %33 = vector.load %arg2[%c5, %c0_30, %c0_31] : memref<9x128x128xf32, #tpu.memory_space<vmem>>, vector<1x128x128xf32>
    %34 = vector.shape_cast %33 : vector<1x128x128xf32> to vector<128x128xf32>
    %cst_32 = arith.constant dense<0.000000e+00> : vector<80x128xf32>
    %35 = tpu.matmul %32, %34, %cst_32 {dimension_numbers = #tpu.dot_dimension_numbers<[1], [0], [0], [1], [0, 0, 1, 1], [], []>} : vector<80x128xf32>, vector<128x128xf32>, vector<80x128xf32> -> vector<80x128xf32>
    %36 = arith.addf %30, %35 : vector<80x128xf32>
    %c0_33 = arith.constant 0 : index
    %c20 = arith.constant 20 : index
    %c0_34 = arith.constant 0 : index
    %37 = vector.load %arg1[%c0_33, %c20, %c0_34] : memref<1x102x128xf32, #tpu.memory_space<vmem>>, vector<1x80x128xf32>
    %38 = vector.shape_cast %37 : vector<1x80x128xf32> to vector<80x128xf32>
    %c6 = arith.constant 6 : index
    %c0_35 = arith.constant 0 : index
    %c0_36 = arith.constant 0 : index
    %39 = vector.load %arg2[%c6, %c0_35, %c0_36] : memref<9x128x128xf32, #tpu.memory_space<vmem>>, vector<1x128x128xf32>
    %40 = vector.shape_cast %39 : vector<1x128x128xf32> to vector<128x128xf32>
    %cst_37 = arith.constant dense<0.000000e+00> : vector<80x128xf32>
    %41 = tpu.matmul %38, %40, %cst_37 {dimension_numbers = #tpu.dot_dimension_numbers<[1], [0], [0], [1], [0, 0, 1, 1], [], []>} : vector<80x128xf32>, vector<128x128xf32>, vector<80x128xf32> -> vector<80x128xf32>
    %42 = arith.addf %36, %41 : vector<80x128xf32>
    %c0_38 = arith.constant 0 : index
    %c21 = arith.constant 21 : index
    %c0_39 = arith.constant 0 : index
    %43 = vector.load %arg1[%c0_38, %c21, %c0_39] : memref<1x102x128xf32, #tpu.memory_space<vmem>>, vector<1x80x128xf32>
    %44 = vector.shape_cast %43 : vector<1x80x128xf32> to vector<80x128xf32>
    %c7 = arith.constant 7 : index
    %c0_40 = arith.constant 0 : index
    %c0_41 = arith.constant 0 : index
    %45 = vector.load %arg2[%c7, %c0_40, %c0_41] : memref<9x128x128xf32, #tpu.memory_space<vmem>>, vector<1x128x128xf32>
    %46 = vector.shape_cast %45 : vector<1x128x128xf32> to vector<128x128xf32>
    %cst_42 = arith.constant dense<0.000000e+00> : vector<80x128xf32>
    %47 = tpu.matmul %44, %46, %cst_42 {dimension_numbers = #tpu.dot_dimension_numbers<[1], [0], [0], [1], [0, 0, 1, 1], [], []>} : vector<80x128xf32>, vector<128x128xf32>, vector<80x128xf32> -> vector<80x128xf32>
    %48 = arith.addf %42, %47 : vector<80x128xf32>
    %c0_43 = arith.constant 0 : index
    %c22 = arith.constant 22 : index
    %c0_44 = arith.constant 0 : index
    %49 = vector.load %arg1[%c0_43, %c22, %c0_44] : memref<1x102x128xf32, #tpu.memory_space<vmem>>, vector<1x80x128xf32>
    %50 = vector.shape_cast %49 : vector<1x80x128xf32> to vector<80x128xf32>
    %c8 = arith.constant 8 : index
    %c0_45 = arith.constant 0 : index
    %c0_46 = arith.constant 0 : index
    %51 = vector.load %arg2[%c8, %c0_45, %c0_46] : memref<9x128x128xf32, #tpu.memory_space<vmem>>, vector<1x128x128xf32>
    %52 = vector.shape_cast %51 : vector<1x128x128xf32> to vector<128x128xf32>
    %cst_47 = arith.constant dense<0.000000e+00> : vector<80x128xf32>
    %53 = tpu.matmul %50, %52, %cst_47 {dimension_numbers = #tpu.dot_dimension_numbers<[1], [0], [0], [1], [0, 0, 1, 1], [], []>} : vector<80x128xf32>, vector<128x128xf32>, vector<80x128xf32> -> vector<80x128xf32>
    %54 = arith.addf %48, %53 : vector<80x128xf32>
    %c0_48 = arith.constant 0 : index
    %c0_49 = arith.constant 0 : index
    %55 = vector.load %arg3[%c0_48, %c0_49] : memref<80x1xf32, #tpu.memory_space<vmem>>, vector<80x1xf32>
    %56 = vector.broadcast %55 : vector<80x1xf32> to vector<80x128xf32>
    %57 = arith.mulf %54, %56 : vector<80x128xf32>
    %c0_50 = arith.constant 0 : index
    %c0_51 = arith.constant 0 : index
    %c0_52 = arith.constant 0 : index
    %58 = vector.load %arg4[%c0_50, %c0_51, %c0_52] : memref<1x80x128xf32, #tpu.memory_space<vmem>>, vector<1x80x128xf32>
    %59 = vector.shape_cast %58 : vector<1x80x128xf32> to vector<80x128xf32>
    %60 = vector.shape_cast %57 : vector<80x128xf32> to vector<1x80x128xf32>
    tpu.vector_store %arg4[%c0_50, %c0_51, %c0_52], %60 {strides = array<i32>} : memref<1x80x128xf32, #tpu.memory_space<vmem>>, vector<1x80x128xf32>,
    %cst_53 = arith.constant dense<0.000000e+00> : vector<128xf32>
    %61 = vector.multi_reduction <add>, %57, %cst_53 [0] : vector<80x128xf32> to vector<128xf32>
    %62 = vector.shape_cast %61 : vector<128xf32> to vector<1x128xf32>
    %63 = arith.mulf %57, %57 : vector<80x128xf32>
    %cst_54 = arith.constant dense<0.000000e+00> : vector<128xf32>
    %64 = vector.multi_reduction <add>, %63, %cst_54 [0] : vector<80x128xf32> to vector<128xf32>
    %65 = vector.shape_cast %64 : vector<128xf32> to vector<1x128xf32>
    %66 = vector.shape_cast %62 : vector<1x128xf32> to vector<1x128xf32>
    %67 = vector.broadcast %66 : vector<1x128xf32> to vector<8x128xf32>
    %c0_55 = arith.constant 0 : index
    %c0_56 = arith.constant 0 : index
    %c0_57 = arith.constant 0 : index
    %68 = vector.load %arg5[%c0_55, %c0_56, %c0_57] : memref<1x8x128xf32, #tpu.memory_space<vmem>>, vector<1x8x128xf32>
    %69 = vector.shape_cast %68 : vector<1x8x128xf32> to vector<8x128xf32>
    %70 = vector.shape_cast %67 : vector<8x128xf32> to vector<1x8x128xf32>
    tpu.vector_store %arg5[%c0_55, %c0_56, %c0_57], %70 {strides = array<i32>} : memref<1x8x128xf32, #tpu.memory_space<vmem>>, vector<1x8x128xf32>,
    %71 = vector.shape_cast %65 : vector<1x128xf32> to vector<1x128xf32>
    %72 = vector.broadcast %71 : vector<1x128xf32> to vector<8x128xf32>
    %c0_58 = arith.constant 0 : index
    %c0_59 = arith.constant 0 : index
    %c0_60 = arith.constant 0 : index
    %73 = vector.load %arg6[%c0_58, %c0_59, %c0_60] : memref<1x8x128xf32, #tpu.memory_space<vmem>>, vector<1x8x128xf32>
    %74 = vector.shape_cast %73 : vector<1x8x128xf32> to vector<8x128xf32>
    %75 = vector.shape_cast %72 : vector<8x128xf32> to vector<1x8x128xf32>
    tpu.vector_store %arg6[%c0_58, %c0_59, %c0_60], %75 {strides = array<i32>} : memref<1x8x128xf32, #tpu.memory_space<vmem>>, vector<1x8x128xf32>,
    return
  }
  func.func @transform_0(%arg0: i32) -> (i32, i32, i32) {
    %c0_i32 = arith.constant 0 : i32
    %c0_i32_0 = arith.constant 0 : i32
    %c0_i32_1 = arith.constant 0 : i32
    return %arg0, %c0_i32, %c0_i32_0 : i32, i32, i32
  }
  func.func @transform_1(%arg0: i32) -> (i32, i32, i32) {
    %c0_i32 = arith.constant 0 : i32
    %c0_i32_0 = arith.constant 0 : i32
    %c0_i32_1 = arith.constant 0 : i32
    %c0_i32_2 = arith.constant 0 : i32
    return %c0_i32, %c0_i32_0, %c0_i32_1 : i32, i32, i32
  }
  func.func @transform_2(%arg0: i32) -> (i32, i32) {
    %c0_i32 = arith.constant 0 : i32
    %c0_i32_0 = arith.constant 0 : i32
    %c0_i32_1 = arith.constant 0 : i32
    return %c0_i32, %c0_i32_0 : i32, i32
  }
  func.func @transform_3(%arg0: i32) -> (i32, i32, i32) {
    %c0_i32 = arith.constant 0 : i32
    %c0_i32_0 = arith.constant 0 : i32
    %c0_i32_1 = arith.constant 0 : i32
    return %arg0, %c0_i32, %c0_i32_0 : i32, i32, i32
  }
  func.func @transform_4(%arg0: i32) -> (i32, i32, i32) {
    %c0_i32 = arith.constant 0 : i32
    %c0_i32_0 = arith.constant 0 : i32
    %c0_i32_1 = arith.constant 0 : i32
    return %arg0, %c0_i32, %c0_i32_0 : i32, i32, i32
  }
  func.func @transform_5(%arg0: i32) -> (i32, i32, i32) {
    %c0_i32 = arith.constant 0 : i32
    %c0_i32_0 = arith.constant 0 : i32
    %c0_i32_1 = arith.constant 0 : i32
    return %arg0, %c0_i32, %c0_i32_0 : i32, i32, i32
  }
}

module attributes {stable_mosaic.version = 11 : i64} {
  func.func @_bn_relu_pool_kernel(%arg0: i32, %arg1: memref<1x8x5x256xf32, #tpu.memory_space<vmem>>, %arg2: memref<1x256xf32, #tpu.memory_space<vmem>>, %arg3: memref<1x256xf32, #tpu.memory_space<vmem>>, %arg4: memref<1x4x4x128xf32, #tpu.memory_space<vmem>>) attributes {dimension_semantics = [#tpu.dimension_semantics<parallel>], iteration_bounds = array<i64: 2>, scalar_prefetch = 0 : i64, scratch_operands = 0 : i64, tpu.core_type = #tpu.core_type<tc>, window_params = [{transform_indices = @transform_0, window_bounds = array<i64: 1, 8, 5, 256>}, {pipeline_mode = #tpu.pipeline_mode<synchronous>, transform_indices = @transform_1, window_bounds = array<i64: 1, 256>}, {pipeline_mode = #tpu.pipeline_mode<synchronous>, transform_indices = @transform_2, window_bounds = array<i64: 1, 256>}, {transform_indices = @transform_3, window_bounds = array<i64: 1, 4, 4, 128>}]} {
    %c0 = arith.constant 0 : index
    %c0_0 = arith.constant 0 : index
    %c0_1 = arith.constant 0 : index
    %c0_2 = arith.constant 0 : index
    %0 = vector.load %arg1[%c0, %c0_0, %c0_1, %c0_2] : memref<1x8x5x256xf32, #tpu.memory_space<vmem>>, vector<1x8x5x256xf32>
    %1 = vector.shape_cast %0 : vector<1x8x5x256xf32> to vector<8x5x256xf32>
    %c0_3 = arith.constant 0 : index
    %c0_4 = arith.constant 0 : index
    %2 = vector.load %arg2[%c0_3, %c0_4] : memref<1x256xf32, #tpu.memory_space<vmem>>, vector<1x256xf32>
    %3 = vector.shape_cast %2 : vector<1x256xf32> to vector<1x1x256xf32>
    %4 = vector.broadcast %3 : vector<1x1x256xf32> to vector<8x5x256xf32>
    %5 = arith.mulf %1, %4 : vector<8x5x256xf32>
    %c0_5 = arith.constant 0 : index
    %c0_6 = arith.constant 0 : index
    %6 = vector.load %arg3[%c0_5, %c0_6] : memref<1x256xf32, #tpu.memory_space<vmem>>, vector<1x256xf32>
    %7 = vector.shape_cast %6 : vector<1x256xf32> to vector<1x1x256xf32>
    %8 = vector.broadcast %7 : vector<1x1x256xf32> to vector<8x5x256xf32>
    %9 = arith.addf %5, %8 : vector<8x5x256xf32>
    %cst = arith.constant 0.000000e+00 : f32
    %10 = vector.broadcast %cst : f32 to vector<8x5x256xf32>
    %11 = arith.maximumf %9, %10 : vector<8x5x256xf32>
    %12 = vector.extract_strided_slice %11 {offsets = [0, 0, 0], sizes = [8, 5, 128], strides = [1, 1, 1]} : vector<8x5x256xf32> to vector<8x5x128xf32>
    %13 = vector.extract_strided_slice %11 {offsets = [0, 0, 128], sizes = [8, 5, 128], strides = [1, 1, 1]} : vector<8x5x256xf32> to vector<8x5x128xf32>
    %14 = arith.maximumf %12, %13 : vector<8x5x128xf32>
    %15 = vector.extract_strided_slice %14 {offsets = [0, 0, 0], sizes = [8, 4, 128], strides = [1, 1, 1]} : vector<8x5x128xf32> to vector<8x4x128xf32>
    %16 = vector.shape_cast %15 : vector<8x4x128xf32> to vector<4x2x4x128xf32>
    %17 = vector.extract_strided_slice %16 {offsets = [0, 0, 0, 0], sizes = [4, 1, 4, 128], strides = [1, 1, 1, 1]} : vector<4x2x4x128xf32> to vector<4x1x4x128xf32>
    %18 = vector.shape_cast %17 : vector<4x1x4x128xf32> to vector<4x4x128xf32>
    %19 = vector.extract_strided_slice %16 {offsets = [0, 1, 0, 0], sizes = [4, 1, 4, 128], strides = [1, 1, 1, 1]} : vector<4x2x4x128xf32> to vector<4x1x4x128xf32>
    %20 = vector.shape_cast %19 : vector<4x1x4x128xf32> to vector<4x4x128xf32>
    %21 = arith.maximumf %18, %20 : vector<4x4x128xf32>
    %c0_7 = arith.constant 0 : index
    %c0_8 = arith.constant 0 : index
    %c0_9 = arith.constant 0 : index
    %c0_10 = arith.constant 0 : index
    %22 = vector.load %arg4[%c0_7, %c0_8, %c0_9, %c0_10] : memref<1x4x4x128xf32, #tpu.memory_space<vmem>>, vector<1x4x4x128xf32>
    %23 = vector.shape_cast %22 : vector<1x4x4x128xf32> to vector<4x4x128xf32>
    %24 = vector.shape_cast %21 : vector<4x4x128xf32> to vector<1x4x4x128xf32>
    tpu.vector_store %arg4[%c0_7, %c0_8, %c0_9, %c0_10], %24 {strides = array<i32>} : memref<1x4x4x128xf32, #tpu.memory_space<vmem>>, vector<1x4x4x128xf32>,
    return
  }
  func.func @transform_0(%arg0: i32) -> (i32, i32, i32, i32) {
    %c0_i32 = arith.constant 0 : i32
    %c0_i32_0 = arith.constant 0 : i32
    %c0_i32_1 = arith.constant 0 : i32
    %c0_i32_2 = arith.constant 0 : i32
    return %arg0, %c0_i32, %c0_i32_0, %c0_i32_1 : i32, i32, i32, i32
  }
  func.func @transform_1(%arg0: i32) -> (i32, i32) {
    %c0_i32 = arith.constant 0 : i32
    %c0_i32_0 = arith.constant 0 : i32
    %c0_i32_1 = arith.constant 0 : i32
    return %c0_i32, %c0_i32_0 : i32, i32
  }
  func.func @transform_2(%arg0: i32) -> (i32, i32) {
    %c0_i32 = arith.constant 0 : i32
    %c0_i32_0 = arith.constant 0 : i32
    %c0_i32_1 = arith.constant 0 : i32
    return %c0_i32, %c0_i32_0 : i32, i32
  }
  func.func @transform_3(%arg0: i32) -> (i32, i32, i32, i32) {
    %c0_i32 = arith.constant 0 : i32
    %c0_i32_0 = arith.constant 0 : i32
    %c0_i32_1 = arith.constant 0 : i32
    %c0_i32_2 = arith.constant 0 : i32
    return %arg0, %c0_i32, %c0_i32_0, %c0_i32_1 : i32, i32, i32, i32
  }
}

</mosaic_0001>

<bundles_post_ra>
// kernel: vgg16bn_forward.9
= control target key start
LH: loop header
LB: loop body
LE: loop exit
PB: predicated region body
PF: predicated region fallthrough
CT: control target
= control target key end

     0   :  { %s757_s15 = smov 0   ;;  %s1099_s0 = inlined_call_operand.vmem [shape: f32[2,288,64], index: 0, kind: input, shape index: {}]   ;;  %s1100_s1 = inlined_call_operand.vmem [shape: f32[1,64], index: 1, kind: input, shape index: {}]   ;;  %s1101_s2 = inlined_call_operand.vmem [shape: f32[1,64], index: 2, kind: input, shape index: {}]   ;;  %s1102_s3 = inlined_call_operand.vmem [shape: f32[288,1], index: 3, kind: input, shape index: {}]   ;;  %s1103_s4 = inlined_call_operand.vmem [shape: f32[2,288,64], index: 4, kind: output, shape index: {}]  }
   0x1 LB: > { %s700_s16 = sadd.s32 4294967295, %s729_s15   ;;  %p704_p0 = scmp.ge.s32.totalorder %s729_s15, 1  ;;  %s729_s15 = sphi %s757_s15, %s14_s15  }
   0x2   : > { %p162_p1 = scmp.lt.s32.totalorder %s729_s15, 3 }
   0x4   : > { %p163_p2 = pnand %p704_p0, %p162_p1 }
   0x5   : > { %v358_v0 = vld [vmem:[%s1102_s3 + $0x10] sm:$0xff] (!%p163_p2)  ;;  %v356_v1 = vld [vmem:[%s1102_s3] sm:$0xff] (!%p163_p2)  ;;  %v731_v2 = vmov (!%p163_p2), 0   ;;  %v359_v3 = vld [vmem:[%s1102_s3 + $0x18] sm:$0xff] (!%p163_p2)  ;;  %p188_p3 = scmp.lt.s32.totalorder (!%p163_p2), %s700_s16, 1  ;;  %vm608_vm0 = vcmask (!%p163_p2), 523264  }
   0x6   : > { %166 = sbr.rel (%p163_p2) target bundleno = 206 (0xce), region = 36  ;;  %722 = vset.pattern.permute.xlu1 (!%p163_p2), %v731_v2  ;;  %721 = vset.pattern.permute.xlu0 (!%p163_p2), %v731_v2  ;;  %v357_v4 = vld [vmem:[%s1102_s3 + $0x8] sm:$0xff] (!%p163_p2)  ;;  %v360_v6 = vld [vmem:[%s1102_s3 + $0x20] sm:$0xff] (!%p163_p2)  ;;  %v363_v7 = vld [vmem:[%s1102_s3 + $0x38] sm:$0xff] (!%p163_p2) }
   0x7   : > { %404 = vperm.xlu1 (!%p163_p2), %722, %v358_v0   ;;  %394 = vperm.xlu0 (!%p163_p2), %721, %v356_v1   ;;  %v361_v5 = vld [vmem:[%s1102_s3 + $0x28] sm:$0xff] (!%p163_p2)  ;;  %v362_v8 = vld [vmem:[%s1102_s3 + $0x30] sm:$0xff] (!%p163_p2)  ;;  %v364_v10 = vld [vmem:[%s1102_s3 + $0x40] sm:$0xff] (!%p163_p2) }
   0x8   : > { %v365_v9 = vld [vmem:[%s1102_s3 + $0x48] sm:$0xff] (!%p163_p2)  ;;  %v367_v11 = vld [vmem:[%s1102_s3 + $0x58] sm:$0xff] (!%p163_p2)  ;;  %v366_v12 = vld [vmem:[%s1102_s3 + $0x50] sm:$0xff] (!%p163_p2) }
   0x9   : > { %v369_v13 = vld [vmem:[%s1102_s3 + $0x68] sm:$0xff] (!%p163_p2)  ;;  %v368_v14 = vld [vmem:[%s1102_s3 + $0x60] sm:$0xff] (!%p163_p2)  ;;  %v371_v15 = vld [vmem:[%s1102_s3 + $0x78] sm:$0xff] (!%p163_p2) }
   0xa   : > { %v370_v16 = vld [vmem:[%s1102_s3 + $0x70] sm:$0xff] (!%p163_p2)  ;;  %v373_v17 = vld [vmem:[%s1102_s3 + $0x88] sm:$0xff] (!%p163_p2)  ;;  %v372_v18 = vld [vmem:[%s1102_s3 + $0x80] sm:$0xff] (!%p163_p2) }
   0xb   : > { %409 = vperm.xlu1 (!%p163_p2), %722, %v359_v3   ;;  %399 = vperm.xlu0 (!%p163_p2), %721, %v357_v4   ;;  %v375_v19 = vld [vmem:[%s1102_s3 + $0x98] sm:$0xff] (!%p163_p2)  ;;  %v374_v20 = vld [vmem:[%s1102_s3 + $0x90] sm:$0xff] (!%p163_p2)  ;;  %v377_v21 = vld [vmem:[%s1102_s3 + $0xa8] sm:$0xff] (!%p163_p2) }
   0xc   : > { %v376_v22 = vld [vmem:[%s1102_s3 + $0xa0] sm:$0xff] (!%p163_p2)  ;;  %v379_v23 = vld [vmem:[%s1102_s3 + $0xb8] sm:$0xff] (!%p163_p2)  ;;  %v378_v24 = vld [vmem:[%s1102_s3 + $0xb0] sm:$0xff] (!%p163_p2) }
   0xd   : > { %v381_v25 = vld [vmem:[%s1102_s3 + $0xc8] sm:$0xff]  ;;  %v380_v26 = vld [vmem:[%s1102_s3 + $0xc0] sm:$0xff]  ;;  %s1105_s16 = smov (!%p188_p3, %s700_s16), 1  ;;  %v383_v27 = vld [vmem:[%s1102_s3 + $0xd8] sm:$0xff] }
   0xe   : > { %v382_v28 = vld [vmem:[%s1102_s3 + $0xd0] sm:$0xff]  ;;  %s711_s25 = smul.u32 288, %s1105_s16  ;;  %v385_v29 = vld [vmem:[%s1102_s3 + $0xe8] sm:$0xff]  ;;  %v384_v30 = vld [vmem:[%s1102_s3 + $0xe0] sm:$0xff] }
   0xf   : > { %419 = vperm.xlu1 %722, %v361_v5   ;;  %414 = vperm.xlu0 %721, %v360_v6   ;;  %v387_v31 = vld [vmem:[%s1102_s3 + $0xf8] sm:$0xff]  ;;  %v386_v32 = vld [vmem:[%s1102_s3 + $0xf0] sm:$0xff]  ;;  %v878_v33 = vld [vmem:[%s1100_s1] ss:$0 sm:$0xff] }
  0x10   : > { %s873_s10 = scalar_lea.vmem %s1099_s0, %s711_s25  ;;  %v887_v38 = vld [vmem:[%s1101_s2] ss:$0 sm:$0xff]  ;;  %v389_v39 = vld [vmem:[%s1102_s3 + $0x108] sm:$0xff]  ;;  %v391_v49 = vld [vmem:[%s1102_s3 + $0x118] sm:$0xff]  ;;  %s940_s28 = scalar_lea.vmem %s1103_s4, %s711_s25 }
  0x11   : > { %v231_v34 = vld [vmem:[%s873_s10 + $0x108] sm:$0xff]  ;;  %v230_v35 = vld [vmem:[%s873_s10 + $0x100] sm:$0xff]  ;;  %v233_v43 = vld [vmem:[%s873_s10 + $0x118] sm:$0xff] }
  0x12   : > { %v274_v36 = vmul.f32 %v878_v33, %v231_v34  ;;  %v273_v37 = vmul.f32 %v878_v33, %v230_v35  ;;  %v388_v42 = vld [vmem:[%s1102_s3 + $0x100] sm:$0xff]  ;;  %v232_v44 = vld [vmem:[%s873_s10 + $0x110] sm:$0xff]  ;;  %v276_v45 = vmul.f32 %v878_v33, %v233_v43  ;;  %v201_v55 = vld [vmem:[%s873_s10 + $0x18] sm:$0xff] }
  0x13   : > { %429 = vperm.xlu1 %722, %v363_v7   ;;  %424 = vperm.xlu0 %721, %v362_v8   ;;  %v275_v46 = vmul.f32 %v878_v33, %v232_v44  ;;  %v390_v50 = vld [vmem:[%s1102_s3 + $0x110] sm:$0xff]  ;;  %v198_v52 = vld [vmem:[%s873_s10] sm:$0xff]  ;;  %v199_v56 = vld [vmem:[%s873_s10 + $0x8] sm:$0xff]  ;;  %v244_v59 = vmul.f32 %v878_v33, %v201_v55 }
  0x14   : > { %v893_v40 = vadd.f32 %v887_v38, %v274_v36  ;;  %v896_v41 = vadd.f32 %v887_v38, %v273_v37  ;;  %v906_v47 = vadd.f32 %v887_v38, %v276_v45  ;;  %v200_v51 = vld [vmem:[%s873_s10 + $0x10] sm:$0xff]  ;;  %v241_v54 = vmul.f32 %v878_v33, %v198_v52  ;;  %v203_v61 = vld [vmem:[%s873_s10 + $0x28] sm:$0xff]  ;;  %v202_v62 = vld [vmem:[%s873_s10 + $0x20] sm:$0xff] }
  0x15   : > { %v909_v48 = vadd.f32 %v887_v38, %v275_v46  ;;  %v243_v53 = vmul.f32 %v878_v33, %v200_v51  ;;  %v242_v60 = vmul.f32 %v878_v33, %v199_v56  ;;  %v246_v63 = vmul.f32 %v878_v33, %v203_v61  ;;  %v205_v5 = vld [vmem:[%s873_s10 + $0x38] sm:$0xff]  ;;  %v204_v6 = vld [vmem:[%s873_s10 + $0x30] sm:$0xff]  ;;  %v211_v45 = vld [vmem:[%s873_s10 + $0x68] sm:$0xff] }
  0x16   : > { %v284_v58 = vadd.f32 %v887_v38, %v241_v54  ;;  %v245_v0 = vmul.f32 %v878_v33, %v202_v62  ;;  %v287_v3 = vadd.f32 %v887_v38, %v244_v59  ;;  %v210_v46 = vld [vmem:[%s873_s10 + $0x60] sm:$0xff]  ;;  %v213_v59 = vld [vmem:[%s873_s10 + $0x78] sm:$0xff] }
  0x17   : > { %439 = vperm.xlu1 %722, %v365_v9   ;;  %434 = vperm.xlu0 %721, %v364_v10   ;;  %v286_v57 = vadd.f32 %v887_v38, %v243_v53  ;;  %v285_v4 = vadd.f32 %v887_v38, %v242_v60  ;;  %v289_v9 = vadd.f32 %v887_v38, %v246_v63  ;;  %v212_v60 = vld [vmem:[%s873_s10 + $0x70] sm:$0xff] }
  0x18   : > { %v320_v2 = vmax.f32 %v284_v58, 0.0  ;;  %v288_v10 = vadd.f32 %v887_v38, %v245_v0  ;;  %v254_v53 = vmul.f32 %v878_v33, %v211_v45  ;;  %v253_v54 = vmul.f32 %v878_v33, %v210_v46 }
  0x19   : > { %v322_v1 = vmax.f32 %v286_v57, 0.0 }
  0x1a   : > { %v297_v63 = vadd.f32 %v887_v38, %v254_v53  ;;  %v296_v0 = vadd.f32 %v887_v38, %v253_v54 }
  0x1b   : > { %449 = vperm.xlu1 %722, %v367_v11   ;;  %444 = vperm.xlu0 %721, %v366_v12   ;;  %v248_v11 = vmul.f32 %v878_v33, %v205_v5  ;;  %v247_v12 = vmul.f32 %v878_v33, %v204_v6 }
  0x1f   : > { %459 = vperm.xlu1 %722, %v369_v13   ;;  %454 = vperm.xlu0 %721, %v368_v14  }
  0x23   : > { %469 = vperm.xlu1 %722, %v371_v15   ;;  %464 = vperm.xlu0 %721, %v370_v16   ;;  %v323_v15 = vmax.f32 %v287_v3, 0.0  ;;  %v321_v16 = vmax.f32 %v285_v4, 0.0 }
  0x27   : > { %479 = vperm.xlu1 %722, %v373_v17   ;;  %474 = vperm.xlu0 %721, %v372_v18   ;;  %v207_v17 = vld [vmem:[%s873_s10 + $0x48] sm:$0xff]  ;;  %v206_v18 = vld [vmem:[%s873_s10 + $0x40] sm:$0xff] }
  0x2b   : > { %489 = vperm.xlu1 %722, %v375_v19   ;;  %484 = vperm.xlu0 %721, %v374_v20  }
  0x2f   : > { %499 = vperm.xlu1 %722, %v377_v21   ;;  %494 = vperm.xlu0 %721, %v376_v22   ;;  %v325_v21 = vmax.f32 %v289_v9, 0.0  ;;  %v324_v22 = vmax.f32 %v288_v10, 0.0 }
  0x33   : > { %509 = vperm.xlu1 %722, %v379_v23   ;;  %504 = vperm.xlu0 %721, %v378_v24   ;;  %v291_v23 = vadd.f32 %v887_v38, %v248_v11  ;;  %v290_v24 = vadd.f32 %v887_v38, %v247_v12 }
  0x35   : > { %v327_v34 = vmax.f32 %v291_v23, 0.0  ;;  %v326_v35 = vmax.f32 %v290_v24, 0.0 }
  0x37   : > { %519 = vperm.xlu1 %722, %v381_v25   ;;  %514 = vperm.xlu0 %721, %v380_v26  }
  0x3b   : > { %529 = vperm.xlu1 %722, %v383_v27   ;;  %524 = vperm.xlu0 %721, %v382_v28   ;;  %v250_v27 = vmul.f32 %v878_v33, %v207_v17  ;;  %v249_v28 = vmul.f32 %v878_v33, %v206_v18  ;;  %v333_v17 = vmax.f32 %v297_v63, 0.0  ;;  %v332_v18 = vmax.f32 %v296_v0, 0.0 }
  0x3d   : > { %v293_v43 = vadd.f32 %v887_v38, %v250_v27  ;;  %v292_v44 = vadd.f32 %v887_v38, %v249_v28 }
  0x3f   : > { %539 = vperm.xlu1 %722, %v385_v29   ;;  %534 = vperm.xlu0 %721, %v384_v30   ;;  %v209_v29 = vld [vmem:[%s873_s10 + $0x58] sm:$0xff]  ;;  %v208_v30 = vld [vmem:[%s873_s10 + $0x50] sm:$0xff]  ;;  %v329_v57 = vmax.f32 %v293_v43, 0.0  ;;  %v328_v58 = vmax.f32 %v292_v44, 0.0 }
  0x40   : > { %v252_v36 = vmul.f32 %v878_v33, %v209_v29  ;;  %v251_v37 = vmul.f32 %v878_v33, %v208_v30 }
  0x42   : > { %v295_v51 = vadd.f32 %v887_v38, %v252_v36  ;;  %v294_v52 = vadd.f32 %v887_v38, %v251_v37 }
  0x43   : > { %549 = vperm.xlu1 %722, %v387_v31   ;;  %544 = vperm.xlu0 %721, %v386_v32  }
  0x44   : > { %v331_v5 = vmax.f32 %v295_v51, 0.0  ;;  %v330_v6 = vmax.f32 %v294_v52, 0.0 }
  0x47   : > { %559 = vperm.xlu1 %722, %v389_v39   ;;  %554 = vperm.xlu0 %721, %v388_v42  }
  0x4b   : > { %569 = vperm.xlu1 %722, %v391_v49   ;;  %564 = vperm.xlu0 %721, %v390_v50  }
  0x86   : > { %v405_v7 = vpop.permute.xlu1 %404  ;;  %v395_v8 = vpop.permute.xlu0 %394 }
  0x87   : > { %v574_v13 = vmul.f32 %v405_v7, %v322_v1  ;;  %v572_v14 = vmul.f32 %v395_v8, %v320_v2  ;;  %v256_v1 = vmul.f32 %v878_v33, %v213_v59  ;;  %v255_v2 = vmul.f32 %v878_v33, %v212_v60  ;;  %v215_v7 = vld [vmem:[%s873_s10 + $0x88] sm:$0xff]  ;;  %v214_v8 = vld [vmem:[%s873_s10 + $0x80] sm:$0xff] }
  0x89   : > { %611 = vst.msk [vmem:[%s940_s28 + $0x10] sm:$0xff] %vm608_vm0, %v574_v13  ;;  %609 = vst.msk [vmem:[%s940_s28] sm:$0xff] %vm608_vm0, %v572_v14  ;;  %v299_v11 = vadd.f32 %v887_v38, %v256_v1  ;;  %v298_v12 = vadd.f32 %v887_v38, %v255_v2  ;;  %v258_v13 = vmul.f32 %v878_v33, %v215_v7 }
  0x8a   : > { %v410_v19 = vpop.permute.xlu1 %409  ;;  %v400_v20 = vpop.permute.xlu0 %399  ;;  %v257_v14 = vmul.f32 %v878_v33, %v214_v8 }
  0x8b   : > { %v575_v25 = vmul.f32 %v410_v19, %v323_v15  ;;  %v573_v26 = vmul.f32 %v400_v20, %v321_v16  ;;  %v217_v19 = vld [vmem:[%s873_s10 + $0x98] sm:$0xff]  ;;  %v216_v20 = vld [vmem:[%s873_s10 + $0x90] sm:$0xff]  ;;  %v335_v23 = vmax.f32 %v299_v11, 0.0  ;;  %v334_v24 = vmax.f32 %v298_v12, 0.0 }
  0x8c   : > { %v260_v29 = vmul.f32 %v878_v33, %v217_v19  ;;  %v259_v30 = vmul.f32 %v878_v33, %v216_v20 }
  0x8d   : > { %612 = vst.msk [vmem:[%s940_s28 + $0x18] sm:$0xff] %vm608_vm0, %v575_v25  ;;  %610 = vst.msk [vmem:[%s940_s28 + $0x8] sm:$0xff] %vm608_vm0, %v573_v26  ;;  %v301_v25 = vadd.f32 %v887_v38, %v258_v13  ;;  %v300_v26 = vadd.f32 %v887_v38, %v257_v14 }
  0x8e   : > { %v420_v31 = vpop.permute.xlu1 %419  ;;  %v415_v32 = vpop.permute.xlu0 %414  ;;  %v303_v45 = vadd.f32 %v887_v38, %v260_v29  ;;  %v302_v46 = vadd.f32 %v887_v38, %v259_v30 }
  0x8f   : > { %v577_v39 = vmul.f32 %v420_v31, %v325_v21  ;;  %v576_v42 = vmul.f32 %v415_v32, %v324_v22  ;;  %v219_v31 = vld [vmem:[%s873_s10 + $0xa8] sm:$0xff]  ;;  %v218_v32 = vld [vmem:[%s873_s10 + $0xa0] sm:$0xff]  ;;  %v337_v36 = vmax.f32 %v301_v25, 0.0  ;;  %v336_v37 = vmax.f32 %v300_v26, 0.0 }
  0x90   : > { %v339_v59 = vmax.f32 %v303_v45, 0.0  ;;  %v338_v60 = vmax.f32 %v302_v46, 0.0 }
  0x91   : > { %614 = vst.msk [vmem:[%s940_s28 + $0x28] sm:$0xff] %vm608_vm0, %v577_v39  ;;  %613 = vst.msk [vmem:[%s940_s28 + $0x20] sm:$0xff] %vm608_vm0, %v576_v42  ;;  %v262_v39 = vmul.f32 %v878_v33, %v219_v31  ;;  %v261_v42 = vmul.f32 %v878_v33, %v218_v32 }
  0x92   : > { %v430_v49 = vpop.permute.xlu1 %429  ;;  %v425_v50 = vpop.permute.xlu0 %424 }
  0x93   : > { %v579_v55 = vmul.f32 %v430_v49, %v327_v34  ;;  %v578_v56 = vmul.f32 %v425_v50, %v326_v35  ;;  %v221_v49 = vld [vmem:[%s873_s10 + $0xb8] sm:$0xff]  ;;  %v220_v50 = vld [vmem:[%s873_s10 + $0xb0] sm:$0xff]  ;;  %v305_v53 = vadd.f32 %v887_v38, %v262_v39  ;;  %v304_v54 = vadd.f32 %v887_v38, %v261_v42 }
  0x95   : > { %616 = vst.msk [vmem:[%s940_s28 + $0x38] sm:$0xff] %vm608_vm0, %v579_v55  ;;  %615 = vst.msk [vmem:[%s940_s28 + $0x30] sm:$0xff] %vm608_vm0, %v578_v56  ;;  %v264_v55 = vmul.f32 %v878_v33, %v221_v49  ;;  %v263_v56 = vmul.f32 %v878_v33, %v220_v50  ;;  %v341_v1 = vmax.f32 %v305_v53, 0.0  ;;  %v340_v2 = vmax.f32 %v304_v54, 0.0 }
  0x96   : > { %v440_v61 = vpop.permute.xlu1 %439  ;;  %v435_v62 = vpop.permute.xlu0 %434 }
  0x97   : > { %v581_v3 = vmul.f32 %v440_v61, %v329_v57  ;;  %v580_v4 = vmul.f32 %v435_v62, %v328_v58  ;;  %v223_v61 = vld [vmem:[%s873_s10 + $0xc8] sm:$0xff]  ;;  %v222_v62 = vld [vmem:[%s873_s10 + $0xc0] sm:$0xff] }
  0x98   : > { %v266_v7 = vmul.f32 %v878_v33, %v223_v61  ;;  %v265_v8 = vmul.f32 %v878_v33, %v222_v62 }
  0x99   : > { %618 = vst.msk [vmem:[%s940_s28 + $0x48] sm:$0xff] %vm608_vm0, %v581_v3  ;;  %617 = vst.msk [vmem:[%s940_s28 + $0x40] sm:$0xff] %vm608_vm0, %v580_v4  ;;  %v307_v3 = vadd.f32 %v887_v38, %v264_v55  ;;  %v306_v4 = vadd.f32 %v887_v38, %v263_v56 }
  0x9a   : > { %v450_v9 = vpop.permute.xlu1 %449  ;;  %v445_v10 = vpop.permute.xlu0 %444  ;;  %v309_v19 = vadd.f32 %v887_v38, %v266_v7  ;;  %v308_v20 = vadd.f32 %v887_v38, %v265_v8 }
  0x9b   : > { %v583_v15 = vmul.f32 %v450_v9, %v331_v5  ;;  %v582_v16 = vmul.f32 %v445_v10, %v330_v6  ;;  %v225_v9 = vld [vmem:[%s873_s10 + $0xd8] sm:$0xff]  ;;  %v224_v10 = vld [vmem:[%s873_s10 + $0xd0] sm:$0xff]  ;;  %v343_v13 = vmax.f32 %v307_v3, 0.0  ;;  %v342_v14 = vmax.f32 %v306_v4, 0.0 }
  0x9c   : > { %v345_v31 = vmax.f32 %v309_v19, 0.0  ;;  %v344_v32 = vmax.f32 %v308_v20, 0.0  ;;  %v353_v3 = vmax.f32 %v893_v40, 0.0  ;;  %v352_v4 = vmax.f32 %v896_v41, 0.0 }
  0x9d   : > { %620 = vst.msk [vmem:[%s940_s28 + $0x58] sm:$0xff] %vm608_vm0, %v583_v15  ;;  %619 = vst.msk [vmem:[%s940_s28 + $0x50] sm:$0xff] %vm608_vm0, %v582_v16  ;;  %v268_v15 = vmul.f32 %v878_v33, %v225_v9  ;;  %v267_v16 = vmul.f32 %v878_v33, %v224_v10  ;;  %v355_v9 = vmax.f32 %v906_v47, 0.0  ;;  %v354_v10 = vmax.f32 %v909_v48, 0.0 }
  0x9e   : > { %v460_v21 = vpop.permute.xlu1 %459  ;;  %v455_v22 = vpop.permute.xlu0 %454 }
  0x9f   : > { %v585_v27 = vmul.f32 %v460_v21, %v333_v17  ;;  %v584_v28 = vmul.f32 %v455_v22, %v332_v18  ;;  %v227_v21 = vld [vmem:[%s873_s10 + $0xe8] sm:$0xff]  ;;  %v226_v22 = vld [vmem:[%s873_s10 + $0xe0] sm:$0xff]  ;;  %v311_v25 = vadd.f32 %v887_v38, %v268_v15  ;;  %v310_v26 = vadd.f32 %v887_v38, %v267_v16 }
  0xa1   : > { %622 = vst.msk [vmem:[%s940_s28 + $0x68] sm:$0xff] %vm608_vm0, %v585_v27  ;;  %621 = vst.msk [vmem:[%s940_s28 + $0x60] sm:$0xff] %vm608_vm0, %v584_v28  ;;  %v270_v27 = vmul.f32 %v878_v33, %v227_v21  ;;  %v269_v28 = vmul.f32 %v878_v33, %v226_v22  ;;  %v347_v39 = vmax.f32 %v311_v25, 0.0  ;;  %v346_v42 = vmax.f32 %v310_v26, 0.0 }
  0xa2   : > { %v470_v34 = vpop.permute.xlu1 %469  ;;  %v465_v35 = vpop.permute.xlu0 %464 }
  0xa3   : > { %v587_v43 = vmul.f32 %v470_v34, %v335_v23  ;;  %v586_v44 = vmul.f32 %v465_v35, %v334_v24  ;;  %v229_v34 = vld [vmem:[%s873_s10 + $0xf8] sm:$0xff]  ;;  %v228_v35 = vld [vmem:[%s873_s10 + $0xf0] sm:$0xff] }
  0xa4   : > { %v272_v49 = vmul.f32 %v878_v33, %v229_v34  ;;  %v271_v50 = vmul.f32 %v878_v33, %v228_v35 }
  0xa5   : > { %624 = vst.msk [vmem:[%s940_s28 + $0x78] sm:$0xff] %vm608_vm0, %v587_v43  ;;  %623 = vst.msk [vmem:[%s940_s28 + $0x70] sm:$0xff] %vm608_vm0, %v586_v44  ;;  %v313_v43 = vadd.f32 %v887_v38, %v270_v27  ;;  %v312_v44 = vadd.f32 %v887_v38, %v269_v28 }
  0xa6   : > { %v480_v51 = vpop.permute.xlu1 %479  ;;  %v475_v52 = vpop.permute.xlu0 %474 }
  0xa7   : > { %v589_v57 = vmul.f32 %v480_v51, %v337_v36  ;;  %v588_v58 = vmul.f32 %v475_v52, %v336_v37  ;;  %v349_v53 = vmax.f32 %v313_v43, 0.0  ;;  %v348_v54 = vmax.f32 %v312_v44, 0.0 }
  0xa9   : > { %626 = vst.msk [vmem:[%s940_s28 + $0x88] sm:$0xff] %vm608_vm0, %v589_v57  ;;  %625 = vst.msk [vmem:[%s940_s28 + $0x80] sm:$0xff] %vm608_vm0, %v588_v58  ;;  %v315_v57 = vadd.f32 %v887_v38, %v272_v49  ;;  %v314_v58 = vadd.f32 %v887_v38, %v271_v50 }
  0xaa   : > { %v490_v63 = vpop.permute.xlu1 %489  ;;  %v485_v0 = vpop.permute.xlu0 %484 }
  0xab   : > { %v591_v5 = vmul.f32 %v490_v63, %v339_v59  ;;  %v590_v6 = vmul.f32 %v485_v0, %v338_v60  ;;  %v351_v62 = vmax.f32 %v315_v57, 0.0  ;;  %v350_v63 = vmax.f32 %v314_v58, 0.0 }
  0xad   : > { %628 = vst.msk [vmem:[%s940_s28 + $0x98] sm:$0xff] %vm608_vm0, %v591_v5  ;;  %627 = vst.msk [vmem:[%s940_s28 + $0x90] sm:$0xff] %vm608_vm0, %v590_v6 }
  0xae   : > { %v500_v11 = vpop.permute.xlu1 %499  ;;  %v495_v12 = vpop.permute.xlu0 %494 }
  0xaf   : > { %v593_v17 = vmul.f32 %v500_v11, %v341_v1  ;;  %v592_v18 = vmul.f32 %v495_v12, %v340_v2 }
  0xb1   : > { %630 = vst.msk [vmem:[%s940_s28 + $0xa8] sm:$0xff] %vm608_vm0, %v593_v17  ;;  %629 = vst.msk [vmem:[%s940_s28 + $0xa0] sm:$0xff] %vm608_vm0, %v592_v18 }
  0xb2   : > { %v510_v23 = vpop.permute.xlu1 %509  ;;  %v505_v24 = vpop.permute.xlu0 %504 }
  0xb3   : > { %v595_v29 = vmul.f32 %v510_v23, %v343_v13  ;;  %v594_v30 = vmul.f32 %v505_v24, %v342_v14 }
  0xb5   : > { %632 = vst.msk [vmem:[%s940_s28 + $0xb8] sm:$0xff] %vm608_vm0, %v595_v29  ;;  %631 = vst.msk [vmem:[%s940_s28 + $0xb0] sm:$0xff] %vm608_vm0, %v594_v30 }
  0xb6   : > { %v520_v36 = vpop.permute.xlu1 %519  ;;  %v515_v37 = vpop.permute.xlu0 %514 }
  0xb7   : > { %v597_v45 = vmul.f32 %v520_v36, %v345_v31  ;;  %v596_v46 = vmul.f32 %v515_v37, %v344_v32 }
  0xb9   : > { %634 = vst.msk [vmem:[%s940_s28 + $0xc8] sm:$0xff] %vm608_vm0, %v597_v45  ;;  %633 = vst.msk [vmem:[%s940_s28 + $0xc0] sm:$0xff] %vm608_vm0, %v596_v46 }
  0xba   : > { %v530_v51 = vpop.permute.xlu1 %529  ;;  %v525_v52 = vpop.permute.xlu0 %524 }
  0xbb   : > { %v599_v55 = vmul.f32 %v530_v51, %v347_v39  ;;  %v598_v56 = vmul.f32 %v525_v52, %v346_v42 }
  0xbd   : > { %636 = vst.msk [vmem:[%s940_s28 + $0xd8] sm:$0xff] %vm608_vm0, %v599_v55  ;;  %635 = vst.msk [vmem:[%s940_s28 + $0xd0] sm:$0xff] %vm608_vm0, %v598_v56 }
  0xbe   : > { %v540_v33 = vpop.permute.xlu1 %539  ;;  %v535_v59 = vpop.permute.xlu0 %534 }
  0xbf   : > { %v601_v60 = vmul.f32 %v540_v33, %v349_v53  ;;  %v600_v61 = vmul.f32 %v535_v59, %v348_v54 }
  0xc1   : > { %638 = vst.msk [vmem:[%s940_s28 + $0xe8] sm:$0xff] %vm608_vm0, %v601_v60  ;;  %637 = vst.msk [vmem:[%s940_s28 + $0xe0] sm:$0xff] %vm608_vm0, %v600_v61 }
  0xc2   : > { %v550_v0 = vpop.permute.xlu1 %549  ;;  %v545_v38 = vpop.permute.xlu0 %544 }
  0xc3   : > { %v603_v1 = vmul.f32 %v550_v0, %v351_v62  ;;  %v602_v2 = vmul.f32 %v545_v38, %v350_v63 }
  0xc5   : > { %640 = vst.msk [vmem:[%s940_s28 + $0xf8] sm:$0xff] %vm608_vm0, %v603_v1  ;;  %639 = vst.msk [vmem:[%s940_s28 + $0xf0] sm:$0xff] %vm608_vm0, %v602_v2 }
  0xc6   : > { %v560_v5 = vpop.permute.xlu1 %559  ;;  %v555_v6 = vpop.permute.xlu0 %554 }
  0xc7   : > { %v605_v7 = vmul.f32 %v560_v5, %v353_v3  ;;  %v604_v8 = vmul.f32 %v555_v6, %v352_v4 }
  0xc9   : > { %642 = vst.msk [vmem:[%s940_s28 + $0x108] sm:$0xff] %vm608_vm0, %v605_v7  ;;  %641 = vst.msk [vmem:[%s940_s28 + $0x100] sm:$0xff] %vm608_vm0, %v604_v8 }
  0xca   : > { %v570_v40 = vpop.permute.xlu1 %569  ;;  %v565_v11 = vpop.permute.xlu0 %564 }
  0xcb   : > { %v607_v41 = vmul.f32 %v570_v40, %v355_v9  ;;  %v606_v12 = vmul.f32 %v565_v11, %v354_v10 }
  0xcd   : > { %644 = vst.msk [vmem:[%s940_s28 + $0x118] sm:$0xff] %vm608_vm0, %v607_v41  ;;  %643 = vst.msk [vmem:[%s940_s28 + $0x110] sm:$0xff] %vm608_vm0, %v606_v12 }
  0xce PF: > { %s14_s15 = sadd.s32 1, %s729_s15  }
  0xcf   : > { %p11_p4 = scmp.ge.s32.totalorder %s14_s15, 4  }
  0xd1   :  { %13 = sbr.rel (!%p11_p4) target bundleno = 1 (0x1), region = 66 }

// kernel: vgg16bn_forward.11
= control target key start
LH: loop header
LB: loop body
LE: loop exit
PB: predicated region body
PF: predicated region fallthrough
CT: control target
= control target key end

     0   :  { %s454_s12 = smov 0   ;;  %s627_s0 = inlined_call_operand.vmem [shape: f32[2,16,9,128], index: 0, kind: input, shape index: {}]   ;;  %s628_s1 = inlined_call_operand.vmem [shape: f32[1,128], index: 1, kind: input, shape index: {}]   ;;  %s629_s2 = inlined_call_operand.vmem [shape: f32[1,128], index: 2, kind: input, shape index: {}]   ;;  %s630_s3 = inlined_call_operand.vmem [shape: f32[2,8,8,64], index: 3, kind: output, shape index: {}]  }
   0x1 LB: > { %s401_s13 = sadd.s32 4294967295, %s431_s12   ;;  %p405_p0 = scmp.ge.s32.totalorder %s431_s12, 1  ;;  %s431_s12 = sphi %s454_s12, %s13_s12  }
   0x2   : > { %p137_p1 = scmp.lt.s32.totalorder %s431_s12, 3 }
   0x4   : > { %p138_p2 = pnand %p405_p0, %p137_p1 }
   0x5   : > { %p161_p3 = scmp.lt.s32.totalorder (!%p138_p2), %s401_s13, 1  ;;  %v468_v0 = vld [vmem:[%s628_s1] ss:$0 sm:$0xff] (!%p138_p2)  ;;  %s433_s22 = smov (!%p138_p2), 64   ;;  %vm337_vm0 = vcmask (!%p138_p2), 523264  }
   0x6   : > { %141 = sbr.rel (%p138_p2) target bundleno = 172 (0xac), region = 32  ;;  %v478_v1 = vld [vmem:[%s629_s2] ss:$0 sm:$0xff] (!%p138_p2) }
   0xd   : > { %s632_s13 = smov (!%p161_p3, %s401_s13), 1 }
   0xe   : > { %s414_s14 = sshll.u32 %s632_s13, 8  ;;  %s415_s23 = sshll.u32 %s632_s13, 6 }
   0xf   : > { %s473_s19 = scalar_lea.vmem %s627_s0, %s414_s14  ;;  %s600_s26 = scalar_lea.vmem %s630_s3, %s415_s23 }
  0x10   : > { %v173_v2 = vld [vmem:[%s473_s19 + $0x20] sm:$0xff]  ;;  %v174_v4 = vld [vmem:[%s473_s19 + $0x30] sm:$0xff] }
  0x11   : > { %v171_v3 = vld [vmem:[%s473_s19] sm:$0xff]  ;;  %v196_v5 = vmul.f32 %v468_v0, %v173_v2  ;;  %v197_v7 = vmul.f32 %v468_v0, %v174_v4  ;;  %v172_v8 = vld [vmem:[%s473_s19 + $0x10] sm:$0xff] }
  0x12   : > { %v194_v6 = vmul.f32 %v468_v0, %v171_v3  ;;  %v176_v9 = vld [vmem:[%s473_s19 + $0x50] sm:$0xff]  ;;  %v175_v10 = vld [vmem:[%s473_s19 + $0x40] sm:$0xff]  ;;  %v195_v11 = vmul.f32 %v468_v0, %v172_v8 }
  0x13   : > { %v199_v12 = vmul.f32 %v468_v0, %v176_v9  ;;  %v492_v13 = vadd.f32 %v478_v1, %v196_v5  ;;  %v498_v15 = vadd.f32 %v478_v1, %v197_v7  ;;  %v198_v16 = vmul.f32 %v468_v0, %v175_v10  ;;  %v178_v17 = vld [vmem:[%s473_s19 + $0x70] sm:$0xff]  ;;  %v177_v19 = vld [vmem:[%s473_s19 + $0x60] sm:$0xff] }
  0x14   : > { %v495_v14 = vadd.f32 %v478_v1, %v194_v6  ;;  %v503_v18 = vadd.f32 %v478_v1, %v195_v11  ;;  %v201_v23 = vmul.f32 %v468_v0, %v178_v17  ;;  %v200_v27 = vmul.f32 %v468_v0, %v177_v19  ;;  %v180_v28 = vld [vmem:[%s473_s19 + $0x90] sm:$0xff]  ;;  %v179_v29 = vld [vmem:[%s473_s19 + $0x80] sm:$0xff] }
  0x15   : > { %v235_v20 = vmax.f32 %v492_v13, 0.0  ;;  %v509_v22 = vadd.f32 %v478_v1, %v199_v12  ;;  %v236_v24 = vmax.f32 %v498_v15, 0.0  ;;  %v521_v26 = vadd.f32 %v478_v1, %v198_v16  ;;  %v182_v36 = vld [vmem:[%s473_s19 + $0xb0] sm:$0xff]  ;;  %v181_v37 = vld [vmem:[%s473_s19 + $0xa0] sm:$0xff] }
  0x16   : > { %v233_v21 = vmax.f32 %v495_v14, 0.0  ;;  %v234_v25 = vmax.f32 %v503_v18, 0.0  ;;  %v528_v31 = vadd.f32 %v478_v1, %v201_v23  ;;  %v538_v33 = vadd.f32 %v478_v1, %v200_v27  ;;  %v184_v44 = vld [vmem:[%s473_s19 + $0xd0] sm:$0xff]  ;;  %v183_v45 = vld [vmem:[%s473_s19 + $0xc0] sm:$0xff] }
  0x17   : > { %269 = vrot.lane.b32.xlu1 %v235_v20, %s433_s22  ;;  %v238_v30 = vmax.f32 %v509_v22, 0.0  ;;  %v237_v32 = vmax.f32 %v521_v26, 0.0  ;;  %v203_v34 = vmul.f32 %v468_v0, %v180_v28  ;;  %v202_v35 = vmul.f32 %v468_v0, %v179_v29  ;;  %v186_v52 = vld [vmem:[%s473_s19 + $0xf0] sm:$0xff]  ;;  %v185_v53 = vld [vmem:[%s473_s19 + $0xe0] sm:$0xff] }
  0x18   : > { %265 = vrot.lane.b32.xlu0 %v233_v21, %s433_s22  ;;  %v240_v38 = vmax.f32 %v528_v31, 0.0  ;;  %v205_v39 = vmul.f32 %v468_v0, %v182_v36  ;;  %v239_v40 = vmax.f32 %v538_v33, 0.0  ;;  %v204_v43 = vmul.f32 %v468_v0, %v181_v37 }
  0x19   : > { %v554_v41 = vadd.f32 %v478_v1, %v203_v34  ;;  %v557_v42 = vadd.f32 %v478_v1, %v202_v35  ;;  %v207_v46 = vmul.f32 %v468_v0, %v184_v44  ;;  %v206_v47 = vmul.f32 %v468_v0, %v183_v45 }
  0x1a   : > { %v228_v50 = vadd.f32 %v478_v1, %v205_v39  ;;  %v227_v51 = vadd.f32 %v478_v1, %v204_v43  ;;  %v209_v55 = vmul.f32 %v468_v0, %v186_v52  ;;  %v208_v59 = vmul.f32 %v468_v0, %v185_v53 }
  0x1b   : > { %271 = vrot.lane.b32.xlu1 %v236_v24, %s433_s22  ;;  %v242_v48 = vmax.f32 %v554_v41, 0.0  ;;  %v241_v49 = vmax.f32 %v557_v42, 0.0  ;;  %v230_v54 = vadd.f32 %v478_v1, %v207_v46  ;;  %v229_v58 = vadd.f32 %v478_v1, %v206_v47 }
  0x1c   : > { %267 = vrot.lane.b32.xlu0 %v234_v25, %s433_s22  ;;  %v244_v56 = vmax.f32 %v228_v50, 0.0  ;;  %v243_v57 = vmax.f32 %v227_v51, 0.0  ;;  %v232_v62 = vadd.f32 %v478_v1, %v209_v55  ;;  %v231_v63 = vadd.f32 %v478_v1, %v208_v59 }
  0x1d   : > { %v246_v60 = vmax.f32 %v230_v54, 0.0  ;;  %v245_v61 = vmax.f32 %v229_v58, 0.0 }
  0x1e   : > { %v248_v2 = vmax.f32 %v232_v62, 0.0  ;;  %v247_v3 = vmax.f32 %v231_v63, 0.0 }
  0x1f   : > { %275 = vrot.lane.b32.xlu1 %v238_v30, %s433_s22 }
  0x20   : > { %273 = vrot.lane.b32.xlu0 %v237_v32, %s433_s22 }
  0x23   : > { %279 = vrot.lane.b32.xlu1 %v240_v38, %s433_s22 }
  0x24   : > { %277 = vrot.lane.b32.xlu0 %v239_v40, %s433_s22 }
  0x27   : > { %283 = vrot.lane.b32.xlu1 %v242_v48, %s433_s22 }
  0x28   : > { %281 = vrot.lane.b32.xlu0 %v241_v49, %s433_s22 }
  0x2b   : > { %287 = vrot.lane.b32.xlu1 %v244_v56, %s433_s22 }
  0x2c   : > { %285 = vrot.lane.b32.xlu0 %v243_v57, %s433_s22 }
  0x2f   : > { %291 = vrot.lane.b32.xlu1 %v246_v60, %s433_s22 }
  0x30   : > { %289 = vrot.lane.b32.xlu0 %v245_v61, %s433_s22 }
  0x33   : > { %295 = vrot.lane.b32.xlu1 %v248_v2, %s433_s22 }
  0x34   : > { %293 = vrot.lane.b32.xlu0 %v247_v3, %s433_s22 }
  0x89   : > { %v270_v0 = vpop.permute.xlu1 %269 }
  0x8a   : > { %v266_v4 = vpop.permute.xlu0 %265  ;;  %v315_v7 = vmax.f32 %v235_v20, %v270_v0 }
  0x8b   : > { %v313_v1 = vmax.f32 %v233_v21, %v266_v4 }
  0x8d   : > { %v272_v5 = vpop.permute.xlu1 %271 }
  0x8e   : > { %v268_v6 = vpop.permute.xlu0 %267  ;;  %v316_v8 = vmax.f32 %v236_v24, %v272_v5 }
  0x8f   : > { %v314_v9 = vmax.f32 %v234_v25, %v268_v6 }
  0x90   : > { %v330_v10 = vmax.f32 %v315_v7, %v316_v8 }
  0x91   : > { %v329_v11 = vmax.f32 %v313_v1, %v314_v9  ;;  %v276_v12 = vpop.permute.xlu1 %275 }
  0x92   : > { %v274_v13 = vpop.permute.xlu0 %273  ;;  %339 = vst.msk [vmem:[%s600_s26 + $0x8] sm:$0xff] %vm337_vm0, %v330_v10  ;;  %v318_v14 = vmax.f32 %v238_v30, %v276_v12 }
  0x93   : > { %338 = vst.msk [vmem:[%s600_s26] sm:$0xff] %vm337_vm0, %v329_v11  ;;  %v317_v15 = vmax.f32 %v237_v32, %v274_v13 }
  0x95   : > { %v331_v16 = vmax.f32 %v317_v15, %v318_v14  ;;  %v280_v17 = vpop.permute.xlu1 %279 }
  0x96   : > { %v278_v18 = vpop.permute.xlu0 %277  ;;  %v320_v19 = vmax.f32 %v240_v38, %v280_v17 }
  0x97   : > { %340 = vst.msk [vmem:[%s600_s26 + $0x10] sm:$0xff] %vm337_vm0, %v331_v16  ;;  %v319_v20 = vmax.f32 %v239_v40, %v278_v18 }
  0x99   : > { %v332_v21 = vmax.f32 %v319_v20, %v320_v19  ;;  %v284_v23 = vpop.permute.xlu1 %283 }
  0x9a   : > { %v282_v24 = vpop.permute.xlu0 %281  ;;  %v322_v22 = vmax.f32 %v242_v48, %v284_v23 }
  0x9b   : > { %341 = vst.msk [vmem:[%s600_s26 + $0x18] sm:$0xff] %vm337_vm0, %v332_v21  ;;  %v321_v25 = vmax.f32 %v241_v49, %v282_v24 }
  0x9d   : > { %v333_v26 = vmax.f32 %v321_v25, %v322_v22  ;;  %v288_v27 = vpop.permute.xlu1 %287 }
  0x9e   : > { %v286_v28 = vpop.permute.xlu0 %285  ;;  %v324_v29 = vmax.f32 %v244_v56, %v288_v27 }
  0x9f   : > { %342 = vst.msk [vmem:[%s600_s26 + $0x20] sm:$0xff] %vm337_vm0, %v333_v26  ;;  %v323_v30 = vmax.f32 %v243_v57, %v286_v28 }
  0xa1   : > { %v334_v31 = vmax.f32 %v323_v30, %v324_v29  ;;  %v292_v32 = vpop.permute.xlu1 %291 }
  0xa2   : > { %v290_v33 = vpop.permute.xlu0 %289  ;;  %v326_v34 = vmax.f32 %v246_v60, %v292_v32 }
  0xa3   : > { %343 = vst.msk [vmem:[%s600_s26 + $0x28] sm:$0xff] %vm337_vm0, %v334_v31  ;;  %v325_v35 = vmax.f32 %v245_v61, %v290_v33 }
  0xa5   : > { %v335_v36 = vmax.f32 %v325_v35, %v326_v34  ;;  %v296_v37 = vpop.permute.xlu1 %295 }
  0xa6   : > { %v294_v38 = vpop.permute.xlu0 %293  ;;  %v328_v39 = vmax.f32 %v248_v2, %v296_v37 }
  0xa7   : > { %344 = vst.msk [vmem:[%s600_s26 + $0x30] sm:$0xff] %vm337_vm0, %v335_v36  ;;  %v327_v40 = vmax.f32 %v247_v3, %v294_v38 }
  0xa9   : > { %v336_v41 = vmax.f32 %v327_v40, %v328_v39 }
  0xab   : > { %345 = vst.msk [vmem:[%s600_s26 + $0x38] sm:$0xff] %vm337_vm0, %v336_v41 }
  0xac PF: > { %s13_s12 = sadd.s32 1, %s431_s12  }
  0xad   : > { %p10_p4 = scmp.ge.s32.totalorder %s13_s12, 4  }
  0xaf   :  { %12 = sbr.rel (!%p10_p4) target bundleno = 1 (0x1), region = 62 }

// kernel: vgg16bn_forward.8
= control target key start
LH: loop header
LB: loop body
LE: loop exit
PB: predicated region body
PF: predicated region fallthrough
CT: control target
= control target key end

     0   :  { %s3596_s18 = smov 0   ;;  %s6375_s0 = inlined_call_operand.vmem [shape: f32[2,326,1], index: 0, kind: input, shape index: {}]   ;;  %s6376_s1 = inlined_call_operand.vmem [shape: f32[9,1,64], index: 1, kind: input, shape index: {}]   ;;  %s6377_s2 = inlined_call_operand.vmem [shape: f32[288,1], index: 2, kind: input, shape index: {}]   ;;  %s6378_s3 = inlined_call_operand.vmem [shape: f32[2,288,64], index: 3, kind: output, shape index: {0}]   ;;  %s6379_s4 = inlined_call_operand.vmem [shape: f32[2,8,64], index: 4, kind: output, shape index: {1}]   ;;  %s6380_s5 = inlined_call_operand.vmem [shape: f32[2,8,64], index: 5, kind: output, shape index: {2}]  }
   0x1 LB: > { %s3507_s19 = sadd.s32 4294967295, %s3563_s18   ;;  %p3511_p0 = scmp.ge.s32.totalorder %s3563_s18, 1  ;;  %s3563_s18 = sphi %s3596_s18, %s16_s18  }
   0x2   : > { %p192_p1 = scmp.lt.s32.totalorder %s3563_s18, 3 }
   0x4   : > { %p193_p2 = pnand %p3511_p0, %p192_p1 }
   0x6   : > { %196 = sbr.rel (%p193_p2) target bundleno = 887 (0x377), region = 32 }
   0xd   : > { %p228_p3 = scmp.lt.s32.totalorder %s3507_s19, 1  ;;  %v3565_v0 = vmov 0   ;;  %vm3161_vm0 = vcmask 523264  }
   0xe   : > { %3547 = vset.pattern.permute.xlu1 %v3565_v0  ;;  %3546 = vset.pattern.permute.xlu0 %v3565_v0 }
   0xf   : > { %s6910_s19 = smov (!%p228_p3, %s3507_s19), 1 }
  0x10   : > { %s3535_s20 = smul.u32 328, %s6910_s19  ;;  %s3514_s24 = sshll.u32 %s6910_s19, 3 }
  0x11   : > { %s3536_s25 = smul.u32 288, %s6910_s19  ;;  %s241_s27 = scalar_lea.vmem %s6379_s4, %s3514_s24 }
  0x12   : > { %s3610_s23 = scalar_lea.vmem %s6375_s0, %s3535_s20  ;;  %s245_s30 = scalar_lea.vmem %s6380_s5, %s3514_s24 }
  0x13   : > { %v248_v1 = vld [vmem:[%s3610_s23 + $0x10] sm:$0xff]  ;;  %v246_v2 = vld [vmem:[%s3610_s23] sm:$0xff]  ;;  %v249_v3 = vld [vmem:[%s3610_s23 + $0x18] sm:$0xff]  ;;  %s6127_s28 = scalar_lea.vmem %s6378_s3, %s3536_s25 }
  0x14   : > { %295 = vperm.xlu1 %3547, %v248_v1   ;;  %285 = vperm.xlu0 %3546, %v246_v2   ;;  %v247_v4 = vld [vmem:[%s3610_s23 + $0x8] sm:$0xff]  ;;  %v250_v6 = vld [vmem:[%s3610_s23 + $0x20] sm:$0xff]  ;;  %v253_v7 = vld [vmem:[%s3610_s23 + $0x38] sm:$0xff] }
  0x15   : > { %v251_v5 = vld [vmem:[%s3610_s23 + $0x28] sm:$0xff]  ;;  %v252_v8 = vld [vmem:[%s3610_s23 + $0x30] sm:$0xff]  ;;  %v254_v10 = vld [vmem:[%s3610_s23 + $0x40] sm:$0xff] }
  0x16   : > { %v255_v9 = vld [vmem:[%s3610_s23 + $0x48] sm:$0xff]  ;;  %v257_v11 = vld [vmem:[%s3610_s23 + $0x58] sm:$0xff]  ;;  %v256_v12 = vld [vmem:[%s3610_s23 + $0x50] sm:$0xff] }
  0x17   : > { %v259_v13 = vld [vmem:[%s3610_s23 + $0x68] sm:$0xff]  ;;  %v258_v14 = vld [vmem:[%s3610_s23 + $0x60] sm:$0xff]  ;;  %v261_v15 = vld [vmem:[%s3610_s23 + $0x78] sm:$0xff] }
  0x18   : > { %300 = vperm.xlu1 %3547, %v249_v3   ;;  %290 = vperm.xlu0 %3546, %v247_v4   ;;  %v260_v16 = vld [vmem:[%s3610_s23 + $0x70] sm:$0xff]  ;;  %v263_v17 = vld [vmem:[%s3610_s23 + $0x88] sm:$0xff]  ;;  %v262_v18 = vld [vmem:[%s3610_s23 + $0x80] sm:$0xff] }
  0x19   : > { %v265_v19 = vld [vmem:[%s3610_s23 + $0x98] sm:$0xff]  ;;  %v264_v20 = vld [vmem:[%s3610_s23 + $0x90] sm:$0xff]  ;;  %v267_v21 = vld [vmem:[%s3610_s23 + $0xa8] sm:$0xff] }
  0x1a   : > { %v266_v22 = vld [vmem:[%s3610_s23 + $0xa0] sm:$0xff]  ;;  %v269_v23 = vld [vmem:[%s3610_s23 + $0xb8] sm:$0xff]  ;;  %v268_v24 = vld [vmem:[%s3610_s23 + $0xb0] sm:$0xff] }
  0x1b   : > { %v271_v25 = vld [vmem:[%s3610_s23 + $0xc8] sm:$0xff]  ;;  %v270_v26 = vld [vmem:[%s3610_s23 + $0xc0] sm:$0xff]  ;;  %v273_v27 = vld [vmem:[%s3610_s23 + $0xd8] sm:$0xff] }
  0x1c   : > { %310 = vperm.xlu1 %3547, %v251_v5   ;;  %305 = vperm.xlu0 %3546, %v250_v6   ;;  %v272_v28 = vld [vmem:[%s3610_s23 + $0xd0] sm:$0xff]  ;;  %v275_v29 = vld [vmem:[%s3610_s23 + $0xe8] sm:$0xff]  ;;  %v274_v30 = vld [vmem:[%s3610_s23 + $0xe0] sm:$0xff] }
  0x1d   : > { %v277_v31 = vld [vmem:[%s3610_s23 + $0xf8] sm:$0xff]  ;;  %v276_v32 = vld [vmem:[%s3610_s23 + $0xf0] sm:$0xff]  ;;  %v279_v33 = vld [vmem:[%s3610_s23 + $0x108] sm:$0xff] }
  0x1e   : > { %v278_v34 = vld [vmem:[%s3610_s23 + $0x100] sm:$0xff]  ;;  %v281_v35 = vld [vmem:[%s3610_s23 + $0x118] sm:$0xff]  ;;  %v280_v36 = vld [vmem:[%s3610_s23 + $0x110] sm:$0xff] }
  0x1f   : > { %v542_v37 = vld [vmem:[%s3610_s23 + $0x9] sm:$0xff]  ;;  %v541_v38 = vld [vmem:[%s3610_s23 + $0x1] sm:$0xff]  ;;  %v544_v39 = vld [vmem:[%s3610_s23 + $0x19] sm:$0xff] }
  0x20   : > { %320 = vperm.xlu1 %3547, %v253_v7   ;;  %315 = vperm.xlu0 %3546, %v252_v8   ;;  %v543_v40 = vld [vmem:[%s3610_s23 + $0x11] sm:$0xff]  ;;  %v546_v41 = vld [vmem:[%s3610_s23 + $0x29] sm:$0xff]  ;;  %v545_v42 = vld [vmem:[%s3610_s23 + $0x21] sm:$0xff] }
  0x21   : > { %v548_v43 = vld [vmem:[%s3610_s23 + $0x39] sm:$0xff]  ;;  %v547_v44 = vld [vmem:[%s3610_s23 + $0x31] sm:$0xff]  ;;  %v550_v45 = vld [vmem:[%s3610_s23 + $0x49] sm:$0xff] }
  0x22   : > { %v549_v46 = vld [vmem:[%s3610_s23 + $0x41] sm:$0xff]  ;;  %v552_v47 = vld [vmem:[%s3610_s23 + $0x59] sm:$0xff]  ;;  %v551_v48 = vld [vmem:[%s3610_s23 + $0x51] sm:$0xff] }
  0x23   : > { %v554_v49 = vld [vmem:[%s3610_s23 + $0x69] sm:$0xff]  ;;  %v553_v50 = vld [vmem:[%s3610_s23 + $0x61] sm:$0xff]  ;;  %v556_v51 = vld [vmem:[%s3610_s23 + $0x79] sm:$0xff] }
  0x24   : > { %330 = vperm.xlu1 %3547, %v255_v9   ;;  %325 = vperm.xlu0 %3546, %v254_v10   ;;  %v555_v52 = vld [vmem:[%s3610_s23 + $0x71] sm:$0xff]  ;;  %v558_v53 = vld [vmem:[%s3610_s23 + $0x89] sm:$0xff]  ;;  %v557_v54 = vld [vmem:[%s3610_s23 + $0x81] sm:$0xff] }
  0x25   : > { %v560_v55 = vld [vmem:[%s3610_s23 + $0x99] sm:$0xff]  ;;  %v559_v56 = vld [vmem:[%s3610_s23 + $0x91] sm:$0xff]  ;;  %v562_v57 = vld [vmem:[%s3610_s23 + $0xa9] sm:$0xff] }
  0x26   : > { %v561_v58 = vld [vmem:[%s3610_s23 + $0xa1] sm:$0xff]  ;;  %v564_v59 = vld [vmem:[%s3610_s23 + $0xb9] sm:$0xff]  ;;  %v563_v60 = vld [vmem:[%s3610_s23 + $0xb1] sm:$0xff] }
  0x27   : > { %v566_v61 = vld [vmem:[%s3610_s23 + $0xc9] sm:$0xff]  ;;  %v565_v62 = vld [vmem:[%s3610_s23 + $0xc1] sm:$0xff]  ;;  %v568_v63 = vld [vmem:[%s3610_s23 + $0xd9] sm:$0xff] }
  0x28   : > { %340 = vperm.xlu1 %3547, %v257_v11   ;;  %335 = vperm.xlu0 %3546, %v256_v12   ;;  %v567_v0 = vld [vmem:[%s3610_s23 + $0xd1] sm:$0xff]  ;;  %v570_v1 = vld [vmem:[%s3610_s23 + $0xe9] sm:$0xff]  ;;  %v569_v2 = vld [vmem:[%s3610_s23 + $0xe1] sm:$0xff] }
  0x29   : > { %v572_v5 = vld [vmem:[%s3610_s23 + $0xf9] sm:$0xff]  ;;  %v571_v6 = vld [vmem:[%s3610_s23 + $0xf1] sm:$0xff]  ;;  %v574_v9 = vld [vmem:[%s3610_s23 + $0x109] sm:$0xff] }
  0x2a   : > { %v573_v10 = vld [vmem:[%s3610_s23 + $0x101] sm:$0xff] }
  0x2c   : > { %350 = vperm.xlu1 %3547, %v259_v13   ;;  %345 = vperm.xlu0 %3546, %v258_v14   ;;  %v576_v13 = vld [vmem:[%s3610_s23 + $0x119] sm:$0xff]  ;;  %v575_v14 = vld [vmem:[%s3610_s23 + $0x111] sm:$0xff] }
  0x30   : > { %360 = vperm.xlu1 %3547, %v261_v15   ;;  %355 = vperm.xlu0 %3546, %v260_v16  }
  0x34   : > { %370 = vperm.xlu1 %3547, %v263_v17   ;;  %365 = vperm.xlu0 %3546, %v262_v18   ;;  %v838_v17 = vld [vmem:[%s3610_s23 + $0xa] sm:$0xff]  ;;  %v837_v18 = vld [vmem:[%s3610_s23 + $0x2] sm:$0xff] }
  0x38   : > { %380 = vperm.xlu1 %3547, %v265_v19   ;;  %375 = vperm.xlu0 %3546, %v264_v20  }
  0x3c   : > { %390 = vperm.xlu1 %3547, %v267_v21   ;;  %385 = vperm.xlu0 %3546, %v266_v22   ;;  %v3707_v21 = vld [vmem:[%s3610_s23 + $0x1a] sm:$0xff]  ;;  %v3710_v22 = vld [vmem:[%s3610_s23 + $0x12] sm:$0xff] }
  0x40   : > { %400 = vperm.xlu1 %3547, %v269_v23   ;;  %395 = vperm.xlu0 %3546, %v268_v24  }
  0x44   : > { %410 = vperm.xlu1 %3547, %v271_v25   ;;  %405 = vperm.xlu0 %3546, %v270_v26   ;;  %v3719_v25 = vld [vmem:[%s3610_s23 + $0x2a] sm:$0xff]  ;;  %v3722_v26 = vld [vmem:[%s3610_s23 + $0x22] sm:$0xff] }
  0x48   : > { %420 = vperm.xlu1 %3547, %v273_v27   ;;  %415 = vperm.xlu0 %3546, %v272_v28  }
  0x4c   : > { %430 = vperm.xlu1 %3547, %v275_v29   ;;  %425 = vperm.xlu0 %3546, %v274_v30   ;;  %v3731_v29 = vld [vmem:[%s3610_s23 + $0x3a] sm:$0xff]  ;;  %v3734_v30 = vld [vmem:[%s3610_s23 + $0x32] sm:$0xff] }
  0x50   : > { %440 = vperm.xlu1 %3547, %v277_v31   ;;  %435 = vperm.xlu0 %3546, %v276_v32  }
  0x54   : > { %450 = vperm.xlu1 %3547, %v279_v33   ;;  %445 = vperm.xlu0 %3546, %v278_v34   ;;  %v3743_v33 = vld [vmem:[%s3610_s23 + $0x4a] sm:$0xff]  ;;  %v3746_v34 = vld [vmem:[%s3610_s23 + $0x42] sm:$0xff] }
  0x58   : > { %460 = vperm.xlu1 %3547, %v281_v35   ;;  %455 = vperm.xlu0 %3546, %v280_v36  }
  0x5c   : > { %586 = vperm.xlu1 %3547, %v542_v37   ;;  %581 = vperm.xlu0 %3546, %v541_v38   ;;  %v3755_v37 = vld [vmem:[%s3610_s23 + $0x5a] sm:$0xff]  ;;  %v3758_v38 = vld [vmem:[%s3610_s23 + $0x52] sm:$0xff] }
  0x60   : > { %596 = vperm.xlu1 %3547, %v544_v39   ;;  %591 = vperm.xlu0 %3546, %v543_v40  }
  0x64   : > { %606 = vperm.xlu1 %3547, %v546_v41   ;;  %601 = vperm.xlu0 %3546, %v545_v42   ;;  %v3767_v41 = vld [vmem:[%s3610_s23 + $0x6a] sm:$0xff]  ;;  %v3770_v42 = vld [vmem:[%s3610_s23 + $0x62] sm:$0xff] }
  0x68   : > { %616 = vperm.xlu1 %3547, %v548_v43   ;;  %611 = vperm.xlu0 %3546, %v547_v44  }
  0x6c   : > { %626 = vperm.xlu1 %3547, %v550_v45   ;;  %621 = vperm.xlu0 %3546, %v549_v46   ;;  %v3779_v45 = vld [vmem:[%s3610_s23 + $0x7a] sm:$0xff]  ;;  %v3782_v46 = vld [vmem:[%s3610_s23 + $0x72] sm:$0xff] }
  0x70   : > { %636 = vperm.xlu1 %3547, %v552_v47   ;;  %631 = vperm.xlu0 %3546, %v551_v48  }
  0x74   : > { %646 = vperm.xlu1 %3547, %v554_v49   ;;  %641 = vperm.xlu0 %3546, %v553_v50   ;;  %v3791_v49 = vld [vmem:[%s3610_s23 + $0x8a] sm:$0xff]  ;;  %v3794_v50 = vld [vmem:[%s3610_s23 + $0x82] sm:$0xff] }
  0x78   : > { %656 = vperm.xlu1 %3547, %v556_v51   ;;  %651 = vperm.xlu0 %3546, %v555_v52  }
  0x7c   : > { %666 = vperm.xlu1 %3547, %v558_v53   ;;  %661 = vperm.xlu0 %3546, %v557_v54   ;;  %v3803_v53 = vld [vmem:[%s3610_s23 + $0x9a] sm:$0xff]  ;;  %v3806_v54 = vld [vmem:[%s3610_s23 + $0x92] sm:$0xff] }
  0x80   : > { %676 = vperm.xlu1 %3547, %v560_v55   ;;  %671 = vperm.xlu0 %3546, %v559_v56  }
  0x84   : > { %686 = vperm.xlu1 %3547, %v562_v57   ;;  %681 = vperm.xlu0 %3546, %v561_v58   ;;  %v3815_v57 = vld [vmem:[%s3610_s23 + $0xaa] sm:$0xff]  ;;  %v3818_v58 = vld [vmem:[%s3610_s23 + $0xa2] sm:$0xff] }
  0x88   : > { %696 = vperm.xlu1 %3547, %v564_v59   ;;  %691 = vperm.xlu0 %3546, %v563_v60  }
  0x8c   : > { %706 = vperm.xlu1 %3547, %v566_v61   ;;  %701 = vperm.xlu0 %3546, %v565_v62   ;;  %v3827_v61 = vld [vmem:[%s3610_s23 + $0xba] sm:$0xff]  ;;  %v3830_v62 = vld [vmem:[%s3610_s23 + $0xb2] sm:$0xff] }
  0x90   : > { %716 = vperm.xlu1 %3547, %v568_v63   ;;  %711 = vperm.xlu0 %3546, %v567_v0  }
  0x93   : > { %v3678_v3 = vpop.permute.xlu1 %295  ;;  %v3680_v4 = vpop.permute.xlu0 %285 }
  0x94   : > { %726 = vperm.xlu1 %3547, %v570_v1   ;;  %721 = vperm.xlu0 %3546, %v569_v2   ;;  %v3839_v1 = vld [vmem:[%s3610_s23 + $0xca] sm:$0xff]  ;;  %v3842_v2 = vld [vmem:[%s3610_s23 + $0xc2] sm:$0xff] }
  0x97   : > { %v3684_v7 = vpop.permute.xlu1 %300  ;;  %v3686_v8 = vpop.permute.xlu0 %290 }
  0x98   : > { %736 = vperm.xlu1 %3547, %v572_v5   ;;  %731 = vperm.xlu0 %3546, %v571_v6  }
  0x9b   : > { %v3690_v11 = vpop.permute.xlu1 %310  ;;  %v3692_v12 = vpop.permute.xlu0 %305 }
  0x9c   : > { %746 = vperm.xlu1 %3547, %v574_v9   ;;  %741 = vperm.xlu0 %3546, %v573_v10   ;;  %v3851_v9 = vld [vmem:[%s3610_s23 + $0xda] sm:$0xff]  ;;  %v3854_v10 = vld [vmem:[%s3610_s23 + $0xd2] sm:$0xff] }
  0x9f   : > { %v3696_v15 = vpop.permute.xlu1 %320  ;;  %v3698_v16 = vpop.permute.xlu0 %315 }
  0xa0   : > { %756 = vperm.xlu1 %3547, %v576_v13   ;;  %751 = vperm.xlu0 %3546, %v575_v14  }
  0xa3   : > { %v3702_v19 = vpop.permute.xlu1 %330  ;;  %v3704_v20 = vpop.permute.xlu0 %325 }
  0xa4   : > { %882 = vperm.xlu1 %3547, %v838_v17   ;;  %877 = vperm.xlu0 %3546, %v837_v18   ;;  %v3863_v17 = vld [vmem:[%s3610_s23 + $0xea] sm:$0xff]  ;;  %v3866_v18 = vld [vmem:[%s3610_s23 + $0xe2] sm:$0xff] }
  0xa7   : > { %v3712_v23 = vpop.permute.xlu1 %340  ;;  %v3714_v24 = vpop.permute.xlu0 %335 }
  0xa8   : > { %892 = vperm.xlu1 %3547, %v3707_v21   ;;  %887 = vperm.xlu0 %3546, %v3710_v22  }
  0xab   : > { %v3724_v27 = vpop.permute.xlu1 %350  ;;  %v3726_v28 = vpop.permute.xlu0 %345 }
  0xac   : > { %902 = vperm.xlu1 %3547, %v3719_v25   ;;  %897 = vperm.xlu0 %3546, %v3722_v26  }
  0xaf   : > { %v3736_v31 = vpop.permute.xlu1 %360  ;;  %v3738_v32 = vpop.permute.xlu0 %355 }
  0xb0   : > { %912 = vperm.xlu1 %3547, %v3731_v29   ;;  %907 = vperm.xlu0 %3546, %v3734_v30  }
  0xb3   : > { %v3748_v35 = vpop.permute.xlu1 %370  ;;  %v3750_v36 = vpop.permute.xlu0 %365 }
  0xb4   : > { %922 = vperm.xlu1 %3547, %v3743_v33   ;;  %917 = vperm.xlu0 %3546, %v3746_v34  }
  0xb7   : > { %v3760_v39 = vpop.permute.xlu1 %380  ;;  %v3762_v40 = vpop.permute.xlu0 %375 }
  0xb8   : > { %932 = vperm.xlu1 %3547, %v3755_v37   ;;  %927 = vperm.xlu0 %3546, %v3758_v38  }
  0xbb   : > { %v3772_v43 = vpop.permute.xlu1 %390  ;;  %v3774_v44 = vpop.permute.xlu0 %385 }
  0xbc   : > { %942 = vperm.xlu1 %3547, %v3767_v41   ;;  %937 = vperm.xlu0 %3546, %v3770_v42  }
  0xbf   : > { %v3784_v47 = vpop.permute.xlu1 %400  ;;  %v3786_v48 = vpop.permute.xlu0 %395 }
  0xc0   : > { %952 = vperm.xlu1 %3547, %v3779_v45   ;;  %947 = vperm.xlu0 %3546, %v3782_v46  }
  0xc3   : > { %v3796_v51 = vpop.permute.xlu1 %410  ;;  %v3798_v52 = vpop.permute.xlu0 %405 }
  0xc4   : > { %6381 = vst [vmem:[#allocation2_spill] sm:$0xff] %v3796_v51  ;;  %6382 = vst [vmem:[#allocation3_spill] sm:$0xff] %v3798_v52  ;;  %962 = vperm.xlu1 %3547, %v3791_v49   ;;  %957 = vperm.xlu0 %3546, %v3794_v50  }
  0xc7   : > { %v3808_v55 = vpop.permute.xlu1 %420  ;;  %v3810_v56 = vpop.permute.xlu0 %415 }
  0xc8   : > { %6383 = vst [vmem:[#allocation4_spill] sm:$0xff] %v3808_v55  ;;  %6384 = vst [vmem:[#allocation5_spill] sm:$0xff] %v3810_v56  ;;  %972 = vperm.xlu1 %3547, %v3803_v53   ;;  %967 = vperm.xlu0 %3546, %v3806_v54   ;;  %v3899_v56 = vld [vmem:[%s3610_s23 + $0x11a] sm:$0xff] }
  0xcb   : > { %v3820_v59 = vpop.permute.xlu1 %430  ;;  %v3822_v60 = vpop.permute.xlu0 %425 }
  0xcc   : > { %6385 = vst [vmem:[#allocation6_spill] sm:$0xff] %v3820_v59  ;;  %6386 = vst [vmem:[#allocation7_spill] sm:$0xff] %v3822_v60  ;;  %982 = vperm.xlu1 %3547, %v3815_v57   ;;  %977 = vperm.xlu0 %3546, %v3818_v58   ;;  %v3887_v60 = vld [vmem:[%s3610_s23 + $0x10a] sm:$0xff] }
  0xcf   : > { %v3832_v63 = vpop.permute.xlu1 %440  ;;  %v3834_v0 = vpop.permute.xlu0 %435 }
  0xd0   : > { %6387 = vst [vmem:[#allocation8_spill] sm:$0xff] %v3832_v63  ;;  %6388 = vst [vmem:[#allocation9_spill] sm:$0xff] %v3834_v0  ;;  %992 = vperm.xlu1 %3547, %v3827_v61   ;;  %987 = vperm.xlu0 %3546, %v3830_v62  }
  0xd3   : > { %v3844_v5 = vpop.permute.xlu1 %450  ;;  %v3846_v6 = vpop.permute.xlu0 %445 }
  0xd4   : > { %6389 = vst [vmem:[#allocation10_spill] sm:$0xff] %v3844_v5  ;;  %6390 = vst [vmem:[#allocation11_spill] sm:$0xff] %v3846_v6  ;;  %1002 = vperm.xlu1 %3547, %v3839_v1   ;;  %997 = vperm.xlu0 %3546, %v3842_v2  }
  0xd7   : > { %v3856_v13 = vpop.permute.xlu1 %460  ;;  %v3858_v14 = vpop.permute.xlu0 %455 }
  0xd8   : > { %6391 = vst [vmem:[#allocation12_spill] sm:$0xff] %v3856_v13  ;;  %6392 = vst [vmem:[#allocation13_spill] sm:$0xff] %v3858_v14  ;;  %1012 = vperm.xlu1 %3547, %v3851_v9   ;;  %1007 = vperm.xlu0 %3546, %v3854_v10   ;;  %v3875_v14 = vld [vmem:[%s3610_s23 + $0xfa] sm:$0xff]  ;;  %v3878_v13 = vld [vmem:[%s3610_s23 + $0xf2] sm:$0xff] }
  0xdb   : > { %v3868_v6 = vpop.permute.xlu1 %586  ;;  %v3870_v5 = vpop.permute.xlu0 %581 }
  0xdc   : > { %6393 = vst [vmem:[#allocation14_spill] sm:$0xff] %v3868_v6  ;;  %6394 = vst [vmem:[#allocation15_spill] sm:$0xff] %v3870_v5  ;;  %1022 = vperm.xlu1 %3547, %v3863_v17   ;;  %1017 = vperm.xlu0 %3546, %v3866_v18   ;;  %v3890_v5 = vld [vmem:[%s3610_s23 + $0x102] sm:$0xff] }
  0xdf   : > { %v3880_v0 = vpop.permute.xlu1 %596  ;;  %v3882_v63 = vpop.permute.xlu0 %591 }
  0xe0   : > { %6395 = vst [vmem:[#allocation16_spill] sm:$0xff] %v3880_v0  ;;  %6396 = vst [vmem:[#allocation17_spill] sm:$0xff] %v3882_v63  ;;  %1032 = vperm.xlu1 %3547, %v3875_v14   ;;  %1027 = vperm.xlu0 %3546, %v3878_v13   ;;  %v3902_v0 = vld [vmem:[%s3610_s23 + $0x112] sm:$0xff] }
  0xe3   : > { %v3892_v6 = vpop.permute.xlu1 %606  ;;  %v3894_v59 = vpop.permute.xlu0 %601 }
  0xe4   : > { %6397 = vst [vmem:[#allocation18_spill] sm:$0xff] %v3892_v6  ;;  %6398 = vst [vmem:[#allocation19_spill] sm:$0xff] %v3894_v59  ;;  %1042 = vperm.xlu1 %3547, %v3887_v60   ;;  %1037 = vperm.xlu0 %3546, %v3890_v5  }
  0xe7   : > { %v3904_v63 = vpop.permute.xlu1 %616  ;;  %v3906_v55 = vpop.permute.xlu0 %611 }
  0xe8   : > { %6399 = vst [vmem:[#allocation20_spill] sm:$0xff] %v3904_v63  ;;  %6400 = vst [vmem:[#allocation21_spill] sm:$0xff] %v3906_v55  ;;  %1052 = vperm.xlu1 %3547, %v3899_v56   ;;  %1047 = vperm.xlu0 %3546, %v3902_v0  }
  0xeb   : > { %v3910_v52 = vpop.permute.xlu1 %626  ;;  %v3912_v6 = vpop.permute.xlu0 %621 }
  0xec   : > { %6401 = vst [vmem:[#allocation22_spill] sm:$0xff] %v3910_v52  ;;  %6402 = vst [vmem:[#allocation23_spill] sm:$0xff] %v3912_v6  ;;  %1178 = vperm.xlu1 %3547, %v3707_v21   ;;  %1173 = vperm.xlu0 %3546, %v3710_v22  }
  0xef   : > { %v3916_v59 = vpop.permute.xlu1 %636  ;;  %v3918_v51 = vpop.permute.xlu0 %631 }
  0xf0   : > { %6403 = vst [vmem:[#allocation24_spill] sm:$0xff] %v3916_v59  ;;  %6404 = vst [vmem:[#allocation25_spill] sm:$0xff] %v3918_v51  ;;  %1188 = vperm.xlu1 %3547, %v3719_v25   ;;  %1183 = vperm.xlu0 %3546, %v3722_v26  }
  0xf3   : > { %v3922_v55 = vpop.permute.xlu1 %646  ;;  %v3924_v63 = vpop.permute.xlu0 %641 }
  0xf4   : > { %6405 = vst [vmem:[#allocation26_spill] sm:$0xff] %v3922_v55  ;;  %6406 = vst [vmem:[#allocation27_spill] sm:$0xff] %v3924_v63  ;;  %1198 = vperm.xlu1 %3547, %v3731_v29   ;;  %1193 = vperm.xlu0 %3546, %v3734_v30   ;;  %v4325_v55 = vld [vmem:[%s3610_s23 + $0x12c] sm:$0xff] }
  0xf7   : > { %v3928_v6 = vpop.permute.xlu1 %656  ;;  %v3930_v21 = vpop.permute.xlu0 %651 }
  0xf8   : > { %6407 = vst [vmem:[#allocation28_spill] sm:$0xff] %v3928_v6  ;;  %6408 = vst [vmem:[#allocation29_spill] sm:$0xff] %v3930_v21  ;;  %1208 = vperm.xlu1 %3547, %v3743_v33   ;;  %1203 = vperm.xlu0 %3546, %v3746_v34  }
  0xfb   : > { %v3934_v22 = vpop.permute.xlu1 %666  ;;  %v3936_v25 = vpop.permute.xlu0 %661 }
  0xfc   : > { %6409 = vst [vmem:[#allocation30_spill] sm:$0xff] %v3934_v22  ;;  %6410 = vst [vmem:[#allocation31_spill] sm:$0xff] %v3936_v25  ;;  %1218 = vperm.xlu1 %3547, %v3755_v37   ;;  %1213 = vperm.xlu0 %3546, %v3758_v38  }
  0xff   : > { %v3940_v26 = vpop.permute.xlu1 %676  ;;  %v3942_v29 = vpop.permute.xlu0 %671 }
 0x100   : > { %6411 = vst [vmem:[#allocation32_spill] sm:$0xff] %v3940_v26  ;;  %6412 = vst [vmem:[#allocation33_spill] sm:$0xff] %v3942_v29  ;;  %1228 = vperm.xlu1 %3547, %v3767_v41   ;;  %1223 = vperm.xlu0 %3546, %v3770_v42  }
 0x103   : > { %v3946_v30 = vpop.permute.xlu1 %686  ;;  %v3948_v33 = vpop.permute.xlu0 %681 }
 0x104   : > { %6413 = vst [vmem:[#allocation34_spill] sm:$0xff] %v3946_v30  ;;  %6414 = vst [vmem:[#allocation35_spill] sm:$0xff] %v3948_v33  ;;  %1238 = vperm.xlu1 %3547, %v3779_v45   ;;  %1233 = vperm.xlu0 %3546, %v3782_v46  }
 0x107   : > { %v3952_v34 = vpop.permute.xlu1 %696  ;;  %v3954_v37 = vpop.permute.xlu0 %691 }
 0x108   : > { %6415 = vst [vmem:[#allocation36_spill] sm:$0xff] %v3952_v34  ;;  %6416 = vst [vmem:[#allocation37_spill] sm:$0xff] %v3954_v37  ;;  %1248 = vperm.xlu1 %3547, %v3791_v49   ;;  %1243 = vperm.xlu0 %3546, %v3794_v50  }
 0x10b   : > { %v3958_v38 = vpop.permute.xlu1 %706  ;;  %v3960_v41 = vpop.permute.xlu0 %701 }
 0x10c   : > { %6417 = vst [vmem:[#allocation38_spill] sm:$0xff] %v3958_v38  ;;  %6418 = vst [vmem:[#allocation39_spill] sm:$0xff] %v3960_v41  ;;  %1258 = vperm.xlu1 %3547, %v3803_v53   ;;  %1253 = vperm.xlu0 %3546, %v3806_v54  }
 0x10f   : > { %v3964_v42 = vpop.permute.xlu1 %716  ;;  %v3966_v45 = vpop.permute.xlu0 %711 }
 0x110   : > { %6419 = vst [vmem:[#allocation40_spill] sm:$0xff] %v3964_v42  ;;  %6420 = vst [vmem:[#allocation41_spill] sm:$0xff] %v3966_v45  ;;  %1268 = vperm.xlu1 %3547, %v3815_v57   ;;  %1263 = vperm.xlu0 %3546, %v3818_v58  }
 0x113   : > { %v3970_v46 = vpop.permute.xlu1 %726  ;;  %v3972_v49 = vpop.permute.xlu0 %721 }
 0x114   : > { %6421 = vst [vmem:[#allocation42_spill] sm:$0xff] %v3970_v46  ;;  %6422 = vst [vmem:[#allocation43_spill] sm:$0xff] %v3972_v49  ;;  %1278 = vperm.xlu1 %3547, %v3827_v61   ;;  %1273 = vperm.xlu0 %3546, %v3830_v62  }
 0x117   : > { %v3976_v50 = vpop.permute.xlu1 %736  ;;  %v3978_v53 = vpop.permute.xlu0 %731 }
 0x118   : > { %6423 = vst [vmem:[#allocation44_spill] sm:$0xff] %v3976_v50  ;;  %6424 = vst [vmem:[#allocation45_spill] sm:$0xff] %v3978_v53  ;;  %1288 = vperm.xlu1 %3547, %v3839_v1   ;;  %1283 = vperm.xlu0 %3546, %v3842_v2  }
 0x11b   : > { %v3982_v54 = vpop.permute.xlu1 %746  ;;  %v3984_v57 = vpop.permute.xlu0 %741 }
 0x11c   : > { %6425 = vst [vmem:[#allocation46_spill] sm:$0xff] %v3982_v54  ;;  %6426 = vst [vmem:[#allocation47_spill] sm:$0xff] %v3984_v57  ;;  %1298 = vperm.xlu1 %3547, %v3851_v9   ;;  %1293 = vperm.xlu0 %3546, %v3854_v10  }
 0x11f   : > { %v3988_v58 = vpop.permute.xlu1 %756  ;;  %v3990_v61 = vpop.permute.xlu0 %751 }
 0x120   : > { %6427 = vst [vmem:[#allocation48_spill] sm:$0xff] %v3988_v58  ;;  %6428 = vst [vmem:[#allocation49_spill] sm:$0xff] %v3990_v61  ;;  %1308 = vperm.xlu1 %3547, %v3863_v17   ;;  %1303 = vperm.xlu0 %3546, %v3866_v18  }
 0x123   : > { %v3994_v62 = vpop.permute.xlu1 %882  ;;  %v3996_v1 = vpop.permute.xlu0 %877 }
 0x124   : > { %6429 = vst [vmem:[#allocation50_spill] sm:$0xff] %v3994_v62  ;;  %6430 = vst [vmem:[#allocation51_spill] sm:$0xff] %v3996_v1  ;;  %1318 = vperm.xlu1 %3547, %v3875_v14   ;;  %1313 = vperm.xlu0 %3546, %v3878_v13   ;;  %v1168_v13 = vld [vmem:[%s3610_s23 + $0x12a] sm:$0xff]  ;;  %v1167_v14 = vld [vmem:[%s3610_s23 + $0x122] sm:$0xff] }
 0x127   : > { %v4000_v2 = vpop.permute.xlu1 %892  ;;  %v4002_v9 = vpop.permute.xlu0 %887 }
 0x128   : > { %6431 = vst [vmem:[#allocation52_spill] sm:$0xff] %v4000_v2  ;;  %6432 = vst [vmem:[#allocation53_spill] sm:$0xff] %v4002_v9  ;;  %1328 = vperm.xlu1 %3547, %v3887_v60   ;;  %1323 = vperm.xlu0 %3546, %v3890_v5   ;;  %v1430_v60 = vld [vmem:[%s3610_s23 + $0x1b] sm:$0xff]  ;;  %v1429_v5 = vld [vmem:[%s3610_s23 + $0x13] sm:$0xff] }
 0x12b   : > { %v4006_v10 = vpop.permute.xlu1 %902  ;;  %v4008_v17 = vpop.permute.xlu0 %897 }
 0x12c   : > { %6433 = vst [vmem:[#allocation54_spill] sm:$0xff] %v4006_v10  ;;  %6434 = vst [vmem:[#allocation55_spill] sm:$0xff] %v4008_v17  ;;  %1338 = vperm.xlu1 %3547, %v3899_v56   ;;  %1333 = vperm.xlu0 %3546, %v3902_v0   ;;  %v1432_v56 = vld [vmem:[%s3610_s23 + $0x2b] sm:$0xff]  ;;  %v1431_v0 = vld [vmem:[%s3610_s23 + $0x23] sm:$0xff] }
 0x12f   : > { %v4014_v18 = vpop.permute.xlu1 %912  ;;  %v4016_v61 = vpop.permute.xlu0 %907 }
 0x130   : > { %6435 = vst [vmem:[#allocation56_spill] sm:$0xff] %v4014_v18  ;;  %6436 = vst [vmem:[#allocation57_spill] sm:$0xff] %v4016_v61  ;;  %1348 = vperm.xlu1 %3547, %v1168_v13   ;;  %1343 = vperm.xlu0 %3546, %v1167_v14   ;;  %v1434_v13 = vld [vmem:[%s3610_s23 + $0x3b] sm:$0xff]  ;;  %v1433_v14 = vld [vmem:[%s3610_s23 + $0x33] sm:$0xff] }
 0x133   : > { %v4020_v58 = vpop.permute.xlu1 %922  ;;  %v4022_v17 = vpop.permute.xlu0 %917 }
 0x134   : > { %6437 = vst [vmem:[#allocation58_spill] sm:$0xff] %v4020_v58  ;;  %6438 = vst [vmem:[#allocation59_spill] sm:$0xff] %v4022_v17  ;;  %1474 = vperm.xlu1 %3547, %v1430_v60   ;;  %1469 = vperm.xlu0 %3546, %v1429_v5   ;;  %v1436_v60 = vld [vmem:[%s3610_s23 + $0x4b] sm:$0xff]  ;;  %v1435_v5 = vld [vmem:[%s3610_s23 + $0x43] sm:$0xff] }
 0x137   : > { %v4026_v10 = vpop.permute.xlu1 %932  ;;  %v4028_v18 = vpop.permute.xlu0 %927 }
 0x138   : > { %6439 = vst [vmem:[#allocation60_spill] sm:$0xff] %v4026_v10  ;;  %6440 = vst [vmem:[#allocation61_spill] sm:$0xff] %v4028_v18  ;;  %1484 = vperm.xlu1 %3547, %v1432_v56   ;;  %1479 = vperm.xlu0 %3546, %v1431_v0   ;;  %v1438_v56 = vld [vmem:[%s3610_s23 + $0x5b] sm:$0xff]  ;;  %v1437_v0 = vld [vmem:[%s3610_s23 + $0x53] sm:$0xff] }
 0x13b   : > { %v4032_v61 = vpop.permute.xlu1 %942  ;;  %v4034_v58 = vpop.permute.xlu0 %937 }
 0x13c   : > { %6441 = vst [vmem:[#allocation62_spill] sm:$0xff] %v4032_v61  ;;  %6442 = vst [vmem:[#allocation63_spill] sm:$0xff] %v4034_v58  ;;  %1494 = vperm.xlu1 %3547, %v1434_v13   ;;  %1489 = vperm.xlu0 %3546, %v1433_v14   ;;  %v1440_v13 = vld [vmem:[%s3610_s23 + $0x6b] sm:$0xff]  ;;  %v1439_v14 = vld [vmem:[%s3610_s23 + $0x63] sm:$0xff] }
 0x13f   : > { %v4038_v17 = vpop.permute.xlu1 %952  ;;  %v4040_v10 = vpop.permute.xlu0 %947 }
 0x140   : > { %6443 = vst [vmem:[#allocation64_spill] sm:$0xff] %v4038_v17  ;;  %6444 = vst [vmem:[#allocation65_spill] sm:$0xff] %v4040_v10  ;;  %1504 = vperm.xlu1 %3547, %v1436_v60   ;;  %1499 = vperm.xlu0 %3546, %v1435_v5   ;;  %v1442_v60 = vld [vmem:[%s3610_s23 + $0x7b] sm:$0xff]  ;;  %v1441_v5 = vld [vmem:[%s3610_s23 + $0x73] sm:$0xff] }
 0x143   : > { %v4044_v18 = vpop.permute.xlu1 %962  ;;  %v4046_v61 = vpop.permute.xlu0 %957 }
 0x144   : > { %6445 = vst [vmem:[#allocation66_spill] sm:$0xff] %v4044_v18  ;;  %6446 = vst [vmem:[#allocation67_spill] sm:$0xff] %v4046_v61  ;;  %1514 = vperm.xlu1 %3547, %v1438_v56   ;;  %1509 = vperm.xlu0 %3546, %v1437_v0   ;;  %v1444_v56 = vld [vmem:[%s3610_s23 + $0x8b] sm:$0xff]  ;;  %v1443_v0 = vld [vmem:[%s3610_s23 + $0x83] sm:$0xff] }
 0x147   : > { %v4050_v58 = vpop.permute.xlu1 %972  ;;  %v4052_v17 = vpop.permute.xlu0 %967 }
 0x148   : > { %6447 = vst [vmem:[#allocation68_spill] sm:$0xff] %v4050_v58  ;;  %6448 = vst [vmem:[#allocation69_spill] sm:$0xff] %v4052_v17  ;;  %1524 = vperm.xlu1 %3547, %v1440_v13   ;;  %1519 = vperm.xlu0 %3546, %v1439_v14   ;;  %v1446_v13 = vld [vmem:[%s3610_s23 + $0x9b] sm:$0xff]  ;;  %v1445_v14 = vld [vmem:[%s3610_s23 + $0x93] sm:$0xff] }
 0x14b   : > { %v4056_v10 = vpop.permute.xlu1 %982  ;;  %v4058_v18 = vpop.permute.xlu0 %977 }
 0x14c   : > { %6449 = vst [vmem:[#allocation70_spill] sm:$0xff] %v4056_v10  ;;  %6450 = vst [vmem:[#allocation71_spill] sm:$0xff] %v4058_v18  ;;  %1534 = vperm.xlu1 %3547, %v1442_v60   ;;  %1529 = vperm.xlu0 %3546, %v1441_v5   ;;  %v1448_v60 = vld [vmem:[%s3610_s23 + $0xab] sm:$0xff]  ;;  %v1447_v5 = vld [vmem:[%s3610_s23 + $0xa3] sm:$0xff] }
 0x14f   : > { %v4062_v61 = vpop.permute.xlu1 %992  ;;  %v4064_v58 = vpop.permute.xlu0 %987 }
 0x150   : > { %6451 = vst [vmem:[#allocation72_spill] sm:$0xff] %v4062_v61  ;;  %6452 = vst [vmem:[#allocation73_spill] sm:$0xff] %v4064_v58  ;;  %1544 = vperm.xlu1 %3547, %v1444_v56   ;;  %1539 = vperm.xlu0 %3546, %v1443_v0   ;;  %v1450_v56 = vld [vmem:[%s3610_s23 + $0xbb] sm:$0xff]  ;;  %v1449_v0 = vld [vmem:[%s3610_s23 + $0xb3] sm:$0xff] }
 0x153   : > { %v4068_v17 = vpop.permute.xlu1 %1002  ;;  %v4070_v10 = vpop.permute.xlu0 %997 }
 0x154   : > { %6453 = vst [vmem:[#allocation74_spill] sm:$0xff] %v4068_v17  ;;  %6454 = vst [vmem:[#allocation75_spill] sm:$0xff] %v4070_v10  ;;  %1554 = vperm.xlu1 %3547, %v1446_v13   ;;  %1549 = vperm.xlu0 %3546, %v1445_v14   ;;  %v1452_v13 = vld [vmem:[%s3610_s23 + $0xcb] sm:$0xff]  ;;  %v1451_v14 = vld [vmem:[%s3610_s23 + $0xc3] sm:$0xff] }
 0x157   : > { %v4074_v18 = vpop.permute.xlu1 %1012  ;;  %v4076_v61 = vpop.permute.xlu0 %1007 }
 0x158   : > { %6455 = vst [vmem:[#allocation76_spill] sm:$0xff] %v4074_v18  ;;  %6456 = vst [vmem:[#allocation77_spill] sm:$0xff] %v4076_v61  ;;  %1564 = vperm.xlu1 %3547, %v1448_v60   ;;  %1559 = vperm.xlu0 %3546, %v1447_v5   ;;  %v1454_v60 = vld [vmem:[%s3610_s23 + $0xdb] sm:$0xff]  ;;  %v1453_v5 = vld [vmem:[%s3610_s23 + $0xd3] sm:$0xff] }
 0x15b   : > { %v4080_v58 = vpop.permute.xlu1 %1022  ;;  %v4082_v17 = vpop.permute.xlu0 %1017 }
 0x15c   : > { %6457 = vst [vmem:[#allocation78_spill] sm:$0xff] %v4080_v58  ;;  %6458 = vst [vmem:[#allocation79_spill] sm:$0xff] %v4082_v17  ;;  %1574 = vperm.xlu1 %3547, %v1450_v56   ;;  %1569 = vperm.xlu0 %3546, %v1449_v0   ;;  %v1456_v56 = vld [vmem:[%s3610_s23 + $0xeb] sm:$0xff]  ;;  %v1455_v0 = vld [vmem:[%s3610_s23 + $0xe3] sm:$0xff] }
 0x15f   : > { %v4086_v10 = vpop.permute.xlu1 %1032  ;;  %v4088_v18 = vpop.permute.xlu0 %1027 }
 0x160   : > { %6459 = vst [vmem:[#allocation80_spill] sm:$0xff] %v4086_v10  ;;  %6460 = vst [vmem:[#allocation81_spill] sm:$0xff] %v4088_v18  ;;  %1584 = vperm.xlu1 %3547, %v1452_v13   ;;  %1579 = vperm.xlu0 %3546, %v1451_v14   ;;  %v1458_v13 = vld [vmem:[%s3610_s23 + $0xfb] sm:$0xff]  ;;  %v1457_v14 = vld [vmem:[%s3610_s23 + $0xf3] sm:$0xff] }
 0x163   : > { %v4092_v61 = vpop.permute.xlu1 %1042  ;;  %v4094_v58 = vpop.permute.xlu0 %1037 }
 0x164   : > { %6461 = vst [vmem:[#allocation82_spill] sm:$0xff] %v4092_v61  ;;  %6462 = vst [vmem:[#allocation83_spill] sm:$0xff] %v4094_v58  ;;  %1594 = vperm.xlu1 %3547, %v1454_v60   ;;  %1589 = vperm.xlu0 %3546, %v1453_v5   ;;  %v1460_v60 = vld [vmem:[%s3610_s23 + $0x10b] sm:$0xff]  ;;  %v1459_v5 = vld [vmem:[%s3610_s23 + $0x103] sm:$0xff] }
 0x167   : > { %v4098_v17 = vpop.permute.xlu1 %1052  ;;  %v4100_v10 = vpop.permute.xlu0 %1047 }
 0x168   : > { %6463 = vst [vmem:[#allocation84_spill] sm:$0xff] %v4098_v17  ;;  %6464 = vst [vmem:[#allocation85_spill] sm:$0xff] %v4100_v10  ;;  %1604 = vperm.xlu1 %3547, %v1456_v56   ;;  %1599 = vperm.xlu0 %3546, %v1455_v0   ;;  %v1462_v56 = vld [vmem:[%s3610_s23 + $0x11b] sm:$0xff]  ;;  %v1461_v0 = vld [vmem:[%s3610_s23 + $0x113] sm:$0xff] }
 0x16b   : > { %v4104_v18 = vpop.permute.xlu1 %1178  ;;  %v4106_v61 = vpop.permute.xlu0 %1173 }
 0x16c   : > { %6465 = vst [vmem:[#allocation86_spill] sm:$0xff] %v4104_v18  ;;  %6466 = vst [vmem:[#allocation87_spill] sm:$0xff] %v4106_v61  ;;  %1614 = vperm.xlu1 %3547, %v1458_v13   ;;  %1609 = vperm.xlu0 %3546, %v1457_v14   ;;  %v1464_v13 = vld [vmem:[%s3610_s23 + $0x12b] sm:$0xff]  ;;  %v1463_v14 = vld [vmem:[%s3610_s23 + $0x123] sm:$0xff] }
 0x16f   : > { %v4110_v58 = vpop.permute.xlu1 %1188  ;;  %v4112_v17 = vpop.permute.xlu0 %1183 }
 0x170   : > { %6467 = vst [vmem:[#allocation88_spill] sm:$0xff] %v4110_v58  ;;  %6468 = vst [vmem:[#allocation89_spill] sm:$0xff] %v4112_v17  ;;  %1624 = vperm.xlu1 %3547, %v1460_v60   ;;  %1619 = vperm.xlu0 %3546, %v1459_v5   ;;  %v1726_v60 = vld [vmem:[%s3610_s23 + $0x1c] sm:$0xff]  ;;  %v1725_v5 = vld [vmem:[%s3610_s23 + $0x14] sm:$0xff] }
 0x173   : > { %v4116_v10 = vpop.permute.xlu1 %1198  ;;  %v4118_v18 = vpop.permute.xlu0 %1193 }
 0x174   : > { %6469 = vst [vmem:[#allocation90_spill] sm:$0xff] %v4116_v10  ;;  %6470 = vst [vmem:[#allocation91_spill] sm:$0xff] %v4118_v18  ;;  %1634 = vperm.xlu1 %3547, %v1462_v56   ;;  %1629 = vperm.xlu0 %3546, %v1461_v0   ;;  %v4133_v56 = vld [vmem:[%s3610_s23 + $0x2c] sm:$0xff]  ;;  %v4136_v0 = vld [vmem:[%s3610_s23 + $0x24] sm:$0xff] }
 0x177   : > { %v4122_v61 = vpop.permute.xlu1 %1208  ;;  %v4124_v58 = vpop.permute.xlu0 %1203 }
 0x178   : > { %6471 = vst [vmem:[#allocation92_spill] sm:$0xff] %v4122_v61  ;;  %6472 = vst [vmem:[#allocation93_spill] sm:$0xff] %v4124_v58  ;;  %1644 = vperm.xlu1 %3547, %v1464_v13   ;;  %1639 = vperm.xlu0 %3546, %v1463_v14   ;;  %v4145_v13 = vld [vmem:[%s3610_s23 + $0x3c] sm:$0xff]  ;;  %v4148_v14 = vld [vmem:[%s3610_s23 + $0x34] sm:$0xff] }
 0x17b   : > { %v4128_v17 = vpop.permute.xlu1 %1218  ;;  %v4130_v10 = vpop.permute.xlu0 %1213 }
 0x17c   : > { %6473 = vst [vmem:[#allocation94_spill] sm:$0xff] %v4128_v17  ;;  %6474 = vst [vmem:[#allocation95_spill] sm:$0xff] %v4130_v10  ;;  %1770 = vperm.xlu1 %3547, %v1726_v60   ;;  %1765 = vperm.xlu0 %3546, %v1725_v5  }
 0x17f   : > { %v4138_v61 = vpop.permute.xlu1 %1228  ;;  %v4140_v58 = vpop.permute.xlu0 %1223 }
 0x180   : > { %6475 = vst [vmem:[#allocation96_spill] sm:$0xff] %v4138_v61  ;;  %6476 = vst [vmem:[#allocation97_spill] sm:$0xff] %v4140_v58  ;;  %1780 = vperm.xlu1 %3547, %v4133_v56   ;;  %1775 = vperm.xlu0 %3546, %v4136_v0   ;;  %v4157_v58 = vld [vmem:[%s3610_s23 + $0x4c] sm:$0xff]  ;;  %v4160_v61 = vld [vmem:[%s3610_s23 + $0x44] sm:$0xff] }
 0x183   : > { %v4150_v60 = vpop.permute.xlu1 %1238  ;;  %v4152_v5 = vpop.permute.xlu0 %1233 }
 0x184   : > { %6477 = vst [vmem:[#allocation98_spill] sm:$0xff] %v4150_v60  ;;  %6478 = vst [vmem:[#allocation99_spill] sm:$0xff] %v4152_v5  ;;  %1790 = vperm.xlu1 %3547, %v4145_v13   ;;  %1785 = vperm.xlu0 %3546, %v4148_v14   ;;  %v4169_v5 = vld [vmem:[%s3610_s23 + $0x5c] sm:$0xff]  ;;  %v4172_v60 = vld [vmem:[%s3610_s23 + $0x54] sm:$0xff] }
 0x187   : > { %v4162_v10 = vpop.permute.xlu1 %1248  ;;  %v4164_v17 = vpop.permute.xlu0 %1243 }
 0x188   : > { %6479 = vst [vmem:[#allocation100_spill] sm:$0xff] %v4162_v10  ;;  %6480 = vst [vmem:[#allocation101_spill] sm:$0xff] %v4164_v17  ;;  %1800 = vperm.xlu1 %3547, %v4157_v58   ;;  %1795 = vperm.xlu0 %3546, %v4160_v61   ;;  %v4181_v17 = vld [vmem:[%s3610_s23 + $0x6c] sm:$0xff]  ;;  %v4184_v10 = vld [vmem:[%s3610_s23 + $0x64] sm:$0xff] }
 0x18b   : > { %v4174_v18 = vpop.permute.xlu1 %1258  ;;  %v4176_v9 = vpop.permute.xlu0 %1253 }
 0x18c   : > { %6481 = vst [vmem:[#allocation102_spill] sm:$0xff] %v4174_v18  ;;  %6482 = vst [vmem:[#allocation103_spill] sm:$0xff] %v4176_v9  ;;  %1810 = vperm.xlu1 %3547, %v4169_v5   ;;  %1805 = vperm.xlu0 %3546, %v4172_v60   ;;  %v4193_v9 = vld [vmem:[%s3610_s23 + $0x7c] sm:$0xff]  ;;  %v4196_v18 = vld [vmem:[%s3610_s23 + $0x74] sm:$0xff] }
 0x18f   : > { %v4186_v2 = vpop.permute.xlu1 %1268  ;;  %v4188_v1 = vpop.permute.xlu0 %1263 }
 0x190   : > { %6483 = vst [vmem:[#allocation104_spill] sm:$0xff] %v4186_v2  ;;  %6484 = vst [vmem:[#allocation105_spill] sm:$0xff] %v4188_v1  ;;  %1820 = vperm.xlu1 %3547, %v4181_v17   ;;  %1815 = vperm.xlu0 %3546, %v4184_v10   ;;  %v4205_v1 = vld [vmem:[%s3610_s23 + $0x8c] sm:$0xff]  ;;  %v4208_v2 = vld [vmem:[%s3610_s23 + $0x84] sm:$0xff] }
 0x193   : > { %v4198_v62 = vpop.permute.xlu1 %1278  ;;  %v4200_v57 = vpop.permute.xlu0 %1273 }
 0x194   : > { %6485 = vst [vmem:[#allocation106_spill] sm:$0xff] %v4198_v62  ;;  %6486 = vst [vmem:[#allocation107_spill] sm:$0xff] %v4200_v57  ;;  %1830 = vperm.xlu1 %3547, %v4193_v9   ;;  %1825 = vperm.xlu0 %3546, %v4196_v18   ;;  %v4217_v57 = vld [vmem:[%s3610_s23 + $0x9c] sm:$0xff]  ;;  %v4220_v62 = vld [vmem:[%s3610_s23 + $0x94] sm:$0xff] }
 0x197   : > { %v4210_v54 = vpop.permute.xlu1 %1288  ;;  %v4212_v53 = vpop.permute.xlu0 %1283 }
 0x198   : > { %6487 = vst [vmem:[#allocation108_spill] sm:$0xff] %v4210_v54  ;;  %6488 = vst [vmem:[#allocation109_spill] sm:$0xff] %v4212_v53  ;;  %1840 = vperm.xlu1 %3547, %v4205_v1   ;;  %1835 = vperm.xlu0 %3546, %v4208_v2   ;;  %v4229_v53 = vld [vmem:[%s3610_s23 + $0xac] sm:$0xff]  ;;  %v4232_v54 = vld [vmem:[%s3610_s23 + $0xa4] sm:$0xff] }
 0x19b   : > { %v4222_v50 = vpop.permute.xlu1 %1298  ;;  %v4224_v49 = vpop.permute.xlu0 %1293 }
 0x19c   : > { %6489 = vst [vmem:[#allocation110_spill] sm:$0xff] %v4222_v50  ;;  %6490 = vst [vmem:[#allocation111_spill] sm:$0xff] %v4224_v49  ;;  %1850 = vperm.xlu1 %3547, %v4217_v57   ;;  %1845 = vperm.xlu0 %3546, %v4220_v62   ;;  %v4241_v49 = vld [vmem:[%s3610_s23 + $0xbc] sm:$0xff]  ;;  %v4244_v50 = vld [vmem:[%s3610_s23 + $0xb4] sm:$0xff] }
 0x19f   : > { %v4234_v46 = vpop.permute.xlu1 %1308  ;;  %v4236_v45 = vpop.permute.xlu0 %1303 }
 0x1a0   : > { %6491 = vst [vmem:[#allocation112_spill] sm:$0xff] %v4234_v46  ;;  %6492 = vst [vmem:[#allocation113_spill] sm:$0xff] %v4236_v45  ;;  %1860 = vperm.xlu1 %3547, %v4229_v53   ;;  %1855 = vperm.xlu0 %3546, %v4232_v54   ;;  %v4253_v45 = vld [vmem:[%s3610_s23 + $0xcc] sm:$0xff]  ;;  %v4256_v46 = vld [vmem:[%s3610_s23 + $0xc4] sm:$0xff] }
 0x1a3   : > { %v4246_v42 = vpop.permute.xlu1 %1318  ;;  %v4248_v41 = vpop.permute.xlu0 %1313 }
 0x1a4   : > { %6493 = vst [vmem:[#allocation114_spill] sm:$0xff] %v4246_v42  ;;  %6494 = vst [vmem:[#allocation115_spill] sm:$0xff] %v4248_v41  ;;  %1870 = vperm.xlu1 %3547, %v4241_v49   ;;  %1865 = vperm.xlu0 %3546, %v4244_v50   ;;  %v4265_v41 = vld [vmem:[%s3610_s23 + $0xdc] sm:$0xff]  ;;  %v4268_v42 = vld [vmem:[%s3610_s23 + $0xd4] sm:$0xff] }
 0x1a7   : > { %v4258_v38 = vpop.permute.xlu1 %1328  ;;  %v4260_v37 = vpop.permute.xlu0 %1323 }
 0x1a8   : > { %6495 = vst [vmem:[#allocation116_spill] sm:$0xff] %v4258_v38  ;;  %6496 = vst [vmem:[#allocation117_spill] sm:$0xff] %v4260_v37  ;;  %1880 = vperm.xlu1 %3547, %v4253_v45   ;;  %1875 = vperm.xlu0 %3546, %v4256_v46   ;;  %v4277_v37 = vld [vmem:[%s3610_s23 + $0xec] sm:$0xff]  ;;  %v4280_v38 = vld [vmem:[%s3610_s23 + $0xe4] sm:$0xff] }
 0x1ab   : > { %v4270_v34 = vpop.permute.xlu1 %1338  ;;  %v4272_v33 = vpop.permute.xlu0 %1333 }
 0x1ac   : > { %6497 = vst [vmem:[#allocation118_spill] sm:$0xff] %v4270_v34  ;;  %6498 = vst [vmem:[#allocation119_spill] sm:$0xff] %v4272_v33  ;;  %1890 = vperm.xlu1 %3547, %v4265_v41   ;;  %1885 = vperm.xlu0 %3546, %v4268_v42   ;;  %v4289_v33 = vld [vmem:[%s3610_s23 + $0xfc] sm:$0xff]  ;;  %v4292_v34 = vld [vmem:[%s3610_s23 + $0xf4] sm:$0xff] }
 0x1af   : > { %v4282_v30 = vpop.permute.xlu1 %1348  ;;  %v4284_v29 = vpop.permute.xlu0 %1343 }
 0x1b0   : > { %6499 = vst [vmem:[#allocation120_spill] sm:$0xff] %v4282_v30  ;;  %6500 = vst [vmem:[#allocation121_spill] sm:$0xff] %v4284_v29  ;;  %1900 = vperm.xlu1 %3547, %v4277_v37   ;;  %1895 = vperm.xlu0 %3546, %v4280_v38   ;;  %v4301_v29 = vld [vmem:[%s3610_s23 + $0x10c] sm:$0xff]  ;;  %v4304_v30 = vld [vmem:[%s3610_s23 + $0x104] sm:$0xff] }
 0x1b3   : > { %v4294_v26 = vpop.permute.xlu1 %1474  ;;  %v4296_v25 = vpop.permute.xlu0 %1469 }
 0x1b4   : > { %6501 = vst [vmem:[#allocation122_spill] sm:$0xff] %v4294_v26  ;;  %6502 = vst [vmem:[#allocation123_spill] sm:$0xff] %v4296_v25  ;;  %1910 = vperm.xlu1 %3547, %v4289_v33   ;;  %1905 = vperm.xlu0 %3546, %v4292_v34   ;;  %v4313_v26 = vld [vmem:[%s3610_s23 + $0x11c] sm:$0xff]  ;;  %v4316_v25 = vld [vmem:[%s3610_s23 + $0x114] sm:$0xff] }
 0x1b7   : > { %v4306_v22 = vpop.permute.xlu1 %1484  ;;  %v4308_v21 = vpop.permute.xlu0 %1479 }
 0x1b8   : > { %6503 = vst [vmem:[#allocation124_spill] sm:$0xff] %v4306_v22  ;;  %6504 = vst [vmem:[#allocation125_spill] sm:$0xff] %v4308_v21  ;;  %1920 = vperm.xlu1 %3547, %v4301_v29   ;;  %1915 = vperm.xlu0 %3546, %v4304_v30   ;;  %v4328_v22 = vld [vmem:[%s3610_s23 + $0x124] sm:$0xff] }
 0x1bb   : > { %v4318_v6 = vpop.permute.xlu1 %1494  ;;  %v4320_v63 = vpop.permute.xlu0 %1489 }
 0x1bc   : > { %6505 = vst [vmem:[#allocation126_spill] sm:$0xff] %v4318_v6  ;;  %6506 = vst [vmem:[#allocation127_spill] sm:$0xff] %v4320_v63  ;;  %1930 = vperm.xlu1 %3547, %v4313_v26   ;;  %1925 = vperm.xlu0 %3546, %v4316_v25  }
 0x1bf   : > { %v4330_v21 = vpop.permute.xlu1 %1504  ;;  %v4332_v51 = vpop.permute.xlu0 %1499 }
 0x1c0   : > { %6507 = vst [vmem:[#allocation128_spill] sm:$0xff] %v4330_v21  ;;  %6508 = vst [vmem:[#allocation129_spill] sm:$0xff] %v4332_v51  ;;  %1940 = vperm.xlu1 %3547, %v4325_v55   ;;  %1935 = vperm.xlu0 %3546, %v4328_v22  }
 0x1c3   : > { %v4336_v59 = vpop.permute.xlu1 %1514  ;;  %v4338_v6 = vpop.permute.xlu0 %1509 }
 0x1c4   : > { %6509 = vst [vmem:[#allocation130_spill] sm:$0xff] %v4338_v6  ;;  %2066 = vperm.xlu1 %3547, %v4133_v56   ;;  %2061 = vperm.xlu0 %3546, %v4136_v0  }
 0x1c7   : > { %v4342_v63 = vpop.permute.xlu1 %1524  ;;  %v4344_v52 = vpop.permute.xlu0 %1519 }
 0x1c8   : > { %2076 = vperm.xlu1 %3547, %v4145_v13   ;;  %2071 = vperm.xlu0 %3546, %v4148_v14  }
 0x1cb   : > { %v4348_v51 = vpop.permute.xlu1 %1534  ;;  %v4350_v21 = vpop.permute.xlu0 %1529 }
 0x1cc   : > { %2086 = vperm.xlu1 %3547, %v4157_v58   ;;  %2081 = vperm.xlu0 %3546, %v4160_v61  }
 0x1cf   : > { %v4354_v6 = vpop.permute.xlu1 %1544  ;;  %v4356_v56 = vpop.permute.xlu0 %1539 }
 0x1d0   : > { %2096 = vperm.xlu1 %3547, %v4169_v5   ;;  %2091 = vperm.xlu0 %3546, %v4172_v60  }
 0x1d3   : > { %v4360_v0 = vpop.permute.xlu1 %1554  ;;  %v4362_v13 = vpop.permute.xlu0 %1549 }
 0x1d4   : > { %6510 = vst [vmem:[#allocation131_spill] sm:$0xff] %v4360_v0  ;;  %6511 = vst [vmem:[#allocation132_spill] sm:$0xff] %v4362_v13  ;;  %2106 = vperm.xlu1 %3547, %v4181_v17   ;;  %2101 = vperm.xlu0 %3546, %v4184_v10   ;;  %v6627_v0 = vld [vmem:[#allocation25_spill] sm:$0xff] }
 0x1d7   : > { %v4366_v14 = vpop.permute.xlu1 %1564  ;;  %v4368_v58 = vpop.permute.xlu0 %1559 }
 0x1d8   : > { %6512 = vst [vmem:[#allocation133_spill] sm:$0xff] %v4366_v14  ;;  %6513 = vst [vmem:[#allocation134_spill] sm:$0xff] %v4368_v58  ;;  %2116 = vperm.xlu1 %3547, %v4193_v9   ;;  %2111 = vperm.xlu0 %3546, %v4196_v18   ;;  %v6625_v58 = vld [vmem:[#allocation23_spill] sm:$0xff] }
 0x1db   : > { %v4372_v61 = vpop.permute.xlu1 %1574  ;;  %v4374_v5 = vpop.permute.xlu0 %1569 }
 0x1dc   : > { %6514 = vst [vmem:[#allocation135_spill] sm:$0xff] %v4372_v61  ;;  %6515 = vst [vmem:[#allocation136_spill] sm:$0xff] %v4374_v5  ;;  %2126 = vperm.xlu1 %3547, %v4205_v1   ;;  %2121 = vperm.xlu0 %3546, %v4208_v2   ;;  %v2645_v5 = vld [vmem:[%s3610_s23 + $0x126] sm:$0xff] }
 0x1dd   : > { %v6623_v61 = vld [vmem:[#allocation11_spill] sm:$0xff] }
 0x1df   : > { %v4378_v60 = vpop.permute.xlu1 %1584  ;;  %v4380_v17 = vpop.permute.xlu0 %1579 }
 0x1e0   : > { %6516 = vst [vmem:[#allocation137_spill] sm:$0xff] %v4378_v60  ;;  %6517 = vst [vmem:[#allocation138_spill] sm:$0xff] %v4380_v17  ;;  %2136 = vperm.xlu1 %3547, %v4217_v57   ;;  %2131 = vperm.xlu0 %3546, %v4220_v62  }
 0x1e3   : > { %v4384_v10 = vpop.permute.xlu1 %1594  ;;  %v4386_v9 = vpop.permute.xlu0 %1589 }
 0x1e4   : > { %6518 = vst [vmem:[#allocation139_spill] sm:$0xff] %v4384_v10  ;;  %6519 = vst [vmem:[#allocation140_spill] sm:$0xff] %v4386_v9  ;;  %2146 = vperm.xlu1 %3547, %v4229_v53   ;;  %2141 = vperm.xlu0 %3546, %v4232_v54   ;;  %v6618_v9 = vld [vmem:[#allocation19_spill] sm:$0xff]  ;;  %v6619_v10 = vld [vmem:[#allocation9_spill] sm:$0xff] }
 0x1e7   : > { %v4390_v18 = vpop.permute.xlu1 %1604  ;;  %v4392_v1 = vpop.permute.xlu0 %1599 }
 0x1e8   : > { %6520 = vst [vmem:[#allocation141_spill] sm:$0xff] %v4390_v18  ;;  %6521 = vst [vmem:[#allocation142_spill] sm:$0xff] %v4392_v1  ;;  %2156 = vperm.xlu1 %3547, %v4241_v49   ;;  %2151 = vperm.xlu0 %3546, %v4244_v50  }
 0x1eb   : > { %v4396_v2 = vpop.permute.xlu1 %1614  ;;  %v4398_v57 = vpop.permute.xlu0 %1609 }
 0x1ec   : > { %6522 = vst [vmem:[#allocation143_spill] sm:$0xff] %v4396_v2  ;;  %6523 = vst [vmem:[#allocation144_spill] sm:$0xff] %v4398_v57  ;;  %2166 = vperm.xlu1 %3547, %v4253_v45   ;;  %2161 = vperm.xlu0 %3546, %v4256_v46  }
 0x1ef   : > { %v4402_v62 = vpop.permute.xlu1 %1624  ;;  %v4404_v53 = vpop.permute.xlu0 %1619 }
 0x1f0   : > { %6524 = vst [vmem:[#allocation145_spill] sm:$0xff] %v4402_v62  ;;  %6525 = vst [vmem:[#allocation146_spill] sm:$0xff] %v4404_v53  ;;  %2176 = vperm.xlu1 %3547, %v4265_v41   ;;  %2171 = vperm.xlu0 %3546, %v4268_v42   ;;  %v6612_v53 = vld [vmem:[#allocation15_spill] sm:$0xff]  ;;  %v6613_v62 = vld [vmem:[#allocation16_spill] sm:$0xff] }
 0x1f3   : > { %v4408_v54 = vpop.permute.xlu1 %1634  ;;  %v4410_v49 = vpop.permute.xlu0 %1629 }
 0x1f4   : > { %6526 = vst [vmem:[#allocation147_spill] sm:$0xff] %v4408_v54  ;;  %6527 = vst [vmem:[#allocation148_spill] sm:$0xff] %v4410_v49  ;;  %2186 = vperm.xlu1 %3547, %v4277_v37   ;;  %2181 = vperm.xlu0 %3546, %v4280_v38   ;;  %v6610_v49 = vld [vmem:[#allocation7_spill] sm:$0xff]  ;;  %v6611_v54 = vld [vmem:[#allocation8_spill] sm:$0xff] }
 0x1f7   : > { %v4414_v50 = vpop.permute.xlu1 %1644  ;;  %v4416_v45 = vpop.permute.xlu0 %1639 }
 0x1f8   : > { %6528 = vst [vmem:[#allocation149_spill] sm:$0xff] %v4414_v50  ;;  %6529 = vst [vmem:[#allocation150_spill] sm:$0xff] %v4416_v45  ;;  %2196 = vperm.xlu1 %3547, %v4289_v33   ;;  %2191 = vperm.xlu0 %3546, %v4292_v34  }
 0x1fb   : > { %v4420_v41 = vpop.permute.xlu1 %1770  ;;  %v4422_v42 = vpop.permute.xlu0 %1765 }
 0x1fc   : > { %6530 = vst [vmem:[#allocation151_spill] sm:$0xff] %v4420_v41  ;;  %6531 = vst [vmem:[#allocation152_spill] sm:$0xff] %v4422_v42  ;;  %2206 = vperm.xlu1 %3547, %v4301_v29   ;;  %2201 = vperm.xlu0 %3546, %v4304_v30   ;;  %v2056_v29 = vld [vmem:[%s3610_s23 + $0x13c] sm:$0xff]  ;;  %v2055_v30 = vld [vmem:[%s3610_s23 + $0x134] sm:$0xff] }
 0x1ff   : > { %v4426_v37 = vpop.permute.xlu1 %1780  ;;  %v4428_v38 = vpop.permute.xlu0 %1775 }
 0x200   : > { %6532 = vst [vmem:[#allocation153_spill] sm:$0xff] %v4426_v37  ;;  %6533 = vst [vmem:[#allocation154_spill] sm:$0xff] %v4428_v38  ;;  %2216 = vperm.xlu1 %3547, %v4313_v26   ;;  %2211 = vperm.xlu0 %3546, %v4316_v25   ;;  %v2318_v25 = vld [vmem:[%s3610_s23 + $0x2d] sm:$0xff]  ;;  %v2317_v26 = vld [vmem:[%s3610_s23 + $0x25] sm:$0xff] }
 0x203   : > { %v4432_v33 = vpop.permute.xlu1 %1790  ;;  %v4434_v34 = vpop.permute.xlu0 %1785 }
 0x204   : > { %6534 = vst [vmem:[#allocation155_spill] sm:$0xff] %v4432_v33  ;;  %6535 = vst [vmem:[#allocation156_spill] sm:$0xff] %v4434_v34  ;;  %2226 = vperm.xlu1 %3547, %v4325_v55   ;;  %2221 = vperm.xlu0 %3546, %v4328_v22   ;;  %v2320_v55 = vld [vmem:[%s3610_s23 + $0x3d] sm:$0xff]  ;;  %v2319_v22 = vld [vmem:[%s3610_s23 + $0x35] sm:$0xff] }
 0x207   : > { %v4440_v46 = vpop.permute.xlu1 %1800  ;;  %v4442_v45 = vpop.permute.xlu0 %1795 }
 0x208   : > { %6536 = vst [vmem:[#allocation157_spill] sm:$0xff] %v4440_v46  ;;  %6537 = vst [vmem:[#allocation158_spill] sm:$0xff] %v4442_v45  ;;  %2236 = vperm.xlu1 %3547, %v2056_v29   ;;  %2231 = vperm.xlu0 %3546, %v2055_v30   ;;  %v2322_v29 = vld [vmem:[%s3610_s23 + $0x4d] sm:$0xff]  ;;  %v2321_v30 = vld [vmem:[%s3610_s23 + $0x45] sm:$0xff] }
 0x20b   : > { %v4446_v50 = vpop.permute.xlu1 %1810  ;;  %v4448_v34 = vpop.permute.xlu0 %1805 }
 0x20c   : > { %6538 = vst [vmem:[#allocation159_spill] sm:$0xff] %v4446_v50  ;;  %6539 = vst [vmem:[#allocation160_spill] sm:$0xff] %v4448_v34  ;;  %2362 = vperm.xlu1 %3547, %v2318_v25   ;;  %2357 = vperm.xlu0 %3546, %v2317_v26   ;;  %v2324_v25 = vld [vmem:[%s3610_s23 + $0x5d] sm:$0xff]  ;;  %v2323_v26 = vld [vmem:[%s3610_s23 + $0x55] sm:$0xff] }
 0x20f   : > { %v4452_v33 = vpop.permute.xlu1 %1820  ;;  %v4454_v46 = vpop.permute.xlu0 %1815 }
 0x210   : > { %6540 = vst [vmem:[#allocation161_spill] sm:$0xff] %v4452_v33  ;;  %6541 = vst [vmem:[#allocation162_spill] sm:$0xff] %v4454_v46  ;;  %2372 = vperm.xlu1 %3547, %v2320_v55   ;;  %2367 = vperm.xlu0 %3546, %v2319_v22   ;;  %v2326_v55 = vld [vmem:[%s3610_s23 + $0x6d] sm:$0xff]  ;;  %v2325_v22 = vld [vmem:[%s3610_s23 + $0x65] sm:$0xff] }
 0x213   : > { %v4458_v45 = vpop.permute.xlu1 %1830  ;;  %v4460_v50 = vpop.permute.xlu0 %1825 }
 0x214   : > { %6542 = vst [vmem:[#allocation163_spill] sm:$0xff] %v4458_v45  ;;  %6543 = vst [vmem:[#allocation164_spill] sm:$0xff] %v4460_v50  ;;  %2382 = vperm.xlu1 %3547, %v2322_v29   ;;  %2377 = vperm.xlu0 %3546, %v2321_v30   ;;  %v2328_v29 = vld [vmem:[%s3610_s23 + $0x7d] sm:$0xff]  ;;  %v2327_v30 = vld [vmem:[%s3610_s23 + $0x75] sm:$0xff] }
 0x217   : > { %v4464_v34 = vpop.permute.xlu1 %1840  ;;  %v4466_v33 = vpop.permute.xlu0 %1835 }
 0x218   : > { %6544 = vst [vmem:[#allocation165_spill] sm:$0xff] %v4464_v34  ;;  %6545 = vst [vmem:[#allocation166_spill] sm:$0xff] %v4466_v33  ;;  %2392 = vperm.xlu1 %3547, %v2324_v25   ;;  %2387 = vperm.xlu0 %3546, %v2323_v26   ;;  %v2330_v25 = vld [vmem:[%s3610_s23 + $0x8d] sm:$0xff]  ;;  %v2329_v26 = vld [vmem:[%s3610_s23 + $0x85] sm:$0xff] }
 0x21b   : > { %v4470_v46 = vpop.permute.xlu1 %1850  ;;  %v4472_v45 = vpop.permute.xlu0 %1845 }
 0x21c   : > { %6546 = vst [vmem:[#allocation167_spill] sm:$0xff] %v4470_v46  ;;  %6547 = vst [vmem:[#allocation168_spill] sm:$0xff] %v4472_v45  ;;  %2402 = vperm.xlu1 %3547, %v2326_v55   ;;  %2397 = vperm.xlu0 %3546, %v2325_v22   ;;  %v2332_v55 = vld [vmem:[%s3610_s23 + $0x9d] sm:$0xff]  ;;  %v2331_v22 = vld [vmem:[%s3610_s23 + $0x95] sm:$0xff] }
 0x21f   : > { %v4476_v50 = vpop.permute.xlu1 %1860  ;;  %v4478_v34 = vpop.permute.xlu0 %1855 }
 0x220   : > { %6548 = vst [vmem:[#allocation169_spill] sm:$0xff] %v4476_v50  ;;  %6549 = vst [vmem:[#allocation170_spill] sm:$0xff] %v4478_v34  ;;  %2412 = vperm.xlu1 %3547, %v2328_v29   ;;  %2407 = vperm.xlu0 %3546, %v2327_v30   ;;  %v2334_v29 = vld [vmem:[%s3610_s23 + $0xad] sm:$0xff]  ;;  %v2333_v30 = vld [vmem:[%s3610_s23 + $0xa5] sm:$0xff] }
 0x223   : > { %v4482_v33 = vpop.permute.xlu1 %1870  ;;  %v4484_v46 = vpop.permute.xlu0 %1865 }
 0x224   : > { %6550 = vst [vmem:[#allocation171_spill] sm:$0xff] %v4482_v33  ;;  %6551 = vst [vmem:[#allocation172_spill] sm:$0xff] %v4484_v46  ;;  %2422 = vperm.xlu1 %3547, %v2330_v25   ;;  %2417 = vperm.xlu0 %3546, %v2329_v26   ;;  %v2336_v25 = vld [vmem:[%s3610_s23 + $0xbd] sm:$0xff]  ;;  %v2335_v26 = vld [vmem:[%s3610_s23 + $0xb5] sm:$0xff] }
 0x227   : > { %v4488_v45 = vpop.permute.xlu1 %1880  ;;  %v4490_v50 = vpop.permute.xlu0 %1875 }
 0x228   : > { %6552 = vst [vmem:[#allocation173_spill] sm:$0xff] %v4488_v45  ;;  %6553 = vst [vmem:[#allocation174_spill] sm:$0xff] %v4490_v50  ;;  %2432 = vperm.xlu1 %3547, %v2332_v55   ;;  %2427 = vperm.xlu0 %3546, %v2331_v22   ;;  %v2338_v55 = vld [vmem:[%s3610_s23 + $0xcd] sm:$0xff]  ;;  %v2337_v22 = vld [vmem:[%s3610_s23 + $0xc5] sm:$0xff] }
 0x22b   : > { %v4494_v34 = vpop.permute.xlu1 %1890  ;;  %v4496_v33 = vpop.permute.xlu0 %1885 }
 0x22c   : > { %6554 = vst [vmem:[#allocation175_spill] sm:$0xff] %v4494_v34  ;;  %6555 = vst [vmem:[#allocation176_spill] sm:$0xff] %v4496_v33  ;;  %2442 = vperm.xlu1 %3547, %v2334_v29   ;;  %2437 = vperm.xlu0 %3546, %v2333_v30   ;;  %v2340_v29 = vld [vmem:[%s3610_s23 + $0xdd] sm:$0xff]  ;;  %v2339_v30 = vld [vmem:[%s3610_s23 + $0xd5] sm:$0xff] }
 0x22f   : > { %v4500_v46 = vpop.permute.xlu1 %1900  ;;  %v4502_v45 = vpop.permute.xlu0 %1895 }
 0x230   : > { %6556 = vst [vmem:[#allocation177_spill] sm:$0xff] %v4500_v46  ;;  %6557 = vst [vmem:[#allocation178_spill] sm:$0xff] %v4502_v45  ;;  %2452 = vperm.xlu1 %3547, %v2336_v25   ;;  %2447 = vperm.xlu0 %3546, %v2335_v26   ;;  %v2342_v25 = vld [vmem:[%s3610_s23 + $0xed] sm:$0xff]  ;;  %v2341_v26 = vld [vmem:[%s3610_s23 + $0xe5] sm:$0xff] }
 0x233   : > { %v4506_v50 = vpop.permute.xlu1 %1910  ;;  %v4508_v34 = vpop.permute.xlu0 %1905 }
 0x234   : > { %6558 = vst [vmem:[#allocation179_spill] sm:$0xff] %v4506_v50  ;;  %6559 = vst [vmem:[#allocation180_spill] sm:$0xff] %v4508_v34  ;;  %2462 = vperm.xlu1 %3547, %v2338_v55   ;;  %2457 = vperm.xlu0 %3546, %v2337_v22   ;;  %v2344_v55 = vld [vmem:[%s3610_s23 + $0xfd] sm:$0xff]  ;;  %v2343_v22 = vld [vmem:[%s3610_s23 + $0xf5] sm:$0xff] }
 0x237   : > { %v4512_v33 = vpop.permute.xlu1 %1920  ;;  %v4514_v46 = vpop.permute.xlu0 %1915 }
 0x238   : > { %6560 = vst [vmem:[#allocation181_spill] sm:$0xff] %v4512_v33  ;;  %6561 = vst [vmem:[#allocation182_spill] sm:$0xff] %v4514_v46  ;;  %2472 = vperm.xlu1 %3547, %v2340_v29   ;;  %2467 = vperm.xlu0 %3546, %v2339_v30   ;;  %v2346_v29 = vld [vmem:[%s3610_s23 + $0x10d] sm:$0xff]  ;;  %v2345_v30 = vld [vmem:[%s3610_s23 + $0x105] sm:$0xff] }
 0x23b   : > { %v4518_v45 = vpop.permute.xlu1 %1930  ;;  %v4520_v50 = vpop.permute.xlu0 %1925 }
 0x23c   : > { %6562 = vst [vmem:[#allocation183_spill] sm:$0xff] %v4518_v45  ;;  %6563 = vst [vmem:[#allocation184_spill] sm:$0xff] %v4520_v50  ;;  %2482 = vperm.xlu1 %3547, %v2342_v25   ;;  %2477 = vperm.xlu0 %3546, %v2341_v26   ;;  %v2348_v25 = vld [vmem:[%s3610_s23 + $0x11d] sm:$0xff]  ;;  %v2347_v26 = vld [vmem:[%s3610_s23 + $0x115] sm:$0xff] }
 0x23f   : > { %v4524_v34 = vpop.permute.xlu1 %1940  ;;  %v4526_v33 = vpop.permute.xlu0 %1935 }
 0x240   : > { %6564 = vst [vmem:[#allocation185_spill] sm:$0xff] %v4524_v34  ;;  %6565 = vst [vmem:[#allocation186_spill] sm:$0xff] %v4526_v33  ;;  %2492 = vperm.xlu1 %3547, %v2344_v55   ;;  %2487 = vperm.xlu0 %3546, %v2343_v22   ;;  %v2350_v55 = vld [vmem:[%s3610_s23 + $0x12d] sm:$0xff]  ;;  %v2349_v22 = vld [vmem:[%s3610_s23 + $0x125] sm:$0xff] }
 0x243   : > { %v4530_v46 = vpop.permute.xlu1 %2066  ;;  %v4532_v45 = vpop.permute.xlu0 %2061 }
 0x244   : > { %6566 = vst [vmem:[#allocation187_spill] sm:$0xff] %v4530_v46  ;;  %6567 = vst [vmem:[#allocation188_spill] sm:$0xff] %v4532_v45  ;;  %2502 = vperm.xlu1 %3547, %v2346_v29   ;;  %2497 = vperm.xlu0 %3546, %v2345_v30   ;;  %v2352_v29 = vld [vmem:[%s3610_s23 + $0x13d] sm:$0xff]  ;;  %v2351_v30 = vld [vmem:[%s3610_s23 + $0x135] sm:$0xff] }
 0x247   : > { %v4536_v50 = vpop.permute.xlu1 %2076  ;;  %v4538_v34 = vpop.permute.xlu0 %2071 }
 0x248   : > { %6568 = vst [vmem:[#allocation189_spill] sm:$0xff] %v4536_v50  ;;  %6569 = vst [vmem:[#allocation190_spill] sm:$0xff] %v4538_v34  ;;  %2512 = vperm.xlu1 %3547, %v2348_v25   ;;  %2507 = vperm.xlu0 %3546, %v2347_v26   ;;  %v2614_v25 = vld [vmem:[%s3610_s23 + $0x2e] sm:$0xff]  ;;  %v2613_v26 = vld [vmem:[%s3610_s23 + $0x26] sm:$0xff] }
 0x24b   : > { %v4542_v33 = vpop.permute.xlu1 %2086  ;;  %v4544_v46 = vpop.permute.xlu0 %2081 }
 0x24c   : > { %6570 = vst [vmem:[#allocation191_spill] sm:$0xff] %v4542_v33  ;;  %6571 = vst [vmem:[#allocation192_spill] sm:$0xff] %v4544_v46  ;;  %2522 = vperm.xlu1 %3547, %v2350_v55   ;;  %2517 = vperm.xlu0 %3546, %v2349_v22   ;;  %v2616_v55 = vld [vmem:[%s3610_s23 + $0x3e] sm:$0xff]  ;;  %v2615_v22 = vld [vmem:[%s3610_s23 + $0x36] sm:$0xff] }
 0x24f   : > { %v4548_v45 = vpop.permute.xlu1 %2096  ;;  %v4550_v50 = vpop.permute.xlu0 %2091 }
 0x250   : > { %6572 = vst [vmem:[#allocation193_spill] sm:$0xff] %v4548_v45  ;;  %6573 = vst [vmem:[#allocation194_spill] sm:$0xff] %v4550_v50  ;;  %2532 = vperm.xlu1 %3547, %v2352_v29   ;;  %2527 = vperm.xlu0 %3546, %v2351_v30   ;;  %v2618_v29 = vld [vmem:[%s3610_s23 + $0x4e] sm:$0xff]  ;;  %v2617_v30 = vld [vmem:[%s3610_s23 + $0x46] sm:$0xff] }
 0x253   : > { %v4554_v34 = vpop.permute.xlu1 %2106  ;;  %v4556_v33 = vpop.permute.xlu0 %2101 }
 0x254   : > { %6574 = vst [vmem:[#allocation195_spill] sm:$0xff] %v4554_v34  ;;  %6575 = vst [vmem:[#allocation196_spill] sm:$0xff] %v4556_v33  ;;  %2658 = vperm.xlu1 %3547, %v2614_v25   ;;  %2653 = vperm.xlu0 %3546, %v2613_v26   ;;  %v2620_v25 = vld [vmem:[%s3610_s23 + $0x5e] sm:$0xff]  ;;  %v2619_v26 = vld [vmem:[%s3610_s23 + $0x56] sm:$0xff] }
 0x257   : > { %v4560_v46 = vpop.permute.xlu1 %2116  ;;  %v4562_v45 = vpop.permute.xlu0 %2111 }
 0x258   : > { %6576 = vst [vmem:[#allocation197_spill] sm:$0xff] %v4560_v46  ;;  %6577 = vst [vmem:[#allocation198_spill] sm:$0xff] %v4562_v45  ;;  %2668 = vperm.xlu1 %3547, %v2616_v55   ;;  %2663 = vperm.xlu0 %3546, %v2615_v22   ;;  %v2622_v55 = vld [vmem:[%s3610_s23 + $0x6e] sm:$0xff]  ;;  %v2621_v22 = vld [vmem:[%s3610_s23 + $0x66] sm:$0xff] }
 0x25b   : > { %v4566_v50 = vpop.permute.xlu1 %2126  ;;  %v4568_v34 = vpop.permute.xlu0 %2121 }
 0x25c   : > { %6578 = vst [vmem:[#allocation199_spill] sm:$0xff] %v4566_v50  ;;  %6579 = vst [vmem:[#allocation200_spill] sm:$0xff] %v4568_v34  ;;  %2678 = vperm.xlu1 %3547, %v2618_v29   ;;  %2673 = vperm.xlu0 %3546, %v2617_v30   ;;  %v2624_v29 = vld [vmem:[%s3610_s23 + $0x7e] sm:$0xff]  ;;  %v2623_v30 = vld [vmem:[%s3610_s23 + $0x76] sm:$0xff] }
 0x25f   : > { %v4572_v33 = vpop.permute.xlu1 %2136  ;;  %v4574_v46 = vpop.permute.xlu0 %2131 }
 0x260   : > { %6580 = vst [vmem:[#allocation201_spill] sm:$0xff] %v4572_v33  ;;  %6581 = vst [vmem:[#allocation202_spill] sm:$0xff] %v4574_v46  ;;  %2688 = vperm.xlu1 %3547, %v2620_v25   ;;  %2683 = vperm.xlu0 %3546, %v2619_v26   ;;  %v2626_v25 = vld [vmem:[%s3610_s23 + $0x8e] sm:$0xff]  ;;  %v2625_v26 = vld [vmem:[%s3610_s23 + $0x86] sm:$0xff] }
 0x263   : > { %v4578_v45 = vpop.permute.xlu1 %2146  ;;  %v4580_v50 = vpop.permute.xlu0 %2141 }
 0x264   : > { %6582 = vst [vmem:[#allocation203_spill] sm:$0xff] %v4578_v45  ;;  %6583 = vst [vmem:[#allocation204_spill] sm:$0xff] %v4580_v50  ;;  %2698 = vperm.xlu1 %3547, %v2622_v55   ;;  %2693 = vperm.xlu0 %3546, %v2621_v22   ;;  %v2628_v55 = vld [vmem:[%s3610_s23 + $0x9e] sm:$0xff]  ;;  %v2627_v22 = vld [vmem:[%s3610_s23 + $0x96] sm:$0xff] }
 0x267   : > { %v4584_v34 = vpop.permute.xlu1 %2156  ;;  %v4586_v33 = vpop.permute.xlu0 %2151 }
 0x268   : > { %6584 = vst [vmem:[#allocation205_spill] sm:$0xff] %v4584_v34  ;;  %6585 = vst [vmem:[#allocation206_spill] sm:$0xff] %v4586_v33  ;;  %2708 = vperm.xlu1 %3547, %v2624_v29   ;;  %2703 = vperm.xlu0 %3546, %v2623_v30   ;;  %v2630_v29 = vld [vmem:[%s3610_s23 + $0xae] sm:$0xff]  ;;  %v2629_v30 = vld [vmem:[%s3610_s23 + $0xa6] sm:$0xff] }
 0x26b   : > { %v4590_v46 = vpop.permute.xlu1 %2166  ;;  %v4592_v45 = vpop.permute.xlu0 %2161 }
 0x26c   : > { %6586 = vst [vmem:[#allocation207_spill] sm:$0xff] %v4590_v46  ;;  %6587 = vst [vmem:[#allocation208_spill] sm:$0xff] %v4592_v45  ;;  %2718 = vperm.xlu1 %3547, %v2626_v25   ;;  %2713 = vperm.xlu0 %3546, %v2625_v26   ;;  %v2632_v25 = vld [vmem:[%s3610_s23 + $0xbe] sm:$0xff]  ;;  %v2631_v26 = vld [vmem:[%s3610_s23 + $0xb6] sm:$0xff] }
 0x26f   : > { %v4596_v50 = vpop.permute.xlu1 %2176  ;;  %v4598_v34 = vpop.permute.xlu0 %2171 }
 0x270   : > { %6588 = vst [vmem:[#allocation209_spill] sm:$0xff] %v4596_v50  ;;  %6589 = vst [vmem:[#allocation210_spill] sm:$0xff] %v4598_v34  ;;  %2728 = vperm.xlu1 %3547, %v2628_v55   ;;  %2723 = vperm.xlu0 %3546, %v2627_v22   ;;  %v2634_v55 = vld [vmem:[%s3610_s23 + $0xce] sm:$0xff]  ;;  %v2633_v22 = vld [vmem:[%s3610_s23 + $0xc6] sm:$0xff] }
 0x273   : > { %v4602_v33 = vpop.permute.xlu1 %2186  ;;  %v4604_v46 = vpop.permute.xlu0 %2181 }
 0x274   : > { %6590 = vst [vmem:[#allocation211_spill] sm:$0xff] %v4602_v33  ;;  %6591 = vst [vmem:[#allocation212_spill] sm:$0xff] %v4604_v46  ;;  %2738 = vperm.xlu1 %3547, %v2630_v29   ;;  %2733 = vperm.xlu0 %3546, %v2629_v30   ;;  %v2636_v29 = vld [vmem:[%s3610_s23 + $0xde] sm:$0xff]  ;;  %v2635_v30 = vld [vmem:[%s3610_s23 + $0xd6] sm:$0xff] }
 0x277   : > { %v4608_v45 = vpop.permute.xlu1 %2196  ;;  %v4610_v50 = vpop.permute.xlu0 %2191 }
 0x278   : > { %6592 = vst [vmem:[#allocation213_spill] sm:$0xff] %v4608_v45  ;;  %6593 = vst [vmem:[#allocation214_spill] sm:$0xff] %v4610_v50  ;;  %2748 = vperm.xlu1 %3547, %v2632_v25   ;;  %2743 = vperm.xlu0 %3546, %v2631_v26   ;;  %v2638_v25 = vld [vmem:[%s3610_s23 + $0xee] sm:$0xff]  ;;  %v2637_v26 = vld [vmem:[%s3610_s23 + $0xe6] sm:$0xff] }
 0x27b   : > { %v4614_v34 = vpop.permute.xlu1 %2206  ;;  %v4616_v33 = vpop.permute.xlu0 %2201 }
 0x27c   : > { %6594 = vst [vmem:[#allocation215_spill] sm:$0xff] %v4614_v34  ;;  %6595 = vst [vmem:[#allocation216_spill] sm:$0xff] %v4616_v33  ;;  %2758 = vperm.xlu1 %3547, %v2634_v55   ;;  %2753 = vperm.xlu0 %3546, %v2633_v22   ;;  %v4633_v55 = vld [vmem:[%s6376_s1] ss:$0 sm:$0xff]  ;;  %v2639_v33 = vld [vmem:[%s3610_s23 + $0xf6] sm:$0xff] }
 0x27d   : > { %v2640_v22 = vld [vmem:[%s3610_s23 + $0xfe] sm:$0xff]  ;;  %v2643_v34 = vld [vmem:[%s3610_s23 + $0x116] sm:$0xff] }
 0x27f   : > { %v4620_v46 = vpop.permute.xlu1 %2216  ;;  %v4622_v45 = vpop.permute.xlu0 %2211 }
 0x280   : > { %6596 = vst [vmem:[#allocation217_spill] sm:$0xff] %v4620_v46  ;;  %6597 = vst [vmem:[#allocation218_spill] sm:$0xff] %v4622_v45  ;;  %2768 = vperm.xlu1 %3547, %v2636_v29   ;;  %2763 = vperm.xlu0 %3546, %v2635_v30   ;;  %v4639_v29 = vmul.f32 %v4633_v55, %v3678_v3  ;;  %v4643_v30 = vmul.f32 %v4633_v55, %v3680_v4 }
 0x281   : > { %v4657_v3 = vmul.f32 %v4633_v55, %v3690_v11  ;;  %v4661_v45 = vmul.f32 %v4633_v55, %v3692_v12  ;;  %v4665_v4 = vmul.f32 %v4633_v55, %v3696_v15  ;;  %v4677_v11 = vmul.f32 %v4633_v55, %v3704_v20  ;;  %v2642_v15 = vld [vmem:[%s3610_s23 + $0x10e] sm:$0xff] }
 0x282   : > { %v4681_v12 = vmul.f32 %v4633_v55, %v3712_v23  ;;  %v4699_v20 = vmul.f32 %v4633_v55, %v3736_v31  ;;  %v4703_v23 = vmul.f32 %v4633_v55, %v3738_v32  ;;  %v4720_v31 = vld [vmem:[%s6376_s1 + $0x1] ss:$0 sm:$0xff] }
 0x283   : > { %v4626_v50 = vpop.permute.xlu1 %2226  ;;  %v4628_v38 = vpop.permute.xlu0 %2221 }
 0x284   : > { %6598 = vst [vmem:[#allocation219_spill] sm:$0xff] %v4626_v50  ;;  %6599 = vst [vmem:[#allocation220_spill] sm:$0xff] %v4628_v38  ;;  %2778 = vperm.xlu1 %3547, %v2638_v25   ;;  %2773 = vperm.xlu0 %3546, %v2637_v26   ;;  %v4647_v38 = vmul.f32 %v4633_v55, %v3684_v7  ;;  %v470_v25 = vmul.f32 %v4633_v55, %v3686_v8 }
 0x285   : > { %v4669_v7 = vmul.f32 %v4633_v55, %v3698_v16  ;;  %v4673_v8 = vmul.f32 %v4633_v55, %v3702_v19  ;;  %v4691_v16 = vmul.f32 %v4633_v55, %v3724_v27  ;;  %v4695_v19 = vmul.f32 %v4633_v55, %v3726_v28 }
 0x286   : > { %v4711_v27 = vmul.f32 %v4633_v55, %v3750_v36  ;;  %v4715_v28 = vmul.f32 %v4633_v55, %v3760_v39  ;;  %v4732_v36 = vmul.f32 %v4633_v55, %v3772_v43  ;;  %v4736_v39 = vmul.f32 %v4633_v55, %v3774_v44  ;;  %v6605_v43 = vld [vmem:[#allocation3_spill] sm:$0xff]  ;;  %v2644_v44 = vld [vmem:[%s3610_s23 + $0x11e] sm:$0xff] }
 0x287   : > { %v4651_v26 = vpop.permute.xlu1 %2236  ;;  %v4653_v50 = vpop.permute.xlu0 %2231  ;;  %v4752_v46 = vmul.f32 %v4633_v55, %v6605_v43  ;;  %v4772_v43 = vmul.f32 %v4633_v55, %v6610_v49  ;;  %v6617_v49 = vld [vmem:[#allocation18_spill] sm:$0xff] }
 0x288   : > { %6600 = vst [vmem:[#allocation221_spill] sm:$0xff] %v4651_v26  ;;  %6601 = vst [vmem:[#allocation222_spill] sm:$0xff] %v4653_v50  ;;  %2788 = vperm.xlu1 %3547, %v2640_v22   ;;  %2783 = vperm.xlu0 %3546, %v2639_v33   ;;  %v2641_v50 = vld [vmem:[%s3610_s23 + $0x106] sm:$0xff]  ;;  %v4687_v33 = vmul.f32 %v4633_v55, %v3714_v24  ;;  %v4707_v24 = vmul.f32 %v4633_v55, %v3748_v35 }
 0x289   : > { %v4728_v35 = vmul.f32 %v4633_v55, %v3762_v40  ;;  %v4740_v26 = vmul.f32 %v4633_v55, %v3784_v47  ;;  %v6604_v40 = vld [vmem:[#allocation2_spill] sm:$0xff]  ;;  %v6607_v47 = vld [vmem:[#allocation5_spill] sm:$0xff]  ;;  %v770_v18 = vmul.f32 %v4720_v31, %v6617_v49  ;;  %v2646_v49 = vld [vmem:[%s3610_s23 + $0x12e] sm:$0xff] }
 0x28a   : > { %v4762_v37 = vmul.f32 %v4633_v55, %v6607_v47  ;;  %v765_v47 = vmul.f32 %v4720_v31, %v6612_v53  ;;  %v4794_v53 = vmul.f32 %v4633_v55, %v6619_v10  ;;  %v6624_v10 = vld [vmem:[#allocation22_spill] sm:$0xff] }
 0x28b   : > { %v4722_v32 = vpop.permute.xlu1 %2362  ;;  %v4724_v22 = vpop.permute.xlu0 %2357 }
 0x28c   : > { %6602 = vst [vmem:[#allocation223_spill] sm:$0xff] %v4722_v32  ;;  %6603 = vst [vmem:[#allocation224_spill] sm:$0xff] %v4724_v22  ;;  %2798 = vperm.xlu1 %3547, %v2642_v15   ;;  %2793 = vperm.xlu0 %3546, %v2641_v50   ;;  %v4744_v22 = vmul.f32 %v4633_v55, %v3786_v48  ;;  %v4748_v32 = vmul.f32 %v4633_v55, %v6604_v40  ;;  %v6606_v15 = vld [vmem:[#allocation4_spill] sm:$0xff]  ;;  %v6608_v48 = vld [vmem:[#allocation6_spill] sm:$0xff] }
 0x28d   : > { %v4758_v50 = vmul.f32 %v4633_v55, %v6606_v15  ;;  %v4766_v42 = vmul.f32 %v4633_v55, %v6608_v48  ;;  %v6609_v40 = vld [vmem:[#allocation14_spill] sm:$0xff]  ;;  %v4776_v15 = vmul.f32 %v4633_v55, %v6611_v54  ;;  %v768_v48 = vmul.f32 %v4720_v31, %v6613_v62 }
 0x28e   : > { %v766_v41 = vmul.f32 %v4720_v31, %v6609_v40  ;;  %v6616_v40 = vld [vmem:[#allocation17_spill] sm:$0xff]  ;;  %v769_v54 = vmul.f32 %v4720_v31, %v6618_v9  ;;  %v6620_v62 = vld [vmem:[#allocation10_spill] sm:$0xff]  ;;  %v4808_v9 = vmul.f32 %v4633_v55, %v6623_v61  ;;  %v4817_v14 = vadd.f32 %v765_v47, %v4643_v30 }
 0x28f   : > { %v4782_v57 = vpop.permute.xlu1 %2372  ;;  %v4784_v2 = vpop.permute.xlu0 %2367  ;;  %v767_v1 = vmul.f32 %v4720_v31, %v6616_v40  ;;  %v6622_v40 = vld [vmem:[#allocation21_spill] sm:$0xff]  ;;  %v775_v61 = vmul.f32 %v4720_v31, %v6627_v0  ;;  %v6630_v47 = vld [vmem:[#allocation26_spill] sm:$0xff] }
 0x290   : > { %6614 = vst [vmem:[#allocation2_spill] sm:$0xff] %v4782_v57  ;;  %6615 = vst [vmem:[#allocation3_spill] sm:$0xff] %v4784_v2  ;;  %2808 = vperm.xlu1 %3547, %v2644_v44   ;;  %2803 = vperm.xlu0 %3546, %v2643_v34   ;;  %v4798_v57 = vmul.f32 %v4633_v55, %v6620_v62  ;;  %v6621_v2 = vld [vmem:[#allocation20_spill] sm:$0xff]  ;;  %v771_v60 = vmul.f32 %v4720_v31, %v6622_v40 }
 0x291   : > { %v772_v17 = vmul.f32 %v4720_v31, %v6621_v2  ;;  %v4810_v34 = vadd.f32 %v766_v41, %v470_v25  ;;  %v774_v44 = vmul.f32 %v4720_v31, %v6624_v10  ;;  %v773_v62 = vmul.f32 %v4720_v31, %v6625_v58  ;;  %v6626_v40 = vld [vmem:[#allocation24_spill] sm:$0xff]  ;;  %v6631_v10 = vld [vmem:[#allocation27_spill] sm:$0xff] }
 0x292   : > { %v4820_v2 = vadd.f32 %v768_v48, %v4647_v38  ;;  %v776_v13 = vmul.f32 %v4720_v31, %v6626_v40  ;;  %v4831_v25 = vadd.f32 %v767_v1, %v4639_v29  ;;  %v4834_v58 = vadd.f32 %v770_v18, %v4657_v3  ;;  %v2910_v18 = vld [vmem:[%s6377_s2 + $0x8] sm:$0xff]  ;;  %v6633_v3 = vld [vmem:[#allocation29_spill] sm:$0xff] }
 0x293   : > { %v4826_v41 = vpop.permute.xlu1 %2382  ;;  %v4828_v55 = vpop.permute.xlu0 %2377  ;;  %v4837_v30 = vadd.f32 %v769_v54, %v4661_v45  ;;  %v4840_v38 = vadd.f32 %v772_v17, %v4665_v4  ;;  %v4843_v0 = vadd.f32 %v771_v60, %v4669_v7  ;;  %v778_v48 = vmul.f32 %v4720_v31, %v6630_v47  ;;  %v6632_v45 = vld [vmem:[#allocation28_spill] sm:$0xff] }
 0x294   : > { %6628 = vst [vmem:[#allocation4_spill] sm:$0xff] %v4826_v41  ;;  %6629 = vst [vmem:[#allocation5_spill] sm:$0xff] %v4828_v55  ;;  %2818 = vperm.xlu1 %3547, %v2646_v49   ;;  %2813 = vperm.xlu0 %3546, %v2645_v5   ;;  %v777_v1 = vmul.f32 %v4720_v31, %v6631_v10  ;;  %v2909_v5 = vld [vmem:[%s6377_s2] sm:$0xff]  ;;  %v4856_v17 = vadd.f32 %v774_v44, %v4673_v8  ;;  %v6635_v8 = vld [vmem:[#allocation31_spill] sm:$0xff] }
 0x295   : > { %v4859_v60 = vadd.f32 %v773_v62, %v4677_v11  ;;  %v780_v29 = vmul.f32 %v4720_v31, %v6632_v45  ;;  %v779_v4 = vmul.f32 %v4720_v31, %v6633_v3  ;;  %v4866_v7 = vadd.f32 %v776_v13, %v4681_v12  ;;  %v6634_v49 = vld [vmem:[#allocation30_spill] sm:$0xff]  ;;  %v6638_v47 = vld [vmem:[#allocation32_spill] sm:$0xff]  ;;  %v6639_v45 = vld [vmem:[#allocation33_spill] sm:$0xff] }
 0x296   : > { %v4869_v54 = vadd.f32 %v775_v61, %v4687_v33  ;;  %v782_v40 = vmul.f32 %v4720_v31, %v6634_v49  ;;  %v781_v44 = vmul.f32 %v4720_v31, %v6635_v8  ;;  %v784_v10 = vmul.f32 %v4720_v31, %v6638_v47  ;;  %v6640_v12 = vld [vmem:[#allocation34_spill] sm:$0xff]  ;;  %v6641_v49 = vld [vmem:[#allocation35_spill] sm:$0xff]  ;;  %v6661_v41 = vld [vmem:[#allocation53_spill] sm:$0xff] }
 0x297   : > { %v4875_v11 = vpop.permute.xlu1 %2392  ;;  %v4877_v62 = vpop.permute.xlu0 %2387  ;;  %v783_v13 = vmul.f32 %v4720_v31, %v6639_v45  ;;  %v786_v33 = vmul.f32 %v4720_v31, %v6640_v12  ;;  %v4886_v61 = vadd.f32 %v778_v48, %v4691_v16  ;;  %v4889_v3 = vadd.f32 %v777_v1, %v4695_v19  ;;  %v2912_v45 = vld [vmem:[%s6377_s2 + $0x18] sm:$0xff] }
 0x298   : > { %6636 = vst [vmem:[#allocation6_spill] sm:$0xff] %v4875_v11  ;;  %6637 = vst [vmem:[#allocation14_spill] sm:$0xff] %v4877_v62  ;;  %2952 = vperm.xlu1 %3547, %v2910_v18   ;;  %2947 = vperm.xlu0 %3546, %v2909_v5   ;;  %v785_v8 = vmul.f32 %v4720_v31, %v6641_v49  ;;  %v6642_v62 = vld [vmem:[#allocation36_spill] sm:$0xff]  ;;  %v4902_v16 = vadd.f32 %v780_v29, %v4699_v20  ;;  %v6643_v48 = vld [vmem:[#allocation37_spill] sm:$0xff] }
 0x299   : > { %v788_v47 = vmul.f32 %v4720_v31, %v6642_v62  ;;  %v2911_v18 = vld [vmem:[%s6377_s2 + $0x10] sm:$0xff]  ;;  %v4905_v19 = vadd.f32 %v779_v4, %v4703_v23  ;;  %v787_v1 = vmul.f32 %v4720_v31, %v6643_v48  ;;  %v6644_v5 = vld [vmem:[#allocation38_spill] sm:$0xff]  ;;  %v4912_v12 = vadd.f32 %v782_v40, %v4707_v24  ;;  %v6645_v11 = vld [vmem:[#allocation39_spill] sm:$0xff] }
 0x29a   : > { %v790_v62 = vmul.f32 %v4720_v31, %v6644_v5  ;;  %v4915_v49 = vadd.f32 %v781_v44, %v4711_v27  ;;  %v789_v55 = vmul.f32 %v4720_v31, %v6645_v11  ;;  %v6646_v20 = vld [vmem:[#allocation40_spill] sm:$0xff]  ;;  %v4926_v48 = vadd.f32 %v784_v10, %v4715_v28  ;;  %v6649_v44 = vld [vmem:[#allocation41_spill] sm:$0xff] }
 0x29b   : > { %v792_v29 = vmul.f32 %v4720_v31, %v6646_v20  ;;  %v4921_v23 = vpop.permute.xlu1 %2402  ;;  %v4923_v4 = vpop.permute.xlu0 %2397  ;;  %v4929_v5 = vadd.f32 %v783_v13, %v4728_v35  ;;  %v4932_v24 = vadd.f32 %v786_v33, %v4732_v36  ;;  %v4935_v27 = vadd.f32 %v785_v8, %v4736_v39  ;;  %v6650_v20 = vld [vmem:[#allocation42_spill] sm:$0xff]  ;;  %v2914_v36 = vld [vmem:[%s6377_s2 + $0x28] sm:$0xff]  ;;  %v6652_v8 = vld [vmem:[#allocation44_spill] sm:$0xff] }
 0x29c   : > { %6647 = vst [vmem:[#allocation7_spill] sm:$0xff] %v4921_v23  ;;  %6648 = vst [vmem:[#allocation8_spill] sm:$0xff] %v4923_v4  ;;  %2962 = vperm.xlu1 %3547, %v2912_v45   ;;  %2957 = vperm.xlu0 %3546, %v2911_v18   ;;  %v4938_v40 = vadd.f32 %v788_v47, %v4740_v26  ;;  %v791_v11 = vmul.f32 %v4720_v31, %v6649_v44  ;;  %v4947_v35 = vld [vmem:[%s6376_s1 + $0x2] ss:$0 sm:$0xff]  ;;  %v6651_v13 = vld [vmem:[#allocation43_spill] sm:$0xff] }
 0x29d   : > { %v794_v28 = vmul.f32 %v4720_v31, %v6650_v20  ;;  %v2913_v26 = vld [vmem:[%s6377_s2 + $0x20] sm:$0xff]  ;;  %v4956_v39 = vadd.f32 %v787_v1, %v4744_v22  ;;  %v4959_v10 = vadd.f32 %v790_v62, %v4748_v32  ;;  %v793_v33 = vmul.f32 %v4720_v31, %v6651_v13  ;;  %v6653_v44 = vld [vmem:[#allocation45_spill] sm:$0xff]  ;;  %v6657_v13 = vld [vmem:[#allocation47_spill] sm:$0xff] }
 0x29e   : > { %v796_v47 = vmul.f32 %v4720_v31, %v6652_v8  ;;  %v4966_v45 = vadd.f32 %v789_v55, %v4752_v46  ;;  %v4969_v18 = vadd.f32 %v792_v29, %v4758_v50  ;;  %v795_v20 = vmul.f32 %v4720_v31, %v6653_v44  ;;  %v6654_v22 = vld [vmem:[#allocation46_spill] sm:$0xff]  ;;  %v6659_v55 = vld [vmem:[#allocation51_spill] sm:$0xff] }
 0x29f   : > { %v798_v1 = vmul.f32 %v4720_v31, %v6654_v22  ;;  %v4975_v32 = vpop.permute.xlu1 %2412  ;;  %v4977_v62 = vpop.permute.xlu0 %2407  ;;  %v797_v4 = vmul.f32 %v4720_v31, %v6657_v13  ;;  %v6658_v8 = vld [vmem:[#allocation50_spill] sm:$0xff]  ;;  %v1061_v50 = vmul.f32 %v4947_v35, %v6659_v55  ;;  %v4986_v29 = vadd.f32 %v791_v11, %v4762_v37  ;;  %v6660_v22 = vld [vmem:[#allocation52_spill] sm:$0xff]  ;;  %v2916_v13 = vld [vmem:[%s6377_s2 + $0x38] sm:$0xff] }
 0x2a0   : > { %6655 = vst [vmem:[#allocation15_spill] sm:$0xff] %v4975_v32  ;;  %6656 = vst [vmem:[#allocation16_spill] sm:$0xff] %v4977_v62  ;;  %v1062_v46 = vmul.f32 %v4947_v35, %v6658_v8  ;;  %2972 = vperm.xlu1 %3547, %v2914_v36   ;;  %2967 = vperm.xlu0 %3546, %v2913_v26   ;;  %v4989_v44 = vadd.f32 %v794_v28, %v4766_v42  ;;  %v2915_v36 = vld [vmem:[%s6377_s2 + $0x30] sm:$0xff]  ;;  %v6662_v11 = vld [vmem:[#allocation54_spill] sm:$0xff] }
 0x2a1   : > { %v1064_v23 = vmul.f32 %v4947_v35, %v6660_v22  ;;  %v1063_v31 = vmul.f32 %v4947_v35, %v6661_v41  ;;  %v5002_v37 = vadd.f32 %v793_v33, %v4772_v43  ;;  %v5005_v42 = vadd.f32 %v796_v47, %v4776_v15  ;;  %v6663_v26 = vld [vmem:[#allocation55_spill] sm:$0xff]  ;;  %v6664_v22 = vld [vmem:[#allocation56_spill] sm:$0xff]  ;;  %v6665_v43 = vld [vmem:[#allocation57_spill] sm:$0xff] }
 0x2a2   : > { %v1066_v28 = vmul.f32 %v4947_v35, %v6662_v11  ;;  %v1065_v41 = vmul.f32 %v4947_v35, %v6663_v26  ;;  %v5012_v8 = vadd.f32 %v795_v20, %v4794_v53  ;;  %v5015_v55 = vadd.f32 %v798_v1, %v4798_v57  ;;  %v6668_v1 = vld [vmem:[#allocation58_spill] sm:$0xff] }
 0x2a3   : > { %v1068_v62 = vmul.f32 %v4947_v35, %v6664_v22  ;;  %v1067_v33 = vmul.f32 %v4947_v35, %v6665_v43  ;;  %v5021_v15 = vpop.permute.xlu1 %2422  ;;  %v5023_v47 = vpop.permute.xlu0 %2417  ;;  %v5026_v11 = vadd.f32 %v797_v4, %v4808_v9  ;;  %v5029_v26 = vadd.f32 %v1062_v46, %v4810_v34  ;;  %v6669_v43 = vld [vmem:[#allocation59_spill] sm:$0xff]  ;;  %v6671_v46 = vld [vmem:[#allocation61_spill] sm:$0xff] }
 0x2a4   : > { %6666 = vst [vmem:[#allocation17_spill] sm:$0xff] %v5021_v15  ;;  %6667 = vst [vmem:[#allocation18_spill] sm:$0xff] %v5023_v47  ;;  %v5032_v53 = vadd.f32 %v1061_v50, %v4817_v14  ;;  %2982 = vperm.xlu1 %3547, %v2916_v13   ;;  %2977 = vperm.xlu0 %3546, %v2915_v36   ;;  %v5035_v57 = vadd.f32 %v1064_v23, %v4820_v2  ;;  %v2918_v34 = vld [vmem:[%s6377_s2 + $0x48] sm:$0xff]  ;;  %v2917_v14 = vld [vmem:[%s6377_s2 + $0x40] sm:$0xff] }
 0x2a5   : > { %v5038_v20 = vadd.f32 %v1063_v31, %v4831_v25  ;;  %v1070_v22 = vmul.f32 %v4947_v35, %v6668_v1  ;;  %v1069_v9 = vmul.f32 %v4947_v35, %v6669_v43  ;;  %v5051_v2 = vadd.f32 %v1066_v28, %v4834_v58  ;;  %v6670_v23 = vld [vmem:[#allocation60_spill] sm:$0xff]  ;;  %v6672_v36 = vld [vmem:[#allocation62_spill] sm:$0xff]  ;;  %v6673_v58 = vld [vmem:[#allocation63_spill] sm:$0xff] }
 0x2a6   : > { %v5054_v25 = vadd.f32 %v1065_v41, %v4837_v30  ;;  %v1072_v4 = vmul.f32 %v4947_v35, %v6670_v23  ;;  %v1071_v50 = vmul.f32 %v4947_v35, %v6671_v46  ;;  %v5061_v31 = vadd.f32 %v1068_v62, %v4840_v38  ;;  %v6676_v43 = vld [vmem:[#allocation64_spill] sm:$0xff]  ;;  %v6677_v46 = vld [vmem:[#allocation65_spill] sm:$0xff]  ;;  %v6678_v62 = vld [vmem:[#allocation66_spill] sm:$0xff] }
 0x2a7   : > { %v5064_v13 = vadd.f32 %v1067_v33, %v4843_v0  ;;  %v1074_v1 = vmul.f32 %v4947_v35, %v6672_v36  ;;  %v1073_v28 = vmul.f32 %v4947_v35, %v6673_v58  ;;  %v5070_v30 = vpop.permute.xlu1 %2432  ;;  %v5072_v41 = vpop.permute.xlu0 %2427  ;;  %v1076_v23 = vmul.f32 %v4947_v35, %v6676_v43  ;;  %v6679_v58 = vld [vmem:[#allocation67_spill] sm:$0xff] }
 0x2a8   : > { %6674 = vst [vmem:[#allocation19_spill] sm:$0xff] %v5070_v30  ;;  %6675 = vst [vmem:[#allocation9_spill] sm:$0xff] %v5072_v41  ;;  %v1075_v38 = vmul.f32 %v4947_v35, %v6677_v46  ;;  %v1078_v0 = vmul.f32 %v4947_v35, %v6678_v62  ;;  %2992 = vperm.xlu1 %3547, %v2918_v34   ;;  %2987 = vperm.xlu0 %3546, %v2917_v14   ;;  %v6680_v30 = vld [vmem:[#allocation68_spill] sm:$0xff]  ;;  %v2920_v46 = vld [vmem:[%s6377_s2 + $0x58] sm:$0xff] }
 0x2a9   : > { %v5081_v33 = vadd.f32 %v1070_v22, %v4856_v17  ;;  %v5084_v36 = vadd.f32 %v1069_v9, %v4859_v60  ;;  %v1077_v41 = vmul.f32 %v4947_v35, %v6679_v58  ;;  %v1080_v43 = vmul.f32 %v4947_v35, %v6680_v30  ;;  %v2919_v34 = vld [vmem:[%s6377_s2 + $0x50] sm:$0xff]  ;;  %v6681_v22 = vld [vmem:[#allocation69_spill] sm:$0xff]  ;;  %v6682_v14 = vld [vmem:[#allocation70_spill] sm:$0xff] }
 0x2aa   : > { %v5097_v17 = vadd.f32 %v1072_v4, %v4866_v7  ;;  %v5100_v60 = vadd.f32 %v1071_v50, %v4869_v54  ;;  %v1079_v9 = vmul.f32 %v4947_v35, %v6681_v22  ;;  %v1082_v30 = vmul.f32 %v4947_v35, %v6682_v14  ;;  %v6683_v47 = vld [vmem:[#allocation71_spill] sm:$0xff]  ;;  %v6684_v7 = vld [vmem:[#allocation72_spill] sm:$0xff] }
 0x2ab   : > { %v5107_v62 = vadd.f32 %v1074_v1, %v4886_v61  ;;  %v5110_v58 = vadd.f32 %v1073_v28, %v4889_v3  ;;  %v1081_v15 = vmul.f32 %v4947_v35, %v6683_v47  ;;  %v1084_v4 = vmul.f32 %v4947_v35, %v6684_v7  ;;  %v5116_v54 = vpop.permute.xlu1 %2442  ;;  %v5118_v50 = vpop.permute.xlu0 %2437  ;;  %v6687_v1 = vld [vmem:[#allocation73_spill] sm:$0xff]  ;;  %v6688_v7 = vld [vmem:[#allocation74_spill] sm:$0xff] }
 0x2ac   : > { %6685 = vst [vmem:[#allocation10_spill] sm:$0xff] %v5116_v54  ;;  %6686 = vst [vmem:[#allocation20_spill] sm:$0xff] %v5118_v50  ;;  %v5121_v22 = vadd.f32 %v1076_v23, %v4902_v16  ;;  %v5124_v14 = vadd.f32 %v1075_v38, %v4905_v19  ;;  %v5127_v61 = vadd.f32 %v1078_v0, %v4912_v12  ;;  %3002 = vperm.xlu1 %3547, %v2920_v46   ;;  %v2922_v19 = vld [vmem:[%s6377_s2 + $0x68] sm:$0xff]  ;;  %v2921_v12 = vld [vmem:[%s6377_s2 + $0x60] sm:$0xff] }
 0x2ad   : > { %2997 = vperm.xlu0 %3546, %v2919_v34   ;;  %v5130_v3 = vadd.f32 %v1077_v41, %v4915_v49  ;;  %v5133_v47 = vadd.f32 %v1080_v43, %v4926_v48  ;;  %v1083_v28 = vmul.f32 %v4947_v35, %v6687_v1  ;;  %v1086_v16 = vmul.f32 %v4947_v35, %v6688_v7  ;;  %v6689_v41 = vld [vmem:[#allocation75_spill] sm:$0xff]  ;;  %v6690_v38 = vld [vmem:[#allocation76_spill] sm:$0xff]  ;;  %v6691_v34 = vld [vmem:[#allocation77_spill] sm:$0xff] }
 0x2ae   : > { %v5146_v49 = vadd.f32 %v1079_v9, %v4929_v5  ;;  %v5149_v48 = vadd.f32 %v1082_v30, %v4932_v24  ;;  %v1085_v23 = vmul.f32 %v4947_v35, %v6689_v41  ;;  %v1088_v0 = vmul.f32 %v4947_v35, %v6690_v38  ;;  %v6692_v5 = vld [vmem:[#allocation78_spill] sm:$0xff]  ;;  %v6697_v41 = vld [vmem:[#allocation81_spill] sm:$0xff]  ;;  %v6699_v50 = vld [vmem:[#allocation83_spill] sm:$0xff] }
 0x2af   : > { %v5156_v43 = vadd.f32 %v1081_v15, %v4935_v27  ;;  %v5159_v46 = vadd.f32 %v1084_v4, %v4938_v40  ;;  %v1087_v1 = vmul.f32 %v4947_v35, %v6691_v34  ;;  %v1090_v9 = vmul.f32 %v4947_v35, %v6692_v5  ;;  %v5168_v24 = vld [vmem:[%s6376_s1 + $0x3] ss:$0 sm:$0xff]  ;;  %v5170_v30 = vpop.permute.xlu1 %2452  ;;  %v5172_v7 = vpop.permute.xlu0 %2447  ;;  %v6695_v27 = vld [vmem:[#allocation79_spill] sm:$0xff]  ;;  %v6696_v40 = vld [vmem:[#allocation80_spill] sm:$0xff] }
 0x2b0   : > { %6693 = vst [vmem:[#allocation21_spill] sm:$0xff] %v5170_v30  ;;  %6694 = vst [vmem:[#allocation11_spill] sm:$0xff] %v5172_v7  ;;  %v1089_v15 = vmul.f32 %v4947_v35, %v6695_v27  ;;  %v1092_v4 = vmul.f32 %v4947_v35, %v6696_v40  ;;  %v1091_v38 = vmul.f32 %v4947_v35, %v6697_v41  ;;  %3012 = vperm.xlu1 %3547, %v2922_v19   ;;  %v6698_v30 = vld [vmem:[#allocation82_spill] sm:$0xff]  ;;  %v2924_v40 = vld [vmem:[%s6377_s2 + $0x78] sm:$0xff] }
 0x2b1   : > { %3007 = vperm.xlu0 %3546, %v2921_v12   ;;  %v5181_v34 = vadd.f32 %v1083_v28, %v4956_v39  ;;  %v5184_v5 = vadd.f32 %v1086_v16, %v4959_v10  ;;  %v1094_v7 = vmul.f32 %v4947_v35, %v6698_v30  ;;  %v1093_v27 = vmul.f32 %v4947_v35, %v6699_v50  ;;  %v2923_v19 = vld [vmem:[%s6377_s2 + $0x70] sm:$0xff]  ;;  %v6700_v28 = vld [vmem:[#allocation86_spill] sm:$0xff]  ;;  %v6701_v12 = vld [vmem:[#allocation87_spill] sm:$0xff] }
 0x2b2   : > { %v5197_v39 = vadd.f32 %v1085_v23, %v4966_v45  ;;  %v5200_v10 = vadd.f32 %v1088_v0, %v4969_v18  ;;  %v1358_v16 = vmul.f32 %v5168_v24, %v6700_v28  ;;  %v1357_v35 = vmul.f32 %v5168_v24, %v6701_v12  ;;  %v6702_v41 = vld [vmem:[#allocation88_spill] sm:$0xff]  ;;  %v6703_v45 = vld [vmem:[#allocation89_spill] sm:$0xff] }
 0x2b3   : > { %v5207_v50 = vadd.f32 %v1087_v1, %v4986_v29  ;;  %v5210_v30 = vadd.f32 %v1090_v9, %v4989_v44  ;;  %v1360_v54 = vmul.f32 %v5168_v24, %v6702_v41  ;;  %v1359_v23 = vmul.f32 %v5168_v24, %v6703_v45  ;;  %v5216_v18 = vpop.permute.xlu1 %2462  ;;  %v5218_v0 = vpop.permute.xlu0 %2457  ;;  %v6706_v9 = vld [vmem:[#allocation90_spill] sm:$0xff]  ;;  %v6707_v45 = vld [vmem:[#allocation91_spill] sm:$0xff] }
 0x2b4   : > { %6704 = vst [vmem:[#allocation22_spill] sm:$0xff] %v5216_v18  ;;  %6705 = vst [vmem:[#allocation23_spill] sm:$0xff] %v5218_v0  ;;  %v5221_v28 = vadd.f32 %v1089_v15, %v5002_v37  ;;  %v5224_v12 = vadd.f32 %v1092_v4, %v5005_v42  ;;  %v5227_v29 = vadd.f32 %v1091_v38, %v5012_v8  ;;  %3022 = vperm.xlu1 %3547, %v2924_v40   ;;  %v2926_v42 = vld [vmem:[%s6377_s2 + $0x88] sm:$0xff]  ;;  %v2925_v8 = vld [vmem:[%s6377_s2 + $0x80] sm:$0xff] }
 0x2b5   : > { %3017 = vperm.xlu0 %3546, %v2923_v19   ;;  %v5230_v44 = vadd.f32 %v1094_v7, %v5015_v55  ;;  %v5233_v1 = vadd.f32 %v1093_v27, %v5026_v11  ;;  %v1362_v41 = vmul.f32 %v5168_v24, %v6706_v9  ;;  %v1361_v37 = vmul.f32 %v5168_v24, %v6707_v45  ;;  %v6708_v7 = vld [vmem:[#allocation92_spill] sm:$0xff]  ;;  %v6709_v4 = vld [vmem:[#allocation93_spill] sm:$0xff]  ;;  %v6710_v19 = vld [vmem:[#allocation94_spill] sm:$0xff] }
 0x2b6   : > { %v5246_v55 = vadd.f32 %v1358_v16, %v5029_v26  ;;  %v5249_v11 = vadd.f32 %v1357_v35, %v5032_v53  ;;  %v1364_v15 = vmul.f32 %v5168_v24, %v6708_v7  ;;  %v1363_v38 = vmul.f32 %v5168_v24, %v6709_v4  ;;  %v6711_v26 = vld [vmem:[#allocation95_spill] sm:$0xff]  ;;  %v6714_v45 = vld [vmem:[#allocation96_spill] sm:$0xff]  ;;  %v6715_v4 = vld [vmem:[#allocation97_spill] sm:$0xff] }
 0x2b7   : > { %v5256_v27 = vadd.f32 %v1360_v54, %v5035_v57  ;;  %v5259_v40 = vadd.f32 %v1359_v23, %v5038_v20  ;;  %v1366_v9 = vmul.f32 %v5168_v24, %v6710_v19  ;;  %v1365_v16 = vmul.f32 %v5168_v24, %v6711_v26  ;;  %v5265_v53 = vpop.permute.xlu1 %2472  ;;  %v5267_v35 = vpop.permute.xlu0 %2467  ;;  %v6716_v54 = vld [vmem:[#allocation98_spill] sm:$0xff]  ;;  %v6717_v26 = vld [vmem:[#allocation99_spill] sm:$0xff] }
 0x2b8   : > { %6712 = vst [vmem:[#allocation24_spill] sm:$0xff] %v5265_v53  ;;  %6713 = vst [vmem:[#allocation25_spill] sm:$0xff] %v5267_v35  ;;  %v1368_v7 = vmul.f32 %v5168_v24, %v6714_v45  ;;  %v1367_v57 = vmul.f32 %v5168_v24, %v6715_v4  ;;  %v1370_v20 = vmul.f32 %v5168_v24, %v6716_v54  ;;  %3032 = vperm.xlu1 %3547, %v2926_v42   ;;  %v6718_v53 = vld [vmem:[#allocation100_spill] sm:$0xff]  ;;  %v2928_v4 = vld [vmem:[%s6377_s2 + $0x98] sm:$0xff] }
 0x2b9   : > { %3027 = vperm.xlu0 %3546, %v2925_v8   ;;  %v5276_v23 = vadd.f32 %v1362_v41, %v5051_v2  ;;  %v5279_v19 = vadd.f32 %v1361_v37, %v5054_v25  ;;  %v1369_v35 = vmul.f32 %v5168_v24, %v6717_v26  ;;  %v1372_v45 = vmul.f32 %v5168_v24, %v6718_v53  ;;  %v2927_v42 = vld [vmem:[%s6377_s2 + $0x90] sm:$0xff]  ;;  %v6719_v41 = vld [vmem:[#allocation101_spill] sm:$0xff]  ;;  %v6720_v8 = vld [vmem:[#allocation102_spill] sm:$0xff] }
 0x2ba   : > { %v5292_v2 = vadd.f32 %v1364_v15, %v5061_v31  ;;  %v5295_v25 = vadd.f32 %v1363_v38, %v5064_v13  ;;  %v1371_v37 = vmul.f32 %v5168_v24, %v6719_v41  ;;  %v1374_v53 = vmul.f32 %v5168_v24, %v6720_v8  ;;  %v6721_v0 = vld [vmem:[#allocation103_spill] sm:$0xff]  ;;  %v6722_v31 = vld [vmem:[#allocation104_spill] sm:$0xff] }
 0x2bb   : > { %v5302_v54 = vadd.f32 %v1366_v9, %v5081_v33  ;;  %v5305_v26 = vadd.f32 %v1365_v16, %v5084_v36  ;;  %v1373_v18 = vmul.f32 %v5168_v24, %v6721_v0  ;;  %v1376_v15 = vmul.f32 %v5168_v24, %v6722_v31  ;;  %v5311_v13 = vpop.permute.xlu1 %2482  ;;  %v5313_v38 = vpop.permute.xlu0 %2477  ;;  %v6725_v9 = vld [vmem:[#allocation105_spill] sm:$0xff]  ;;  %v6726_v31 = vld [vmem:[#allocation106_spill] sm:$0xff] }
 0x2bc   : > { %6723 = vst [vmem:[#allocation26_spill] sm:$0xff] %v5311_v13  ;;  %6724 = vst [vmem:[#allocation27_spill] sm:$0xff] %v5313_v38  ;;  %v5316_v41 = vadd.f32 %v1368_v7, %v5097_v17  ;;  %v5319_v8 = vadd.f32 %v1367_v57, %v5100_v60  ;;  %v5322_v33 = vadd.f32 %v1370_v20, %v5107_v62  ;;  %3042 = vperm.xlu1 %3547, %v2928_v4   ;;  %v2930_v60 = vld [vmem:[%s6377_s2 + $0xa8] sm:$0xff]  ;;  %v2929_v62 = vld [vmem:[%s6377_s2 + $0xa0] sm:$0xff] }
 0x2bd   : > { %3037 = vperm.xlu0 %3546, %v2927_v42   ;;  %v5325_v36 = vadd.f32 %v1369_v35, %v5110_v58  ;;  %v5328_v0 = vadd.f32 %v1372_v45, %v5121_v22  ;;  %v1375_v16 = vmul.f32 %v5168_v24, %v6725_v9  ;;  %v1378_v17 = vmul.f32 %v5168_v24, %v6726_v31  ;;  %v6727_v35 = vld [vmem:[#allocation107_spill] sm:$0xff]  ;;  %v6728_v57 = vld [vmem:[#allocation108_spill] sm:$0xff]  ;;  %v6729_v42 = vld [vmem:[#allocation109_spill] sm:$0xff] }
 0x2be   : > { %v5341_v58 = vadd.f32 %v1371_v37, %v5124_v14  ;;  %v5344_v22 = vadd.f32 %v1374_v53, %v5127_v61  ;;  %v1377_v7 = vmul.f32 %v5168_v24, %v6727_v35  ;;  %v1380_v20 = vmul.f32 %v5168_v24, %v6728_v57  ;;  %v6730_v14 = vld [vmem:[#allocation110_spill] sm:$0xff]  ;;  %v6733_v31 = vld [vmem:[#allocation111_spill] sm:$0xff]  ;;  %v6734_v57 = vld [vmem:[#allocation112_spill] sm:$0xff] }
 0x2bf   : > { %v5351_v45 = vadd.f32 %v1373_v18, %v5130_v3  ;;  %v5354_v4 = vadd.f32 %v1376_v15, %v5133_v47  ;;  %v1379_v9 = vmul.f32 %v5168_v24, %v6729_v42  ;;  %v1382_v37 = vmul.f32 %v5168_v24, %v6730_v14  ;;  %v5360_v61 = vpop.permute.xlu1 %2492  ;;  %v5362_v53 = vpop.permute.xlu0 %2487  ;;  %v6735_v18 = vld [vmem:[#allocation113_spill] sm:$0xff]  ;;  %v6736_v14 = vld [vmem:[#allocation114_spill] sm:$0xff] }
 0x2c0   : > { %6731 = vst [vmem:[#allocation28_spill] sm:$0xff] %v5360_v61  ;;  %6732 = vst [vmem:[#allocation29_spill] sm:$0xff] %v5362_v53  ;;  %v1381_v35 = vmul.f32 %v5168_v24, %v6733_v31  ;;  %v1384_v3 = vmul.f32 %v5168_v24, %v6734_v57  ;;  %v1383_v47 = vmul.f32 %v5168_v24, %v6735_v18  ;;  %3052 = vperm.xlu1 %3547, %v2930_v60   ;;  %v6737_v61 = vld [vmem:[#allocation115_spill] sm:$0xff]  ;;  %v2932_v57 = vld [vmem:[%s6377_s2 + $0xb8] sm:$0xff] }
 0x2c1   : > { %3047 = vperm.xlu0 %3546, %v2929_v62   ;;  %v5371_v15 = vadd.f32 %v1375_v16, %v5146_v49  ;;  %v5374_v42 = vadd.f32 %v1378_v17, %v5149_v48  ;;  %v1386_v53 = vmul.f32 %v5168_v24, %v6736_v14  ;;  %v1385_v31 = vmul.f32 %v5168_v24, %v6737_v61  ;;  %v2931_v60 = vld [vmem:[%s6377_s2 + $0xb0] sm:$0xff]  ;;  %v6739_v62 = vld [vmem:[#allocation117_spill] sm:$0xff]  ;;  %v5399_v18 = vld [vmem:[%s6376_s1 + $0x4] ss:$0 sm:$0xff] }
 0x2c2   : > { %v5387_v49 = vadd.f32 %v1377_v7, %v5156_v43  ;;  %v5390_v48 = vadd.f32 %v1380_v20, %v5159_v46  ;;  %v6738_v16 = vld [vmem:[#allocation116_spill] sm:$0xff]  ;;  %v1387_v61 = vmul.f32 %v5168_v24, %v6739_v62  ;;  %v5402_v14 = vadd.f32 %v1379_v9, %v5181_v34  ;;  %v6740_v7 = vld [vmem:[#allocation118_spill] sm:$0xff]  ;;  %v6741_v20 = vld [vmem:[#allocation119_spill] sm:$0xff] }
 0x2c3   : > { %v1388_v17 = vmul.f32 %v5168_v24, %v6738_v16  ;;  %v5405_v43 = vadd.f32 %v1382_v37, %v5184_v5  ;;  %v1390_v46 = vmul.f32 %v5168_v24, %v6740_v7  ;;  %v1389_v16 = vmul.f32 %v5168_v24, %v6741_v20  ;;  %v5411_v38 = vpop.permute.xlu1 %2502  ;;  %v5413_v62 = vpop.permute.xlu0 %2497  ;;  %v6742_v9 = vld [vmem:[#allocation122_spill] sm:$0xff]  ;;  %v6743_v7 = vld [vmem:[#allocation123_spill] sm:$0xff] }
 0x2c4   : > { %v5416_v13 = vadd.f32 %v1381_v35, %v5197_v39  ;;  %v5419_v32 = vadd.f32 %v1384_v3, %v5200_v10  ;;  %v5422_v34 = vadd.f32 %v1383_v47, %v5207_v50  ;;  %3062 = vperm.xlu1 %3547, %v2932_v57   ;;  %v5425_v5 = vadd.f32 %v1386_v53, %v5210_v30  ;;  %v2934_v10 = vld [vmem:[%s6377_s2 + $0xc8] sm:$0xff]  ;;  %v2933_v50 = vld [vmem:[%s6377_s2 + $0xc0] sm:$0xff]  ;;  %v6744_v53 = vld [vmem:[#allocation124_spill] sm:$0xff] }
 0x2c5   : > { %3057 = vperm.xlu0 %3546, %v2931_v60   ;;  %v5428_v24 = vadd.f32 %v1385_v31, %v5221_v28  ;;  %v1654_v37 = vmul.f32 %v5399_v18, %v6742_v9  ;;  %v1653_v39 = vmul.f32 %v5399_v18, %v6743_v7  ;;  %v5441_v30 = vadd.f32 %v1388_v17, %v5224_v12  ;;  %v6745_v3 = vld [vmem:[#allocation125_spill] sm:$0xff]  ;;  %v6746_v60 = vld [vmem:[#allocation126_spill] sm:$0xff]  ;;  %v6747_v12 = vld [vmem:[#allocation127_spill] sm:$0xff] }
 0x2c6   : > { %v5444_v28 = vadd.f32 %v1387_v61, %v5227_v29  ;;  %v1656_v35 = vmul.f32 %v5399_v18, %v6744_v53  ;;  %v1655_v47 = vmul.f32 %v5399_v18, %v6745_v3  ;;  %v5451_v31 = vadd.f32 %v1390_v46, %v5230_v44  ;;  %v6748_v9 = vld [vmem:[#allocation128_spill] sm:$0xff]  ;;  %v6749_v53 = vld [vmem:[#allocation129_spill] sm:$0xff]  ;;  %v6750_v3 = vld [vmem:[#allocation130_spill] sm:$0xff] }
 0x2c7   : > { %v5454_v57 = vadd.f32 %v1389_v16, %v5233_v1  ;;  %v1658_v20 = vmul.f32 %v5399_v18, %v6746_v60  ;;  %v1657_v17 = vmul.f32 %v5399_v18, %v6747_v12  ;;  %v5460_v29 = vpop.permute.xlu1 %2512  ;;  %v5462_v61 = vpop.permute.xlu0 %2507  ;;  %v1660_v7 = vmul.f32 %v5399_v18, %v6748_v9  ;;  %v2936_v9 = vld [vmem:[%s6377_s2 + $0xd8] sm:$0xff] }
 0x2c8   : > { %v1659_v44 = vmul.f32 %v5399_v18, %v6749_v53  ;;  %v1662_v1 = vmul.f32 %v5399_v18, %v4336_v59  ;;  %3072 = vperm.xlu1 %3547, %v2934_v10   ;;  %v5471_v46 = vadd.f32 %v1654_v37, %v5246_v55  ;;  %v5474_v16 = vadd.f32 %v1653_v39, %v5249_v11  ;;  %v2935_v59 = vld [vmem:[%s6377_s2 + $0xd0] sm:$0xff] }
 0x2c9   : > { %3067 = vperm.xlu0 %3546, %v2933_v50   ;;  %v1661_v60 = vmul.f32 %v5399_v18, %v6750_v3  ;;  %v1664_v12 = vmul.f32 %v5399_v18, %v4342_v63  ;;  %v5487_v55 = vadd.f32 %v1656_v35, %v5256_v27  ;;  %v5490_v11 = vadd.f32 %v1655_v47, %v5259_v40  ;;  %v6752_v47 = vld [vmem:[#allocation131_spill] sm:$0xff] }
 0x2ca   : > { %v1663_v37 = vmul.f32 %v5399_v18, %v4344_v52  ;;  %v1666_v63 = vmul.f32 %v5399_v18, %v4348_v51  ;;  %v5497_v39 = vadd.f32 %v1658_v20, %v5276_v23  ;;  %v5500_v10 = vadd.f32 %v1657_v17, %v5279_v19  ;;  %v6753_v20 = vld [vmem:[#allocation132_spill] sm:$0xff]  ;;  %v6754_v17 = vld [vmem:[#allocation133_spill] sm:$0xff] }
 0x2cb   : > { %v1665_v50 = vmul.f32 %v5399_v18, %v4350_v21  ;;  %v1668_v27 = vmul.f32 %v5399_v18, %v4354_v6  ;;  %v5506_v40 = vpop.permute.xlu1 %2522  ;;  %v5508_v35 = vpop.permute.xlu0 %2517  ;;  %v5511_v52 = vadd.f32 %v1660_v7, %v5292_v2  ;;  %v5514_v51 = vadd.f32 %v1659_v44, %v5295_v25  ;;  %v2938_v25 = vld [vmem:[%s6377_s2 + $0xe8] sm:$0xff] }
 0x2cc   : > { %6751 = vst [vmem:[#allocation30_spill] sm:$0xff] %v5508_v35  ;;  %v5517_v23 = vadd.f32 %v1662_v1, %v5302_v54  ;;  %3082 = vperm.xlu1 %3547, %v2936_v9   ;;  %v5520_v21 = vadd.f32 %v1661_v60, %v5305_v26  ;;  %v5523_v6 = vadd.f32 %v1664_v12, %v5316_v41  ;;  %v2937_v54 = vld [vmem:[%s6377_s2 + $0xe0] sm:$0xff]  ;;  %v6759_v9 = vld [vmem:[#allocation136_spill] sm:$0xff] }
 0x2cd   : > { %3077 = vperm.xlu0 %3546, %v2935_v59   ;;  %v1667_v19 = vmul.f32 %v5399_v18, %v4356_v56  ;;  %v1670_v2 = vmul.f32 %v5399_v18, %v6752_v47  ;;  %v5536_v26 = vadd.f32 %v1663_v37, %v5319_v8  ;;  %v5539_v41 = vadd.f32 %v1666_v63, %v5322_v33  ;;  %v6755_v1 = vld [vmem:[#allocation134_spill] sm:$0xff]  ;;  %v6756_v8 = vld [vmem:[#allocation135_spill] sm:$0xff]  ;;  %v6760_v37 = vld [vmem:[#allocation137_spill] sm:$0xff] }
 0x2ce   : > { %v1669_v56 = vmul.f32 %v5399_v18, %v6753_v20  ;;  %v1672_v7 = vmul.f32 %v5399_v18, %v6754_v17  ;;  %v5546_v53 = vadd.f32 %v1665_v50, %v5325_v36  ;;  %v5549_v44 = vadd.f32 %v1668_v27, %v5328_v0  ;;  %v6761_v63 = vld [vmem:[#allocation138_spill] sm:$0xff]  ;;  %v6762_v47 = vld [vmem:[#allocation139_spill] sm:$0xff]  ;;  %v6763_v17 = vld [vmem:[#allocation140_spill] sm:$0xff] }
 0x2cf   : > { %v1671_v3 = vmul.f32 %v5399_v18, %v6755_v1  ;;  %v1674_v60 = vmul.f32 %v5399_v18, %v6756_v8  ;;  %v5555_v33 = vpop.permute.xlu1 %2532  ;;  %v5557_v12 = vpop.permute.xlu0 %2527  ;;  %v1673_v59 = vmul.f32 %v5399_v18, %v6759_v9  ;;  %v1676_v36 = vmul.f32 %v5399_v18, %v6760_v37  ;;  %v2940_v8 = vld [vmem:[%s6377_s2 + $0xf8] sm:$0xff] }
 0x2d0   : > { %6757 = vst [vmem:[#allocation31_spill] sm:$0xff] %v5555_v33  ;;  %6758 = vst [vmem:[#allocation32_spill] sm:$0xff] %v5557_v12  ;;  %v1675_v0 = vmul.f32 %v5399_v18, %v6761_v63  ;;  %3092 = vperm.xlu1 %3547, %v2938_v25   ;;  %v5566_v50 = vadd.f32 %v1667_v19, %v5341_v58  ;;  %v5569_v27 = vadd.f32 %v1670_v2, %v5344_v22  ;;  %v2939_v25 = vld [vmem:[%s6377_s2 + $0xf0] sm:$0xff]  ;;  %v6764_v19 = vld [vmem:[#allocation141_spill] sm:$0xff] }
 0x2d1   : > { %3087 = vperm.xlu0 %3546, %v2937_v54   ;;  %v1678_v20 = vmul.f32 %v5399_v18, %v6762_v47  ;;  %v1677_v1 = vmul.f32 %v5399_v18, %v6763_v17  ;;  %v5582_v58 = vadd.f32 %v1669_v56, %v5351_v45  ;;  %v5585_v22 = vadd.f32 %v1672_v7, %v5354_v4  ;;  %v6765_v54 = vld [vmem:[#allocation142_spill] sm:$0xff]  ;;  %v6766_v47 = vld [vmem:[#allocation143_spill] sm:$0xff]  ;;  %v6767_v56 = vld [vmem:[#allocation144_spill] sm:$0xff] }
 0x2d2   : > { %v1680_v2 = vmul.f32 %v5399_v18, %v6764_v19  ;;  %v1679_v9 = vmul.f32 %v5399_v18, %v6765_v54  ;;  %v5592_v37 = vadd.f32 %v1671_v3, %v5371_v15  ;;  %v5595_v63 = vadd.f32 %v1674_v60, %v5374_v42  ;;  %v5617_v3 = vld [vmem:[%s6376_s1 + $0x5] ss:$0 sm:$0xff]  ;;  %v6782_v33 = vld [vmem:[#allocation157_spill] sm:$0xff] }
 0x2d3   : > { %v1682_v45 = vmul.f32 %v5399_v18, %v6766_v47  ;;  %v1681_v4 = vmul.f32 %v5399_v18, %v6767_v56  ;;  %v5601_v7 = vpop.permute.xlu1 %2658  ;;  %v5603_v17 = vpop.permute.xlu0 %2653  ;;  %v5606_v19 = vadd.f32 %v1673_v59, %v5387_v49  ;;  %v5609_v15 = vadd.f32 %v1676_v36, %v5390_v48  ;;  %v6770_v49 = vld [vmem:[#allocation145_spill] sm:$0xff]  ;;  %v6771_v59 = vld [vmem:[#allocation146_spill] sm:$0xff] }
 0x2d4   : > { %6768 = vst [vmem:[#allocation33_spill] sm:$0xff] %v5601_v7  ;;  %6769 = vst [vmem:[#allocation34_spill] sm:$0xff] %v5603_v17  ;;  %v5612_v42 = vadd.f32 %v1675_v0, %v5402_v14  ;;  %3102 = vperm.xlu1 %3547, %v2940_v8   ;;  %v5620_v60 = vadd.f32 %v1678_v20, %v5405_v43  ;;  %v5623_v54 = vadd.f32 %v1677_v1, %v5416_v13  ;;  %v2941_v36 = vld [vmem:[%s6377_s2 + $0x100] sm:$0xff]  ;;  %v2647_v0 = vld [vmem:[%s3610_s23 + $0x136] sm:$0xff] }
 0x2d5   : > { %3097 = vperm.xlu0 %3546, %v2939_v25   ;;  %v1684_v48 = vmul.f32 %v5399_v18, %v6770_v49  ;;  %v1683_v14 = vmul.f32 %v5399_v18, %v6771_v59  ;;  %v5634_v8 = vadd.f32 %v1680_v2, %v5419_v32  ;;  %v5637_v43 = vadd.f32 %v1679_v9, %v5422_v34  ;;  %v6772_v20 = vld [vmem:[#allocation147_spill] sm:$0xff]  ;;  %v6773_v1 = vld [vmem:[#allocation148_spill] sm:$0xff] }
 0x2d6   : > { %v1686_v13 = vmul.f32 %v5399_v18, %v6772_v20  ;;  %v1685_v25 = vmul.f32 %v5399_v18, %v6773_v1  ;;  %v5644_v47 = vadd.f32 %v1682_v45, %v5425_v5  ;;  %v5647_v56 = vadd.f32 %v1681_v4, %v5428_v24  ;;  %v6774_v49 = vld [vmem:[#allocation151_spill] sm:$0xff]  ;;  %v6775_v2 = vld [vmem:[#allocation152_spill] sm:$0xff]  ;;  %v6778_v20 = vld [vmem:[#allocation153_spill] sm:$0xff] }
 0x2d7   : > { %v1950_v32 = vmul.f32 %v5617_v3, %v6774_v49  ;;  %v1949_v34 = vmul.f32 %v5617_v3, %v6775_v2  ;;  %v5653_v9 = vpop.permute.xlu1 %2668  ;;  %v5655_v59 = vpop.permute.xlu0 %2663  ;;  %v1952_v18 = vmul.f32 %v5617_v3, %v6778_v20  ;;  %v6779_v1 = vld [vmem:[#allocation154_spill] sm:$0xff]  ;;  %v6780_v45 = vld [vmem:[#allocation155_spill] sm:$0xff]  ;;  %v5664_v4 = vadd.f32 %v1684_v48, %v5441_v30  ;;  %v6781_v2 = vld [vmem:[#allocation156_spill] sm:$0xff] }
 0x2d8   : > { %6776 = vst [vmem:[#allocation35_spill] sm:$0xff] %v5653_v9  ;;  %6777 = vst [vmem:[#allocation36_spill] sm:$0xff] %v5655_v59  ;;  %v1951_v5 = vmul.f32 %v5617_v3, %v6779_v1  ;;  %v1954_v24 = vmul.f32 %v5617_v3, %v6780_v45  ;;  %3107 = vperm.xlu1 %3547, %v2941_v36   ;;  %v5667_v49 = vadd.f32 %v1683_v14, %v5444_v28  ;;  %v2942_v1 = vld [vmem:[%s6377_s2 + $0x108] sm:$0xff]  ;;  %v2648_v59 = vld [vmem:[%s3610_s23 + $0x13e] sm:$0xff] }
 0x2d9   : > { %2823 = vperm.xlu0 %3546, %v2647_v0   ;;  %v1953_v12 = vmul.f32 %v5617_v3, %v6781_v2  ;;  %v1956_v20 = vmul.f32 %v5617_v3, %v6782_v33  ;;  %v5678_v36 = vadd.f32 %v1686_v13, %v5451_v31  ;;  %v5681_v30 = vadd.f32 %v1685_v25, %v5454_v57  ;;  %v6783_v48 = vld [vmem:[#allocation158_spill] sm:$0xff]  ;;  %v6784_v14 = vld [vmem:[#allocation159_spill] sm:$0xff]  ;;  %v6785_v2 = vld [vmem:[#allocation160_spill] sm:$0xff] }
 0x2da   : > { %v1955_v28 = vmul.f32 %v5617_v3, %v6783_v48  ;;  %v1958_v0 = vmul.f32 %v5617_v3, %v6784_v14  ;;  %v5688_v45 = vadd.f32 %v1950_v32, %v5471_v46  ;;  %v5691_v33 = vadd.f32 %v1949_v34, %v5474_v16  ;;  %v6786_v31 = vld [vmem:[#allocation161_spill] sm:$0xff]  ;;  %v6789_v34 = vld [vmem:[#allocation162_spill] sm:$0xff]  ;;  %v6804_v17 = vld [vmem:[#allocation172_spill] sm:$0xff] }
 0x2db   : > { %v1957_v9 = vmul.f32 %v5617_v3, %v6785_v2  ;;  %v1960_v13 = vmul.f32 %v5617_v3, %v6786_v31  ;;  %v5697_v57 = vpop.permute.xlu1 %2678  ;;  %v5699_v25 = vpop.permute.xlu0 %2673  ;;  %v5702_v48 = vadd.f32 %v1952_v18, %v5487_v55  ;;  %v5705_v14 = vadd.f32 %v1951_v5, %v5490_v11  ;;  %v6790_v31 = vld [vmem:[#allocation163_spill] sm:$0xff]  ;;  %v2944_v11 = vld [vmem:[%s6377_s2 + $0x118] sm:$0xff] }
 0x2dc   : > { %6787 = vst [vmem:[#allocation37_spill] sm:$0xff] %v5697_v57  ;;  %6788 = vst [vmem:[#allocation38_spill] sm:$0xff] %v5699_v25  ;;  %v5708_v46 = vadd.f32 %v1954_v24, %v5497_v39  ;;  %3112 = vperm.xlu1 %3547, %v2942_v1   ;;  %v5711_v16 = vadd.f32 %v1953_v12, %v5500_v10  ;;  %v5714_v32 = vadd.f32 %v1956_v20, %v5511_v52  ;;  %v2943_v39 = vld [vmem:[%s6377_s2 + $0x110] sm:$0xff]  ;;  %v6792_v18 = vld [vmem:[#allocation165_spill] sm:$0xff] }
 0x2dd   : > { %2828 = vperm.xlu0 %3546, %v2648_v59   ;;  %v1959_v2 = vmul.f32 %v5617_v3, %v6789_v34  ;;  %v1962_v55 = vmul.f32 %v5617_v3, %v6790_v31  ;;  %v5727_v10 = vadd.f32 %v1955_v28, %v5514_v51  ;;  %v5730_v52 = vadd.f32 %v1958_v0, %v5517_v23  ;;  %v6791_v12 = vld [vmem:[#allocation164_spill] sm:$0xff]  ;;  %v6794_v1 = vld [vmem:[#allocation166_spill] sm:$0xff]  ;;  %v6795_v31 = vld [vmem:[#allocation167_spill] sm:$0xff] }
 0x2de   : > { %v1961_v59 = vmul.f32 %v5617_v3, %v6791_v12  ;;  %v1964_v5 = vmul.f32 %v5617_v3, %v6792_v18  ;;  %v5737_v24 = vadd.f32 %v1957_v9, %v5520_v21  ;;  %v1996_v20 = vadd.f32 %v1960_v13, %v5523_v6  ;;  %v6798_v0 = vld [vmem:[#allocation168_spill] sm:$0xff]  ;;  %v6799_v25 = vld [vmem:[#allocation169_spill] sm:$0xff]  ;;  %v6800_v21 = vld [vmem:[#allocation170_spill] sm:$0xff] }
 0x2df   : > { %v1963_v34 = vmul.f32 %v5617_v3, %v6794_v1  ;;  %v1966_v51 = vmul.f32 %v5617_v3, %v6795_v31  ;;  %v5744_v28 = vpop.permute.xlu1 %2688  ;;  %v5746_v23 = vpop.permute.xlu0 %2683  ;;  %v1965_v12 = vmul.f32 %v5617_v3, %v6798_v0  ;;  %v1968_v18 = vmul.f32 %v5617_v3, %v6799_v25  ;;  %v5757_v6 = vld [vmem:[%s6376_s1 + $0x6] ss:$0 sm:$0xff]  ;;  %v6801_v31 = vld [vmem:[#allocation197_spill] sm:$0xff]  ;;  %v6803_v57 = vld [vmem:[#allocation171_spill] sm:$0xff] }
 0x2e0   : > { %6793 = vst [vmem:[#allocation39_spill] sm:$0xff] %v5737_v24  ;;  %6796 = vst [vmem:[#allocation40_spill] sm:$0xff] %v5744_v28  ;;  %v1967_v9 = vmul.f32 %v5617_v3, %v6800_v21  ;;  %3122 = vperm.xlu1 %3547, %v2944_v11   ;;  %v1995_v13 = vadd.f32 %v1959_v2, %v5536_v26  ;;  %v1998_v1 = vadd.f32 %v1962_v55, %v5539_v41  ;;  %v5774_v26 = vld [vmem:[%s6376_s1 + $0x7] ss:$0 sm:$0xff]  ;;  %v6805_v2 = vld [vmem:[#allocation173_spill] sm:$0xff] }
 0x2e1   : > { %6797 = vst [vmem:[#allocation41_spill] sm:$0xff] %v5746_v23  ;;  %3117 = vperm.xlu0 %3546, %v2943_v39   ;;  %v2256_v0 = vmul.f32 %v5757_v6, %v6801_v31  ;;  %v6802_v23 = vld [vmem:[#allocation198_spill] sm:$0xff]  ;;  %v1997_v28 = vadd.f32 %v1961_v59, %v5546_v53  ;;  %v2000_v21 = vadd.f32 %v1964_v5, %v5549_v44  ;;  %v6806_v39 = vld [vmem:[#allocation15_spill] sm:$0xff]  ;;  %v6807_v44 = vld [vmem:[#allocation16_spill] sm:$0xff] }
 0x2e2   : > { %v2255_v25 = vmul.f32 %v5757_v6, %v6802_v23  ;;  %v1970_v24 = vmul.f32 %v5617_v3, %v6803_v57  ;;  %v1969_v11 = vmul.f32 %v5617_v3, %v6804_v17  ;;  %v1999_v41 = vadd.f32 %v1963_v34, %v5566_v50  ;;  %v6810_v31 = vld [vmem:[#allocation174_spill] sm:$0xff] }
 0x2e3   : > { %v1972_v55 = vmul.f32 %v5617_v3, %v6805_v2  ;;  %v2552_v53 = vmul.f32 %v5774_v26, %v6806_v39  ;;  %v2551_v59 = vmul.f32 %v5774_v26, %v6807_v44  ;;  %v5783_v57 = vpop.permute.xlu1 %2698  ;;  %v5785_v5 = vpop.permute.xlu0 %2693  ;;  %v5788_v17 = vadd.f32 %v1966_v51, %v5569_v27  ;;  %v6811_v39 = vld [vmem:[#allocation175_spill] sm:$0xff] }
 0x2e4   : > { %6808 = vst [vmem:[#allocation42_spill] sm:$0xff] %v5783_v57  ;;  %6809 = vst [vmem:[#allocation43_spill] sm:$0xff] %v5785_v5  ;;  %v5791_v23 = vadd.f32 %v1965_v12, %v5582_v58  ;;  %v5794_v50 = vadd.f32 %v1968_v18, %v5585_v22  ;;  %v5797_v34 = vadd.f32 %v1967_v9, %v5592_v37  ;;  %v6812_v51 = vld [vmem:[#allocation199_spill] sm:$0xff]  ;;  %v6813_v12 = vld [vmem:[#allocation200_spill] sm:$0xff] }
 0x2e5   : > { %v1971_v2 = vmul.f32 %v5617_v3, %v6810_v31  ;;  %v1974_v44 = vmul.f32 %v5617_v3, %v6811_v39  ;;  %v2292_v57 = vadd.f32 %v2256_v0, %v1996_v20  ;;  %v2291_v5 = vadd.f32 %v2255_v25, %v1995_v13  ;;  %v6814_v9 = vld [vmem:[#allocation176_spill] sm:$0xff]  ;;  %v6815_v0 = vld [vmem:[#allocation17_spill] sm:$0xff] }
 0x2e6   : > { %v5804_v27 = vadd.f32 %v1970_v24, %v5595_v63  ;;  %v5807_v58 = vadd.f32 %v1969_v11, %v5606_v19  ;;  %v2258_v22 = vmul.f32 %v5757_v6, %v6812_v51  ;;  %v2257_v37 = vmul.f32 %v5757_v6, %v6813_v12  ;;  %v5821_v63 = vld [vmem:[%s6376_s1 + $0x8] ss:$0 sm:$0xff]  ;;  %v6816_v11 = vld [vmem:[#allocation18_spill] sm:$0xff] }
 0x2e7   : > { %v5814_v18 = vadd.f32 %v1972_v55, %v5609_v15  ;;  %v1973_v31 = vmul.f32 %v5617_v3, %v6814_v9  ;;  %v2588_v20 = vadd.f32 %v2552_v53, %v2292_v57  ;;  %v2587_v13 = vadd.f32 %v2551_v59, %v2291_v5  ;;  %v2709_v19 = vpop.permute.xlu1 %2708  ;;  %v2704_v24 = vpop.permute.xlu0 %2703  ;;  %v6817_v57 = vld [vmem:[#allocation201_spill] sm:$0xff]  ;;  %v6818_v51 = vld [vmem:[#allocation202_spill] sm:$0xff] }
 0x2e8   : > { %v2554_v25 = vmul.f32 %v5774_v26, %v6815_v0  ;;  %v2553_v39 = vmul.f32 %v5774_v26, %v6816_v11  ;;  %v2848_v15 = vmul.f32 %v5821_v63, %v2709_v19  ;;  %v2847_v55 = vmul.f32 %v5821_v63, %v2704_v24  ;;  %v6822_v24 = vld [vmem:[#allocation9_spill] sm:$0xff] }
 0x2e9   : > { %v5830_v53 = vadd.f32 %v1971_v2, %v5612_v42  ;;  %v5833_v59 = vadd.f32 %v1974_v44, %v5620_v60  ;;  %v2260_v5 = vmul.f32 %v5757_v6, %v6817_v57  ;;  %v2259_v12 = vmul.f32 %v5757_v6, %v6818_v51  ;;  %v6820_v42 = vld [vmem:[#allocation177_spill] sm:$0xff]  ;;  %v6821_v60 = vld [vmem:[#allocation19_spill] sm:$0xff] }
 0x2ea   : > { %v2294_v9 = vadd.f32 %v2258_v22, %v1998_v1  ;;  %v2293_v0 = vadd.f32 %v2257_v37, %v1997_v28  ;;  %v5839_v7 = vadd.f32 %v2848_v15, %v2588_v20  ;;  %v5841_v11 = vadd.f32 %v2847_v55, %v2587_v13  ;;  %v6823_v20 = vld [vmem:[#allocation178_spill] sm:$0xff] }
 0x2eb   : > { %v5844_v19 = vadd.f32 %v1973_v31, %v5623_v54  ;;  %v1976_v2 = vmul.f32 %v5617_v3, %v6820_v42  ;;  %v2556_v44 = vmul.f32 %v5774_v26, %v6821_v60  ;;  %v2555_v57 = vmul.f32 %v5774_v26, %v6822_v24  ;;  %v2719_v35 = vpop.permute.xlu1 %2718  ;;  %v2714_v51 = vpop.permute.xlu0 %2713  ;;  %v6824_v31 = vld [vmem:[#allocation179_spill] sm:$0xff]  ;;  %v6826_v24 = vld [vmem:[#allocation204_spill] sm:$0xff] }
 0x2ec   : > { %6819 = vst [vmem:[#allocation44_spill] sm:$0xff] %v5841_v11  ;;  %v2590_v1 = vadd.f32 %v2554_v25, %v2294_v9  ;;  %v2589_v28 = vadd.f32 %v2553_v39, %v2293_v0  ;;  %v2850_v22 = vmul.f32 %v5821_v63, %v2719_v35  ;;  %v2849_v37 = vmul.f32 %v5821_v63, %v2714_v51  ;;  %v6825_v42 = vld [vmem:[#allocation203_spill] sm:$0xff]  ;;  %v6827_v9 = vld [vmem:[#allocation180_spill] sm:$0xff] }
 0x2ed   : > { %v1975_v54 = vmul.f32 %v5617_v3, %v6823_v20  ;;  %v1978_v13 = vmul.f32 %v5617_v3, %v6824_v31  ;;  %v2296_v15 = vadd.f32 %v2260_v5, %v2000_v21  ;;  %v2295_v55 = vadd.f32 %v2259_v12, %v1999_v41  ;;  %v6828_v5 = vld [vmem:[#allocation10_spill] sm:$0xff]  ;;  %v6829_v31 = vld [vmem:[#allocation20_spill] sm:$0xff] }
 0x2ee   : > { %v2262_v60 = vmul.f32 %v5757_v6, %v6825_v42  ;;  %v2261_v11 = vmul.f32 %v5757_v6, %v6826_v24  ;;  %v5862_v25 = vadd.f32 %v2850_v22, %v2590_v1  ;;  %v5864_v39 = vadd.f32 %v2849_v37, %v2589_v28  ;;  %v6831_v22 = vld [vmem:[#allocation206_spill] sm:$0xff] }
 0x2ef   : > { %v5867_v35 = vadd.f32 %v1976_v2, %v5634_v8  ;;  %v1977_v0 = vmul.f32 %v5617_v3, %v6827_v9  ;;  %v2592_v51 = vadd.f32 %v2556_v44, %v2296_v15  ;;  %v2591_v20 = vadd.f32 %v2555_v57, %v2295_v55  ;;  %v2729_v21 = vpop.permute.xlu1 %2728  ;;  %v2724_v41 = vpop.permute.xlu0 %2723  ;;  %v6830_v44 = vld [vmem:[#allocation205_spill] sm:$0xff] }
 0x2f0   : > { %v2558_v12 = vmul.f32 %v5774_v26, %v6828_v5  ;;  %v2557_v42 = vmul.f32 %v5774_v26, %v6829_v31  ;;  %v2852_v1 = vmul.f32 %v5821_v63, %v2729_v21  ;;  %v2851_v28 = vmul.f32 %v5821_v63, %v2724_v41  ;;  %v6834_v41 = vld [vmem:[#allocation11_spill] sm:$0xff] }
 0x2f1   : > { %v5878_v8 = vadd.f32 %v1975_v54, %v5637_v43  ;;  %v5881_v2 = vadd.f32 %v1978_v13, %v5644_v47  ;;  %v2264_v57 = vmul.f32 %v5757_v6, %v6830_v44  ;;  %v2263_v37 = vmul.f32 %v5757_v6, %v6831_v22  ;;  %v6832_v54 = vld [vmem:[#allocation181_spill] sm:$0xff]  ;;  %v6837_v22 = vld [vmem:[#allocation207_spill] sm:$0xff] }
 0x2f2   : > { %v2298_v15 = vadd.f32 %v2262_v60, %v5788_v17  ;;  %v2297_v55 = vadd.f32 %v2261_v11, %v5791_v23  ;;  %v5889_v24 = vadd.f32 %v2852_v1, %v2592_v51  ;;  %v5891_v9 = vadd.f32 %v2851_v28, %v2591_v20  ;;  %v6833_v13 = vld [vmem:[#allocation21_spill] sm:$0xff]  ;;  %v6835_v20 = vld [vmem:[#allocation182_spill] sm:$0xff] }
 0x2f3   : > { %v5894_v43 = vadd.f32 %v1977_v0, %v5647_v56  ;;  %v1980_v47 = vmul.f32 %v5617_v3, %v6832_v54  ;;  %v2560_v21 = vmul.f32 %v5774_v26, %v6833_v13  ;;  %v2559_v5 = vmul.f32 %v5774_v26, %v6834_v41  ;;  %v2739_v31 = vpop.permute.xlu1 %2738  ;;  %v2734_v17 = vpop.permute.xlu0 %2733  ;;  %v6836_v0 = vld [vmem:[#allocation183_spill] sm:$0xff]  ;;  %v6838_v13 = vld [vmem:[#allocation208_spill] sm:$0xff] }
 0x2f4   : > { %v2594_v60 = vadd.f32 %v2558_v12, %v2298_v15  ;;  %v2593_v23 = vadd.f32 %v2557_v42, %v2297_v55  ;;  %v2854_v11 = vmul.f32 %v5821_v63, %v2739_v31  ;;  %v2853_v51 = vmul.f32 %v5821_v63, %v2734_v17  ;;  %v6839_v41 = vld [vmem:[#allocation184_spill] sm:$0xff] }
 0x2f5   : > { %v1979_v56 = vmul.f32 %v5617_v3, %v6835_v20  ;;  %v1982_v1 = vmul.f32 %v5617_v3, %v6836_v0  ;;  %v2300_v28 = vadd.f32 %v2264_v57, %v5794_v50  ;;  %v2299_v44 = vadd.f32 %v2263_v37, %v5797_v34  ;;  %v6840_v37 = vld [vmem:[#allocation22_spill] sm:$0xff]  ;;  %v6841_v0 = vld [vmem:[#allocation23_spill] sm:$0xff] }
 0x2f6   : > { %v2266_v54 = vmul.f32 %v5757_v6, %v6837_v22  ;;  %v2265_v12 = vmul.f32 %v5757_v6, %v6838_v13  ;;  %v5914_v42 = vadd.f32 %v2854_v11, %v2594_v60  ;;  %v5916_v15 = vadd.f32 %v2853_v51, %v2593_v23 }
 0x2f7   : > { %v5919_v55 = vadd.f32 %v1980_v47, %v5664_v4  ;;  %v1981_v31 = vmul.f32 %v5617_v3, %v6839_v41  ;;  %v2596_v17 = vadd.f32 %v2560_v21, %v2300_v28  ;;  %v2595_v50 = vadd.f32 %v2559_v5, %v2299_v44  ;;  %v2749_v57 = vpop.permute.xlu1 %2748  ;;  %v2744_v34 = vpop.permute.xlu0 %2743  ;;  %v6842_v3 = vld [vmem:[#allocation209_spill] sm:$0xff]  ;;  %v6843_v5 = vld [vmem:[#allocation210_spill] sm:$0xff] }
 0x2f8   : > { %v2562_v20 = vmul.f32 %v5774_v26, %v6840_v37  ;;  %v2561_v22 = vmul.f32 %v5774_v26, %v6841_v0  ;;  %v2856_v60 = vmul.f32 %v5821_v63, %v2749_v57  ;;  %v2855_v23 = vmul.f32 %v5821_v63, %v2744_v34  ;;  %v6846_v57 = vld [vmem:[#allocation25_spill] sm:$0xff] }
 0x2f9   : > { %v5930_v4 = vadd.f32 %v1979_v56, %v5667_v49  ;;  %v5933_v47 = vadd.f32 %v1982_v1, %v5678_v36  ;;  %v2268_v21 = vmul.f32 %v5757_v6, %v6842_v3  ;;  %v2267_v11 = vmul.f32 %v5757_v6, %v6843_v5  ;;  %v6844_v56 = vld [vmem:[#allocation187_spill] sm:$0xff]  ;;  %v6845_v1 = vld [vmem:[#allocation24_spill] sm:$0xff] }
 0x2fa   : > { %v2302_v51 = vadd.f32 %v2266_v54, %v5804_v27  ;;  %v2301_v28 = vadd.f32 %v2265_v12, %v5807_v58  ;;  %v5941_v44 = vadd.f32 %v2856_v60, %v2596_v17  ;;  %v5943_v13 = vadd.f32 %v2855_v23, %v2595_v50  ;;  %v6847_v50 = vld [vmem:[#allocation188_spill] sm:$0xff]  ;;  %v6849_v3 = vld [vmem:[#allocation211_spill] sm:$0xff] }
 0x2fb   : > { %v5946_v49 = vadd.f32 %v1981_v31, %v5681_v30  ;;  %v2246_v36 = vmul.f32 %v5757_v6, %v6844_v56  ;;  %v2564_v41 = vmul.f32 %v5774_v26, %v6845_v1  ;;  %v2563_v34 = vmul.f32 %v5774_v26, %v6846_v57  ;;  %v2759_v37 = vpop.permute.xlu1 %2758  ;;  %v2754_v27 = vpop.permute.xlu0 %2753  ;;  %v6848_v31 = vld [vmem:[#allocation189_spill] sm:$0xff]  ;;  %v6850_v56 = vld [vmem:[#allocation212_spill] sm:$0xff]  ;;  %v6851_v1 = vld [vmem:[#allocation190_spill] sm:$0xff] }
 0x2fc   : > { %v2598_v54 = vadd.f32 %v2562_v20, %v2302_v51  ;;  %v2597_v58 = vadd.f32 %v2561_v22, %v2301_v28  ;;  %v2858_v12 = vmul.f32 %v5821_v63, %v2759_v37  ;;  %v2857_v17 = vmul.f32 %v5821_v63, %v2754_v27 }
 0x2fd   : > { %v2245_v30 = vmul.f32 %v5757_v6, %v6847_v50  ;;  %v2248_v0 = vmul.f32 %v5757_v6, %v6848_v31  ;;  %v2304_v60 = vadd.f32 %v2268_v21, %v5814_v18  ;;  %v2303_v23 = vadd.f32 %v2267_v11, %v5830_v53  ;;  %v6852_v11 = vld [vmem:[#allocation26_spill] sm:$0xff]  ;;  %v6853_v50 = vld [vmem:[#allocation27_spill] sm:$0xff] }
 0x2fe   : > { %v2270_v5 = vmul.f32 %v5757_v6, %v6849_v3  ;;  %v2269_v20 = vmul.f32 %v5757_v6, %v6850_v56  ;;  %v5966_v22 = vadd.f32 %v2858_v12, %v2598_v54  ;;  %v5968_v51 = vadd.f32 %v2857_v17, %v2597_v58  ;;  %v6855_v12 = vld [vmem:[#allocation214_spill] sm:$0xff] }
 0x2ff   : > { %v5971_v28 = vadd.f32 %v2246_v36, %v5688_v45  ;;  %v2247_v57 = vmul.f32 %v5757_v6, %v6851_v1  ;;  %v2600_v37 = vadd.f32 %v2564_v41, %v2304_v60  ;;  %v2599_v18 = vadd.f32 %v2563_v34, %v2303_v23  ;;  %v2769_v21 = vpop.permute.xlu1 %2768  ;;  %v2764_v53 = vpop.permute.xlu0 %2763  ;;  %v6854_v41 = vld [vmem:[#allocation213_spill] sm:$0xff] }
 0x300   : > { %v2566_v27 = vmul.f32 %v5774_v26, %v6852_v11  ;;  %v2565_v31 = vmul.f32 %v5774_v26, %v6853_v50  ;;  %v2860_v54 = vmul.f32 %v5821_v63, %v2769_v21  ;;  %v2859_v58 = vmul.f32 %v5821_v63, %v2764_v53  ;;  %v6858_v21 = vld [vmem:[#allocation29_spill] sm:$0xff] }
 0x301   : > { %v5982_v45 = vadd.f32 %v2245_v30, %v5691_v33  ;;  %v5985_v36 = vadd.f32 %v2248_v0, %v5702_v48  ;;  %v2272_v34 = vmul.f32 %v5757_v6, %v6854_v41  ;;  %v2271_v17 = vmul.f32 %v5757_v6, %v6855_v12  ;;  %v6856_v30 = vld [vmem:[#allocation191_spill] sm:$0xff]  ;;  %v6857_v0 = vld [vmem:[#allocation28_spill] sm:$0xff] }
 0x302   : > { %v2306_v60 = vadd.f32 %v2270_v5, %v5833_v59  ;;  %v2305_v23 = vadd.f32 %v2269_v20, %v5844_v19  ;;  %v5993_v3 = vadd.f32 %v2860_v54, %v2600_v37  ;;  %v5995_v56 = vadd.f32 %v2859_v58, %v2599_v18  ;;  %v6859_v18 = vld [vmem:[#allocation192_spill] sm:$0xff]  ;;  %v6861_v41 = vld [vmem:[#allocation215_spill] sm:$0xff] }
 0x303   : > { %v5998_v33 = vadd.f32 %v2247_v57, %v5705_v14  ;;  %v2250_v48 = vmul.f32 %v5757_v6, %v6856_v30  ;;  %v2568_v1 = vmul.f32 %v5774_v26, %v6857_v0  ;;  %v2567_v53 = vmul.f32 %v5774_v26, %v6858_v21  ;;  %v2779_v11 = vpop.permute.xlu1 %2778  ;;  %v2774_v59 = vpop.permute.xlu0 %2773  ;;  %v6860_v57 = vld [vmem:[#allocation193_spill] sm:$0xff]  ;;  %v6862_v30 = vld [vmem:[#allocation216_spill] sm:$0xff] }
 0x304   : > { %v2602_v5 = vadd.f32 %v2566_v27, %v2306_v60  ;;  %v2601_v19 = vadd.f32 %v2565_v31, %v2305_v23  ;;  %v2862_v20 = vmul.f32 %v5821_v63, %v2779_v11  ;;  %v2861_v37 = vmul.f32 %v5821_v63, %v2774_v59  ;;  %v6863_v0 = vld [vmem:[#allocation217_spill] sm:$0xff] }
 0x305   : > { %v2249_v14 = vmul.f32 %v5757_v6, %v6859_v18  ;;  %v2252_v50 = vmul.f32 %v5757_v6, %v6860_v57  ;;  %v2308_v54 = vadd.f32 %v2272_v34, %v5867_v35  ;;  %v2307_v58 = vadd.f32 %v2271_v17, %v5878_v8 }
 0x306   : > { %v2274_v12 = vmul.f32 %v5757_v6, %v6861_v41  ;;  %v2273_v27 = vmul.f32 %v5757_v6, %v6862_v30  ;;  %v6018_v31 = vadd.f32 %v2862_v20, %v2602_v5  ;;  %v6020_v60 = vadd.f32 %v2861_v37, %v2601_v19  ;;  %v6865_v20 = vld [vmem:[#allocation218_spill] sm:$0xff] }
 0x307   : > { %v6023_v23 = vadd.f32 %v2250_v48, %v5708_v46  ;;  %v2276_v21 = vmul.f32 %v5757_v6, %v6863_v0  ;;  %v2604_v11 = vadd.f32 %v2568_v1, %v2308_v54  ;;  %v2603_v35 = vadd.f32 %v2567_v53, %v2307_v58  ;;  %v2789_v34 = vpop.permute.xlu1 %2788  ;;  %v2784_v8 = vpop.permute.xlu0 %2783  ;;  %v6864_v1 = vld [vmem:[#allocation194_spill] sm:$0xff]  ;;  %v6866_v54 = vld [vmem:[#allocation195_spill] sm:$0xff] }
 0x308   : > { %v2570_v17 = vmul.f32 %v5774_v26, %v5411_v38  ;;  %v2569_v59 = vmul.f32 %v5774_v26, %v5413_v62  ;;  %v2864_v5 = vmul.f32 %v5821_v63, %v2789_v34  ;;  %v2863_v19 = vmul.f32 %v5821_v63, %v2784_v8  ;;  %v6867_v0 = vld [vmem:[#allocation219_spill] sm:$0xff]  ;;  %v6870_v34 = vld [vmem:[#allocation196_spill] sm:$0xff] }
 0x309   : > { %v6034_v46 = vadd.f32 %v2249_v14, %v5711_v16  ;;  %v6037_v48 = vadd.f32 %v2252_v50, %v5714_v32  ;;  %v2251_v53 = vmul.f32 %v5757_v6, %v6864_v1  ;;  %v2275_v37 = vmul.f32 %v5757_v6, %v6865_v20 }
 0x30a   : > { %v2310_v38 = vadd.f32 %v2274_v12, %v5881_v2  ;;  %v2309_v62 = vadd.f32 %v2273_v27, %v5894_v43  ;;  %v6045_v18 = vadd.f32 %v2864_v5, %v2604_v11  ;;  %v6047_v57 = vadd.f32 %v2863_v19, %v2603_v35  ;;  %v6871_v5 = vld [vmem:[#allocation224_spill] sm:$0xff] }
 0x30b   : > { %v2254_v16 = vmul.f32 %v5757_v6, %v6866_v54  ;;  %v2312_v32 = vadd.f32 %v2276_v21, %v5919_v55  ;;  %v2572_v14 = vmul.f32 %v5774_v26, %v5460_v29  ;;  %v2571_v50 = vmul.f32 %v5774_v26, %v5462_v61  ;;  %v2799_v58 = vpop.permute.xlu1 %2798  ;;  %v2794_v41 = vpop.permute.xlu0 %2793  ;;  %v6868_v55 = vld [vmem:[#allocation220_spill] sm:$0xff]  ;;  %v6869_v29 = vld [vmem:[#allocation223_spill] sm:$0xff] }
 0x30c   : > { %v2606_v2 = vadd.f32 %v2570_v17, %v2310_v38  ;;  %v2605_v12 = vadd.f32 %v2569_v59, %v2309_v62  ;;  %v2866_v43 = vmul.f32 %v5821_v63, %v2799_v58  ;;  %v2865_v30 = vmul.f32 %v5821_v63, %v2794_v41  ;;  %v6874_v58 = vld [vmem:[#allocation33_spill] sm:$0xff]  ;;  %v6875_v41 = vld [vmem:[#allocation34_spill] sm:$0xff] }
 0x30d   : > { %v2311_v27 = vadd.f32 %v2275_v37, %v5930_v4  ;;  %v2278_v11 = vmul.f32 %v5757_v6, %v6867_v0  ;;  %v2277_v21 = vmul.f32 %v5757_v6, %v6868_v55  ;;  %v2542_v35 = vmul.f32 %v5774_v26, %v6869_v29  ;;  %v6878_v0 = vld [vmem:[#allocation5_spill] sm:$0xff] }
 0x30e   : > { %v6066_v61 = vadd.f32 %v2251_v53, %v5727_v10  ;;  %v2253_v8 = vmul.f32 %v5757_v6, %v6870_v34  ;;  %v6070_v17 = vadd.f32 %v2866_v43, %v2606_v2  ;;  %v6072_v59 = vadd.f32 %v2865_v30, %v2605_v12  ;;  %v6872_v53 = vld [vmem:[#allocation30_spill] sm:$0xff] }
 0x30f   : > { %v6075_v4 = vadd.f32 %v2254_v16, %v5730_v52  ;;  %v2541_v19 = vmul.f32 %v5774_v26, %v6871_v5  ;;  %v2608_v1 = vadd.f32 %v2572_v14, %v2312_v32  ;;  %v2607_v20 = vadd.f32 %v2571_v50, %v2311_v27  ;;  %v2809_v37 = vpop.permute.xlu1 %2808  ;;  %v2804_v38 = vpop.permute.xlu0 %2803  ;;  %v6873_v14 = vld [vmem:[#allocation2_spill] sm:$0xff]  ;;  %v6877_v27 = vld [vmem:[#allocation4_spill] sm:$0xff] }
 0x310   : > { %v2574_v10 = vmul.f32 %v5774_v26, %v5506_v40  ;;  %v2573_v6 = vmul.f32 %v5774_v26, %v6872_v53  ;;  %v2868_v62 = vmul.f32 %v5821_v63, %v2809_v37  ;;  %v2867_v54 = vmul.f32 %v5821_v63, %v2804_v38  ;;  %v6881_v38 = vld [vmem:[#allocation36_spill] sm:$0xff] }
 0x311   : > { %v2314_v52 = vadd.f32 %v2278_v11, %v5933_v47  ;;  %v2313_v16 = vadd.f32 %v2277_v21, %v5946_v49  ;;  %v2578_v32 = vadd.f32 %v2542_v35, %v5971_v28  ;;  %v2544_v50 = vmul.f32 %v5774_v26, %v6873_v14  ;;  %v6876_v47 = vld [vmem:[#allocation3_spill] sm:$0xff] }
 0x312   : > { %v2838_v40 = vmul.f32 %v5821_v63, %v6874_v58  ;;  %v2837_v2 = vmul.f32 %v5821_v63, %v6875_v41  ;;  %v6094_v12 = vadd.f32 %v2868_v62, %v2608_v1  ;;  %v6096_v43 = vadd.f32 %v2867_v54, %v2607_v20  ;;  %v6879_v1 = vld [vmem:[#allocation39_spill] sm:$0xff]  ;;  %v6883_v58 = vld [vmem:[#allocation14_spill] sm:$0xff]  ;;  %v6884_v41 = vld [vmem:[#allocation37_spill] sm:$0xff] }
 0x313   : > { %v2577_v30 = vadd.f32 %v2541_v19, %v5982_v45  ;;  %v2543_v49 = vmul.f32 %v5774_v26, %v6876_v47  ;;  %v2546_v28 = vmul.f32 %v5774_v26, %v6877_v27  ;;  %v2545_v11 = vmul.f32 %v5774_v26, %v6878_v0  ;;  %v2819_v55 = vpop.permute.xlu1 %2818  ;;  %v2814_v21 = vpop.permute.xlu0 %2813  ;;  %v6880_v20 = vld [vmem:[#allocation35_spill] sm:$0xff] }
 0x314   : > { %v2610_v29 = vadd.f32 %v2574_v10, %v2314_v52  ;;  %v2609_v35 = vadd.f32 %v2573_v6, %v2313_v16  ;;  %v2870_v34 = vmul.f32 %v5821_v63, %v2819_v55  ;;  %v2869_v5 = vmul.f32 %v5821_v63, %v2814_v21  ;;  %v6886_v21 = vld [vmem:[#allocation40_spill] sm:$0xff] }
 0x315   : > { %v6109_v45 = vadd.f32 %v2253_v8, %v6879_v1  ;;  %v2580_v19 = vadd.f32 %v2544_v50, %v5985_v36  ;;  %v2840_v37 = vmul.f32 %v5821_v63, %v6880_v20  ;;  %v2839_v53 = vmul.f32 %v5821_v63, %v6881_v38  ;;  %v6882_v8 = vld [vmem:[#allocation6_spill] sm:$0xff] }
 0x316   : > { %v2874_v62 = vadd.f32 %v2838_v40, %v2578_v32  ;;  %v2873_v54 = vadd.f32 %v2837_v2, %v2577_v30  ;;  %v6116_v14 = vadd.f32 %v2869_v5, %v2609_v35  ;;  %v6118_v10 = vadd.f32 %v2870_v34, %v2610_v29  ;;  %v6885_v30 = vld [vmem:[#allocation38_spill] sm:$0xff]  ;;  %v6887_v35 = vld [vmem:[#allocation41_spill] sm:$0xff] }
 0x317   : > { %v2579_v6 = vadd.f32 %v2543_v49, %v5998_v33  ;;  %v2582_v52 = vadd.f32 %v2546_v28, %v6023_v23  ;;  %v2548_v16 = vmul.f32 %v5774_v26, %v6882_v8  ;;  %v2953_v36 = vpop.permute.xlu1 %2952  ;;  %v2948_v32 = vpop.permute.xlu0 %2947  ;;  %v2581_v50 = vadd.f32 %v2545_v11, %v6034_v46 }
 0x318   : > { %v2547_v33 = vmul.f32 %v5774_v26, %v6883_v58  ;;  %v3126_v40 = vmul.f32 %v2953_v36, %v2874_v62  ;;  %v3125_v23 = vmul.f32 %v2948_v32, %v2873_v54  ;;  %v2842_v2 = vmul.f32 %v5821_v63, %v6884_v41  ;;  %v6888_v54 = vld [vmem:[#allocation7_spill] sm:$0xff] }
 0x319   : > { %v2841_v47 = vmul.f32 %v5821_v63, %v6885_v30  ;;  %v2876_v49 = vadd.f32 %v2840_v37, %v2580_v19  ;;  %v2875_v27 = vadd.f32 %v2839_v53, %v2579_v6  ;;  %v2584_v55 = vadd.f32 %v2548_v16, %v6037_v48 }
 0x31a   : > { %3163 = vst.msk [vmem:[%s6127_s28 + $0x8] sm:$0xff] %vm3161_vm0, %v3126_v40  ;;  %v3199_v28 = vsel %vm3161_vm0, %v3126_v40, 0.0  ;;  %v3276_v0 = vmul.f32 %v3126_v40, %v3126_v40  ;;  %3162 = vst.msk [vmem:[%s6127_s28] sm:$0xff] %vm3161_vm0, %v3125_v23  ;;  %v3198_v46 = vsel %vm3161_vm0, %v3125_v23, 0.0  ;;  %v3275_v11 = vmul.f32 %v3125_v23, %v3125_v23  ;;  %v6889_v40 = vld [vmem:[#allocation8_spill] sm:$0xff] }
 0x31b   : > { %v2844_v29 = vmul.f32 %v5821_v63, %v6886_v21  ;;  %v2843_v34 = vmul.f32 %v5821_v63, %v6887_v35  ;;  %v3200_v5 = vadd.f32 %v3199_v28, %v3198_v46  ;;  %v2963_v1 = vpop.permute.xlu1 %2962  ;;  %v2958_v19 = vpop.permute.xlu0 %2957  ;;  %v2583_v62 = vadd.f32 %v2547_v33, %v6066_v61 }
 0x31c   : > { %v3312_v20 = vsel %vm3161_vm0, %v3276_v0, 0.0  ;;  %v3311_v37 = vsel %vm3161_vm0, %v3275_v11, 0.0  ;;  %v3128_v38 = vmul.f32 %v2963_v1, %v2876_v49  ;;  %v3127_v53 = vmul.f32 %v2958_v19, %v2875_v27  ;;  %v6890_v0 = vld [vmem:[#allocation42_spill] sm:$0xff] }
 0x31d   : > { %v2550_v48 = vmul.f32 %v5774_v26, %v6888_v54  ;;  %v3313_v6 = vadd.f32 %v3312_v20, %v3311_v37  ;;  %v2878_v8 = vadd.f32 %v2842_v2, %v2582_v52  ;;  %v2877_v58 = vadd.f32 %v2841_v47, %v2581_v50  ;;  %v6891_v50 = vld [vmem:[#allocation43_spill] sm:$0xff] }
 0x31e   : > { %3165 = vst.msk [vmem:[%s6127_s28 + $0x18] sm:$0xff] %vm3161_vm0, %v3128_v38  ;;  %v3278_v16 = vmul.f32 %v3128_v38, %v3128_v38  ;;  %3164 = vst.msk [vmem:[%s6127_s28 + $0x10] sm:$0xff] %vm3161_vm0, %v3127_v53  ;;  %v3201_v36 = vsel %vm3161_vm0, %v3127_v53, 0.0  ;;  %v3277_v32 = vmul.f32 %v3127_v53, %v3127_v53  ;;  %v2549_v23 = vmul.f32 %v5774_v26, %v6889_v40 }
 0x31f   : > { %v3202_v41 = vadd.f32 %v3201_v36, %v3200_v5  ;;  %v2973_v61 = vpop.permute.xlu1 %2972  ;;  %v2968_v33 = vpop.permute.xlu0 %2967  ;;  %v2880_v30 = vadd.f32 %v2844_v29, %v2584_v55  ;;  %v2879_v49 = vadd.f32 %v2843_v34, %v2583_v62  ;;  %v3203_v52 = vsel %vm3161_vm0, %v3128_v38, 0.0 }
 0x320   : > { %v3314_v2 = vsel %vm3161_vm0, %v3277_v32, 0.0  ;;  %v3130_v27 = vmul.f32 %v2973_v61, %v2878_v8  ;;  %v3129_v28 = vmul.f32 %v2968_v33, %v2877_v58  ;;  %v2846_v46 = vmul.f32 %v5821_v63, %v6890_v0 }
 0x321   : > { %v2845_v47 = vmul.f32 %v5821_v63, %v6891_v50  ;;  %v3315_v11 = vadd.f32 %v3314_v2, %v3313_v6  ;;  %v3204_v26 = vadd.f32 %v3203_v52, %v3202_v41  ;;  %v3316_v21 = vsel %vm3161_vm0, %v3278_v16, 0.0 }
 0x322   : > { %3167 = vst.msk [vmem:[%s6127_s28 + $0x28] sm:$0xff] %vm3161_vm0, %v3130_v27  ;;  %v3280_v55 = vmul.f32 %v3130_v27, %v3130_v27  ;;  %3166 = vst.msk [vmem:[%s6127_s28 + $0x20] sm:$0xff] %vm3161_vm0, %v3129_v28  ;;  %v3205_v29 = vsel %vm3161_vm0, %v3129_v28, 0.0  ;;  %v3279_v35 = vmul.f32 %v3129_v28, %v3129_v28  ;;  %v2586_v34 = vadd.f32 %v2550_v48, %v6075_v4 }
 0x323   : > { %v2585_v5 = vadd.f32 %v2549_v23, %v6109_v45  ;;  %v3317_v1 = vadd.f32 %v3316_v21, %v3315_v11  ;;  %v3206_v63 = vadd.f32 %v3205_v29, %v3204_v26  ;;  %v2983_v19 = vpop.permute.xlu1 %2982  ;;  %v2978_v20 = vpop.permute.xlu0 %2977  ;;  %v3207_v37 = vsel %vm3161_vm0, %v3130_v27, 0.0  ;;  %v6892_v29 = vld [vmem:[#allocation44_spill] sm:$0xff] }
 0x324   : > { %v3318_v38 = vsel %vm3161_vm0, %v3279_v35, 0.0  ;;  %v3132_v53 = vmul.f32 %v2983_v19, %v2880_v30  ;;  %v3131_v62 = vmul.f32 %v2978_v20, %v2879_v49  ;;  %v2882_v8 = vadd.f32 %v2846_v46, %v2586_v34 }
 0x325   : > { %v3319_v54 = vadd.f32 %v3318_v38, %v3317_v1  ;;  %v3208_v6 = vadd.f32 %v3207_v37, %v3206_v63  ;;  %v2881_v16 = vadd.f32 %v2845_v47, %v2585_v5  ;;  %v3320_v36 = vsel %vm3161_vm0, %v3280_v55, 0.0 }
 0x326   : > { %3169 = vst.msk [vmem:[%s6127_s28 + $0x38] sm:$0xff] %vm3161_vm0, %v3132_v53  ;;  %v3282_v4 = vmul.f32 %v3132_v53, %v3132_v53  ;;  %3168 = vst.msk [vmem:[%s6127_s28 + $0x30] sm:$0xff] %vm3161_vm0, %v3131_v62  ;;  %v3209_v45 = vsel %vm3161_vm0, %v3131_v62, 0.0  ;;  %v3281_v48 = vmul.f32 %v3131_v62, %v3131_v62  ;;  %v3211_v41 = vsel %vm3161_vm0, %v3132_v53, 0.0 }
 0x327   : > { %v3321_v32 = vadd.f32 %v3320_v36, %v3319_v54  ;;  %v3210_v58 = vadd.f32 %v3209_v45, %v3208_v6  ;;  %v2993_v40 = vpop.permute.xlu1 %2992  ;;  %v2988_v23 = vpop.permute.xlu0 %2987 }
 0x328   : > { %v3322_v61 = vsel %vm3161_vm0, %v3281_v48, 0.0  ;;  %v3134_v33 = vmul.f32 %v2993_v40, %v2882_v8  ;;  %v3133_v30 = vmul.f32 %v2988_v23, %v2881_v16  ;;  %v3324_v2 = vsel %vm3161_vm0, %v3282_v4, 0.0 }
 0x329   : > { %v3323_v49 = vadd.f32 %v3322_v61, %v3321_v32  ;;  %v3212_v52 = vadd.f32 %v3211_v41, %v3210_v58 }
 0x32a   : > { %3171 = vst.msk [vmem:[%s6127_s28 + $0x48] sm:$0xff] %vm3161_vm0, %v3134_v33  ;;  %v3284_v27 = vmul.f32 %v3134_v33, %v3134_v33  ;;  %3170 = vst.msk [vmem:[%s6127_s28 + $0x40] sm:$0xff] %vm3161_vm0, %v3133_v30  ;;  %v3213_v28 = vsel %vm3161_vm0, %v3133_v30, 0.0  ;;  %v3283_v0 = vmul.f32 %v3133_v30, %v3133_v30  ;;  %v3215_v26 = vsel %vm3161_vm0, %v3134_v33, 0.0 }
 0x32b   : > { %v3325_v46 = vadd.f32 %v3324_v2, %v3323_v49  ;;  %v3214_v50 = vadd.f32 %v3213_v28, %v3212_v52  ;;  %v3003_v47 = vpop.permute.xlu1 %3002 }
 0x32c   : > { %v2998_v11 = vpop.permute.xlu0 %2997  ;;  %v3326_v21 = vsel %vm3161_vm0, %v3283_v0, 0.0  ;;  %v3136_v55 = vmul.f32 %v3003_v47, %v5839_v7  ;;  %v3328_v1 = vsel %vm3161_vm0, %v3284_v27, 0.0 }
 0x32d   : > { %v3135_v35 = vmul.f32 %v2998_v11, %v6892_v29  ;;  %v3327_v34 = vadd.f32 %v3326_v21, %v3325_v46  ;;  %v3216_v5 = vadd.f32 %v3215_v26, %v3214_v50 }
 0x32e   : > { %3173 = vst.msk [vmem:[%s6127_s28 + $0x58] sm:$0xff] %vm3161_vm0, %v3136_v55  ;;  %v3286_v63 = vmul.f32 %v3136_v55, %v3136_v55  ;;  %v3219_v62 = vsel %vm3161_vm0, %v3136_v55, 0.0 }
 0x32f   : > { %3172 = vst.msk [vmem:[%s6127_s28 + $0x50] sm:$0xff] %vm3161_vm0, %v3135_v35  ;;  %v3217_v19 = vsel %vm3161_vm0, %v3135_v35, 0.0  ;;  %v3285_v20 = vmul.f32 %v3135_v35, %v3135_v35  ;;  %v3329_v37 = vadd.f32 %v3328_v1, %v3327_v34  ;;  %v3013_v53 = vpop.permute.xlu1 %3012 }
 0x330   : > { %v3218_v38 = vadd.f32 %v3217_v19, %v3216_v5  ;;  %v3008_v7 = vpop.permute.xlu0 %3007  ;;  %v3138_v6 = vmul.f32 %v3013_v53, %v5862_v25  ;;  %v3332_v4 = vsel %vm3161_vm0, %v3286_v63, 0.0 }
 0x331   : > { %v3330_v54 = vsel %vm3161_vm0, %v3285_v20, 0.0  ;;  %v3137_v8 = vmul.f32 %v3008_v7, %v5864_v39 }
 0x332   : > { %v3331_v16 = vadd.f32 %v3330_v54, %v3329_v37  ;;  %v3220_v36 = vadd.f32 %v3219_v62, %v3218_v38  ;;  %3175 = vst.msk [vmem:[%s6127_s28 + $0x68] sm:$0xff] %vm3161_vm0, %v3138_v6  ;;  %v3288_v45 = vmul.f32 %v3138_v6, %v3138_v6  ;;  %v3223_v39 = vsel %vm3161_vm0, %v3138_v6, 0.0 }
 0x333   : > { %3174 = vst.msk [vmem:[%s6127_s28 + $0x60] sm:$0xff] %vm3161_vm0, %v3137_v8  ;;  %v3221_v48 = vsel %vm3161_vm0, %v3137_v8, 0.0  ;;  %v3287_v32 = vmul.f32 %v3137_v8, %v3137_v8  ;;  %v3023_v23 = vpop.permute.xlu1 %3022 }
 0x334   : > { %v3333_v58 = vadd.f32 %v3332_v4, %v3331_v16  ;;  %v3222_v40 = vadd.f32 %v3221_v48, %v3220_v36  ;;  %v3018_v25 = vpop.permute.xlu0 %3017  ;;  %v3140_v61 = vmul.f32 %v3023_v23, %v5889_v24  ;;  %v3336_v52 = vsel %vm3161_vm0, %v3288_v45, 0.0  ;;  %v3548_v16 = vld [vmem:[%s6376_s1 + $0x1] ss:$0 sm:$0xff]  ;;  %v6893_v36 = vld [vmem:[#allocation48_spill] sm:$0xff] }
 0x335   : > { %v3334_v41 = vsel %vm3161_vm0, %v3287_v32, 0.0  ;;  %v3139_v33 = vmul.f32 %v3018_v25, %v5891_v9  ;;  %v3549_v25 = vld [vmem:[%s6376_s1] ss:$0 sm:$0xff] }
 0x336   : > { %v3335_v30 = vadd.f32 %v3334_v41, %v3333_v58  ;;  %v3224_v49 = vadd.f32 %v3223_v39, %v3222_v40  ;;  %3177 = vst.msk [vmem:[%s6127_s28 + $0x78] sm:$0xff] %vm3161_vm0, %v3140_v61  ;;  %v3290_v2 = vmul.f32 %v3140_v61, %v3140_v61  ;;  %v3227_v9 = vsel %vm3161_vm0, %v3140_v61, 0.0  ;;  %v6894_v39 = vld [vmem:[#allocation12_spill] sm:$0xff]  ;;  %v6895_v61 = vld [vmem:[#allocation13_spill] sm:$0xff] }
 0x337   : > { %3176 = vst.msk [vmem:[%s6127_s28 + $0x70] sm:$0xff] %vm3161_vm0, %v3139_v33  ;;  %v3225_v27 = vsel %vm3161_vm0, %v3139_v33, 0.0  ;;  %v3289_v28 = vmul.f32 %v3139_v33, %v3139_v33  ;;  %v3033_v50 = vpop.permute.xlu1 %3032  ;;  %v504_v41 = vmul.f32 %v3549_v25, %v6894_v39  ;;  %v503_v33 = vmul.f32 %v3549_v25, %v6895_v61  ;;  %v6900_v25 = vld [vmem:[#allocation121_spill] sm:$0xff] }
 0x338   : > { %v3337_v0 = vadd.f32 %v3336_v52, %v3335_v30  ;;  %v3226_v46 = vadd.f32 %v3225_v27, %v3224_v49  ;;  %v3028_v24 = vpop.permute.xlu0 %3027  ;;  %v3142_v11 = vmul.f32 %v3033_v50, %v5914_v42  ;;  %v3340_v29 = vsel %vm3161_vm0, %v3290_v2, 0.0 }
 0x339   : > { %v3338_v47 = vsel %vm3161_vm0, %v3289_v28, 0.0  ;;  %v3141_v26 = vmul.f32 %v3028_v24, %v5916_v15  ;;  %v6896_v28 = vld [vmem:[#allocation49_spill] sm:$0xff] }
 0x33a   : > { %v3339_v21 = vadd.f32 %v3338_v47, %v3337_v0  ;;  %v3228_v55 = vadd.f32 %v3227_v9, %v3226_v46  ;;  %3179 = vst.msk [vmem:[%s6127_s28 + $0x88] sm:$0xff] %vm3161_vm0, %v3142_v11  ;;  %v3292_v35 = vmul.f32 %v3142_v11, %v3142_v11  ;;  %v3231_v15 = vsel %vm3161_vm0, %v3142_v11, 0.0 }
 0x33b   : > { %3178 = vst.msk [vmem:[%s6127_s28 + $0x80] sm:$0xff] %vm3161_vm0, %v3141_v26  ;;  %v3229_v34 = vsel %vm3161_vm0, %v3141_v26, 0.0  ;;  %v3291_v5 = vmul.f32 %v3141_v26, %v3141_v26  ;;  %v3043_v19 = vpop.permute.xlu1 %3042  ;;  %v799_v0 = vmul.f32 %v3548_v16, %v6896_v28 }
 0x33c   : > { %v3341_v1 = vadd.f32 %v3340_v29, %v3339_v21  ;;  %v3230_v63 = vadd.f32 %v3229_v34, %v3228_v55  ;;  %v3038_v42 = vpop.permute.xlu0 %3037  ;;  %v3144_v37 = vmul.f32 %v3043_v19, %v5941_v44  ;;  %v3344_v62 = vsel %vm3161_vm0, %v3292_v35, 0.0  ;;  %v3550_v55 = vld [vmem:[%s6376_s1 + $0x2] ss:$0 sm:$0xff]  ;;  %v6897_v29 = vld [vmem:[#allocation84_spill] sm:$0xff]  ;;  %v6898_v34 = vld [vmem:[#allocation85_spill] sm:$0xff] }
 0x33d   : > { %v3342_v20 = vsel %vm3161_vm0, %v3291_v5, 0.0  ;;  %v3143_v38 = vmul.f32 %v3038_v42, %v5943_v13  ;;  %v800_v44 = vmul.f32 %v3548_v16, %v6893_v36  ;;  %v1096_v35 = vmul.f32 %v3550_v55, %v6897_v29 }
 0x33e   : > { %v3343_v53 = vadd.f32 %v3342_v20, %v3341_v1  ;;  %v3232_v7 = vadd.f32 %v3231_v15, %v3230_v63  ;;  %3181 = vst.msk [vmem:[%s6127_s28 + $0x98] sm:$0xff] %vm3161_vm0, %v3144_v37  ;;  %v3294_v54 = vmul.f32 %v3144_v37, %v3144_v37  ;;  %v3235_v32 = vsel %vm3161_vm0, %v3144_v37, 0.0  ;;  %v3551_v20 = vld [vmem:[%s6376_s1 + $0x3] ss:$0 sm:$0xff]  ;;  %v6899_v37 = vld [vmem:[#allocation120_spill] sm:$0xff] }
 0x33f   : > { %3180 = vst.msk [vmem:[%s6127_s28 + $0x90] sm:$0xff] %vm3161_vm0, %v3143_v38  ;;  %v3233_v6 = vsel %vm3161_vm0, %v3143_v38, 0.0  ;;  %v3293_v8 = vmul.f32 %v3143_v38, %v3143_v38  ;;  %v3053_v45 = vpop.permute.xlu1 %3052  ;;  %v836_v27 = vadd.f32 %v800_v44, %v504_v41  ;;  %v1095_v5 = vmul.f32 %v3550_v55, %v6898_v34 }
 0x340   : > { %v3345_v13 = vadd.f32 %v3344_v62, %v3343_v53  ;;  %v3234_v4 = vadd.f32 %v3233_v6, %v3232_v7  ;;  %v3048_v48 = vpop.permute.xlu0 %3047  ;;  %v3146_v40 = vmul.f32 %v3053_v45, %v5966_v22  ;;  %v3348_v52 = vsel %vm3161_vm0, %v3294_v54, 0.0 }
 0x341   : > { %v3346_v58 = vsel %vm3161_vm0, %v3293_v8, 0.0  ;;  %v3145_v23 = vmul.f32 %v3048_v48, %v5968_v51  ;;  %v835_v15 = vadd.f32 %v799_v0, %v503_v33  ;;  %v1392_v38 = vmul.f32 %v3551_v20, %v6899_v37 }
 0x342   : > { %v3347_v30 = vadd.f32 %v3346_v58, %v3345_v13  ;;  %v3236_v49 = vadd.f32 %v3235_v32, %v3234_v4  ;;  %3183 = vst.msk [vmem:[%s6127_s28 + $0xa8] sm:$0xff] %vm3161_vm0, %v3146_v40  ;;  %v3296_v2 = vmul.f32 %v3146_v40, %v3146_v40  ;;  %v3239_v47 = vsel %vm3161_vm0, %v3146_v40, 0.0 }
 0x343   : > { %3182 = vst.msk [vmem:[%s6127_s28 + $0xa0] sm:$0xff] %vm3161_vm0, %v3145_v23  ;;  %v3237_v22 = vsel %vm3161_vm0, %v3145_v23, 0.0  ;;  %v3295_v51 = vmul.f32 %v3145_v23, %v3145_v23  ;;  %v3063_v24 = vpop.permute.xlu1 %3062  ;;  %v1132_v44 = vadd.f32 %v1096_v35, %v836_v27  ;;  %v1131_v13 = vadd.f32 %v1095_v5, %v835_v15  ;;  %v6902_v27 = vld [vmem:[#allocation150_spill] sm:$0xff] }
 0x344   : > { %v3349_v46 = vadd.f32 %v3348_v52, %v3347_v30  ;;  %v3238_v50 = vadd.f32 %v3237_v22, %v3236_v49  ;;  %v3058_v9 = vpop.permute.xlu0 %3057  ;;  %v3148_v26 = vmul.f32 %v3063_v24, %v5993_v3  ;;  %v3352_v19 = vsel %vm3161_vm0, %v3296_v2, 0.0  ;;  %v3552_v2 = vld [vmem:[%s6376_s1 + $0x4] ss:$0 sm:$0xff]  ;;  %v6901_v22 = vld [vmem:[#allocation149_spill] sm:$0xff] }
 0x345   : > { %v3350_v11 = vsel %vm3161_vm0, %v3295_v51, 0.0  ;;  %v3147_v21 = vmul.f32 %v3058_v9, %v5995_v56  ;;  %v1428_v23 = vadd.f32 %v1392_v38, %v1132_v44  ;;  %v1688_v51 = vmul.f32 %v3552_v2, %v6901_v22 }
 0x346   : > { %v3351_v1 = vadd.f32 %v3350_v11, %v3349_v46  ;;  %v3240_v63 = vadd.f32 %v3239_v47, %v3238_v50  ;;  %3185 = vst.msk [vmem:[%s6127_s28 + $0xb8] sm:$0xff] %vm3161_vm0, %v3148_v26  ;;  %v3298_v42 = vmul.f32 %v3148_v26, %v3148_v26  ;;  %v3243_v6 = vsel %vm3161_vm0, %v3148_v26, 0.0  ;;  %v3553_v47 = vld [vmem:[%s6376_s1 + $0x5] ss:$0 sm:$0xff]  ;;  %v6903_v11 = vld [vmem:[#allocation185_spill] sm:$0xff] }
 0x347   : > { %3184 = vst.msk [vmem:[%s6127_s28 + $0xb0] sm:$0xff] %vm3161_vm0, %v3147_v21  ;;  %v3241_v3 = vsel %vm3161_vm0, %v3147_v21, 0.0  ;;  %v3297_v56 = vmul.f32 %v3147_v21, %v3147_v21  ;;  %v3073_v62 = vpop.permute.xlu1 %3072  ;;  %v1687_v28 = vmul.f32 %v3552_v2, %v6902_v27  ;;  %v1984_v26 = vmul.f32 %v3553_v47, %v6903_v11 }
 0x348   : > { %v3353_v53 = vadd.f32 %v3352_v19, %v3351_v1  ;;  %v3242_v7 = vadd.f32 %v3241_v3, %v3240_v63  ;;  %v3068_v54 = vpop.permute.xlu0 %3067  ;;  %v3150_v16 = vmul.f32 %v3073_v62, %v6018_v31  ;;  %v3356_v48 = vsel %vm3161_vm0, %v3298_v42, 0.0 }
 0x349   : > { %v3354_v8 = vsel %vm3161_vm0, %v3297_v56, 0.0  ;;  %v3149_v36 = vmul.f32 %v3068_v54, %v6020_v60  ;;  %v1391_v31 = vmul.f32 %v3551_v20, %v6900_v25  ;;  %v1724_v19 = vadd.f32 %v1688_v51, %v1428_v23 }
 0x34a   : > { %v3355_v4 = vadd.f32 %v3354_v8, %v3353_v53  ;;  %v3244_v45 = vadd.f32 %v3243_v6, %v3242_v7  ;;  %3187 = vst.msk [vmem:[%s6127_s28 + $0xc8] sm:$0xff] %vm3161_vm0, %v3150_v16  ;;  %v3300_v32 = vmul.f32 %v3150_v16, %v3150_v16  ;;  %v3247_v33 = vsel %vm3161_vm0, %v3150_v16, 0.0  ;;  %v6904_v7 = vld [vmem:[#allocation186_spill] sm:$0xff] }
 0x34b   : > { %3186 = vst.msk [vmem:[%s6127_s28 + $0xc0] sm:$0xff] %vm3161_vm0, %v3149_v36  ;;  %v3245_v58 = vsel %vm3161_vm0, %v3149_v36, 0.0  ;;  %v3299_v40 = vmul.f32 %v3149_v36, %v3149_v36  ;;  %v3083_v41 = vpop.permute.xlu1 %3082  ;;  %v1427_v9 = vadd.f32 %v1391_v31, %v1131_v13  ;;  %v2020_v53 = vadd.f32 %v1984_v26, %v1724_v19  ;;  %v3554_v13 = vld [vmem:[%s6376_s1 + $0x6] ss:$0 sm:$0xff] }
 0x34c   : > { %v3357_v39 = vadd.f32 %v3356_v48, %v3355_v4  ;;  %v3246_v60 = vadd.f32 %v3245_v58, %v3244_v45  ;;  %v3078_v61 = vpop.permute.xlu0 %3077  ;;  %v3152_v49 = vmul.f32 %v3083_v41, %v6045_v18  ;;  %v3360_v50 = vsel %vm3161_vm0, %v3300_v32, 0.0  ;;  %v6905_v4 = vld [vmem:[#allocation221_spill] sm:$0xff]  ;;  %v6906_v48 = vld [vmem:[#allocation222_spill] sm:$0xff] }
 0x34d   : > { %v3358_v30 = vsel %vm3161_vm0, %v3299_v40, 0.0  ;;  %v3151_v52 = vmul.f32 %v3078_v61, %v6047_v57  ;;  %v1723_v42 = vadd.f32 %v1687_v28, %v1427_v9  ;;  %v2280_v45 = vmul.f32 %v3554_v13, %v6905_v4  ;;  %v3556_v9 = vld [vmem:[%s6376_s1 + $0x8] ss:$0 sm:$0xff] }
 0x34e   : > { %v3359_v0 = vadd.f32 %v3358_v30, %v3357_v39  ;;  %v3248_v46 = vadd.f32 %v3247_v33, %v3246_v60  ;;  %3189 = vst.msk [vmem:[%s6127_s28 + $0xd8] sm:$0xff] %vm3161_vm0, %v3152_v49  ;;  %v3302_v24 = vmul.f32 %v3152_v49, %v3152_v49  ;;  %v3251_v34 = vsel %vm3161_vm0, %v3152_v49, 0.0  ;;  %v3555_v39 = vld [vmem:[%s6376_s1 + $0x7] ss:$0 sm:$0xff]  ;;  %v6907_v60 = vld [vmem:[#allocation31_spill] sm:$0xff] }
 0x34f   : > { %3188 = vst.msk [vmem:[%s6127_s28 + $0xd0] sm:$0xff] %vm3161_vm0, %v3151_v52  ;;  %v3249_v18 = vsel %vm3161_vm0, %v3151_v52, 0.0  ;;  %v3301_v57 = vmul.f32 %v3151_v52, %v3151_v52  ;;  %v3093_v29 = vpop.permute.xlu1 %3092  ;;  %v2279_v32 = vmul.f32 %v3554_v13, %v6906_v48  ;;  %v2576_v41 = vmul.f32 %v3555_v39, %v6907_v60  ;;  %v6908_v52 = vld [vmem:[#allocation32_spill] sm:$0xff] }
 0x350   : > { %v3361_v21 = vadd.f32 %v3360_v50, %v3359_v0  ;;  %v3250_v55 = vadd.f32 %v3249_v18, %v3248_v46  ;;  %v3088_v35 = vpop.permute.xlu0 %3087  ;;  %v3154_v1 = vmul.f32 %v3093_v29, %v6070_v17  ;;  %v3364_v15 = vsel %vm3161_vm0, %v3302_v24, 0.0 }
 0x351   : > { %v3362_v5 = vsel %vm3161_vm0, %v3301_v57, 0.0  ;;  %v3153_v63 = vmul.f32 %v3088_v35, %v6072_v59  ;;  %v1983_v17 = vmul.f32 %v3553_v47, %v6904_v7  ;;  %v2575_v2 = vmul.f32 %v3555_v39, %v6908_v52 }
 0x352   : > { %v3363_v3 = vadd.f32 %v3362_v5, %v3361_v21  ;;  %v3252_v56 = vadd.f32 %v3251_v34, %v3250_v55  ;;  %3191 = vst.msk [vmem:[%s6127_s28 + $0xe8] sm:$0xff] %vm3161_vm0, %v3154_v1  ;;  %v3304_v20 = vmul.f32 %v3154_v1, %v3154_v1  ;;  %v3255_v8 = vsel %vm3161_vm0, %v3154_v1, 0.0 }
 0x353   : > { %3190 = vst.msk [vmem:[%s6127_s28 + $0xe0] sm:$0xff] %vm3161_vm0, %v3153_v63  ;;  %v3253_v37 = vsel %vm3161_vm0, %v3153_v63, 0.0  ;;  %v3303_v38 = vmul.f32 %v3153_v63, %v3153_v63  ;;  %v3103_v54 = vpop.permute.xlu1 %3102  ;;  %v2019_v31 = vadd.f32 %v1983_v17, %v1723_v42  ;;  %v2316_v28 = vadd.f32 %v2280_v45, %v2020_v53 }
 0x354   : > { %v3365_v62 = vadd.f32 %v3364_v15, %v3363_v3  ;;  %v3254_v59 = vadd.f32 %v3253_v37, %v3252_v56  ;;  %v3098_v6 = vpop.permute.xlu0 %3097  ;;  %v3156_v36 = vmul.f32 %v3103_v54, %v6094_v12  ;;  %v3368_v23 = vsel %vm3161_vm0, %v3304_v20, 0.0 }
 0x355   : > { %v3366_v16 = vsel %vm3161_vm0, %v3303_v38, 0.0  ;;  %v3155_v44 = vmul.f32 %v3098_v6, %v6096_v43  ;;  %v2315_v0 = vadd.f32 %v2279_v32, %v2019_v31  ;;  %v2612_v11 = vadd.f32 %v2576_v41, %v2316_v28 }
 0x356   : > { %v3367_v58 = vadd.f32 %v3366_v16, %v3365_v62  ;;  %v3256_v40 = vadd.f32 %v3255_v8, %v3254_v59  ;;  %3193 = vst.msk [vmem:[%s6127_s28 + $0xf8] sm:$0xff] %vm3161_vm0, %v3156_v36  ;;  %v3306_v25 = vmul.f32 %v3156_v36, %v3156_v36  ;;  %v3259_v22 = vsel %vm3161_vm0, %v3156_v36, 0.0 }
 0x357   : > { %3192 = vst.msk [vmem:[%s6127_s28 + $0xf0] sm:$0xff] %vm3161_vm0, %v3155_v44  ;;  %v3257_v12 = vsel %vm3161_vm0, %v3155_v44, 0.0  ;;  %v3305_v43 = vmul.f32 %v3155_v44, %v3155_v44  ;;  %v3108_v30 = vpop.permute.xlu1 %3107  ;;  %v2611_v29 = vadd.f32 %v2575_v2, %v2315_v0 }
 0x358   : > { %v3369_v61 = vadd.f32 %v3368_v23, %v3367_v58  ;;  %v3258_v33 = vadd.f32 %v3257_v12, %v3256_v40  ;;  %v2824_v49 = vpop.permute.xlu0 %2823  ;;  %v3157_v27 = vmul.f32 %v3108_v30, %v6116_v14  ;;  %v3372_v24 = vsel %vm3161_vm0, %v3306_v25, 0.0 }
 0x359   : > { %v3370_v51 = vsel %vm3161_vm0, %v3305_v43, 0.0  ;;  %v2871_v47 = vmul.f32 %v3556_v9, %v2824_v49 }
 0x35a   : > { %v3371_v46 = vadd.f32 %v3370_v51, %v3369_v61  ;;  %v3260_v50 = vadd.f32 %v3259_v22, %v3258_v33  ;;  %3194 = vst.msk [vmem:[%s6127_s28 + $0x100] sm:$0xff] %vm3161_vm0, %v3157_v27  ;;  %v3261_v18 = vsel %vm3161_vm0, %v3157_v27, 0.0  ;;  %v3307_v57 = vmul.f32 %v3157_v27, %v3157_v27 }
 0x35b   : > { %v3113_v21 = vpop.permute.xlu1 %3112  ;;  %v2907_v3 = vadd.f32 %v2871_v47, %v2611_v29 }
 0x35c   : > { %v3262_v26 = vadd.f32 %v3261_v18, %v3260_v50  ;;  %v3373_v14 = vadd.f32 %v3372_v24, %v3371_v46  ;;  %v2829_v55 = vpop.permute.xlu0 %2828  ;;  %v3374_v35 = vsel %vm3161_vm0, %v3307_v57, 0.0  ;;  %v3158_v34 = vmul.f32 %v3113_v21, %v6118_v10 }
 0x35d   : > { %v2872_v5 = vmul.f32 %v3556_v9, %v2829_v55 }
 0x35e   : > { %v3375_v1 = vadd.f32 %v3374_v35, %v3373_v14  ;;  %3195 = vst.msk [vmem:[%s6127_s28 + $0x108] sm:$0xff] %vm3161_vm0, %v3158_v34  ;;  %v3263_v63 = vsel %vm3161_vm0, %v3158_v34, 0.0  ;;  %v3308_v19 = vmul.f32 %v3158_v34, %v3158_v34 }
 0x35f   : > { %v2908_v42 = vadd.f32 %v2872_v5, %v2612_v11  ;;  %v3264_v56 = vadd.f32 %v3263_v63, %v3262_v26  ;;  %v3123_v15 = vpop.permute.xlu1 %3122 }
 0x360   : > { %v3118_v20 = vpop.permute.xlu0 %3117  ;;  %v3376_v37 = vsel %vm3161_vm0, %v3308_v19, 0.0 }
 0x361   : > { %v3160_v38 = vmul.f32 %v3123_v15, %v2908_v42  ;;  %v3159_v53 = vmul.f32 %v3118_v20, %v2907_v3  ;;  %v3377_v7 = vadd.f32 %v3376_v37, %v3375_v1 }
 0x363   : > { %3197 = vst.msk [vmem:[%s6127_s28 + $0x118] sm:$0xff] %vm3161_vm0, %v3160_v38  ;;  %v3310_v10 = vmul.f32 %v3160_v38, %v3160_v38  ;;  %3196 = vst.msk [vmem:[%s6127_s28 + $0x110] sm:$0xff] %vm3161_vm0, %v3159_v53  ;;  %v3265_v17 = vsel %vm3161_vm0, %v3159_v53, 0.0  ;;  %v3309_v62 = vmul.f32 %v3159_v53, %v3159_v53  ;;  %v3267_v54 = vsel %vm3161_vm0, %v3160_v38, 0.0 }
 0x364   : > { %v3266_v59 = vadd.f32 %v3265_v17, %v3264_v56 }
 0x365   : > { %v3378_v6 = vsel %vm3161_vm0, %v3309_v62, 0.0  ;;  %v3380_v36 = vsel %vm3161_vm0, %v3310_v10, 0.0 }
 0x366   : > { %v3268_v8 = vadd.f32 %v3267_v54, %v3266_v59  ;;  %v3379_v16 = vadd.f32 %v3378_v6, %v3377_v7 }
 0x368   : > { %v3269_v44 = vrot.slane %v3268_v8, 4  ;;  %v3381_v13 = vadd.f32 %v3380_v36, %v3379_v16 }
 0x36a   : > { %v3270_v4 = vadd.f32 %v3269_v44, %v3268_v8  ;;  %v3382_v45 = vrot.slane %v3381_v13, 4 }
 0x36c   : > { %v3271_v48 = vrot.slane %v3270_v4, 2  ;;  %v3383_v32 = vadd.f32 %v3382_v45, %v3381_v13 }
 0x36e   : > { %v3272_v58 = vadd.f32 %v3271_v48, %v3270_v4  ;;  %v3384_v40 = vrot.slane %v3383_v32, 2 }
 0x370   : > { %v3273_v23 = vrot.slane %v3272_v58, 1  ;;  %v3385_v25 = vadd.f32 %v3384_v40, %v3383_v32 }
 0x372   : > { %v3274_v12 = vadd.f32 %v3273_v23, %v3272_v58  ;;  %v3386_v43 = vrot.slane %v3385_v25, 1 }
 0x374   : > { %v3387_v31 = vadd.f32 %v3386_v43, %v3385_v25  ;;  %3388 = vst.msk [vmem:[%s241_s27] sm:$0xff] %vm3161_vm0, %v3274_v12 }
 0x376   : > { %3389 = vst.msk [vmem:[%s245_s30] sm:$0xff] %vm3161_vm0, %v3387_v31 }
 0x377 PF: > { %s16_s18 = sadd.s32 1, %s3563_s18  }
 0x378   : > { %p13_p4 = scmp.ge.s32.totalorder %s16_s18, 4  }
 0x37a   :  { %15 = sbr.rel (!%p13_p4) target bundleno = 1 (0x1), region = 94 }

// kernel: vgg16bn_forward.13
= control target key start
LH: loop header
LB: loop body
LE: loop exit
PB: predicated region body
PF: predicated region fallthrough
CT: control target
= control target key end

     0   :  { %s444_s15 = smov 0   ;;  %s521_s0 = inlined_call_operand.vmem [shape: f32[2,80,128], index: 0, kind: input, shape index: {}]   ;;  %s522_s1 = inlined_call_operand.vmem [shape: f32[1,128], index: 1, kind: input, shape index: {}]   ;;  %s523_s2 = inlined_call_operand.vmem [shape: f32[1,128], index: 2, kind: input, shape index: {}]   ;;  %s524_s3 = inlined_call_operand.vmem [shape: f32[80,1], index: 3, kind: input, shape index: {}]   ;;  %s525_s4 = inlined_call_operand.vmem [shape: f32[2,80,128], index: 4, kind: output, shape index: {}]  }
   0x1 LB: > { %s387_s16 = sadd.s32 4294967295, %s416_s15   ;;  %p391_p0 = scmp.ge.s32.totalorder %s416_s15, 1  ;;  %s416_s15 = sphi %s444_s15, %s14_s15  }
   0x2   : > { %p162_p1 = scmp.lt.s32.totalorder %s416_s15, 3 }
   0x4   : > { %p163_p2 = pnand %p391_p0, %p162_p1 }
   0x5   : > { %v254_v0 = vld [vmem:[%s524_s3 + $0x10] sm:$0xff] (!%p163_p2)  ;;  %v252_v1 = vld [vmem:[%s524_s3] sm:$0xff] (!%p163_p2)  ;;  %v418_v2 = vmov (!%p163_p2), 0   ;;  %v255_v3 = vld [vmem:[%s524_s3 + $0x18] sm:$0xff] (!%p163_p2)  ;;  %p188_p3 = scmp.lt.s32.totalorder (!%p163_p2), %s387_s16, 1 }
   0x6   : > { %166 = sbr.rel (%p163_p2) target bundleno = 154 (0x9a), region = 36  ;;  %409 = vset.pattern.permute.xlu1 (!%p163_p2), %v418_v2  ;;  %408 = vset.pattern.permute.xlu0 (!%p163_p2), %v418_v2  ;;  %v253_v4 = vld [vmem:[%s524_s3 + $0x8] sm:$0xff] (!%p163_p2)  ;;  %v256_v6 = vld [vmem:[%s524_s3 + $0x20] sm:$0xff] (!%p163_p2)  ;;  %v259_v7 = vld [vmem:[%s524_s3 + $0x38] sm:$0xff] (!%p163_p2) }
   0x7   : > { %274 = vperm.xlu1 (!%p163_p2), %409, %v254_v0   ;;  %264 = vperm.xlu0 (!%p163_p2), %408, %v252_v1   ;;  %v257_v5 = vld [vmem:[%s524_s3 + $0x28] sm:$0xff] (!%p163_p2)  ;;  %v258_v8 = vld [vmem:[%s524_s3 + $0x30] sm:$0xff] (!%p163_p2)  ;;  %v260_v10 = vld [vmem:[%s524_s3 + $0x40] sm:$0xff] (!%p163_p2) }
   0x8   : > { %v261_v9 = vld [vmem:[%s524_s3 + $0x48] sm:$0xff] (!%p163_p2)  ;;  %v394_v12 = vld [vmem:[%s522_s1] ss:$0 sm:$0xff] (!%p163_p2) }
   0x9   : > { %v395_v16 = vld [vmem:[%s523_s2] ss:$0 sm:$0xff] (!%p163_p2) }
   0xb   : > { %279 = vperm.xlu1 (!%p163_p2), %409, %v255_v3   ;;  %269 = vperm.xlu0 (!%p163_p2), %408, %v253_v4  }
   0xd   : > { %s527_s16 = smov (!%p188_p3, %s387_s16), 1 }
   0xe   : > { %s398_s11 = smul.u32 80, %s527_s16 }
   0xf   : > { %289 = vperm.xlu1 %409, %v257_v5   ;;  %284 = vperm.xlu0 %408, %v256_v6  }
  0x10   : > { %s485_s14 = scalar_lea.vmem %s521_s0, %s398_s11  ;;  %s504_s22 = scalar_lea.vmem %s525_s4, %s398_s11 }
  0x11   : > { %v200_v11 = vld [vmem:[%s485_s14 + $0x10] sm:$0xff]  ;;  %v198_v13 = vld [vmem:[%s485_s14] sm:$0xff]  ;;  %v201_v17 = vld [vmem:[%s485_s14 + $0x18] sm:$0xff] }
  0x12   : > { %v217_v14 = vmul.f32 %v394_v12, %v200_v11  ;;  %v215_v15 = vmul.f32 %v394_v12, %v198_v13  ;;  %v199_v18 = vld [vmem:[%s485_s14 + $0x8] sm:$0xff]  ;;  %v218_v21 = vmul.f32 %v394_v12, %v201_v17  ;;  %v202_v24 = vld [vmem:[%s485_s14 + $0x20] sm:$0xff]  ;;  %v205_v31 = vld [vmem:[%s485_s14 + $0x38] sm:$0xff] }
  0x13   : > { %299 = vperm.xlu1 %409, %v259_v7   ;;  %294 = vperm.xlu0 %408, %v258_v8   ;;  %v216_v22 = vmul.f32 %v394_v12, %v199_v18  ;;  %v203_v23 = vld [vmem:[%s485_s14 + $0x28] sm:$0xff]  ;;  %v219_v26 = vmul.f32 %v394_v12, %v202_v24  ;;  %v204_v32 = vld [vmem:[%s485_s14 + $0x30] sm:$0xff]  ;;  %v222_v37 = vmul.f32 %v394_v12, %v205_v31  ;;  %v206_v44 = vld [vmem:[%s485_s14 + $0x40] sm:$0xff] }
  0x14   : > { %v234_v19 = vadd.f32 %v395_v16, %v217_v14  ;;  %v232_v20 = vadd.f32 %v395_v16, %v215_v15  ;;  %v220_v25 = vmul.f32 %v394_v12, %v203_v23  ;;  %v235_v29 = vadd.f32 %v395_v16, %v218_v21  ;;  %v207_v43 = vld [vmem:[%s485_s14 + $0x48] sm:$0xff] }
  0x15   : > { %v233_v30 = vadd.f32 %v395_v16, %v216_v22  ;;  %v236_v36 = vadd.f32 %v395_v16, %v219_v26  ;;  %v221_v38 = vmul.f32 %v394_v12, %v204_v32  ;;  %v239_v49 = vadd.f32 %v395_v16, %v222_v37 }
  0x16   : > { %v244_v27 = vmax.f32 %v234_v19, 0.0  ;;  %v242_v28 = vmax.f32 %v232_v20, 0.0  ;;  %v237_v35 = vadd.f32 %v395_v16, %v220_v25  ;;  %v245_v41 = vmax.f32 %v235_v29, 0.0 }
  0x17   : > { %309 = vperm.xlu1 %409, %v261_v9   ;;  %304 = vperm.xlu0 %408, %v260_v10   ;;  %v243_v42 = vmax.f32 %v233_v30, 0.0  ;;  %v246_v48 = vmax.f32 %v236_v36, 0.0  ;;  %v238_v50 = vadd.f32 %v395_v16, %v221_v38  ;;  %v224_v53 = vmul.f32 %v394_v12, %v207_v43 }
  0x18   : > { %v247_v47 = vmax.f32 %v237_v35, 0.0  ;;  %v223_v54 = vmul.f32 %v394_v12, %v206_v44  ;;  %v249_v57 = vmax.f32 %v239_v49, 0.0 }
  0x19   : > { %v248_v58 = vmax.f32 %v238_v50, 0.0  ;;  %v241_v61 = vadd.f32 %v395_v16, %v224_v53 }
  0x1a   : > { %v240_v62 = vadd.f32 %v395_v16, %v223_v54 }
  0x1b   : > { %v251_v3 = vmax.f32 %v241_v61, 0.0 }
  0x1c   : > { %v250_v4 = vmax.f32 %v240_v62, 0.0 }
  0x86   : > { %v275_v33 = vpop.permute.xlu1 %274  ;;  %v265_v34 = vpop.permute.xlu0 %264 }
  0x87   : > { %v314_v39 = vmul.f32 %v275_v33, %v244_v27  ;;  %v312_v40 = vmul.f32 %v265_v34, %v242_v28 }
  0x89   : > { %324 = vst [vmem:[%s504_s22 + $0x10] sm:$0xff] %v314_v39  ;;  %322 = vst [vmem:[%s504_s22] sm:$0xff] %v312_v40 }
  0x8a   : > { %v280_v45 = vpop.permute.xlu1 %279  ;;  %v270_v46 = vpop.permute.xlu0 %269 }
  0x8b   : > { %v315_v51 = vmul.f32 %v280_v45, %v245_v41  ;;  %v313_v52 = vmul.f32 %v270_v46, %v243_v42 }
  0x8d   : > { %325 = vst [vmem:[%s504_s22 + $0x18] sm:$0xff] %v315_v51  ;;  %323 = vst [vmem:[%s504_s22 + $0x8] sm:$0xff] %v313_v52 }
  0x8e   : > { %v290_v55 = vpop.permute.xlu1 %289  ;;  %v285_v56 = vpop.permute.xlu0 %284 }
  0x8f   : > { %v317_v59 = vmul.f32 %v290_v55, %v247_v47  ;;  %v316_v60 = vmul.f32 %v285_v56, %v246_v48 }
  0x91   : > { %327 = vst [vmem:[%s504_s22 + $0x28] sm:$0xff] %v317_v59  ;;  %326 = vst [vmem:[%s504_s22 + $0x20] sm:$0xff] %v316_v60 }
  0x92   : > { %v300_v63 = vpop.permute.xlu1 %299  ;;  %v295_v0 = vpop.permute.xlu0 %294 }
  0x93   : > { %v319_v1 = vmul.f32 %v300_v63, %v249_v57  ;;  %v318_v2 = vmul.f32 %v295_v0, %v248_v58 }
  0x95   : > { %329 = vst [vmem:[%s504_s22 + $0x38] sm:$0xff] %v319_v1  ;;  %328 = vst [vmem:[%s504_s22 + $0x30] sm:$0xff] %v318_v2 }
  0x96   : > { %v310_v5 = vpop.permute.xlu1 %309  ;;  %v305_v6 = vpop.permute.xlu0 %304 }
  0x97   : > { %v321_v7 = vmul.f32 %v310_v5, %v251_v3  ;;  %v320_v8 = vmul.f32 %v305_v6, %v250_v4 }
  0x99   : > { %331 = vst [vmem:[%s504_s22 + $0x48] sm:$0xff] %v321_v7  ;;  %330 = vst [vmem:[%s504_s22 + $0x40] sm:$0xff] %v320_v8 }
  0x9a PF: > { %s14_s15 = sadd.s32 1, %s416_s15  }
  0x9b   : > { %p11_p4 = scmp.ge.s32.totalorder %s14_s15, 4  }
  0x9d   :  { %13 = sbr.rel (!%p11_p4) target bundleno = 1 (0x1), region = 66 }

// kernel: vgg16bn_forward.10
= control target key start
LH: loop header
LB: loop body
LE: loop exit
PB: predicated region body
PF: predicated region fallthrough
CT: control target
= control target key end

     0   :  { %s6594_s18 = smov 0   ;;  %s8085_s0 = inlined_call_operand.vmem [shape: f32[2,326,64], index: 0, kind: input, shape index: {}]   ;;  %s8086_s1 = inlined_call_operand.vmem [shape: f32[9,64,64], index: 1, kind: input, shape index: {}]   ;;  %s8087_s2 = inlined_call_operand.vmem [shape: f32[288,1], index: 2, kind: input, shape index: {}]   ;;  %s8088_s3 = inlined_call_operand.vmem [shape: f32[2,288,64], index: 3, kind: output, shape index: {0}]   ;;  %s8089_s4 = inlined_call_operand.vmem [shape: f32[2,8,64], index: 4, kind: output, shape index: {1}]   ;;  %s8090_s5 = inlined_call_operand.vmem [shape: f32[2,8,64], index: 5, kind: output, shape index: {2}]  }
   0x1 LB: > { %s4677_s19 = sadd.s32 4294967295, %s6561_s18   ;;  %p4681_p0 = scmp.ge.s32.totalorder %s6561_s18, 1  ;;  %s6561_s18 = sphi %s6594_s18, %s16_s18  }
   0x2   : > { %p192_p1 = scmp.lt.s32.totalorder %s6561_s18, 3 }
   0x4   : > { %p193_p2 = pnand %p4681_p0, %p192_p1 }
   0x5   : > { %v4686_v0 = vld [vmem:[%s8086_s1 + $0x40] sm:$0xff] (!%p193_p2)  ;;  %v4687_v1 = vld [vmem:[%s8086_s1 + $0x48] sm:$0xff] (!%p193_p2)  ;;  %p228_p3 = scmp.lt.s32.totalorder (!%p193_p2), %s4677_s19, 1  ;;  %v4688_v5 = vld [vmem:[%s8086_s1 + $0x50] sm:$0xff] (!%p193_p2)  ;;  %vm335_vm0 = vcmask (!%p193_p2), 523264  }
   0x6   : > { %196 = sbr.rel (%p193_p2) target bundleno = 583 (0x247), region = 32  ;;  %v4854_v2 = vld [vmem:[%s8086_s1 + $0x100] sm:$0xff] (!%p193_p2)  ;;  %v6102_v3 = vpack.c.bf16 (!%p193_p2), %v4687_v1, %v4686_v0  ;;  %v4855_v4 = vld [vmem:[%s8086_s1 + $0x108] sm:$0xff] (!%p193_p2)  ;;  %v4689_v6 = vld [vmem:[%s8086_s1 + $0x58] sm:$0xff] (!%p193_p2) }
   0x7   : > { %v6620_v7 = vpack.c.bf16 (!%p193_p2), %v4855_v4, %v4854_v2  ;;  %v6106_v8 = vpack.c.bf16 (!%p193_p2), %v4689_v6, %v4688_v5  ;;  %v4856_v9 = vld [vmem:[%s8086_s1 + $0x110] sm:$0xff] (!%p193_p2)  ;;  %v4857_v10 = vld [vmem:[%s8086_s1 + $0x118] sm:$0xff] (!%p193_p2)  ;;  %v4690_v11 = vld [vmem:[%s8086_s1 + $0x60] sm:$0xff] (!%p193_p2) }
   0x8   : > { %6103 = vmatprep.subr.bf16.mxu1 (!%p193_p2), %v6102_v3  ;;  %v6633_v12 = vpack.c.bf16 (!%p193_p2), %v4857_v10, %v4856_v9  ;;  %v4691_v13 = vld [vmem:[%s8086_s1 + $0x68] sm:$0xff] (!%p193_p2)  ;;  %v4858_v14 = vld [vmem:[%s8086_s1 + $0x120] sm:$0xff] (!%p193_p2)  ;;  %v4692_v18 = vld [vmem:[%s8086_s1 + $0x70] sm:$0xff] (!%p193_p2) }
   0x9   : > { %v4859_v15 = vld [vmem:[%s8086_s1 + $0x128] sm:$0xff] (!%p193_p2)  ;;  %6167 = vmatprep.subr.bf16.mxu0 (!%p193_p2), %v6620_v7  ;;  %6105 = vmatpush3.bf16.msra.mxu1 (!%p193_p2), %v6102_v3  ;;  %v6110_v16 = vpack.c.bf16 (!%p193_p2), %v4691_v13, %v4690_v11  ;;  %v4693_v19 = vld [vmem:[%s8086_s1 + $0x78] sm:$0xff] (!%p193_p2)  ;;  %v4860_v20 = vld [vmem:[%s8086_s1 + $0x130] sm:$0xff] (!%p193_p2) }
   0xa   : > { %6169 = vmatpush3.bf16.msra.mxu0 (!%p193_p2), %v6620_v7  ;;  %6107 = vmatprep.subr.bf16.mxu1 (!%p193_p2), %v6106_v8  ;;  %v6648_v17 = vpack.c.bf16 (!%p193_p2), %v4859_v15, %v4858_v14  ;;  %v4861_v21 = vld [vmem:[%s8086_s1 + $0x138] sm:$0xff] (!%p193_p2)  ;;  %v6114_v24 = vpack.c.bf16 (!%p193_p2), %v4693_v19, %v4692_v18  ;;  %v282_v26 = vld [vmem:[%s8086_s1] sm:$0xff] (!%p193_p2)  ;;  %v283_v27 = vld [vmem:[%s8086_s1 + $0x8] sm:$0xff] (!%p193_p2) }
   0xb   : > { %6171 = vmatprep.subr.bf16.mxu0 (!%p193_p2), %v6633_v12  ;;  %v6672_v25 = vpack.c.bf16 (!%p193_p2), %v4861_v21, %v4860_v20  ;;  %v4898_v28 = vld [vmem:[%s8086_s1 + $0x140] sm:$0xff] (!%p193_p2)  ;;  %v4899_v29 = vld [vmem:[%s8086_s1 + $0x148] sm:$0xff] (!%p193_p2)  ;;  %v6118_v30 = vpack.c.bf16 (!%p193_p2), %v283_v27, %v282_v26  ;;  %v4900_v32 = vld [vmem:[%s8086_s1 + $0x150] sm:$0xff] (!%p193_p2) }
   0xc   : > { %v6182_v31 = vpack.c.bf16 (!%p193_p2), %v4899_v29, %v4898_v28  ;;  %v4901_v33 = vld [vmem:[%s8086_s1 + $0x158] sm:$0xff] (!%p193_p2)  ;;  %v284_v35 = vld [vmem:[%s8086_s1 + $0x10] sm:$0xff] (!%p193_p2)  ;;  %v4902_v42 = vld [vmem:[%s8086_s1 + $0x160] sm:$0xff] (!%p193_p2) }
   0xd   : > { %s8092_s19 = smov (!%p228_p3, %s4677_s19), 1  ;;  %6109 = vmatpush3.bf16.msra.mxu1 %v6106_v8  ;;  %v285_v36 = vld [vmem:[%s8086_s1 + $0x18] sm:$0xff]  ;;  %v6186_v39 = vpack.c.bf16 %v4901_v33, %v4900_v32  ;;  %v4903_v43 = vld [vmem:[%s8086_s1 + $0x168] sm:$0xff]  ;;  %v286_v49 = vld [vmem:[%s8086_s1 + $0x20] sm:$0xff] }
   0xe   : > { %s6542_s21 = smul.u32 328, %s8092_s19  ;;  %6173 = vmatpush3.bf16.msra.mxu0 %v6633_v12  ;;  %6111 = vmatprep.subr.bf16.mxu1 %v6110_v16  ;;  %v6122_v41 = vpack.c.bf16 %v285_v36, %v284_v35  ;;  %v6190_v48 = vpack.c.bf16 %v4903_v43, %v4902_v42  ;;  %v287_v50 = vld [vmem:[%s8086_s1 + $0x28] sm:$0xff]  ;;  %v4904_v51 = vld [vmem:[%s8086_s1 + $0x170] sm:$0xff]  ;;  %v4905_v52 = vld [vmem:[%s8086_s1 + $0x178] sm:$0xff] }
   0xf   : > { %6175 = vmatprep.subr.bf16.mxu0 %v6648_v17  ;;  %v6126_v53 = vpack.c.bf16 %v287_v50, %v286_v49  ;;  %v6194_v58 = vpack.c.bf16 %v4905_v52, %v4904_v51  ;;  %v4942_v59 = vld [vmem:[%s8086_s1 + $0x180] sm:$0xff]  ;;  %v4943_v60 = vld [vmem:[%s8086_s1 + $0x188] sm:$0xff]  ;;  %v288_v0 = vld [vmem:[%s8086_s1 + $0x30] sm:$0xff] }
  0x10   : > { %s6662_s30 = scalar_lea.vmem %s8085_s0, %s6542_s21  ;;  %v289_v1 = vld [vmem:[%s8086_s1 + $0x38] sm:$0xff]  ;;  %v6760_v3 = vpack.c.bf16 %v4943_v60, %v4942_v59  ;;  %v4766_v14 = vld [vmem:[%s8086_s1 + $0x80] sm:$0xff]  ;;  %v4767_v15 = vld [vmem:[%s8086_s1 + $0x88] sm:$0xff]  ;;  %s4684_s21 = sshll.u32 %s8092_s19, 3 }
  0x11   : > { %v290_v22 = vld [vmem:[%s6662_s30 + $0x1] sm:$0xff]  ;;  %v1910_v23 = vld [vmem:[%s6662_s30 + $0x13] sm:$0xff]  ;;  %6113 = vmatpush3.bf16.msra.mxu1 %v6110_v16  ;;  %v291_v34 = vld [vmem:[%s6662_s30 + $0x9] sm:$0xff]  ;;  %v6130_v4 = vpack.c.bf16 %v289_v1, %v288_v0  ;;  %v6785_v18 = vpack.c.bf16 %v4767_v15, %v4766_v14  ;;  %s241_s24 = scalar_lea.vmem %s8089_s4, %s4684_s21  ;;  %s245_s27 = scalar_lea.vmem %s8090_s5, %s4684_s21 }
  0x12   : > { %5488 = vmatprep.mubr.msk.f32.mxu1 %vm335_vm0, %v290_v22  ;;  %5768 = vmatprep.mubr.msk.f32.mxu0 %vm335_vm0, %v1910_v23  ;;  %v1911_v37 = vld [vmem:[%s6662_s30 + $0x1b] sm:$0xff]  ;;  %v292_v38 = vld [vmem:[%s6662_s30 + $0x11] sm:$0xff]  ;;  %v1912_v40 = vld [vmem:[%s6662_s30 + $0x23] sm:$0xff] }
  0x13   : > { %6177 = vmatpush3.bf16.msra.mxu0 %v6648_v17  ;;  %6115 = vmatprep.subr.bf16.mxu1 %v6114_v24  ;;  %v293_v44 = vld [vmem:[%s6662_s30 + $0x19] sm:$0xff]  ;;  %v1913_v45 = vld [vmem:[%s6662_s30 + $0x2b] sm:$0xff]  ;;  %v294_v46 = vld [vmem:[%s6662_s30 + $0x21] sm:$0xff] }
  0x14   : > { %6179 = vmatprep.subr.bf16.mxu0 %v6672_v25  ;;  %v1914_v47 = vld [vmem:[%s6662_s30 + $0x33] sm:$0xff]  ;;  %v295_v54 = vld [vmem:[%s6662_s30 + $0x29] sm:$0xff]  ;;  %v1915_v55 = vld [vmem:[%s6662_s30 + $0x3b] sm:$0xff] }
  0x15   : > { %6117 = vmatpush3.bf16.msra.mxu1 %v6114_v24  ;;  %v296_v56 = vld [vmem:[%s6662_s30 + $0x31] sm:$0xff]  ;;  %v1916_v57 = vld [vmem:[%s6662_s30 + $0x43] sm:$0xff]  ;;  %v297_v61 = vld [vmem:[%s6662_s30 + $0x39] sm:$0xff] }
  0x16   : > { %6119 = vmatprep.subr.bf16.mxu1 %v6118_v30  ;;  %v1917_v62 = vld [vmem:[%s6662_s30 + $0x4b] sm:$0xff]  ;;  %v298_v63 = vld [vmem:[%s6662_s30 + $0x41] sm:$0xff]  ;;  %v1918_v2 = vld [vmem:[%s6662_s30 + $0x53] sm:$0xff] }
  0x17   : > { %6181 = vmatpush3.bf16.msra.mxu0 %v6672_v25  ;;  %v299_v5 = vld [vmem:[%s6662_s30 + $0x49] sm:$0xff]  ;;  %v1919_v6 = vld [vmem:[%s6662_s30 + $0x5b] sm:$0xff]  ;;  %v300_v8 = vld [vmem:[%s6662_s30 + $0x51] sm:$0xff] }
  0x18   : > { %6183 = vmatprep.subr.bf16.mxu0 %v6182_v31  ;;  %5489 = vmatmul.mubr.msk.f32.vlgmr.msra.gmra.mrb[0].mxu1 %vm335_vm0, %v291_v34  ;;  %v1920_v9 = vld [vmem:[%s6662_s30 + $0x63] sm:$0xff]  ;;  %v301_v10 = vld [vmem:[%s6662_s30 + $0x59] sm:$0xff]  ;;  %v1921_v11 = vld [vmem:[%s6662_s30 + $0x6b] sm:$0xff] }
  0x19   : > { %6121 = vmatpush3.bf16.msra.mxu1 %v6118_v30  ;;  %5491 = vmatprep.mubr.msk.f32.mxu1 %vm335_vm0, %v292_v38  ;;  %v302_v13 = vld [vmem:[%s6662_s30 + $0x61] sm:$0xff]  ;;  %v1922_v16 = vld [vmem:[%s6662_s30 + $0x73] sm:$0xff]  ;;  %v303_v19 = vld [vmem:[%s6662_s30 + $0x69] sm:$0xff] }
  0x1a   : > { %5769 = vmatmul.mubr.msk.f32.vlgmr.msra.gmra.mrb[0].mxu0 %vm335_vm0, %v1911_v37  ;;  %6123 = vmatprep.subr.bf16.mxu1 %v6122_v41  ;;  %v1923_v20 = vld [vmem:[%s6662_s30 + $0x7b] sm:$0xff]  ;;  %v304_v21 = vld [vmem:[%s6662_s30 + $0x71] sm:$0xff]  ;;  %v1924_v22 = vld [vmem:[%s6662_s30 + $0x83] sm:$0xff] }
  0x1b   : > { %6185 = vmatpush3.bf16.msra.mxu0 %v6182_v31  ;;  %5771 = vmatprep.mubr.msk.f32.mxu0 %vm335_vm0, %v1912_v40  ;;  %v305_v23 = vld [vmem:[%s6662_s30 + $0x79] sm:$0xff]  ;;  %v1925_v24 = vld [vmem:[%s6662_s30 + $0x8b] sm:$0xff]  ;;  %v306_v26 = vld [vmem:[%s6662_s30 + $0x81] sm:$0xff] }
  0x1c   : > { %6187 = vmatprep.subr.bf16.mxu0 %v6186_v39  ;;  %5492 = vmatmul.mubr.msk.f32.gmra.mrb[2].mxu1 %vm335_vm0, %v293_v44  ;;  %v1926_v27 = vld [vmem:[%s6662_s30 + $0x93] sm:$0xff]  ;;  %v307_v28 = vld [vmem:[%s6662_s30 + $0x89] sm:$0xff]  ;;  %v1927_v29 = vld [vmem:[%s6662_s30 + $0x9b] sm:$0xff] }
  0x1d   : > { %5494 = vmatprep.mubr.msk.f32.mxu1 %vm335_vm0, %v294_v46  ;;  %6125 = vmatpush3.bf16.msra.mxu1 %v6122_v41  ;;  %v308_v30 = vld [vmem:[%s6662_s30 + $0x91] sm:$0xff]  ;;  %v309_v34 = vld [vmem:[%s6662_s30 + $0x99] sm:$0xff]  ;;  %v310_v36 = vld [vmem:[%s6662_s30 + $0xa1] sm:$0xff] }
  0x1e   : > { %5772 = vmatmul.mubr.msk.f32.gmra.mrb[2].mxu0 %vm335_vm0, %v1913_v45  ;;  %6127 = vmatprep.subr.bf16.mxu1 %v6126_v53  ;;  %v2344_v31 = vld [vmem:[%s6662_s30 + $0x14] sm:$0xff]  ;;  %v2345_v35 = vld [vmem:[%s6662_s30 + $0x1c] sm:$0xff]  ;;  %v6826_v37 = vld [vmem:[%s6662_s30 + $0x24] sm:$0xff] }
  0x1f   : > { %5774 = vmatprep.mubr.msk.f32.mxu0 %vm335_vm0, %v1914_v47  ;;  %6189 = vmatpush3.bf16.msra.mxu0 %v6186_v39  ;;  %v4944_v32 = vld [vmem:[%s8086_s1 + $0x190] sm:$0xff]  ;;  %v4945_v33 = vld [vmem:[%s8086_s1 + $0x198] sm:$0xff]  ;;  %v4946_v39 = vld [vmem:[%s8086_s1 + $0x1a0] sm:$0xff] }
  0x20   : > { %6191 = vmatprep.subr.bf16.mxu0 %v6190_v48  ;;  %5495 = vmatmul.mubr.msk.f32.gmra.mrb[4].mxu1 %vm335_vm0, %v295_v54  ;;  %v6202_v38 = vpack.c.bf16 %v4945_v33, %v4944_v32  ;;  %v4947_v40 = vld [vmem:[%s8086_s1 + $0x1a8] sm:$0xff]  ;;  %v312_v43 = vld [vmem:[%s6662_s30 + $0xb1] sm:$0xff]  ;;  %v6862_v49 = vld [vmem:[%s6662_s30 + $0x3c] sm:$0xff] }
  0x21   : > { %5497 = vmatprep.mubr.msk.f32.mxu1 %vm335_vm0, %v296_v56  ;;  %6129 = vmatpush3.bf16.msra.mxu1 %v6126_v53  ;;  %v311_v41 = vld [vmem:[%s6662_s30 + $0xa9] sm:$0xff]  ;;  %v6846_v44 = vld [vmem:[%s6662_s30 + $0x34] sm:$0xff]  ;;  %v6206_v45 = vpack.c.bf16 %v4947_v40, %v4946_v39  ;;  %v314_v50 = vld [vmem:[%s6662_s30 + $0xc1] sm:$0xff] }
  0x22   : > { %5775 = vmatmul.mubr.msk.f32.gmra.mrb[4].mxu0 %vm335_vm0, %v1915_v55  ;;  %6131 = vmatprep.subr.bf16.mxu1 %v6130_v4  ;;  %v6842_v42 = vld [vmem:[%s6662_s30 + $0x2c] sm:$0xff]  ;;  %v4949_v47 = vld [vmem:[%s8086_s1 + $0x1b8] sm:$0xff]  ;;  %v6866_v51 = vld [vmem:[%s6662_s30 + $0x44] sm:$0xff] }
  0x23   : > { %5777 = vmatprep.mubr.msk.f32.mxu0 %vm335_vm0, %v1916_v57  ;;  %6193 = vmatpush3.bf16.msra.mxu0 %v6190_v48  ;;  %v4948_v46 = vld [vmem:[%s8086_s1 + $0x1b0] sm:$0xff]  ;;  %v313_v48 = vld [vmem:[%s6662_s30 + $0xb9] sm:$0xff]  ;;  %v4987_v54 = vld [vmem:[%s8086_s1 + $0x1c8] sm:$0xff] }
  0x24   : > { %6195 = vmatprep.subr.bf16.mxu0 %v6194_v58  ;;  %5498 = vmatmul.mubr.msk.f32.gmra.mrb[6].mxu1 %vm335_vm0, %v297_v61  ;;  %v6210_v52 = vpack.c.bf16 %v4949_v47, %v4948_v46  ;;  %v4986_v53 = vld [vmem:[%s8086_s1 + $0x1c0] sm:$0xff]  ;;  %v315_v55 = vld [vmem:[%s6662_s30 + $0xc9] sm:$0xff]  ;;  %v316_v57 = vld [vmem:[%s6662_s30 + $0xd1] sm:$0xff] }
  0x25   : > { %5500 = vmatprep.mubr.msk.f32.mxu1 %vm335_vm0, %v298_v63  ;;  %6133 = vmatpush3.bf16.msra.mxu1 %v6130_v4  ;;  %v6882_v56 = vld [vmem:[%s6662_s30 + $0x4c] sm:$0xff]  ;;  %v6888_v59 = vpack.c.bf16 %v4987_v54, %v4986_v53  ;;  %v317_v60 = vld [vmem:[%s6662_s30 + $0xd9] sm:$0xff]  ;;  %v6902_v63 = vld [vmem:[%s6662_s30 + $0x64] sm:$0xff] }
  0x26   : > { %5778 = vmatmul.mubr.msk.f32.gmra.mrb[6].mxu0 %vm335_vm0, %v1917_v62  ;;  %6135 = vmatprep.subr.bf16.mxu1 %v6785_v18  ;;  %v6898_v61 = vld [vmem:[%s6662_s30 + $0x5c] sm:$0xff]  ;;  %v319_v0 = vld [vmem:[%s6662_s30 + $0xe9] sm:$0xff]  ;;  %v7020_v40 = vld [vmem:[%s6662_s30 + $0xd4] sm:$0xff] }
  0x27   : > { %5780 = vmatprep.mubr.msk.f32.mxu0 %vm335_vm0, %v1918_v2  ;;  %6197 = vmatpush3.bf16.msra.mxu0 %v6194_v58  ;;  %v6886_v58 = vld [vmem:[%s6662_s30 + $0x54] sm:$0xff]  ;;  %v318_v62 = vld [vmem:[%s6662_s30 + $0xe1] sm:$0xff]  ;;  %v6913_v1 = vld [vmem:[%s6662_s30 + $0x6c] sm:$0xff] }
  0x28   : > { %6199 = vmatprep.subr.bf16.mxu0 %v6760_v3  ;;  %5501 = vmatmul.mubr.msk.f32.gmra.mrb[8].mxu1 %vm335_vm0, %v299_v5  ;;  %v320_v2 = vld [vmem:[%s6662_s30 + $0xf1] sm:$0xff]  ;;  %v321_v4 = vld [vmem:[%s6662_s30 + $0xf9] sm:$0xff]  ;;  %v7000_v33 = vld [vmem:[%s6662_s30 + $0xc4] sm:$0xff] }
  0x29   : > { %5503 = vmatprep.mubr.msk.f32.mxu1 %vm335_vm0, %v300_v8  ;;  %v6927_v5 = vld [vmem:[%s6662_s30 + $0x7c] sm:$0xff]  ;;  %v6931_v8 = vld [vmem:[%s6662_s30 + $0x84] sm:$0xff]  ;;  %v252_v39 = vld [vmem:[%s6662_s30 + $0x30] sm:$0xff] }
  0x2a   : > { %5781 = vmatmul.mubr.msk.f32.gmra.mrb[8].mxu0 %vm335_vm0, %v1919_v6  ;;  %v322_v6 = vld [vmem:[%s6662_s30 + $0x101] sm:$0xff]  ;;  %v325_v14 = vld [vmem:[%s6662_s30 + $0x119] sm:$0xff]  ;;  %v7052_v54 = vld [vmem:[%s6662_s30 + $0xec] sm:$0xff] }
  0x2b   : > { %5783 = vmatprep.mubr.msk.f32.mxu0 %vm335_vm0, %v1920_v9  ;;  %v323_v9 = vld [vmem:[%s6662_s30 + $0x109] sm:$0xff]  ;;  %v6955_v15 = vld [vmem:[%s6662_s30 + $0x9c] sm:$0xff] }
  0x2c   : > { %5504 = vmatmul.mubr.msk.f32.gmra.mrb[10].mxu1 %vm335_vm0, %v301_v10  ;;  %v6941_v10 = vld [vmem:[%s6662_s30 + $0x8c] sm:$0xff]  ;;  %v250_v32 = vld [vmem:[%s6662_s30 + $0x20] sm:$0xff]  ;;  %v253_v46 = vld [vmem:[%s6662_s30 + $0x38] sm:$0xff] }
  0x2d   : > { %5506 = vmatprep.mubr.msk.f32.mxu1 %vm335_vm0, %v302_v13  ;;  %v6945_v13 = vld [vmem:[%s6662_s30 + $0x94] sm:$0xff]  ;;  %v7036_v47 = vld [vmem:[%s6662_s30 + $0xdc] sm:$0xff]  ;;  %v255_v53 = vld [vmem:[%s6662_s30 + $0x48] sm:$0xff] }
  0x2e   : > { %5784 = vmatmul.mubr.msk.f32.gmra.mrb[10].mxu0 %vm335_vm0, %v1921_v11  ;;  %v324_v11 = vld [vmem:[%s6662_s30 + $0x111] sm:$0xff] }
  0x2f   : > { %5786 = vmatprep.mubr.msk.f32.mxu0 %vm335_vm0, %v1922_v16  ;;  %v246_v16 = vld [vmem:[%s6662_s30] sm:$0xff] }
  0x30   : > { %5507 = vmatmul.mubr.msk.f32.gmra.mrb[12].mxu1 %vm335_vm0, %v303_v19  ;;  %v6959_v19 = vld [vmem:[%s6662_s30 + $0xa4] sm:$0xff] }
  0x31   : > { %5509 = vmatprep.mubr.msk.f32.mxu1 %vm335_vm0, %v304_v21  ;;  %v4769_v21 = vld [vmem:[%s8086_s1 + $0x98] sm:$0xff] }
  0x32   : > { %5787 = vmatmul.mubr.msk.f32.gmra.mrb[12].mxu0 %vm335_vm0, %v1923_v20  ;;  %v4768_v20 = vld [vmem:[%s8086_s1 + $0x90] sm:$0xff] }
  0x33   : > { %5789 = vmatprep.mubr.msk.f32.mxu0 %vm335_vm0, %v1924_v22  ;;  %v247_v22 = vld [vmem:[%s6662_s30 + $0x8] sm:$0xff] }
  0x34   : > { %5510 = vmatmul.mubr.msk.f32.gmra.mrb[14].mxu1 %vm335_vm0, %v305_v23  ;;  %v6975_v23 = vld [vmem:[%s6662_s30 + $0xac] sm:$0xff] }
  0x35   : > { %5512 = vmatprep.mubr.msk.f32.mxu1 %vm335_vm0, %v306_v26  ;;  %v6979_v26 = vld [vmem:[%s6662_s30 + $0xb4] sm:$0xff] }
  0x36   : > { %5790 = vmatmul.mubr.msk.f32.gmra.mrb[14].mxu0 %vm335_vm0, %v1925_v24  ;;  %v248_v24 = vld [vmem:[%s6662_s30 + $0x10] sm:$0xff] }
  0x37   : > { %5792 = vmatprep.mubr.msk.f32.mxu0 %vm335_vm0, %v1926_v27  ;;  %v6138_v27 = vpack.c.bf16 %v4769_v21, %v4768_v20  ;;  %v262_v20 = vld [vmem:[%s6662_s30 + $0x80] sm:$0xff] }
  0x38   : > { %5513 = vmatmul.mubr.msk.f32.gmra.mrb[16].mxu1 %vm335_vm0, %v307_v28  ;;  %v4770_v28 = vld [vmem:[%s8086_s1 + $0xa0] sm:$0xff] }
  0x39   : > { %5515 = vmatprep.mubr.msk.f32.mxu1 %vm335_vm0, %v308_v30  ;;  %v249_v30 = vld [vmem:[%s6662_s30 + $0x18] sm:$0xff]  ;;  %v7099_v21 = vld [vmem:[%s6662_s30 + $0x124] sm:$0xff] }
  0x3a   : > { %5793 = vmatmul.mubr.msk.f32.gmra.mrb[16].mxu0 %vm335_vm0, %v1927_v29  ;;  %v4771_v29 = vld [vmem:[%s8086_s1 + $0xa8] sm:$0xff] }
  0x3b   : > { %5838 = vmatprep.mubr.msk.f32.mxu0 %vm335_vm0, %v2344_v31  ;;  %v6996_v31 = vld [vmem:[%s6662_s30 + $0xbc] sm:$0xff] }
  0x3c   : > { %5516 = vmatmul.mubr.msk.f32.gmra.mrb[18].mxu1 %vm335_vm0, %v309_v34  ;;  %v6142_v34 = vpack.c.bf16 %v4771_v29, %v4770_v28  ;;  %v4988_v28 = vld [vmem:[%s8086_s1 + $0x1d0] sm:$0xff]  ;;  %v4989_v29 = vld [vmem:[%s8086_s1 + $0x1d8] sm:$0xff] }
  0x3d   : > { %5518 = vmatprep.mubr.msk.f32.mxu1 %vm335_vm0, %v310_v36  ;;  %v251_v36 = vld [vmem:[%s6662_s30 + $0x28] sm:$0xff] }
  0x3e   : > { %5839 = vmatmul.mubr.msk.f32.vlgmr.msra.gmra.mrb[0].mxu0 %vm335_vm0, %v2345_v35  ;;  %v4773_v35 = vld [vmem:[%s8086_s1 + $0xb8] sm:$0xff] }
  0x3f   : > { %6201 = vmatpush3.bf16.msra.mxu0 %v6760_v3  ;;  %5841 = vmatprep.mubr.msk.f32.mxu0 %vm335_vm0, %v6826_v37  ;;  %v6917_v3 = vld [vmem:[%s6662_s30 + $0x74] sm:$0xff] }
  0x40   : > { %6203 = vmatprep.subr.bf16.mxu0 %v6202_v38  ;;  %5519 = vmatmul.mubr.msk.f32.gmra.mrb[20].mxu1 %vm335_vm0, %v311_v41 }
  0x41   : > { %5521 = vmatprep.mubr.msk.f32.mxu1 %vm335_vm0, %v312_v43  ;;  %v4810_v43 = vld [vmem:[%s8086_s1 + $0xc0] sm:$0xff] }
  0x42   : > { %5842 = vmatmul.mubr.msk.f32.gmra.mrb[2].mxu0 %vm335_vm0, %v6842_v42 }
  0x43   : > { %5844 = vmatprep.mubr.msk.f32.mxu0 %vm335_vm0, %v6846_v44  ;;  %6205 = vmatpush3.bf16.msra.mxu0 %v6202_v38  ;;  %v7016_v38 = vld [vmem:[%s6662_s30 + $0xcc] sm:$0xff] }
  0x44   : > { %6207 = vmatprep.subr.bf16.mxu0 %v6206_v45  ;;  %5522 = vmatmul.mubr.msk.f32.gmra.mrb[22].mxu1 %vm335_vm0, %v313_v48  ;;  %v254_v48 = vld [vmem:[%s6662_s30 + $0x40] sm:$0xff] }
  0x45   : > { %5524 = vmatprep.mubr.msk.f32.mxu1 %vm335_vm0, %v314_v50  ;;  %v7040_v50 = vld [vmem:[%s6662_s30 + $0xe4] sm:$0xff] }
  0x46   : > { %5845 = vmatmul.mubr.msk.f32.gmra.mrb[4].mxu0 %vm335_vm0, %v6862_v49 }
  0x47   : > { %5847 = vmatprep.mubr.msk.f32.mxu0 %vm335_vm0, %v6866_v51  ;;  %6209 = vmatpush3.bf16.msra.mxu0 %v6206_v45  ;;  %v4811_v45 = vld [vmem:[%s8086_s1 + $0xc8] sm:$0xff] }
  0x48   : > { %6211 = vmatprep.subr.bf16.mxu0 %v6210_v52  ;;  %5525 = vmatmul.mubr.msk.f32.gmra.mrb[24].mxu1 %vm335_vm0, %v315_v55  ;;  %v256_v55 = vld [vmem:[%s6662_s30 + $0x50] sm:$0xff] }
  0x49   : > { %5527 = vmatprep.mubr.msk.f32.mxu1 %vm335_vm0, %v316_v57  ;;  %v7056_v57 = vld [vmem:[%s6662_s30 + $0xf4] sm:$0xff] }
  0x4a   : > { %5848 = vmatmul.mubr.msk.f32.gmra.mrb[6].mxu0 %vm335_vm0, %v6882_v56 }
  0x4b   : > { %5850 = vmatprep.mubr.msk.f32.mxu0 %vm335_vm0, %v6886_v58  ;;  %6213 = vmatpush3.bf16.msra.mxu0 %v6210_v52  ;;  %v7042_v52 = vpack.c.bf16 %v4811_v45, %v4810_v43  ;;  %v5030_v45 = vld [vmem:[%s8086_s1 + $0x200] sm:$0xff] }
  0x4c   : > { %6215 = vmatprep.subr.bf16.mxu0 %v6888_v59  ;;  %5528 = vmatmul.mubr.msk.f32.gmra.mrb[26].mxu1 %vm335_vm0, %v317_v60  ;;  %v257_v60 = vld [vmem:[%s6662_s30 + $0x58] sm:$0xff] }
  0x4d   : > { %5530 = vmatprep.mubr.msk.f32.mxu1 %vm335_vm0, %v318_v62  ;;  %v7067_v62 = vld [vmem:[%s6662_s30 + $0xfc] sm:$0xff] }
  0x4e   : > { %5851 = vmatmul.mubr.msk.f32.gmra.mrb[8].mxu0 %vm335_vm0, %v6898_v61 }
  0x4f   : > { %5853 = vmatprep.mubr.msk.f32.mxu0 %vm335_vm0, %v6902_v63 }
  0x50   : > { %5531 = vmatmul.mubr.msk.f32.gmra.mrb[28].mxu1 %vm335_vm0, %v319_v0  ;;  %v258_v0 = vld [vmem:[%s6662_s30 + $0x60] sm:$0xff] }
  0x51   : > { %5533 = vmatprep.mubr.msk.f32.mxu1 %vm335_vm0, %v320_v2  ;;  %v7071_v2 = vld [vmem:[%s6662_s30 + $0x104] sm:$0xff] }
  0x52   : > { %5854 = vmatmul.mubr.msk.f32.gmra.mrb[10].mxu0 %vm335_vm0, %v6913_v1 }
  0x53   : > { %5856 = vmatprep.mubr.msk.f32.mxu0 %vm335_vm0, %v6917_v3 }
  0x54   : > { %5534 = vmatmul.mubr.msk.f32.gmra.mrb[30].mxu1 %vm335_vm0, %v321_v4  ;;  %v259_v4 = vld [vmem:[%s6662_s30 + $0x68] sm:$0xff] }
  0x55   : > { %5536 = vmatprep.mubr.msk.f32.mxu1 %vm335_vm0, %v322_v6  ;;  %v7081_v6 = vld [vmem:[%s6662_s30 + $0x10c] sm:$0xff] }
  0x56   : > { %5857 = vmatmul.mubr.msk.f32.gmra.mrb[12].mxu0 %vm335_vm0, %v6927_v5 }
  0x57   : > { %5859 = vmatprep.mubr.msk.f32.mxu0 %vm335_vm0, %v6931_v8 }
  0x58   : > { %5537 = vmatmul.mubr.msk.f32.gmra.mrb[32].mxu1 %vm335_vm0, %v323_v9  ;;  %v260_v9 = vld [vmem:[%s6662_s30 + $0x70] sm:$0xff] }
  0x59   : > { %5539 = vmatprep.mubr.msk.f32.mxu1 %vm335_vm0, %v324_v11  ;;  %v7085_v11 = vld [vmem:[%s6662_s30 + $0x114] sm:$0xff] }
  0x5a   : > { %5860 = vmatmul.mubr.msk.f32.gmra.mrb[14].mxu0 %vm335_vm0, %v6941_v10 }
  0x5b   : > { %5862 = vmatprep.mubr.msk.f32.mxu0 %vm335_vm0, %v6945_v13 }
  0x5c   : > { %5540 = vmatmul.mubr.msk.f32.gmra.mrb[34].mxu1 %vm335_vm0, %v325_v14  ;;  %v261_v14 = vld [vmem:[%s6662_s30 + $0x78] sm:$0xff] }
  0x5d   : > { %5558 = vmatprep.mubr.msk.f32.mxu1 %vm335_vm0, %v246_v16  ;;  %v7095_v16 = vld [vmem:[%s6662_s30 + $0x11c] sm:$0xff] }
  0x5e   : > { %5863 = vmatmul.mubr.msk.f32.gmra.mrb[16].mxu0 %vm335_vm0, %v6955_v15 }
  0x5f   : > { %5865 = vmatprep.mubr.msk.f32.mxu0 %vm335_vm0, %v6959_v19 }
  0x60   : > { %5559 = vmatmul.mubr.msk.f32.vlgmr.msra.gmra.mrb[0].mxu1 %vm335_vm0, %v247_v22  ;;  %v263_v22 = vld [vmem:[%s6662_s30 + $0x88] sm:$0xff] }
  0x61   : > { %6137 = vmatpush3.bf16.msra.mxu1 %v6785_v18  ;;  %5561 = vmatprep.mubr.msk.f32.mxu1 %vm335_vm0, %v248_v24  ;;  %v4772_v18 = vld [vmem:[%s8086_s1 + $0xb0] sm:$0xff] }
  0x62   : > { %5866 = vmatmul.mubr.msk.f32.gmra.mrb[18].mxu0 %vm335_vm0, %v6975_v23  ;;  %6139 = vmatprep.subr.bf16.mxu1 %v6138_v27  ;;  %v6146_v41 = vpack.c.bf16 %v4773_v35, %v4772_v18  ;;  %v7109_v24 = vld [vmem:[%s6662_s30 + $0x12c] sm:$0xff]  ;;  %v4990_v18 = vld [vmem:[%s8086_s1 + $0x1e0] sm:$0xff] }
  0x63   : > { %5868 = vmatprep.mubr.msk.f32.mxu0 %vm335_vm0, %v6979_v26  ;;  %v4991_v35 = vld [vmem:[%s8086_s1 + $0x1e8] sm:$0xff] }
  0x64   : > { %5562 = vmatmul.mubr.msk.f32.gmra.mrb[2].mxu1 %vm335_vm0, %v249_v30  ;;  %v265_v30 = vld [vmem:[%s6662_s30 + $0x98] sm:$0xff] }
  0x65   : > { %5564 = vmatprep.mubr.msk.f32.mxu1 %vm335_vm0, %v250_v32  ;;  %6141 = vmatpush3.bf16.msra.mxu1 %v6138_v27  ;;  %v264_v27 = vld [vmem:[%s6662_s30 + $0x90] sm:$0xff]  ;;  %v266_v32 = vld [vmem:[%s6662_s30 + $0xa0] sm:$0xff] }
  0x66   : > { %5869 = vmatmul.mubr.msk.f32.gmra.mrb[20].mxu0 %vm335_vm0, %v6996_v31  ;;  %6143 = vmatprep.subr.bf16.mxu1 %v6142_v34 }
  0x67   : > { %5871 = vmatprep.mubr.msk.f32.mxu0 %vm335_vm0, %v7000_v33 }
  0x68   : > { %5565 = vmatmul.mubr.msk.f32.gmra.mrb[4].mxu1 %vm335_vm0, %v251_v36  ;;  %v268_v36 = vld [vmem:[%s6662_s30 + $0xb0] sm:$0xff] }
  0x69   : > { %5567 = vmatprep.mubr.msk.f32.mxu1 %vm335_vm0, %v252_v39  ;;  %6145 = vmatpush3.bf16.msra.mxu1 %v6142_v34  ;;  %v6218_v34 = vpack.c.bf16 %v4989_v29, %v4988_v28  ;;  %v6222_v39 = vpack.c.bf16 %v4991_v35, %v4990_v18  ;;  %v4083_v28 = vld [vmem:[%s8087_s2 + $0x18] sm:$0xff]  ;;  %v4084_v29 = vld [vmem:[%s8087_s2 + $0x20] sm:$0xff] }
  0x6a   : > { %5872 = vmatmul.mubr.msk.f32.gmra.mrb[22].mxu0 %vm335_vm0, %v7016_v38  ;;  %6147 = vmatprep.subr.bf16.mxu1 %v6146_v41  ;;  %v7301_v18 = vld [vmem:[%s6662_s30 + $0x42] sm:$0xff] }
  0x6b   : > { %5874 = vmatprep.mubr.msk.f32.mxu0 %vm335_vm0, %v7020_v40  ;;  %v4088_v35 = vld [vmem:[%s8087_s2 + $0x40] sm:$0xff] }
  0x6c   : > { %5568 = vmatmul.mubr.msk.f32.gmra.mrb[6].mxu1 %vm335_vm0, %v253_v46  ;;  %v272_v46 = vld [vmem:[%s6662_s30 + $0xd0] sm:$0xff] }
  0x6d   : > { %5570 = vmatprep.mubr.msk.f32.mxu1 %vm335_vm0, %v254_v48  ;;  %6149 = vmatpush3.bf16.msra.mxu1 %v6146_v41  ;;  %v4992_v41 = vld [vmem:[%s8086_s1 + $0x1f0] sm:$0xff] }
  0x6e   : > { %5875 = vmatmul.mubr.msk.f32.gmra.mrb[24].mxu0 %vm335_vm0, %v7036_v47  ;;  %6151 = vmatprep.subr.bf16.mxu1 %v7042_v52 }
  0x6f   : > { %5877 = vmatprep.mubr.msk.f32.mxu0 %vm335_vm0, %v7040_v50 }
  0x70   : > { %5571 = vmatmul.mubr.msk.f32.gmra.mrb[8].mxu1 %vm335_vm0, %v255_v53  ;;  %v276_v53 = vld [vmem:[%s6662_s30 + $0xf0] sm:$0xff] }
  0x71   : > { %5573 = vmatprep.mubr.msk.f32.mxu1 %vm335_vm0, %v256_v55  ;;  %v4813_v55 = vld [vmem:[%s8086_s1 + $0xd8] sm:$0xff] }
  0x72   : > { %5878 = vmatmul.mubr.msk.f32.gmra.mrb[26].mxu0 %vm335_vm0, %v7052_v54 }
  0x73   : > { %5880 = vmatprep.mubr.msk.f32.mxu0 %vm335_vm0, %v7056_v57 }
  0x74   : > { %5574 = vmatmul.mubr.msk.f32.gmra.mrb[10].mxu1 %vm335_vm0, %v257_v60  ;;  %v6563_v60 = vmov 0  }
  0x75   : > { %5576 = vmatprep.mubr.msk.f32.mxu1 %vm335_vm0, %v258_v0  ;;  %6553 = vset.pattern.permute.xlu0 %v6563_v60  ;;  %v7229_v0 = vld [vmem:[%s6662_s30 + $0x12] sm:$0xff] }
  0x76   : > { %5881 = vmatmul.mubr.msk.f32.gmra.mrb[28].mxu0 %vm335_vm0, %v7067_v62  ;;  %6554 = vset.pattern.permute.xlu1 %v6563_v60  ;;  %v7456_v60 = vld [vmem:[%s6662_s30 + $0xb2] sm:$0xff] }
  0x77   : > { %5883 = vmatprep.mubr.msk.f32.mxu0 %vm335_vm0, %v7071_v2 }
  0x78   : > { %5577 = vmatmul.mubr.msk.f32.gmra.mrb[12].mxu1 %vm335_vm0, %v259_v4 }
  0x79   : > { %5579 = vmatprep.mubr.msk.f32.mxu1 %vm335_vm0, %v260_v9  ;;  %v4815_v9 = vld [vmem:[%s8086_s1 + $0xe8] sm:$0xff] }
  0x7a   : > { %5884 = vmatmul.mubr.msk.f32.gmra.mrb[30].mxu0 %vm335_vm0, %v7081_v6 }
  0x7b   : > { %5886 = vmatprep.mubr.msk.f32.mxu0 %vm335_vm0, %v7085_v11 }
  0x7c   : > { %5580 = vmatmul.mubr.msk.f32.gmra.mrb[14].mxu1 %vm335_vm0, %v261_v14  ;;  %v4082_v14 = vld [vmem:[%s8087_s2 + $0x10] sm:$0xff] }
  0x7d   : > { %5582 = vmatprep.mubr.msk.f32.mxu1 %vm335_vm0, %v262_v20  ;;  %v4081_v20 = vld [vmem:[%s8087_s2 + $0x8] sm:$0xff]  ;;  %4128 = vperm.xlu1 %6554, %v4082_v14   ;;  %v7471_v14 = vld [vmem:[%s6662_s30 + $0xba] sm:$0xff] }
  0x7e   : > { %5887 = vmatmul.mubr.msk.f32.gmra.mrb[32].mxu0 %vm335_vm0, %v7095_v16 }
  0x7f   : > { %5889 = vmatprep.mubr.msk.f32.mxu0 %vm335_vm0, %v7099_v21 }
  0x80   : > { %5583 = vmatmul.mubr.msk.f32.gmra.mrb[16].mxu1 %vm335_vm0, %v263_v22  ;;  %v4816_v22 = vld [vmem:[%s8086_s1 + $0xf0] sm:$0xff] }
  0x81   : > { %5585 = vmatprep.mubr.msk.f32.mxu1 %vm335_vm0, %v264_v27  ;;  %v4817_v27 = vld [vmem:[%s8086_s1 + $0xf8] sm:$0xff]  ;;  %4133 = vperm.xlu1 %6554, %v4083_v28  }
  0x82   : > { %5890 = vmatmul.mubr.msk.f32.gmra.mrb[34].mxu0 %vm335_vm0, %v7109_v24  ;;  %v3218_v28 = vld [vmem:[%s6662_s30 + $0x55] sm:$0xff] }
  0x83   : > { %5908 = vmatprep.mubr.msk.f32.mxu0 %vm335_vm0, %v6826_v37  ;;  %v267_v37 = vld [vmem:[%s6662_s30 + $0xa8] sm:$0xff] }
  0x84   : > { %5586 = vmatmul.mubr.msk.f32.gmra.mrb[18].mxu1 %vm335_vm0, %v265_v30  ;;  %v7281_v30 = vld [vmem:[%s6662_s30 + $0x32] sm:$0xff] }
  0x85   : > { %5588 = vmatprep.mubr.msk.f32.mxu1 %vm335_vm0, %v266_v32  ;;  %v7290_v32 = vld [vmem:[%s6662_s30 + $0x3a] sm:$0xff] }
  0x86   : > { %5909 = vmatmul.mubr.msk.f32.vlgmr.msra.gmra.mrb[0].mxu0 %vm335_vm0, %v6842_v42  ;;  %v4993_v42 = vld [vmem:[%s8086_s1 + $0x1f8] sm:$0xff] }
  0x87   : > { %6217 = vmatpush3.bf16.msra.mxu0 %v6888_v59  ;;  %5911 = vmatprep.mubr.msk.f32.mxu0 %vm335_vm0, %v6846_v44  ;;  %v269_v44 = vld [vmem:[%s6662_s30 + $0xb8] sm:$0xff]  ;;  %v270_v59 = vld [vmem:[%s6662_s30 + $0xc0] sm:$0xff]  ;;  %v6226_v43 = vpack.c.bf16 %v4993_v42, %v4992_v41 }
  0x88   : > { %6219 = vmatprep.subr.bf16.mxu0 %v6218_v34  ;;  %5589 = vmatmul.mubr.msk.f32.gmra.mrb[20].mxu1 %vm335_vm0, %v267_v37  ;;  %v7321_v37 = vld [vmem:[%s6662_s30 + $0x52] sm:$0xff]  ;;  %v4092_v41 = vld [vmem:[%s8087_s2 + $0x60] sm:$0xff] }
  0x89   : > { %5591 = vmatprep.mubr.msk.f32.mxu1 %vm335_vm0, %v268_v36  ;;  %v4090_v36 = vld [vmem:[%s8087_s2 + $0x50] sm:$0xff] }
  0x8a   : > { %5912 = vmatmul.mubr.msk.f32.gmra.mrb[2].mxu0 %vm335_vm0, %v6862_v49  ;;  %v5031_v49 = vld [vmem:[%s8086_s1 + $0x208] sm:$0xff]  ;;  %v7362_v42 = vld [vmem:[%s6662_s30 + $0x72] sm:$0xff] }
  0x8b   : > { %5914 = vmatprep.mubr.msk.f32.mxu0 %vm335_vm0, %v6866_v51  ;;  %6221 = vmatpush3.bf16.msra.mxu0 %v6218_v34  ;;  %v271_v51 = vld [vmem:[%s6662_s30 + $0xc8] sm:$0xff]  ;;  %v7169_v48 = vpack.c.bf16 %v5031_v49, %v5030_v45  ;;  %v4086_v34 = vld [vmem:[%s8087_s2 + $0x30] sm:$0xff]  ;;  %v4096_v45 = vld [vmem:[%s8087_s2 + $0x80] sm:$0xff] }
  0x8c   : > { %6223 = vmatprep.subr.bf16.mxu0 %v6222_v39  ;;  %5592 = vmatmul.mubr.msk.f32.gmra.mrb[22].mxu1 %vm335_vm0, %v269_v44  ;;  %v4094_v44 = vld [vmem:[%s8087_s2 + $0x70] sm:$0xff]  ;;  %v2813_v49 = vld [vmem:[%s6662_s30 + $0x13c] sm:$0xff] }
  0x8d   : > { %5594 = vmatprep.mubr.msk.f32.mxu1 %vm335_vm0, %v270_v59  ;;  %v2812_v59 = vld [vmem:[%s6662_s30 + $0x134] sm:$0xff] }
  0x8e   : > { %5915 = vmatmul.mubr.msk.f32.gmra.mrb[4].mxu0 %vm335_vm0, %v6882_v56  ;;  %v273_v56 = vld [vmem:[%s6662_s30 + $0xd8] sm:$0xff] }
  0x8f   : > { %5917 = vmatprep.mubr.msk.f32.mxu0 %vm335_vm0, %v6886_v58  ;;  %6225 = vmatpush3.bf16.msra.mxu0 %v6222_v39  ;;  %v274_v58 = vld [vmem:[%s6662_s30 + $0xe0] sm:$0xff] }
  0x90   : > { %6227 = vmatprep.subr.bf16.mxu0 %v6226_v43  ;;  %5595 = vmatmul.mubr.msk.f32.gmra.mrb[24].mxu1 %vm335_vm0, %v271_v51  ;;  %v7342_v39 = vld [vmem:[%s6662_s30 + $0x62] sm:$0xff] }
  0x91   : > { %5597 = vmatprep.mubr.msk.f32.mxu1 %vm335_vm0, %v272_v46  ;;  %v3212_v51 = vld [vmem:[%s6662_s30 + $0x25] sm:$0xff]  ;;  %v5032_v46 = vld [vmem:[%s8086_s1 + $0x210] sm:$0xff] }
  0x92   : > { %5918 = vmatmul.mubr.msk.f32.gmra.mrb[6].mxu0 %vm335_vm0, %v6898_v61  ;;  %v275_v61 = vld [vmem:[%s6662_s30 + $0xe8] sm:$0xff] }
  0x93   : > { %5920 = vmatprep.mubr.msk.f32.mxu0 %vm335_vm0, %v6902_v63  ;;  %6229 = vmatpush3.bf16.msra.mxu0 %v6226_v43  ;;  %v277_v63 = vld [vmem:[%s6662_s30 + $0xf8] sm:$0xff]  ;;  %v7392_v43 = vld [vmem:[%s6662_s30 + $0x8a] sm:$0xff] }
  0x94   : > { %6231 = vmatprep.subr.bf16.mxu0 %v7169_v48  ;;  %5598 = vmatmul.mubr.msk.f32.gmra.mrb[26].mxu1 %vm335_vm0, %v273_v56  ;;  %v5033_v56 = vld [vmem:[%s8086_s1 + $0x218] sm:$0xff] }
  0x95   : > { %5600 = vmatprep.mubr.msk.f32.mxu1 %vm335_vm0, %v274_v58  ;;  %v7418_v58 = vld [vmem:[%s6662_s30 + $0x9a] sm:$0xff] }
  0x96   : > { %5921 = vmatmul.mubr.msk.f32.gmra.mrb[8].mxu0 %vm335_vm0, %v6913_v1  ;;  %v278_v1 = vld [vmem:[%s6662_s30 + $0x100] sm:$0xff] }
  0x97   : > { %5923 = vmatprep.mubr.msk.f32.mxu0 %vm335_vm0, %v6917_v3  ;;  %v279_v3 = vld [vmem:[%s6662_s30 + $0x108] sm:$0xff] }
  0x98   : > { %5601 = vmatmul.mubr.msk.f32.gmra.mrb[28].mxu1 %vm335_vm0, %v275_v61  ;;  %v4097_v61 = vld [vmem:[%s8087_s2 + $0x88] sm:$0xff] }
  0x99   : > { %5603 = vmatprep.mubr.msk.f32.mxu1 %vm335_vm0, %v276_v53  ;;  %v4098_v53 = vld [vmem:[%s8087_s2 + $0x90] sm:$0xff] }
  0x9a   : > { %5924 = vmatmul.mubr.msk.f32.gmra.mrb[10].mxu0 %vm335_vm0, %v6927_v5  ;;  %v280_v5 = vld [vmem:[%s6662_s30 + $0x110] sm:$0xff] }
  0x9b   : > { %5926 = vmatprep.mubr.msk.f32.mxu0 %vm335_vm0, %v6931_v8  ;;  %v281_v8 = vld [vmem:[%s6662_s30 + $0x118] sm:$0xff] }
  0x9c   : > { %5604 = vmatmul.mubr.msk.f32.gmra.mrb[30].mxu1 %vm335_vm0, %v277_v63  ;;  %v3213_v63 = vld [vmem:[%s6662_s30 + $0x2d] sm:$0xff] }
  0x9d   : > { %5606 = vmatprep.mubr.msk.f32.mxu1 %vm335_vm0, %v278_v1  ;;  %v7429_v1 = vld [vmem:[%s6662_s30 + $0xa2] sm:$0xff] }
  0x9e   : > { %5927 = vmatmul.mubr.msk.f32.gmra.mrb[12].mxu0 %vm335_vm0, %v6941_v10  ;;  %v1042_v10 = vld [vmem:[%s6662_s30 + $0x2] sm:$0xff] }
  0x9f   : > { %5929 = vmatprep.mubr.msk.f32.mxu0 %vm335_vm0, %v6945_v13  ;;  %v4812_v13 = vld [vmem:[%s8086_s1 + $0xd0] sm:$0xff] }
  0xa0   : > { %5607 = vmatmul.mubr.msk.f32.gmra.mrb[32].mxu1 %vm335_vm0, %v279_v3  ;;  %v6154_v4 = vpack.c.bf16 %v4813_v55, %v4812_v13  ;;  %v3214_v3 = vld [vmem:[%s6662_s30 + $0x35] sm:$0xff]  ;;  %v7444_v13 = vld [vmem:[%s6662_s30 + $0xaa] sm:$0xff] }
  0xa1   : > { %5609 = vmatprep.mubr.msk.f32.mxu1 %vm335_vm0, %v280_v5  ;;  %v6234_v5 = vpack.c.bf16 %v5033_v56, %v5032_v46  ;;  %v4099_v55 = vld [vmem:[%s8087_s2 + $0x98] sm:$0xff]  ;;  %v3224_v56 = vld [vmem:[%s6662_s30 + $0x85] sm:$0xff] }
  0xa2   : > { %5930 = vmatmul.mubr.msk.f32.gmra.mrb[14].mxu0 %vm335_vm0, %v6955_v15  ;;  %v1043_v15 = vld [vmem:[%s6662_s30 + $0xa] sm:$0xff]  ;;  %v7542_v46 = vld [vmem:[%s6662_s30 + $0xf2] sm:$0xff] }
  0xa3   : > { %5932 = vmatprep.mubr.msk.f32.mxu0 %vm335_vm0, %v6959_v19  ;;  %v4080_v19 = vld [vmem:[%s8087_s2] sm:$0xff] }
  0xa4   : > { %5610 = vmatmul.mubr.msk.f32.gmra.mrb[34].mxu1 %vm335_vm0, %v281_v8  ;;  %4118 = vperm.xlu0 %6553, %v4080_v19   ;;  %v5034_v8 = vld [vmem:[%s8086_s1 + $0x220] sm:$0xff] }
  0xa5   : > { %5628 = vmatprep.mubr.msk.f32.mxu1 %vm335_vm0, %v1042_v10  ;;  %v5035_v10 = vld [vmem:[%s8086_s1 + $0x228] sm:$0xff]  ;;  %v3215_v19 = vld [vmem:[%s6662_s30 + $0x3d] sm:$0xff] }
  0xa6   : > { %5933 = vmatmul.mubr.msk.f32.gmra.mrb[16].mxu0 %vm335_vm0, %v6975_v23  ;;  %v4814_v23 = vld [vmem:[%s8086_s1 + $0xe0] sm:$0xff] }
  0xa7   : > { %5935 = vmatprep.mubr.msk.f32.mxu0 %vm335_vm0, %v6979_v26  ;;  %v7242_v26 = vld [vmem:[%s6662_s30 + $0x1a] sm:$0xff] }
  0xa8   : > { %5629 = vmatmul.mubr.msk.f32.vlgmr.msra.gmra.mrb[0].mxu1 %vm335_vm0, %v1043_v15  ;;  %4123 = vperm.xlu0 %6553, %v4081_v20   ;;  %v4100_v15 = vld [vmem:[%s8087_s2 + $0xa0] sm:$0xff]  ;;  %v4101_v20 = vld [vmem:[%s8087_s2 + $0xa8] sm:$0xff] }
  0xa9   : > { %6153 = vmatpush3.bf16.msra.mxu1 %v7042_v52  ;;  %5631 = vmatprep.mubr.msk.f32.mxu1 %vm335_vm0, %v7229_v0  ;;  %v6158_v52 = vpack.c.bf16 %v4815_v9, %v4814_v23  ;;  %v6238_v23 = vpack.c.bf16 %v5035_v10, %v5034_v8  ;;  %v5036_v9 = vld [vmem:[%s8086_s1 + $0x230] sm:$0xff]  ;;  %v4111_v10 = vld [vmem:[%s8087_s2 + $0xf8] sm:$0xff] }
  0xaa   : > { %5936 = vmatmul.mubr.msk.f32.gmra.mrb[18].mxu0 %vm335_vm0, %v6996_v31  ;;  %v7255_v31 = vld [vmem:[%s6662_s30 + $0x22] sm:$0xff]  ;;  %6155 = vmatprep.subr.bf16.mxu1 %v6154_v4  ;;  %v3226_v8 = vld [vmem:[%s6662_s30 + $0x95] sm:$0xff] }
  0xab   : > { %5938 = vmatprep.mubr.msk.f32.mxu0 %vm335_vm0, %v7000_v33  ;;  %v7270_v33 = vld [vmem:[%s6662_s30 + $0x2a] sm:$0xff] }
  0xac   : > { %5632 = vmatmul.mubr.msk.f32.gmra.mrb[2].mxu1 %vm335_vm0, %v7242_v26  ;;  %4138 = vperm.xlu0 %6553, %v4084_v29  }
  0xad   : > { %5634 = vmatprep.mubr.msk.f32.mxu1 %vm335_vm0, %v7255_v31  ;;  %6157 = vmatpush3.bf16.msra.mxu1 %v6154_v4  ;;  %v3216_v4 = vld [vmem:[%s6662_s30 + $0x45] sm:$0xff] }
  0xae   : > { %5939 = vmatmul.mubr.msk.f32.gmra.mrb[20].mxu0 %vm335_vm0, %v7016_v38  ;;  %6159 = vmatprep.subr.bf16.mxu1 %v6158_v52  ;;  %v6162_v38 = vpack.c.bf16 %v4817_v27, %v4816_v22  ;;  %v3217_v22 = vld [vmem:[%s6662_s30 + $0x4d] sm:$0xff]  ;;  %v7482_v27 = vld [vmem:[%s6662_s30 + $0xc2] sm:$0xff] }
  0xaf   : > { %5941 = vmatprep.mubr.msk.f32.mxu0 %vm335_vm0, %v7020_v40  ;;  %v4085_v40 = vld [vmem:[%s8087_s2 + $0x28] sm:$0xff] }
  0xb0   : > { %5635 = vmatmul.mubr.msk.f32.gmra.mrb[4].mxu1 %vm335_vm0, %v7270_v33  ;;  %4143 = vperm.xlu1 %6554, %v4085_v40   ;;  %v4103_v40 = vld [vmem:[%s8087_s2 + $0xb8] sm:$0xff] }
  0xb1   : > { %5637 = vmatprep.mubr.msk.f32.mxu1 %vm335_vm0, %v7281_v30  ;;  %6161 = vmatpush3.bf16.msra.mxu1 %v6158_v52  ;;  %v4102_v52 = vld [vmem:[%s8087_s2 + $0xb0] sm:$0xff] }
  0xb2   : > { %5942 = vmatmul.mubr.msk.f32.gmra.mrb[22].mxu0 %vm335_vm0, %v7036_v47  ;;  %6163 = vmatprep.subr.bf16.mxu1 %v6162_v38  ;;  %v7310_v47 = vld [vmem:[%s6662_s30 + $0x4a] sm:$0xff] }
  0xb3   : > { %5944 = vmatprep.mubr.msk.f32.mxu0 %vm335_vm0, %v7040_v50  ;;  %4148 = vperm.xlu0 %6553, %v4086_v34   ;;  %v4087_v50 = vld [vmem:[%s8087_s2 + $0x38] sm:$0xff]  ;;  %v4104_v34 = vld [vmem:[%s8087_s2 + $0xc0] sm:$0xff] }
  0xb4   : > { %5638 = vmatmul.mubr.msk.f32.gmra.mrb[6].mxu1 %vm335_vm0, %v7290_v32  ;;  %4153 = vperm.xlu1 %6554, %v4087_v50   ;;  %v3219_v50 = vld [vmem:[%s6662_s30 + $0x5d] sm:$0xff] }
  0xb5   : > { %5640 = vmatprep.mubr.msk.f32.mxu1 %vm335_vm0, %v7301_v18  ;;  %6165 = vmatpush3.bf16.msra.mxu1 %v6162_v38  ;;  %v7491_v38 = vld [vmem:[%s6662_s30 + $0xca] sm:$0xff] }
  0xb6   : > { %5945 = vmatmul.mubr.msk.f32.gmra.mrb[24].mxu0 %vm335_vm0, %v7052_v54  ;;  %6246 = vmatprep.subr.bf16.mxu1 %v6620_v7  ;;  %v7331_v54 = vld [vmem:[%s6662_s30 + $0x5a] sm:$0xff] }
  0xb7   : > { %5947 = vmatprep.mubr.msk.f32.mxu0 %vm335_vm0, %v7056_v57  ;;  %4158 = vperm.xlu0 %6553, %v4088_v35   ;;  %v4089_v57 = vld [vmem:[%s8087_s2 + $0x48] sm:$0xff]  ;;  %v7502_v35 = vld [vmem:[%s6662_s30 + $0xd2] sm:$0xff] }
  0xb8   : > { %5641 = vmatmul.mubr.msk.f32.gmra.mrb[8].mxu1 %vm335_vm0, %v7310_v47  ;;  %4163 = vperm.xlu1 %6554, %v4089_v57   ;;  %v3220_v57 = vld [vmem:[%s6662_s30 + $0x65] sm:$0xff] }
  0xb9   : > { %5643 = vmatprep.mubr.msk.f32.mxu1 %vm335_vm0, %v7321_v37 }
  0xba   : > { %5948 = vmatmul.mubr.msk.f32.gmra.mrb[26].mxu0 %vm335_vm0, %v7067_v62  ;;  %v7351_v62 = vld [vmem:[%s6662_s30 + $0x6a] sm:$0xff] }
  0xbb   : > { %5950 = vmatprep.mubr.msk.f32.mxu0 %vm335_vm0, %v7071_v2  ;;  %4168 = vperm.xlu0 %6553, %v4090_v36   ;;  %v4091_v2 = vld [vmem:[%s8087_s2 + $0x58] sm:$0xff] }
  0xbc   : > { %5644 = vmatmul.mubr.msk.f32.gmra.mrb[10].mxu1 %vm335_vm0, %v7331_v54  ;;  %4173 = vperm.xlu1 %6554, %v4091_v2   ;;  %v7511_v36 = vld [vmem:[%s6662_s30 + $0xda] sm:$0xff]  ;;  %v4105_v2 = vld [vmem:[%s8087_s2 + $0xc8] sm:$0xff] }
  0xbd   : > { %5646 = vmatprep.mubr.msk.f32.mxu1 %vm335_vm0, %v7342_v39 }
  0xbe   : > { %5951 = vmatmul.mubr.msk.f32.gmra.mrb[28].mxu0 %vm335_vm0, %v7081_v6  ;;  %v7371_v6 = vld [vmem:[%s6662_s30 + $0x7a] sm:$0xff] }
  0xbf   : > { %5953 = vmatprep.mubr.msk.f32.mxu0 %vm335_vm0, %v7085_v11  ;;  %4178 = vperm.xlu0 %6553, %v4092_v41   ;;  %v4093_v11 = vld [vmem:[%s8087_s2 + $0x68] sm:$0xff]  ;;  %v4106_v41 = vld [vmem:[%s8087_s2 + $0xd0] sm:$0xff] }
  0xc0   : > { %5647 = vmatmul.mubr.msk.f32.gmra.mrb[12].mxu1 %vm335_vm0, %v7351_v62  ;;  %4183 = vperm.xlu1 %6554, %v4093_v11   ;;  %v3221_v11 = vld [vmem:[%s6662_s30 + $0x6d] sm:$0xff] }
  0xc1   : > { %5649 = vmatprep.mubr.msk.f32.mxu1 %vm335_vm0, %v7362_v42 }
  0xc2   : > { %5954 = vmatmul.mubr.msk.f32.gmra.mrb[30].mxu0 %vm335_vm0, %v7095_v16  ;;  %v7382_v16 = vld [vmem:[%s6662_s30 + $0x82] sm:$0xff] }
  0xc3   : > { %5956 = vmatprep.mubr.msk.f32.mxu0 %vm335_vm0, %v7099_v21  ;;  %4188 = vperm.xlu0 %6553, %v4094_v44   ;;  %v4095_v21 = vld [vmem:[%s8087_s2 + $0x78] sm:$0xff]  ;;  %v7522_v44 = vld [vmem:[%s6662_s30 + $0xe2] sm:$0xff] }
  0xc4   : > { %5650 = vmatmul.mubr.msk.f32.gmra.mrb[14].mxu1 %vm335_vm0, %v7371_v6  ;;  %4193 = vperm.xlu1 %6554, %v4095_v21   ;;  %v4107_v21 = vld [vmem:[%s8087_s2 + $0xd8] sm:$0xff] }
  0xc5   : > { %5652 = vmatprep.mubr.msk.f32.mxu1 %vm335_vm0, %v7382_v16 }
  0xc6   : > { %5957 = vmatmul.mubr.msk.f32.gmra.mrb[32].mxu0 %vm335_vm0, %v7109_v24  ;;  %v7403_v24 = vld [vmem:[%s6662_s30 + $0x92] sm:$0xff] }
  0xc7   : > { %5959 = vmatprep.mubr.msk.f32.mxu0 %vm335_vm0, %v2812_v59  ;;  %4198 = vperm.xlu0 %6553, %v4096_v45   ;;  %v3222_v59 = vld [vmem:[%s6662_s30 + $0x75] sm:$0xff]  ;;  %v7534_v45 = vld [vmem:[%s6662_s30 + $0xea] sm:$0xff] }
  0xc8   : > { %5653 = vmatmul.mubr.msk.f32.gmra.mrb[16].mxu1 %vm335_vm0, %v7392_v43  ;;  %4203 = vperm.xlu1 %6554, %v4097_v61   ;;  %v4109_v61 = vld [vmem:[%s8087_s2 + $0xe8] sm:$0xff] }
  0xc9   : > { %5655 = vmatprep.mubr.msk.f32.mxu1 %vm335_vm0, %v7403_v24 }
  0xca   : > { %5960 = vmatmul.mubr.msk.f32.gmra.mrb[34].mxu0 %vm335_vm0, %v2813_v49  ;;  %v4108_v49 = vld [vmem:[%s8087_s2 + $0xe0] sm:$0xff] }
  0xcb   : > { %5978 = vmatprep.mubr.msk.f32.mxu0 %vm335_vm0, %v3212_v51  ;;  %4208 = vperm.xlu0 %6553, %v4098_v53   ;;  %v3223_v51 = vld [vmem:[%s6662_s30 + $0x7d] sm:$0xff] }
  0xcc   : > { %5656 = vmatmul.mubr.msk.f32.gmra.mrb[18].mxu1 %vm335_vm0, %v7418_v58  ;;  %4213 = vperm.xlu1 %6554, %v4099_v55   ;;  %v7554_v53 = vld [vmem:[%s6662_s30 + $0xfa] sm:$0xff]  ;;  %v7574_v55 = vld [vmem:[%s6662_s30 + $0x10a] sm:$0xff] }
  0xcd   : > { %5658 = vmatprep.mubr.msk.f32.mxu1 %vm335_vm0, %v7429_v1 }
  0xce   : > { %5979 = vmatmul.mubr.msk.f32.vlgmr.msra.gmra.mrb[0].mxu0 %vm335_vm0, %v3213_v63  ;;  %v4110_v63 = vld [vmem:[%s8087_s2 + $0xf0] sm:$0xff] }
  0xcf   : > { %6233 = vmatpush3.bf16.msra.mxu0 %v7169_v48  ;;  %5981 = vmatprep.mubr.msk.f32.mxu0 %vm335_vm0, %v3214_v3  ;;  %v5037_v48 = vld [vmem:[%s8086_s1 + $0x238] sm:$0xff]  ;;  %v3225_v3 = vld [vmem:[%s6662_s30 + $0x8d] sm:$0xff] }
  0xd0   : > { %6235 = vmatprep.subr.bf16.mxu0 %v6234_v5  ;;  %5659 = vmatmul.mubr.msk.f32.gmra.mrb[20].mxu1 %vm335_vm0, %v7444_v13  ;;  %v6242_v29 = vpack.c.bf16 %v5037_v48, %v5036_v9  ;;  %v4113_v9 = vld [vmem:[%s8087_s2 + $0x108] sm:$0xff]  ;;  %v7594_v48 = vld [vmem:[%s6662_s30 + $0x11a] sm:$0xff] }
  0xd1   : > { %4218 = vperm.xlu0 %6553, %v4100_v15   ;;  %5661 = vmatprep.mubr.msk.f32.mxu1 %vm335_vm0, %v7456_v60  ;;  %v4112_v15 = vld [vmem:[%s8087_s2 + $0x100] sm:$0xff] }
  0xd2   : > { %5982 = vmatmul.mubr.msk.f32.gmra.mrb[2].mxu0 %vm335_vm0, %v3215_v19  ;;  %4223 = vperm.xlu1 %6554, %v4101_v20   ;;  %v3227_v19 = vld [vmem:[%s6662_s30 + $0x9d] sm:$0xff]  ;;  %v4114_v20 = vld [vmem:[%s8087_s2 + $0x110] sm:$0xff] }
  0xd3   : > { %5984 = vmatprep.mubr.msk.f32.mxu0 %vm335_vm0, %v3216_v4  ;;  %6237 = vmatpush3.bf16.msra.mxu0 %v6234_v5  ;;  %v7562_v5 = vld [vmem:[%s6662_s30 + $0x102] sm:$0xff]  ;;  %v7582_v4 = vld [vmem:[%s6662_s30 + $0x112] sm:$0xff] }
  0xd4   : > { %6239 = vmatprep.subr.bf16.mxu0 %v6238_v23  ;;  %5662 = vmatmul.mubr.msk.f32.gmra.mrb[22].mxu1 %vm335_vm0, %v7471_v14 }
  0xd5   : > { %4228 = vperm.xlu0 %6553, %v4102_v52   ;;  %5664 = vmatprep.mubr.msk.f32.mxu1 %vm335_vm0, %v7482_v27  ;;  %v3229_v52 = vld [vmem:[%s6662_s30 + $0xad] sm:$0xff] }
  0xd6   : > { %5985 = vmatmul.mubr.msk.f32.gmra.mrb[4].mxu0 %vm335_vm0, %v3217_v22  ;;  %4233 = vperm.xlu1 %6554, %v4103_v40   ;;  %v3230_v22 = vld [vmem:[%s6662_s30 + $0xb5] sm:$0xff]  ;;  %v3232_v40 = vld [vmem:[%s6662_s30 + $0xc5] sm:$0xff] }
  0xd7   : > { %5987 = vmatprep.mubr.msk.f32.mxu0 %vm335_vm0, %v3218_v28  ;;  %6241 = vmatpush3.bf16.msra.mxu0 %v6238_v23  ;;  %v3228_v23 = vld [vmem:[%s6662_s30 + $0xa5] sm:$0xff]  ;;  %v4115_v28 = vld [vmem:[%s8087_s2 + $0x118] sm:$0xff] }
  0xd8   : > { %6243 = vmatprep.subr.bf16.mxu0 %v6242_v29  ;;  %5665 = vmatmul.mubr.msk.f32.gmra.mrb[24].mxu1 %vm335_vm0, %v7491_v38 }
  0xd9   : > { %4238 = vperm.xlu0 %6553, %v4104_v34   ;;  %5667 = vmatprep.mubr.msk.f32.mxu1 %vm335_vm0, %v7502_v35  ;;  %v3234_v34 = vld [vmem:[%s6662_s30 + $0xd5] sm:$0xff] }
  0xda   : > { %5988 = vmatmul.mubr.msk.f32.gmra.mrb[6].mxu0 %vm335_vm0, %v3219_v50  ;;  %4243 = vperm.xlu1 %6554, %v4105_v2   ;;  %v3660_v50 = vld [vmem:[%s6662_s30 + $0x96] sm:$0xff]  ;;  %v1511_v2 = vld [vmem:[%s6662_s30 + $0x12a] sm:$0xff] }
  0xdb   : > { %5990 = vmatprep.mubr.msk.f32.mxu0 %vm335_vm0, %v3220_v57  ;;  %6245 = vmatpush3.bf16.msra.mxu0 %v6242_v29  ;;  %v3231_v29 = vld [vmem:[%s6662_s30 + $0xbd] sm:$0xff] }
  0xdc   : > { %5668 = vmatmul.mubr.msk.f32.gmra.mrb[26].mxu1 %vm335_vm0, %v7511_v36  ;;  %v1510_v57 = vld [vmem:[%s6662_s30 + $0x122] sm:$0xff] }
  0xdd   : > { %4248 = vperm.xlu0 %6553, %v4106_v41   ;;  %5670 = vmatprep.mubr.msk.f32.mxu1 %vm335_vm0, %v7522_v44  ;;  %v3663_v41 = vld [vmem:[%s6662_s30 + $0xae] sm:$0xff] }
  0xde   : > { %5991 = vmatmul.mubr.msk.f32.gmra.mrb[8].mxu0 %vm335_vm0, %v3221_v11  ;;  %4253 = vperm.xlu1 %6554, %v4107_v21   ;;  %v1928_v11 = vld [vmem:[%s6662_s30 + $0xa3] sm:$0xff] }
  0xdf   : > { %5993 = vmatprep.mubr.msk.f32.mxu0 %vm335_vm0, %v3222_v59  ;;  %v1929_v59 = vld [vmem:[%s6662_s30 + $0xab] sm:$0xff]  ;;  %v3665_v21 = vld [vmem:[%s6662_s30 + $0xbe] sm:$0xff] }
  0xe0   : > { %5671 = vmatmul.mubr.msk.f32.gmra.mrb[28].mxu1 %vm335_vm0, %v7534_v45 }
  0xe1   : > { %4258 = vperm.xlu0 %6553, %v4108_v49   ;;  %5673 = vmatprep.mubr.msk.f32.mxu1 %vm335_vm0, %v7542_v46  ;;  %v3666_v49 = vld [vmem:[%s6662_s30 + $0xc6] sm:$0xff] }
  0xe2   : > { %5994 = vmatmul.mubr.msk.f32.gmra.mrb[10].mxu0 %vm335_vm0, %v3223_v51  ;;  %4263 = vperm.xlu1 %6554, %v4109_v61   ;;  %v1931_v51 = vld [vmem:[%s6662_s30 + $0xbb] sm:$0xff] }
  0xe3   : > { %5996 = vmatprep.mubr.msk.f32.mxu0 %vm335_vm0, %v3224_v56  ;;  %v1932_v56 = vld [vmem:[%s6662_s30 + $0xc3] sm:$0xff]  ;;  %v3668_v61 = vld [vmem:[%s6662_s30 + $0xd6] sm:$0xff] }
  0xe4   : > { %5674 = vmatmul.mubr.msk.f32.gmra.mrb[30].mxu1 %vm335_vm0, %v7554_v53 }
  0xe5   : > { %4268 = vperm.xlu0 %6553, %v4110_v63   ;;  %5676 = vmatprep.mubr.msk.f32.mxu1 %vm335_vm0, %v7562_v5  ;;  %v3669_v63 = vld [vmem:[%s6662_s30 + $0xde] sm:$0xff] }
  0xe6   : > { %5997 = vmatmul.mubr.msk.f32.gmra.mrb[12].mxu0 %vm335_vm0, %v3225_v3  ;;  %4273 = vperm.xlu1 %6554, %v4111_v10   ;;  %v1934_v3 = vld [vmem:[%s6662_s30 + $0xd3] sm:$0xff] }
  0xe7   : > { %5999 = vmatprep.mubr.msk.f32.mxu0 %vm335_vm0, %v3226_v8  ;;  %v1935_v8 = vld [vmem:[%s6662_s30 + $0xdb] sm:$0xff]  ;;  %v3671_v10 = vld [vmem:[%s6662_s30 + $0xee] sm:$0xff] }
  0xe8   : > { %5677 = vmatmul.mubr.msk.f32.gmra.mrb[32].mxu1 %vm335_vm0, %v7574_v55 }
  0xe9   : > { %4278 = vperm.xlu0 %6553, %v4112_v15   ;;  %5679 = vmatprep.mubr.msk.f32.mxu1 %vm335_vm0, %v7582_v4  ;;  %v3672_v15 = vld [vmem:[%s6662_s30 + $0xf6] sm:$0xff] }
  0xea   : > { %6000 = vmatmul.mubr.msk.f32.gmra.mrb[14].mxu0 %vm335_vm0, %v3227_v19  ;;  %4283 = vperm.xlu1 %6554, %v4113_v9   ;;  %v1937_v19 = vld [vmem:[%s6662_s30 + $0xeb] sm:$0xff] }
  0xeb   : > { %6002 = vmatprep.mubr.msk.f32.mxu0 %vm335_vm0, %v3228_v23  ;;  %v1938_v23 = vld [vmem:[%s6662_s30 + $0xf3] sm:$0xff]  ;;  %v3674_v9 = vld [vmem:[%s6662_s30 + $0x106] sm:$0xff] }
  0xec   : > { %5680 = vmatmul.mubr.msk.f32.gmra.mrb[34].mxu1 %vm335_vm0, %v7594_v48 }
  0xed   : > { %4288 = vperm.xlu0 %6553, %v4114_v20   ;;  %5698 = vmatprep.mubr.msk.f32.mxu1 %vm335_vm0, %v7229_v0  ;;  %v3233_v0 = vld [vmem:[%s6662_s30 + $0xcd] sm:$0xff] }
  0xee   : > { %6003 = vmatmul.mubr.msk.f32.gmra.mrb[16].mxu0 %vm335_vm0, %v3229_v52  ;;  %4293 = vperm.xlu1 %6554, %v4115_v28   ;;  %v3675_v20 = vld [vmem:[%s6662_s30 + $0x10e] sm:$0xff]  ;;  %v1940_v52 = vld [vmem:[%s6662_s30 + $0x103] sm:$0xff] }
  0xef   : > { %6005 = vmatprep.mubr.msk.f32.mxu0 %vm335_vm0, %v3230_v22  ;;  %v3676_v22 = vld [vmem:[%s6662_s30 + $0x116] sm:$0xff]  ;;  %v1941_v28 = vld [vmem:[%s6662_s30 + $0x10b] sm:$0xff] }
  0xf0   : > { %5699 = vmatmul.mubr.msk.f32.vlgmr.msra.gmra.mrb[0].mxu1 %vm335_vm0, %v7242_v26  ;;  %v3236_v26 = vld [vmem:[%s6662_s30 + $0xe5] sm:$0xff] }
  0xf1   : > { %6250 = vmatpush3.bf16.msra.mxu1 %v6620_v7  ;;  %5701 = vmatprep.mubr.msk.f32.mxu1 %vm335_vm0, %v7255_v31  ;;  %v3235_v7 = vld [vmem:[%s6662_s30 + $0xdd] sm:$0xff]  ;;  %v3237_v31 = vld [vmem:[%s6662_s30 + $0xed] sm:$0xff] }
  0xf2   : > { %6006 = vmatmul.mubr.msk.f32.gmra.mrb[18].mxu0 %vm335_vm0, %v3231_v29  ;;  %6247 = vmatprep.subr.bf16.mxu1 %v6633_v12  ;;  %v3677_v29 = vld [vmem:[%s6662_s30 + $0x11e] sm:$0xff] }
  0xf3   : > { %6008 = vmatprep.mubr.msk.f32.mxu0 %vm335_vm0, %v3232_v40  ;;  %v1942_v40 = vld [vmem:[%s6662_s30 + $0x113] sm:$0xff] }
  0xf4   : > { %5702 = vmatmul.mubr.msk.f32.gmra.mrb[2].mxu1 %vm335_vm0, %v7270_v33  ;;  %v3239_v33 = vld [vmem:[%s6662_s30 + $0xfd] sm:$0xff] }
  0xf5   : > { %5704 = vmatprep.mubr.msk.f32.mxu1 %vm335_vm0, %v7281_v30  ;;  %6251 = vmatpush3.bf16.msra.mxu1 %v6633_v12  ;;  %v3238_v12 = vld [vmem:[%s6662_s30 + $0xf5] sm:$0xff]  ;;  %v3240_v30 = vld [vmem:[%s6662_s30 + $0x105] sm:$0xff] }
  0xf6   : > { %6009 = vmatmul.mubr.msk.f32.gmra.mrb[20].mxu0 %vm335_vm0, %v3233_v0  ;;  %6248 = vmatprep.subr.bf16.mxu1 %v6648_v17  ;;  %v3678_v0 = vld [vmem:[%s6662_s30 + $0x126] sm:$0xff] }
  0xf7   : > { %6011 = vmatprep.mubr.msk.f32.mxu0 %vm335_vm0, %v3234_v34  ;;  %v1943_v34 = vld [vmem:[%s6662_s30 + $0x11b] sm:$0xff] }
  0xf8   : > { %5705 = vmatmul.mubr.msk.f32.gmra.mrb[4].mxu1 %vm335_vm0, %v7290_v32  ;;  %v3242_v32 = vld [vmem:[%s6662_s30 + $0x115] sm:$0xff] }
  0xf9   : > { %5707 = vmatprep.mubr.msk.f32.mxu1 %vm335_vm0, %v7301_v18  ;;  %6252 = vmatpush3.bf16.msra.mxu1 %v6648_v17  ;;  %v3241_v17 = vld [vmem:[%s6662_s30 + $0x10d] sm:$0xff]  ;;  %v3244_v18 = vld [vmem:[%s6662_s30 + $0x125] sm:$0xff] }
  0xfa   : > { %6012 = vmatmul.mubr.msk.f32.gmra.mrb[22].mxu0 %vm335_vm0, %v3235_v7  ;;  %6249 = vmatprep.subr.bf16.mxu1 %v6672_v25  ;;  %v3679_v7 = vld [vmem:[%s6662_s30 + $0x12e] sm:$0xff] }
  0xfb   : > { %6014 = vmatprep.mubr.msk.f32.mxu0 %vm335_vm0, %v3236_v26  ;;  %v1944_v26 = vld [vmem:[%s6662_s30 + $0x123] sm:$0xff] }
  0xfc   : > { %5708 = vmatmul.mubr.msk.f32.gmra.mrb[6].mxu1 %vm335_vm0, %v7310_v47  ;;  %v3245_v47 = vld [vmem:[%s6662_s30 + $0x12d] sm:$0xff] }
  0xfd   : > { %5710 = vmatprep.mubr.msk.f32.mxu1 %vm335_vm0, %v7321_v37  ;;  %6253 = vmatpush3.bf16.msra.mxu1 %v6672_v25  ;;  %v3243_v25 = vld [vmem:[%s6662_s30 + $0x11d] sm:$0xff]  ;;  %v3246_v37 = vld [vmem:[%s6662_s30 + $0x135] sm:$0xff] }
  0xfe   : > { %6015 = vmatmul.mubr.msk.f32.gmra.mrb[24].mxu0 %vm335_vm0, %v3237_v31  ;;  %v3680_v31 = vld [vmem:[%s6662_s30 + $0x136] sm:$0xff] }
  0xff   : > { %6017 = vmatprep.mubr.msk.f32.mxu0 %vm335_vm0, %v3238_v12  ;;  %v1945_v12 = vld [vmem:[%s6662_s30 + $0x12b] sm:$0xff] }
 0x100   : > { %5711 = vmatmul.mubr.msk.f32.gmra.mrb[8].mxu1 %vm335_vm0, %v7331_v54  ;;  %v3247_v54 = vld [vmem:[%s6662_s30 + $0x13d] sm:$0xff] }
 0x101   : > { %5713 = vmatprep.mubr.msk.f32.mxu1 %vm335_vm0, %v7342_v39  ;;  %v3646_v39 = vld [vmem:[%s6662_s30 + $0x26] sm:$0xff] }
 0x102   : > { %6018 = vmatmul.mubr.msk.f32.gmra.mrb[26].mxu0 %vm335_vm0, %v3239_v33  ;;  %v3681_v33 = vld [vmem:[%s6662_s30 + $0x13e] sm:$0xff] }
 0x103   : > { %6020 = vmatprep.mubr.msk.f32.mxu0 %vm335_vm0, %v3240_v30 }
 0x104   : > { %5714 = vmatmul.mubr.msk.f32.gmra.mrb[10].mxu1 %vm335_vm0, %v7351_v62  ;;  %v3647_v62 = vld [vmem:[%s6662_s30 + $0x2e] sm:$0xff] }
 0x105   : > { %5716 = vmatprep.mubr.msk.f32.mxu1 %vm335_vm0, %v7362_v42  ;;  %v3648_v42 = vld [vmem:[%s6662_s30 + $0x36] sm:$0xff] }
 0x106   : > { %6021 = vmatmul.mubr.msk.f32.gmra.mrb[28].mxu0 %vm335_vm0, %v3241_v17 }
 0x107   : > { %6023 = vmatprep.mubr.msk.f32.mxu0 %vm335_vm0, %v3242_v32 }
 0x108   : > { %5717 = vmatmul.mubr.msk.f32.gmra.mrb[12].mxu1 %vm335_vm0, %v7371_v6  ;;  %v3649_v6 = vld [vmem:[%s6662_s30 + $0x3e] sm:$0xff] }
 0x109   : > { %5719 = vmatprep.mubr.msk.f32.mxu1 %vm335_vm0, %v7382_v16  ;;  %v3650_v16 = vld [vmem:[%s6662_s30 + $0x46] sm:$0xff] }
 0x10a   : > { %6024 = vmatmul.mubr.msk.f32.gmra.mrb[30].mxu0 %vm335_vm0, %v3243_v25 }
 0x10b   : > { %6026 = vmatprep.mubr.msk.f32.mxu0 %vm335_vm0, %v3244_v18 }
 0x10c   : > { %5720 = vmatmul.mubr.msk.f32.gmra.mrb[14].mxu1 %vm335_vm0, %v7392_v43  ;;  %v3651_v43 = vld [vmem:[%s6662_s30 + $0x4e] sm:$0xff] }
 0x10d   : > { %5722 = vmatprep.mubr.msk.f32.mxu1 %vm335_vm0, %v7403_v24  ;;  %v3652_v24 = vld [vmem:[%s6662_s30 + $0x56] sm:$0xff] }
 0x10e   : > { %6027 = vmatmul.mubr.msk.f32.gmra.mrb[32].mxu0 %vm335_vm0, %v3245_v47  ;;  %v4129_v47 = vpop.permute.xlu1 %4128 }
 0x10f   : > { %6029 = vmatprep.mubr.msk.f32.mxu0 %vm335_vm0, %v3246_v37 }
 0x110   : > { %5723 = vmatmul.mubr.msk.f32.gmra.mrb[16].mxu1 %vm335_vm0, %v7418_v58  ;;  %v3653_v58 = vld [vmem:[%s6662_s30 + $0x5e] sm:$0xff] }
 0x111   : > { %5725 = vmatprep.mubr.msk.f32.mxu1 %vm335_vm0, %v7429_v1  ;;  %v3654_v1 = vld [vmem:[%s6662_s30 + $0x66] sm:$0xff] }
 0x112   : > { %6030 = vmatmul.mubr.msk.f32.gmra.mrb[34].mxu0 %vm335_vm0, %v3247_v54 }
 0x113   : > { %6048 = vmatprep.mubr.msk.f32.mxu0 %vm335_vm0, %v3646_v39 }
 0x114   : > { %5726 = vmatmul.mubr.msk.f32.gmra.mrb[18].mxu1 %vm335_vm0, %v7444_v13  ;;  %v3655_v13 = vld [vmem:[%s6662_s30 + $0x6e] sm:$0xff] }
 0x115   : > { %5728 = vmatprep.mubr.msk.f32.mxu1 %vm335_vm0, %v7456_v60  ;;  %v3656_v60 = vld [vmem:[%s6662_s30 + $0x76] sm:$0xff] }
 0x116   : > { %6049 = vmatmul.mubr.msk.f32.vlgmr.msra.gmra.mrb[0].mxu0 %vm335_vm0, %v3647_v62  ;;  %v4134_v62 = vpop.permute.xlu1 %4133 }
 0x117   : > { %6051 = vmatprep.mubr.msk.f32.mxu0 %vm335_vm0, %v3648_v42 }
 0x118   : > { %5729 = vmatmul.mubr.msk.f32.gmra.mrb[20].mxu1 %vm335_vm0, %v7471_v14  ;;  %v3657_v14 = vld [vmem:[%s6662_s30 + $0x7e] sm:$0xff] }
 0x119   : > { %5731 = vmatprep.mubr.msk.f32.mxu1 %vm335_vm0, %v7482_v27  ;;  %v3658_v27 = vld [vmem:[%s6662_s30 + $0x86] sm:$0xff] }
 0x11a   : > { %6052 = vmatmul.mubr.msk.f32.gmra.mrb[2].mxu0 %vm335_vm0, %v3649_v6 }
 0x11b   : > { %6054 = vmatprep.mubr.msk.f32.mxu0 %vm335_vm0, %v3650_v16 }
 0x11c   : > { %5732 = vmatmul.mubr.msk.f32.gmra.mrb[22].mxu1 %vm335_vm0, %v7491_v38  ;;  %v3659_v38 = vld [vmem:[%s6662_s30 + $0x8e] sm:$0xff] }
 0x11d   : > { %5734 = vmatprep.mubr.msk.f32.mxu1 %vm335_vm0, %v7502_v35  ;;  %v3661_v35 = vld [vmem:[%s6662_s30 + $0x9e] sm:$0xff] }
 0x11e   : > { %6055 = vmatmul.mubr.msk.f32.gmra.mrb[4].mxu0 %vm335_vm0, %v3651_v43 }
 0x11f   : > { %6057 = vmatprep.mubr.msk.f32.mxu0 %vm335_vm0, %v3652_v24 }
 0x120   : > { %5735 = vmatmul.mubr.msk.f32.gmra.mrb[24].mxu1 %vm335_vm0, %v7511_v36  ;;  %v3662_v36 = vld [vmem:[%s6662_s30 + $0xa6] sm:$0xff] }
 0x121   : > { %5737 = vmatprep.mubr.msk.f32.mxu1 %vm335_vm0, %v7522_v44  ;;  %v3664_v44 = vld [vmem:[%s6662_s30 + $0xb6] sm:$0xff] }
 0x122   : > { %6058 = vmatmul.mubr.msk.f32.gmra.mrb[6].mxu0 %vm335_vm0, %v3653_v58 }
 0x123   : > { %6060 = vmatprep.mubr.msk.f32.mxu0 %vm335_vm0, %v3654_v1  ;;  %v4119_v32 = vpop.permute.xlu0 %4118 }
 0x124   : > { %5738 = vmatmul.mubr.msk.f32.gmra.mrb[26].mxu1 %vm335_vm0, %v7534_v45  ;;  %v1930_v45 = vld [vmem:[%s6662_s30 + $0xb3] sm:$0xff] }
 0x125   : > { %5740 = vmatprep.mubr.msk.f32.mxu1 %vm335_vm0, %v7542_v46  ;;  %v3667_v46 = vld [vmem:[%s6662_s30 + $0xce] sm:$0xff] }
 0x126   : > { %6061 = vmatmul.mubr.msk.f32.gmra.mrb[8].mxu0 %vm335_vm0, %v3655_v13 }
 0x127   : > { %6063 = vmatprep.mubr.msk.f32.mxu0 %vm335_vm0, %v3656_v60  ;;  %v4124_v39 = vpop.permute.xlu0 %4123 }
 0x128   : > { %5741 = vmatmul.mubr.msk.f32.gmra.mrb[28].mxu1 %vm335_vm0, %v7554_v53  ;;  %v1933_v53 = vld [vmem:[%s6662_s30 + $0xcb] sm:$0xff] }
 0x129   : > { %5743 = vmatprep.mubr.msk.f32.mxu1 %vm335_vm0, %v7562_v5  ;;  %v3670_v5 = vld [vmem:[%s6662_s30 + $0xe6] sm:$0xff] }
 0x12a   : > { %6064 = vmatmul.mubr.msk.f32.gmra.mrb[10].mxu0 %vm335_vm0, %v3657_v14 }
 0x12b   : > { %6066 = vmatprep.mubr.msk.f32.mxu0 %vm335_vm0, %v3658_v27  ;;  %v4139_v16 = vpop.permute.xlu0 %4138 }
 0x12c   : > { %5744 = vmatmul.mubr.msk.f32.gmra.mrb[30].mxu1 %vm335_vm0, %v7574_v55  ;;  %v1936_v55 = vld [vmem:[%s6662_s30 + $0xe3] sm:$0xff] }
 0x12d   : > { %5746 = vmatprep.mubr.msk.f32.mxu1 %vm335_vm0, %v7582_v4  ;;  %v3673_v4 = vld [vmem:[%s6662_s30 + $0xfe] sm:$0xff] }
 0x12e   : > { %6067 = vmatmul.mubr.msk.f32.gmra.mrb[12].mxu0 %vm335_vm0, %v3659_v38 }
 0x12f   : > { %6069 = vmatprep.mubr.msk.f32.mxu0 %vm335_vm0, %v3660_v50  ;;  %v4144_v58 = vpop.permute.xlu1 %4143 }
 0x130   : > { %5747 = vmatmul.mubr.msk.f32.gmra.mrb[32].mxu1 %vm335_vm0, %v7594_v48  ;;  %v1939_v48 = vld [vmem:[%s6662_s30 + $0xfb] sm:$0xff]  ;;  %s6543_s30 = smul.u32 288, %s8092_s19 }
 0x131   : > { %5749 = vmatprep.mubr.msk.f32.mxu1 %vm335_vm0, %v1510_v57 }
 0x132   : > { %6070 = vmatmul.mubr.msk.f32.gmra.mrb[14].mxu0 %vm335_vm0, %v3661_v35  ;;  %v7842_v60 = vpop.permute.xlu0 %4148  ;;  %s7870_s20 = scalar_lea.vmem %s8088_s3, %s6543_s30 }
 0x133   : > { %6072 = vmatprep.mubr.msk.f32.mxu0 %vm335_vm0, %v3662_v36  ;;  %v7844_v14 = vpop.permute.xlu1 %4153 }
 0x134   : > { %5750 = vmatmul.mubr.msk.f32.gmra.mrb[34].mxu1 %vm335_vm0, %v1511_v2 }
 0x135   : > { %5795 = vmatprep.mubr.msk.f32.mxu1 %vm335_vm0, %v1928_v11 }
 0x136   : > { %6073 = vmatmul.mubr.msk.f32.gmra.mrb[16].mxu0 %vm335_vm0, %v3663_v41  ;;  %v7850_v50 = vpop.permute.xlu0 %4158 }
 0x137   : > { %6075 = vmatprep.mubr.msk.f32.mxu0 %vm335_vm0, %v3664_v44  ;;  %v7856_v36 = vpop.permute.xlu1 %4163 }
 0x138   : > { %5796 = vmatmul.mubr.msk.f32.vlgmr.msra.gmra.mrb[18].mxu1 %vm335_vm0, %v1929_v59 }
 0x139   : > { %5798 = vmatprep.mubr.msk.f32.mxu1 %vm335_vm0, %v1930_v45 }
 0x13a   : > { %6076 = vmatmul.mubr.msk.f32.gmra.mrb[18].mxu0 %vm335_vm0, %v3665_v21  ;;  %v7862_v11 = vpop.permute.xlu0 %4168 }
 0x13b   : > { %6078 = vmatprep.mubr.msk.f32.mxu0 %vm335_vm0, %v3666_v49  ;;  %v7865_v44 = vpop.permute.xlu1 %4173 }
 0x13c   : > { %5799 = vmatmul.mubr.msk.f32.gmra.mrb[20].mxu1 %vm335_vm0, %v1931_v51 }
 0x13d   : > { %5801 = vmatprep.mubr.msk.f32.mxu1 %vm335_vm0, %v1932_v56 }
 0x13e   : > { %6079 = vmatmul.mubr.msk.f32.gmra.mrb[20].mxu0 %vm335_vm0, %v3667_v46  ;;  %v7872_v51 = vpop.permute.xlu0 %4178 }
 0x13f   : > { %6081 = vmatprep.mubr.msk.f32.mxu0 %vm335_vm0, %v3668_v61 }
 0x140   : > { %5802 = vmatmul.mubr.msk.f32.gmra.mrb[22].mxu1 %vm335_vm0, %v1933_v53  ;;  %v7874_v53 = vpop.permute.xlu1 %4183 }
 0x141   : > { %5804 = vmatprep.mubr.msk.f32.mxu1 %vm335_vm0, %v1934_v3 }
 0x142   : > { %6082 = vmatmul.mubr.msk.f32.gmra.mrb[22].mxu0 %vm335_vm0, %v3669_v63 }
 0x143   : > { %6084 = vmatprep.mubr.msk.f32.mxu0 %vm335_vm0, %v3670_v5 }
 0x144   : > { %5805 = vmatmul.mubr.msk.f32.gmra.mrb[24].mxu1 %vm335_vm0, %v1935_v8 }
 0x145   : > { %5807 = vmatprep.mubr.msk.f32.mxu1 %vm335_vm0, %v1936_v55 }
 0x146   : > { %6085 = vmatmul.mubr.msk.f32.gmra.mrb[24].mxu0 %vm335_vm0, %v3671_v10 }
 0x147   : > { %6087 = vmatprep.mubr.msk.f32.mxu0 %vm335_vm0, %v3672_v15 }
 0x148   : > { %5808 = vmatmul.mubr.msk.f32.gmra.mrb[26].mxu1 %vm335_vm0, %v1937_v19 }
 0x149   : > { %5810 = vmatprep.mubr.msk.f32.mxu1 %vm335_vm0, %v1938_v23 }
 0x14a   : > { %6088 = vmatmul.mubr.msk.f32.gmra.mrb[26].mxu0 %vm335_vm0, %v3673_v4 }
 0x14b   : > { %6090 = vmatprep.mubr.msk.f32.mxu0 %vm335_vm0, %v3674_v9 }
 0x14c   : > { %5811 = vmatmul.mubr.msk.f32.gmra.mrb[28].mxu1 %vm335_vm0, %v1939_v48 }
 0x14d   : > { %5813 = vmatprep.mubr.msk.f32.mxu1 %vm335_vm0, %v1940_v52  ;;  %v7884_v52 = vpop.permute.xlu0 %4188 }
 0x14e   : > { %6091 = vmatmul.mubr.msk.f32.gmra.mrb[28].mxu0 %vm335_vm0, %v3675_v20 }
 0x14f   : > { %6093 = vmatprep.mubr.msk.f32.mxu0 %vm335_vm0, %v3676_v22 }
 0x150   : > { %5814 = vmatmul.mubr.msk.f32.gmra.mrb[30].mxu1 %vm335_vm0, %v1941_v28 }
 0x151   : > { %5816 = vmatprep.mubr.msk.f32.mxu1 %vm335_vm0, %v1942_v40 }
 0x152   : > { %6094 = vmatmul.mubr.msk.f32.gmra.mrb[30].mxu0 %vm335_vm0, %v3677_v29 }
 0x153   : > { %6096 = vmatprep.mubr.msk.f32.mxu0 %vm335_vm0, %v3678_v0 }
 0x154   : > { %5817 = vmatmul.mubr.msk.f32.gmra.mrb[32].mxu1 %vm335_vm0, %v1943_v34 }
 0x155   : > { %5819 = vmatprep.mubr.msk.f32.mxu1 %vm335_vm0, %v1944_v26  ;;  %v7891_v26 = vpop.permute.xlu1 %4193 }
 0x156   : > { %6097 = vmatmul.mubr.msk.f32.gmra.mrb[32].mxu0 %vm335_vm0, %v3679_v7 }
 0x157   : > { %6099 = vmatprep.mubr.msk.f32.mxu0 %vm335_vm0, %v3680_v31 }
 0x158   : > { %5820 = vmatmul.mubr.msk.f32.gmra.mrb[34].mxu1 %vm335_vm0, %v1945_v12 }
 0x15a   : > { %6100 = vmatmul.mubr.msk.f32.gmra.mrb[34].mxu0 %vm335_vm0, %v3681_v33 }
 0x1c3   : > { %v5700_v30 = vpop.f32.mrb[0].mxu1 }
 0x1c4   : > { %v1695_v17 = vpop.f32.mrb[1].mxu1 }
 0x1c7   : > { %v5703_v25 = vpop.f32.mrb[2].mxu1 }
 0x1c8   : > { %v1705_v18 = vpop.f32.mrb[3].mxu1 }
 0x1cb   : > { %v5706_v37 = vpop.f32.mrb[4].mxu1 }
 0x1cc   : > { %v1715_v54 = vpop.f32.mrb[5].mxu1 }
 0x1cf   : > { %v7830_v42 = vpop.f32.mrb[6].mxu1 }
 0x1d0   : > { %v7832_v6 = vpop.f32.mrb[7].mxu1 }
 0x1d3   : > { %v7834_v43 = vpop.f32.mrb[8].mxu1 }
 0x1d4   : > { %v7836_v24 = vpop.f32.mrb[9].mxu1 }
 0x1d7   : > { %v7838_v1 = vpop.f32.mrb[10].mxu1 }
 0x1d8   : > { %v7840_v13 = vpop.f32.mrb[11].mxu1 }
 0x1db   : > { %v7846_v27 = vpop.f32.mrb[12].mxu1 }
 0x1dc   : > { %v7848_v38 = vpop.f32.mrb[13].mxu1 }
 0x1df   : > { %v7852_v35 = vpop.f32.mrb[14].mxu1 }
 0x1e0   : > { %v7854_v57 = vpop.f32.mrb[15].mxu1 }
 0x1e3   : > { %v7858_v2 = vpop.f32.mrb[16].mxu1 }
 0x1e4   : > { %v7860_v41 = vpop.f32.mrb[17].mxu1 }
 0x1e9   : > { %v6050_v59 = vpop.f32.mrb[0].mxu0 }
 0x1ea   : > { %v6254_v21 = vadd.f32 %v6050_v59, %v5700_v30  ;;  %v3865_v45 = vpop.f32.mrb[1].mxu0 }
 0x1eb   : > { %v6255_v49 = vadd.f32 %v3865_v45, %v1695_v17 }
 0x1ec   : > { %v4297_v46 = vmul.f32 %v6254_v21, %v4124_v39 }
 0x1ed   : > { %v4296_v56 = vmul.f32 %v6255_v49, %v4119_v32  ;;  %v6053_v61 = vpop.f32.mrb[2].mxu0 }
 0x1ee   : > { %4333 = vst.msk [vmem:[%s7870_s20 + $0x8] sm:$0xff] %vm335_vm0, %v4297_v46  ;;  %v4369_v63 = vsel %vm335_vm0, %v4297_v46, 0.0  ;;  %v4446_v3 = vmul.f32 %v4297_v46, %v4297_v46  ;;  %v6256_v5 = vadd.f32 %v6053_v61, %v5703_v25  ;;  %v3875_v8 = vpop.f32.mrb[3].mxu0 }
 0x1ef   : > { %4332 = vst.msk [vmem:[%s7870_s20] sm:$0xff] %vm335_vm0, %v4296_v56  ;;  %v4368_v10 = vsel %vm335_vm0, %v4296_v56, 0.0  ;;  %v4445_v55 = vmul.f32 %v4296_v56, %v4296_v56  ;;  %v6257_v15 = vadd.f32 %v3875_v8, %v1705_v18 }
 0x1f0   : > { %v4482_v19 = vsel %vm335_vm0, %v4446_v3, 0.0  ;;  %v4370_v4 = vadd.f32 %v4369_v63, %v4368_v10  ;;  %v4299_v23 = vmul.f32 %v6256_v5, %v4134_v62  ;;  %v7909_v3 = vpop.permute.xlu1 %4203 }
 0x1f1   : > { %v4481_v9 = vsel %vm335_vm0, %v4445_v55, 0.0  ;;  %v4298_v48 = vmul.f32 %v6257_v15, %v4129_v47  ;;  %v6056_v20 = vpop.f32.mrb[4].mxu0 }
 0x1f2   : > { %v4483_v22 = vadd.f32 %v4482_v19, %v4481_v9  ;;  %4335 = vst.msk [vmem:[%s7870_s20 + $0x18] sm:$0xff] %vm335_vm0, %v4299_v23  ;;  %v4448_v28 = vmul.f32 %v4299_v23, %v4299_v23  ;;  %v6258_v29 = vadd.f32 %v6056_v20, %v5706_v37  ;;  %v3885_v40 = vpop.f32.mrb[5].mxu0  ;;  %v4373_v33 = vsel %vm335_vm0, %v4299_v23, 0.0 }
 0x1f3   : > { %4334 = vst.msk [vmem:[%s7870_s20 + $0x10] sm:$0xff] %vm335_vm0, %v4298_v48  ;;  %v4371_v0 = vsel %vm335_vm0, %v4298_v48, 0.0  ;;  %v4447_v34 = vmul.f32 %v4298_v48, %v4298_v48  ;;  %v6259_v7 = vadd.f32 %v3885_v40, %v1715_v54 }
 0x1f4   : > { %v4372_v31 = vadd.f32 %v4371_v0, %v4370_v4  ;;  %v4301_v12 = vmul.f32 %v6258_v29, %v4144_v58  ;;  %v4486_v25 = vsel %vm335_vm0, %v4448_v28, 0.0 }
 0x1f5   : > { %v4484_v30 = vsel %vm335_vm0, %v4447_v34, 0.0  ;;  %v4300_v17 = vmul.f32 %v6259_v7, %v4139_v16  ;;  %v6059_v32 = vpop.f32.mrb[6].mxu0  ;;  %v7903_v16 = vpop.permute.xlu0 %4198 }
 0x1f6   : > { %v4485_v18 = vadd.f32 %v4484_v30, %v4483_v22  ;;  %4337 = vst.msk [vmem:[%s7870_s20 + $0x28] sm:$0xff] %vm335_vm0, %v4301_v12  ;;  %v4450_v47 = vmul.f32 %v4301_v12, %v4301_v12  ;;  %v4374_v37 = vadd.f32 %v4373_v33, %v4372_v31  ;;  %v3895_v39 = vpop.f32.mrb[7].mxu0  ;;  %v6260_v58 = vadd.f32 %v6059_v32, %v7830_v42  ;;  %v7930_v7 = vpop.permute.xlu1 %4213 }
 0x1f7   : > { %4336 = vst.msk [vmem:[%s7870_s20 + $0x20] sm:$0xff] %vm335_vm0, %v4300_v17  ;;  %v4375_v54 = vsel %vm335_vm0, %v4300_v17, 0.0  ;;  %v4449_v62 = vmul.f32 %v4300_v17, %v4300_v17  ;;  %v6261_v59 = vadd.f32 %v3895_v39, %v7832_v6  ;;  %v4377_v49 = vsel %vm335_vm0, %v4301_v12, 0.0 }
 0x1f8   : > { %v4376_v21 = vadd.f32 %v4375_v54, %v4374_v37  ;;  %v4487_v45 = vadd.f32 %v4486_v25, %v4485_v18  ;;  %v4303_v56 = vmul.f32 %v6260_v58, %v7844_v14  ;;  %v4490_v10 = vsel %vm335_vm0, %v4450_v47, 0.0 }
 0x1f9   : > { %v4488_v46 = vsel %vm335_vm0, %v4449_v62, 0.0  ;;  %v4302_v61 = vmul.f32 %v6261_v59, %v7842_v60  ;;  %v6062_v63 = vpop.f32.mrb[8].mxu0  ;;  %v7921_v48 = vpop.permute.xlu0 %4208 }
 0x1fa   : > { %v4489_v42 = vadd.f32 %v4488_v46, %v4487_v45  ;;  %v4378_v5 = vadd.f32 %v4377_v49, %v4376_v21  ;;  %v6262_v6 = vadd.f32 %v6062_v63, %v7834_v43  ;;  %v3905_v8 = vpop.f32.mrb[9].mxu0  ;;  %4339 = vst.msk [vmem:[%s7870_s20 + $0x38] sm:$0xff] %vm335_vm0, %v4303_v56  ;;  %v4452_v55 = vmul.f32 %v4303_v56, %v4303_v56  ;;  %v7950_v49 = vpop.permute.xlu1 %4223 }
 0x1fb   : > { %4338 = vst.msk [vmem:[%s7870_s20 + $0x30] sm:$0xff] %vm335_vm0, %v4302_v61  ;;  %v4379_v14 = vsel %vm335_vm0, %v4302_v61, 0.0  ;;  %v4451_v15 = vmul.f32 %v4302_v61, %v4302_v61  ;;  %v6263_v23 = vadd.f32 %v3905_v8, %v7836_v24  ;;  %v4381_v20 = vsel %vm335_vm0, %v4303_v56, 0.0 }
 0x1fc   : > { %v4380_v60 = vadd.f32 %v4379_v14, %v4378_v5  ;;  %v4491_v19 = vadd.f32 %v4490_v10, %v4489_v42  ;;  %v4305_v4 = vmul.f32 %v6262_v6, %v7856_v36  ;;  %v4494_v22 = vsel %vm335_vm0, %v4452_v55, 0.0 }
 0x1fd   : > { %v4492_v43 = vsel %vm335_vm0, %v4451_v15, 0.0  ;;  %v6065_v9 = vpop.f32.mrb[10].mxu0  ;;  %v4304_v29 = vmul.f32 %v6263_v23, %v7850_v50  ;;  %v7945_v54 = vpop.permute.xlu0 %4218 }
 0x1fe   : > { %v4493_v28 = vadd.f32 %v4492_v43, %v4491_v19  ;;  %4341 = vst.msk [vmem:[%s7870_s20 + $0x48] sm:$0xff] %vm335_vm0, %v4305_v4  ;;  %v3915_v40 = vpop.f32.mrb[11].mxu0  ;;  %v4454_v0 = vmul.f32 %v4305_v4, %v4305_v4  ;;  %v4382_v36 = vadd.f32 %v4381_v20, %v4380_v60  ;;  %v6264_v34 = vadd.f32 %v6065_v9, %v7838_v1 }
 0x1ff   : > { %v6265_v24 = vadd.f32 %v3915_v40, %v7840_v13  ;;  %4340 = vst.msk [vmem:[%s7870_s20 + $0x40] sm:$0xff] %vm335_vm0, %v4304_v29  ;;  %v4383_v31 = vsel %vm335_vm0, %v4304_v29, 0.0  ;;  %v4453_v12 = vmul.f32 %v4304_v29, %v4304_v29  ;;  %v4385_v1 = vsel %vm335_vm0, %v4305_v4, 0.0 }
 0x200   : > { %v4495_v33 = vadd.f32 %v4494_v22, %v4493_v28  ;;  %v4384_v30 = vadd.f32 %v4383_v31, %v4382_v36  ;;  %v4307_v50 = vmul.f32 %v6264_v34, %v7865_v44  ;;  %v4498_v47 = vsel %vm335_vm0, %v4454_v0, 0.0 }
 0x201   : > { %v4306_v17 = vmul.f32 %v6265_v24, %v7862_v11  ;;  %v6068_v32 = vpop.f32.mrb[12].mxu0  ;;  %v4496_v13 = vsel %vm335_vm0, %v4453_v12, 0.0  ;;  %v7965_v4 = vpop.permute.xlu0 %4228 }
 0x202   : > { %v6266_v25 = vadd.f32 %v6068_v32, %v7846_v27  ;;  %v3925_v18 = vpop.f32.mrb[13].mxu0  ;;  %v4497_v37 = vadd.f32 %v4496_v13, %v4495_v33  ;;  %4343 = vst.msk [vmem:[%s7870_s20 + $0x58] sm:$0xff] %vm335_vm0, %v4307_v50  ;;  %v4456_v39 = vmul.f32 %v4307_v50, %v4307_v50  ;;  %v4386_v44 = vadd.f32 %v4385_v1, %v4384_v30 }
 0x203   : > { %4342 = vst.msk [vmem:[%s7870_s20 + $0x50] sm:$0xff] %vm335_vm0, %v4306_v17  ;;  %v4387_v11 = vsel %vm335_vm0, %v4306_v17, 0.0  ;;  %v4455_v62 = vmul.f32 %v4306_v17, %v4306_v17  ;;  %v6267_v27 = vadd.f32 %v3925_v18, %v7848_v38  ;;  %v4389_v46 = vsel %vm335_vm0, %v4307_v50, 0.0 }
 0x204   : > { %v4309_v58 = vmul.f32 %v6266_v25, %v7874_v53  ;;  %v4388_v59 = vadd.f32 %v4387_v11, %v4386_v44  ;;  %v4499_v21 = vadd.f32 %v4498_v47, %v4497_v37  ;;  %v4502_v8 = vsel %vm335_vm0, %v4456_v39, 0.0 }
 0x205   : > { %v6071_v45 = vpop.f32.mrb[14].mxu0  ;;  %v4500_v56 = vsel %vm335_vm0, %v4455_v62, 0.0  ;;  %v4308_v63 = vmul.f32 %v6267_v27, %v7872_v51  ;;  %v7985_v13 = vpop.permute.xlu0 %4238 }
 0x206   : > { %4345 = vst.msk [vmem:[%s7870_s20 + $0x68] sm:$0xff] %vm335_vm0, %v4309_v58  ;;  %v4458_v61 = vmul.f32 %v4309_v58, %v4309_v58  ;;  %v3935_v42 = vpop.f32.mrb[15].mxu0  ;;  %v4501_v5 = vadd.f32 %v4500_v56, %v4499_v21  ;;  %v4390_v53 = vadd.f32 %v4389_v46, %v4388_v59  ;;  %v6268_v38 = vadd.f32 %v6071_v45, %v7852_v35 }
 0x207   : > { %v6269_v6 = vadd.f32 %v3935_v42, %v7854_v57  ;;  %4344 = vst.msk [vmem:[%s7870_s20 + $0x60] sm:$0xff] %vm335_vm0, %v4308_v63  ;;  %v4391_v10 = vsel %vm335_vm0, %v4308_v63, 0.0  ;;  %v4457_v55 = vmul.f32 %v4308_v63, %v4308_v63  ;;  %v4393_v35 = vsel %vm335_vm0, %v4309_v58, 0.0 }
 0x208   : > { %v4392_v14 = vadd.f32 %v4391_v10, %v4390_v53  ;;  %v4503_v15 = vadd.f32 %v4502_v8, %v4501_v5  ;;  %v4311_v51 = vmul.f32 %v6268_v38, %v7891_v26  ;;  %v4506_v9 = vsel %vm335_vm0, %v4458_v61, 0.0  ;;  %v7975_v26 = vpop.permute.xlu1 %4233 }
 0x209   : > { %v4310_v60 = vmul.f32 %v6269_v6, %v7884_v52  ;;  %v6074_v19 = vpop.f32.mrb[16].mxu0  ;;  %v4504_v57 = vsel %vm335_vm0, %v4457_v55, 0.0 }
 0x20a   : > { %v6270_v23 = vadd.f32 %v6074_v19, %v7858_v2  ;;  %v3945_v43 = vpop.f32.mrb[17].mxu0  ;;  %v4505_v20 = vadd.f32 %v4504_v57, %v4503_v15  ;;  %4347 = vst.msk [vmem:[%s7870_s20 + $0x78] sm:$0xff] %vm335_vm0, %v4311_v51  ;;  %v4460_v22 = vmul.f32 %v4311_v51, %v4311_v51  ;;  %v4394_v52 = vadd.f32 %v4393_v35, %v4392_v14  ;;  %v4249_v14 = vpop.permute.xlu0 %4248 }
 0x20b   : > { %4346 = vst.msk [vmem:[%s7870_s20 + $0x70] sm:$0xff] %vm335_vm0, %v4310_v60  ;;  %v4395_v28 = vsel %vm335_vm0, %v4310_v60, 0.0  ;;  %v4459_v29 = vmul.f32 %v4310_v60, %v4310_v60  ;;  %v6271_v2 = vadd.f32 %v3945_v43, %v7860_v41  ;;  %v5797_v0 = vpop.f32.mrb[18].mxu1  ;;  %v4397_v12 = vsel %vm335_vm0, %v4311_v51, 0.0 }
 0x20c   : > { %v4313_v40 = vmul.f32 %v6270_v23, %v7909_v3  ;;  %v4396_v36 = vadd.f32 %v4395_v28, %v4394_v52  ;;  %v4507_v34 = vadd.f32 %v4506_v9, %v4505_v20  ;;  %v2219_v31 = vpop.f32.mrb[19].mxu1  ;;  %v4510_v25 = vsel %vm335_vm0, %v4460_v22, 0.0  ;;  %v4244_v27 = vpop.permute.xlu1 %4243 }
 0x20d   : > { %v6077_v24 = vpop.f32.mrb[18].mxu0  ;;  %v4508_v33 = vsel %vm335_vm0, %v4459_v29, 0.0  ;;  %v4312_v50 = vmul.f32 %v6271_v2, %v7903_v16 }
 0x20e   : > { %4349 = vst.msk [vmem:[%s7870_s20 + $0x88] sm:$0xff] %vm335_vm0, %v4313_v40  ;;  %v4462_v30 = vmul.f32 %v4313_v40, %v4313_v40  ;;  %v3955_v17 = vpop.f32.mrb[19].mxu0  ;;  %v4509_v32 = vadd.f32 %v4508_v33, %v4507_v34  ;;  %v4398_v3 = vadd.f32 %v4397_v12, %v4396_v36  ;;  %v6272_v1 = vadd.f32 %v6077_v24, %v5797_v0 }
 0x20f   : > { %v6273_v41 = vadd.f32 %v3955_v17, %v2219_v31  ;;  %4348 = vst.msk [vmem:[%s7870_s20 + $0x80] sm:$0xff] %vm335_vm0, %v4312_v50  ;;  %v4399_v18 = vsel %vm335_vm0, %v4312_v50, 0.0  ;;  %v4461_v47 = vmul.f32 %v4312_v50, %v4312_v50  ;;  %v5800_v37 = vpop.f32.mrb[20].mxu1  ;;  %v4401_v59 = vsel %vm335_vm0, %v4313_v40, 0.0  ;;  %v4259_v17 = vpop.permute.xlu0 %4258 }
 0x210   : > { %v4400_v39 = vadd.f32 %v4399_v18, %v4398_v3  ;;  %v4511_v44 = vadd.f32 %v4510_v25, %v4509_v32  ;;  %v4315_v16 = vmul.f32 %v6272_v1, %v7930_v7  ;;  %v2229_v58 = vpop.f32.mrb[21].mxu1  ;;  %v4514_v56 = vsel %vm335_vm0, %v4462_v30, 0.0  ;;  %v4254_v9 = vpop.permute.xlu1 %4253 }
 0x211   : > { %v4314_v11 = vmul.f32 %v6273_v41, %v7921_v48  ;;  %v6080_v62 = vpop.f32.mrb[20].mxu0  ;;  %v4512_v21 = vsel %vm335_vm0, %v4461_v47, 0.0 }
 0x212   : > { %v6274_v45 = vadd.f32 %v6080_v62, %v5800_v37  ;;  %v3965_v46 = vpop.f32.mrb[21].mxu0  ;;  %v4513_v61 = vadd.f32 %v4512_v21, %v4511_v44  ;;  %4351 = vst.msk [vmem:[%s7870_s20 + $0x98] sm:$0xff] %vm335_vm0, %v4315_v16  ;;  %v4464_v63 = vmul.f32 %v4315_v16, %v4315_v16  ;;  %v4402_v7 = vadd.f32 %v4401_v59, %v4400_v39 }
 0x213   : > { %4350 = vst.msk [vmem:[%s7870_s20 + $0x90] sm:$0xff] %vm335_vm0, %v4314_v11  ;;  %v4403_v48 = vsel %vm335_vm0, %v4314_v11, 0.0  ;;  %v4463_v42 = vmul.f32 %v4314_v11, %v4314_v11  ;;  %v6275_v53 = vadd.f32 %v3965_v46, %v2229_v58  ;;  %v5803_v38 = vpop.f32.mrb[22].mxu1  ;;  %v4405_v15 = vsel %vm335_vm0, %v4315_v16, 0.0 }
 0x214   : > { %v4317_v5 = vmul.f32 %v6274_v45, %v7950_v49  ;;  %v4404_v6 = vadd.f32 %v4403_v48, %v4402_v7  ;;  %v4515_v8 = vadd.f32 %v4514_v56, %v4513_v61  ;;  %v2239_v55 = vpop.f32.mrb[23].mxu1  ;;  %v4518_v20 = vsel %vm335_vm0, %v4464_v63, 0.0  ;;  %v4264_v39 = vpop.permute.xlu1 %4263 }
 0x215   : > { %v6083_v10 = vpop.f32.mrb[22].mxu0  ;;  %v4516_v51 = vsel %vm335_vm0, %v4463_v42, 0.0  ;;  %v4316_v19 = vmul.f32 %v6275_v53, %v7945_v54 }
 0x216   : > { %4353 = vst.msk [vmem:[%s7870_s20 + $0xa8] sm:$0xff] %vm335_vm0, %v4317_v5  ;;  %v4466_v60 = vmul.f32 %v4317_v5, %v4317_v5  ;;  %v3975_v35 = vpop.f32.mrb[23].mxu0  ;;  %v4517_v57 = vadd.f32 %v4516_v51, %v4515_v8  ;;  %v4406_v49 = vadd.f32 %v4405_v15, %v4404_v6  ;;  %v6276_v23 = vadd.f32 %v6083_v10, %v5803_v38  ;;  %v4269_v38 = vpop.permute.xlu0 %4268 }
 0x217   : > { %v6277_v43 = vadd.f32 %v3975_v35, %v2239_v55  ;;  %4352 = vst.msk [vmem:[%s7870_s20 + $0xa0] sm:$0xff] %vm335_vm0, %v4316_v19  ;;  %v4407_v22 = vsel %vm335_vm0, %v4316_v19, 0.0  ;;  %v4465_v52 = vmul.f32 %v4316_v19, %v4316_v19  ;;  %v5806_v28 = vpop.f32.mrb[24].mxu1  ;;  %v4409_v34 = vsel %vm335_vm0, %v4317_v5, 0.0 }
 0x218   : > { %v4408_v29 = vadd.f32 %v4407_v22, %v4406_v49  ;;  %v4519_v40 = vadd.f32 %v4518_v20, %v4517_v57  ;;  %v4319_v54 = vmul.f32 %v6276_v23, %v7975_v26  ;;  %v2249_v36 = vpop.f32.mrb[25].mxu1  ;;  %v4522_v33 = vsel %vm335_vm0, %v4466_v60, 0.0 }
 0x219   : > { %v4318_v2 = vmul.f32 %v6277_v43, %v7965_v4  ;;  %v6086_v0 = vpop.f32.mrb[24].mxu0  ;;  %v4520_v24 = vsel %vm335_vm0, %v4465_v52, 0.0 }
 0x21a   : > { %v6278_v31 = vadd.f32 %v6086_v0, %v5806_v28  ;;  %v3985_v12 = vpop.f32.mrb[25].mxu0  ;;  %v4521_v30 = vadd.f32 %v4520_v24, %v4519_v40  ;;  %4355 = vst.msk [vmem:[%s7870_s20 + $0xb8] sm:$0xff] %vm335_vm0, %v4319_v54  ;;  %v4468_v50 = vmul.f32 %v4319_v54, %v4319_v54  ;;  %v4410_v26 = vadd.f32 %v4409_v34, %v4408_v29 }
 0x21b   : > { %4354 = vst.msk [vmem:[%s7870_s20 + $0xb0] sm:$0xff] %vm335_vm0, %v4318_v2  ;;  %v4411_v4 = vsel %vm335_vm0, %v4318_v2, 0.0  ;;  %v4467_v32 = vmul.f32 %v4318_v2, %v4318_v2  ;;  %v6279_v1 = vadd.f32 %v3985_v12, %v2249_v36  ;;  %v5809_v41 = vpop.f32.mrb[26].mxu1  ;;  %v4413_v44 = vsel %vm335_vm0, %v4319_v54, 0.0 }
 0x21c   : > { %v4321_v3 = vmul.f32 %v6278_v31, %v4244_v27  ;;  %v4412_v25 = vadd.f32 %v4411_v4, %v4410_v26  ;;  %v4523_v18 = vadd.f32 %v4522_v33, %v4521_v30  ;;  %v2259_v37 = vpop.f32.mrb[27].mxu1  ;;  %v4526_v46 = vsel %vm335_vm0, %v4468_v50, 0.0  ;;  %v4279_v31 = vpop.permute.xlu0 %4278 }
 0x21d   : > { %v6089_v47 = vpop.f32.mrb[26].mxu0  ;;  %v4524_v16 = vsel %vm335_vm0, %v4467_v32, 0.0  ;;  %v4320_v62 = vmul.f32 %v6279_v1, %v7985_v13 }
 0x21e   : > { %4357 = vst.msk [vmem:[%s7870_s20 + $0xc8] sm:$0xff] %vm335_vm0, %v4321_v3  ;;  %v4470_v11 = vmul.f32 %v4321_v3, %v4321_v3  ;;  %v3995_v58 = vpop.f32.mrb[27].mxu0  ;;  %v4525_v59 = vadd.f32 %v4524_v16, %v4523_v18  ;;  %v4414_v27 = vadd.f32 %v4413_v44, %v4412_v25  ;;  %v6280_v21 = vadd.f32 %v6089_v47, %v5809_v41 }
 0x21f   : > { %v6281_v45 = vadd.f32 %v3995_v58, %v2259_v37  ;;  %4356 = vst.msk [vmem:[%s7870_s20 + $0xc0] sm:$0xff] %vm335_vm0, %v4320_v62  ;;  %v4415_v56 = vsel %vm335_vm0, %v4320_v62, 0.0  ;;  %v4469_v61 = vmul.f32 %v4320_v62, %v4320_v62  ;;  %v5812_v63 = vpop.f32.mrb[28].mxu1  ;;  %v4417_v6 = vsel %vm335_vm0, %v4321_v3, 0.0 }
 0x220   : > { %v4416_v7 = vadd.f32 %v4415_v56, %v4414_v27  ;;  %v4527_v48 = vadd.f32 %v4526_v46, %v4525_v59  ;;  %v4323_v42 = vmul.f32 %v6280_v21, %v4254_v9  ;;  %v2269_v53 = vpop.f32.mrb[29].mxu1  ;;  %v4530_v15 = vsel %vm335_vm0, %v4470_v11, 0.0 }
 0x221   : > { %v4322_v5 = vmul.f32 %v6281_v45, %v4249_v14  ;;  %v6092_v13 = vpop.f32.mrb[28].mxu0  ;;  %v4528_v8 = vsel %vm335_vm0, %v4469_v61, 0.0  ;;  %v4274_v14 = vpop.permute.xlu1 %4273 }
 0x222   : > { %v6282_v10 = vadd.f32 %v6092_v13, %v5812_v63  ;;  %v4005_v55 = vpop.f32.mrb[29].mxu0  ;;  %v4529_v51 = vadd.f32 %v4528_v8, %v4527_v48  ;;  %4359 = vst.msk [vmem:[%s7870_s20 + $0xd8] sm:$0xff] %vm335_vm0, %v4323_v42  ;;  %v4472_v60 = vmul.f32 %v4323_v42, %v4323_v42  ;;  %v4418_v19 = vadd.f32 %v4417_v6, %v4416_v7  ;;  %v4289_v6 = vpop.permute.xlu0 %4288 }
 0x223   : > { %4358 = vst.msk [vmem:[%s7870_s20 + $0xd0] sm:$0xff] %vm335_vm0, %v4322_v5  ;;  %v4419_v35 = vsel %vm335_vm0, %v4322_v5, 0.0  ;;  %v4471_v57 = vmul.f32 %v4322_v5, %v4322_v5  ;;  %v6283_v23 = vadd.f32 %v4005_v55, %v2269_v53  ;;  %v5815_v43 = vpop.f32.mrb[30].mxu1  ;;  %v4421_v28 = vsel %vm335_vm0, %v4323_v42, 0.0 }
 0x224   : > { %v4325_v49 = vmul.f32 %v6282_v10, %v4264_v39  ;;  %v4420_v9 = vadd.f32 %v4419_v35, %v4418_v19  ;;  %v4531_v20 = vadd.f32 %v4530_v15, %v4529_v51  ;;  %v2279_v52 = vpop.f32.mrb[31].mxu1  ;;  %v4534_v12 = vsel %vm335_vm0, %v4472_v60, 0.0 }
 0x225   : > { %v6095_v22 = vpop.f32.mrb[30].mxu0  ;;  %v4532_v29 = vsel %vm335_vm0, %v4471_v57, 0.0  ;;  %v4324_v54 = vmul.f32 %v6283_v23, %v4259_v17  ;;  %v4284_v41 = vpop.permute.xlu1 %4283 }
 0x226   : > { %4361 = vst.msk [vmem:[%s7870_s20 + $0xe8] sm:$0xff] %vm335_vm0, %v4325_v49  ;;  %v4474_v40 = vmul.f32 %v4325_v49, %v4325_v49  ;;  %v4015_v2 = vpop.f32.mrb[31].mxu0  ;;  %v4533_v0 = vadd.f32 %v4532_v29, %v4531_v20  ;;  %v4422_v36 = vadd.f32 %v4421_v28, %v4420_v9  ;;  %v6284_v34 = vadd.f32 %v6095_v22, %v5815_v43 }
 0x227   : > { %v6285_v24 = vadd.f32 %v4015_v2, %v2279_v52  ;;  %4360 = vst.msk [vmem:[%s7870_s20 + $0xe0] sm:$0xff] %vm335_vm0, %v4324_v54  ;;  %v4423_v33 = vsel %vm335_vm0, %v4324_v54, 0.0  ;;  %v4473_v30 = vmul.f32 %v4324_v54, %v4324_v54  ;;  %v5818_v50 = vpop.f32.mrb[32].mxu1  ;;  %v4425_v25 = vsel %vm335_vm0, %v4325_v49, 0.0 }
 0x228   : > { %v4424_v26 = vadd.f32 %v4423_v33, %v4422_v36  ;;  %v4535_v4 = vadd.f32 %v4534_v12, %v4533_v0  ;;  %v4327_v32 = vmul.f32 %v6284_v34, %v4274_v14  ;;  %v2289_v1 = vpop.f32.mrb[33].mxu1  ;;  %v4538_v39 = vsel %vm335_vm0, %v4474_v40, 0.0 }
 0x229   : > { %v4326_v17 = vmul.f32 %v6285_v24, %v4269_v38  ;;  %v6098_v3 = vpop.f32.mrb[32].mxu0  ;;  %v4536_v18 = vsel %vm335_vm0, %v4473_v30, 0.0  ;;  %v4294_v8 = vpop.permute.xlu1 %4293 }
 0x22a   : > { %v6286_v47 = vadd.f32 %v6098_v3, %v5818_v50  ;;  %v4025_v37 = vpop.f32.mrb[33].mxu0  ;;  %v4537_v44 = vadd.f32 %v4536_v18, %v4535_v4  ;;  %4363 = vst.msk [vmem:[%s7870_s20 + $0xf8] sm:$0xff] %vm335_vm0, %v4327_v32  ;;  %v4476_v16 = vmul.f32 %v4327_v32, %v4327_v32  ;;  %v4426_v11 = vadd.f32 %v4425_v25, %v4424_v26 }
 0x22b   : > { %4362 = vst.msk [vmem:[%s7870_s20 + $0xf0] sm:$0xff] %vm335_vm0, %v4326_v17  ;;  %v4427_v62 = vsel %vm335_vm0, %v4326_v17, 0.0  ;;  %v4475_v58 = vmul.f32 %v4326_v17, %v4326_v17  ;;  %v6287_v27 = vadd.f32 %v4025_v37, %v2289_v1  ;;  %v5821_v21 = vpop.f32.mrb[34].mxu1  ;;  %v4429_v63 = vsel %vm335_vm0, %v4327_v32, 0.0 }
 0x22c   : > { %v4329_v59 = vmul.f32 %v6286_v47, %v4284_v41  ;;  %v4428_v45 = vadd.f32 %v4427_v62, %v4426_v11  ;;  %v4539_v46 = vadd.f32 %v4538_v39, %v4537_v44  ;;  %v2299_v61 = vpop.f32.mrb[35].mxu1  ;;  %v4542_v10 = vsel %vm335_vm0, %v4476_v16, 0.0 }
 0x22d   : > { %v6101_v56 = vpop.f32.mrb[34].mxu0  ;;  %v4540_v7 = vsel %vm335_vm0, %v4475_v58, 0.0  ;;  %v4328_v48 = vmul.f32 %v6287_v27, %v4279_v31 }
 0x22e   : > { %4365 = vst.msk [vmem:[%s7870_s20 + $0x108] sm:$0xff] %vm335_vm0, %v4329_v59  ;;  %v4035_v42 = vpop.f32.mrb[35].mxu0  ;;  %v4541_v5 = vadd.f32 %v4540_v7, %v4539_v46  ;;  %v4430_v13 = vadd.f32 %v4429_v63, %v4428_v45  ;;  %v6288_v53 = vadd.f32 %v6101_v56, %v5821_v21  ;;  %v4478_v55 = vmul.f32 %v4329_v59, %v4329_v59 }
 0x22f   : > { %v6289_v38 = vadd.f32 %v4035_v42, %v2299_v61  ;;  %4364 = vst.msk [vmem:[%s7870_s20 + $0x100] sm:$0xff] %vm335_vm0, %v4328_v48  ;;  %v4431_v15 = vsel %vm335_vm0, %v4328_v48, 0.0  ;;  %v4477_v51 = vmul.f32 %v4328_v48, %v4328_v48  ;;  %v4433_v57 = vsel %vm335_vm0, %v4329_v59, 0.0 }
 0x230   : > { %v4432_v60 = vadd.f32 %v4431_v15, %v4430_v13  ;;  %v4543_v19 = vadd.f32 %v4542_v10, %v4541_v5  ;;  %v4331_v14 = vmul.f32 %v6288_v53, %v4294_v8  ;;  %v4546_v9 = vsel %vm335_vm0, %v4478_v55, 0.0 }
 0x231   : > { %v4330_v35 = vmul.f32 %v6289_v38, %v4289_v6  ;;  %v4544_v49 = vsel %vm335_vm0, %v4477_v51, 0.0 }
 0x232   : > { %v4545_v23 = vadd.f32 %v4544_v49, %v4543_v19  ;;  %4367 = vst.msk [vmem:[%s7870_s20 + $0x118] sm:$0xff] %vm335_vm0, %v4331_v14  ;;  %v4434_v43 = vadd.f32 %v4433_v57, %v4432_v60  ;;  %v4480_v20 = vmul.f32 %v4331_v14, %v4331_v14  ;;  %v4437_v40 = vsel %vm335_vm0, %v4331_v14, 0.0 }
 0x233   : > { %4366 = vst.msk [vmem:[%s7870_s20 + $0x110] sm:$0xff] %vm335_vm0, %v4330_v35  ;;  %v4435_v22 = vsel %vm335_vm0, %v4330_v35, 0.0  ;;  %v4479_v52 = vmul.f32 %v4330_v35, %v4330_v35 }
 0x234   : > { %v4436_v28 = vadd.f32 %v4435_v22, %v4434_v43  ;;  %v4547_v29 = vadd.f32 %v4546_v9, %v4545_v23  ;;  %v4550_v36 = vsel %vm335_vm0, %v4480_v20, 0.0 }
 0x235   : > { %v4548_v54 = vsel %vm335_vm0, %v4479_v52, 0.0 }
 0x236   : > { %v4438_v2 = vadd.f32 %v4437_v40, %v4436_v28  ;;  %v4549_v0 = vadd.f32 %v4548_v54, %v4547_v29 }
 0x238   : > { %v4439_v34 = vrot.slane %v4438_v2, 4  ;;  %v4551_v24 = vadd.f32 %v4550_v36, %v4549_v0 }
 0x23a   : > { %v4440_v31 = vadd.f32 %v4439_v34, %v4438_v2  ;;  %v4552_v12 = vrot.slane %v4551_v24, 4 }
 0x23c   : > { %v4441_v33 = vrot.slane %v4440_v31, 2  ;;  %v4553_v30 = vadd.f32 %v4552_v12, %v4551_v24 }
 0x23e   : > { %v4442_v50 = vadd.f32 %v4441_v33, %v4440_v31  ;;  %v4554_v26 = vrot.slane %v4553_v30, 2 }
 0x240   : > { %v4443_v4 = vrot.slane %v4442_v50, 1  ;;  %v4555_v32 = vadd.f32 %v4554_v26, %v4553_v30 }
 0x242   : > { %v4444_v17 = vadd.f32 %v4443_v4, %v4442_v50  ;;  %v4556_v3 = vrot.slane %v4555_v32, 1 }
 0x244   : > { %v4557_v1 = vadd.f32 %v4556_v3, %v4555_v32  ;;  %4558 = vst.msk [vmem:[%s241_s24] sm:$0xff] %vm335_vm0, %v4444_v17 }
 0x246   : > { %4559 = vst.msk [vmem:[%s245_s27] sm:$0xff] %vm335_vm0, %v4557_v1 }
 0x247 PF: > { %s16_s18 = sadd.s32 1, %s6561_s18  }
 0x248   : > { %p13_p4 = scmp.ge.s32.totalorder %s16_s18, 4  }
 0x24a   :  { %15 = sbr.rel (!%p13_p4) target bundleno = 1 (0x1), region = 94 }

// kernel: vgg16bn_forward.12
= control target key start
LH: loop header
LB: loop body
LE: loop exit
PB: predicated region body
PF: predicated region fallthrough
CT: control target
= control target key end

     0   :  { %s2921_s18 = smov 0   ;;  %s3435_s0 = inlined_call_operand.vmem [shape: f32[2,102,64], index: 0, kind: input, shape index: {}]   ;;  %s3436_s1 = inlined_call_operand.vmem [shape: f32[9,64,128], index: 1, kind: input, shape index: {}]   ;;  %s3437_s2 = inlined_call_operand.vmem [shape: f32[80,1], index: 2, kind: input, shape index: {}]   ;;  %s3438_s3 = inlined_call_operand.vmem [shape: f32[2,80,128], index: 3, kind: output, shape index: {0}]   ;;  %s3439_s4 = inlined_call_operand.vmem [shape: f32[2,8,128], index: 4, kind: output, shape index: {1}]   ;;  %s3440_s5 = inlined_call_operand.vmem [shape: f32[2,8,128], index: 5, kind: output, shape index: {2}]  }
   0x1 LB: > { %s2031_s19 = sadd.s32 4294967295, %s2888_s18   ;;  %p2035_p0 = scmp.ge.s32.totalorder %s2888_s18, 1  ;;  %s2888_s18 = sphi %s2921_s18, %s16_s18  }
   0x2   : > { %p192_p1 = scmp.lt.s32.totalorder %s2888_s18, 3 }
   0x4   : > { %p193_p2 = pnand %p2035_p0, %p192_p1 }
   0x5   : > { %v2040_v0 = vld [vmem:[%s3436_s1 + $0x40] sm:$0xff] (!%p193_p2)  ;;  %v2041_v1 = vld [vmem:[%s3436_s1 + $0x48] sm:$0xff] (!%p193_p2)  ;;  %p228_p3 = scmp.lt.s32.totalorder (!%p193_p2), %s2031_s19, 1  ;;  %v2042_v5 = vld [vmem:[%s3436_s1 + $0x50] sm:$0xff] (!%p193_p2)  ;;  %v2890_v7 = vmov (!%p193_p2), 0   ;;  %vm283_vm0 = vcmask (!%p193_p2), 523264  }
   0x6   : > { %196 = sbr.rel (%p193_p2) target bundleno = 358 (0x166), region = 32  ;;  %v2104_v2 = vld [vmem:[%s3436_s1 + $0x100] sm:$0xff] (!%p193_p2)  ;;  %v2637_v3 = vpack.c.bf16 (!%p193_p2), %v2041_v1, %v2040_v0  ;;  %v2105_v4 = vld [vmem:[%s3436_s1 + $0x108] sm:$0xff] (!%p193_p2)  ;;  %v2043_v6 = vld [vmem:[%s3436_s1 + $0x58] sm:$0xff] (!%p193_p2)  ;;  %2880 = vset.pattern.permute.xlu0 (!%p193_p2), %v2890_v7  ;;  %2881 = vset.pattern.permute.xlu1 (!%p193_p2), %v2890_v7 }
   0x7   : > { %v2701_v8 = vpack.c.bf16 (!%p193_p2), %v2105_v4, %v2104_v2  ;;  %v2641_v9 = vpack.c.bf16 (!%p193_p2), %v2043_v6, %v2042_v5  ;;  %v2106_v10 = vld [vmem:[%s3436_s1 + $0x110] sm:$0xff] (!%p193_p2)  ;;  %v2107_v11 = vld [vmem:[%s3436_s1 + $0x118] sm:$0xff] (!%p193_p2)  ;;  %v2044_v12 = vld [vmem:[%s3436_s1 + $0x60] sm:$0xff] (!%p193_p2) }
   0x8   : > { %2638 = vmatprep.subr.bf16.mxu1 (!%p193_p2), %v2637_v3  ;;  %v2705_v13 = vpack.c.bf16 (!%p193_p2), %v2107_v11, %v2106_v10  ;;  %v2045_v14 = vld [vmem:[%s3436_s1 + $0x68] sm:$0xff] (!%p193_p2)  ;;  %v2108_v15 = vld [vmem:[%s3436_s1 + $0x120] sm:$0xff] (!%p193_p2)  ;;  %v2046_v19 = vld [vmem:[%s3436_s1 + $0x70] sm:$0xff] (!%p193_p2) }
   0x9   : > { %v2109_v16 = vld [vmem:[%s3436_s1 + $0x128] sm:$0xff] (!%p193_p2)  ;;  %2702 = vmatprep.subr.bf16.mxu0 (!%p193_p2), %v2701_v8  ;;  %2640 = vmatpush3.bf16.msra.mxu1 (!%p193_p2), %v2637_v3  ;;  %v2645_v17 = vpack.c.bf16 (!%p193_p2), %v2045_v14, %v2044_v12  ;;  %v2047_v20 = vld [vmem:[%s3436_s1 + $0x78] sm:$0xff] (!%p193_p2)  ;;  %v2110_v21 = vld [vmem:[%s3436_s1 + $0x130] sm:$0xff] (!%p193_p2) }
   0xa   : > { %2704 = vmatpush3.bf16.msra.mxu0 (!%p193_p2), %v2701_v8  ;;  %2642 = vmatprep.subr.bf16.mxu1 (!%p193_p2), %v2641_v9  ;;  %v2709_v18 = vpack.c.bf16 (!%p193_p2), %v2109_v16, %v2108_v15  ;;  %v2111_v22 = vld [vmem:[%s3436_s1 + $0x138] sm:$0xff] (!%p193_p2)  ;;  %v2649_v25 = vpack.c.bf16 (!%p193_p2), %v2047_v20, %v2046_v19  ;;  %v256_v27 = vld [vmem:[%s3436_s1] sm:$0xff] (!%p193_p2)  ;;  %v257_v28 = vld [vmem:[%s3436_s1 + $0x8] sm:$0xff] (!%p193_p2) }
   0xb   : > { %2706 = vmatprep.subr.bf16.mxu0 (!%p193_p2), %v2705_v13  ;;  %v2713_v26 = vpack.c.bf16 (!%p193_p2), %v2111_v22, %v2110_v21  ;;  %v2122_v29 = vld [vmem:[%s3436_s1 + $0x140] sm:$0xff] (!%p193_p2)  ;;  %v2123_v30 = vld [vmem:[%s3436_s1 + $0x148] sm:$0xff] (!%p193_p2)  ;;  %v2653_v31 = vpack.c.bf16 (!%p193_p2), %v257_v28, %v256_v27  ;;  %v2124_v33 = vld [vmem:[%s3436_s1 + $0x150] sm:$0xff] (!%p193_p2) }
   0xc   : > { %v2717_v32 = vpack.c.bf16 (!%p193_p2), %v2123_v30, %v2122_v29  ;;  %v2125_v34 = vld [vmem:[%s3436_s1 + $0x158] sm:$0xff] (!%p193_p2)  ;;  %v258_v36 = vld [vmem:[%s3436_s1 + $0x10] sm:$0xff] (!%p193_p2)  ;;  %v2126_v43 = vld [vmem:[%s3436_s1 + $0x160] sm:$0xff] (!%p193_p2) }
   0xd   : > { %s3442_s19 = smov (!%p228_p3, %s2031_s19), 1  ;;  %2644 = vmatpush3.bf16.msra.mxu1 %v2641_v9  ;;  %v259_v37 = vld [vmem:[%s3436_s1 + $0x18] sm:$0xff]  ;;  %v2721_v41 = vpack.c.bf16 %v2125_v34, %v2124_v33  ;;  %v2127_v44 = vld [vmem:[%s3436_s1 + $0x168] sm:$0xff]  ;;  %v260_v46 = vld [vmem:[%s3436_s1 + $0x20] sm:$0xff] }
   0xe   : > { %s2869_s21 = smul.u32 104, %s3442_s19  ;;  %2708 = vmatpush3.bf16.msra.mxu0 %v2705_v13  ;;  %2646 = vmatprep.subr.bf16.mxu1 %v2645_v17  ;;  %v2657_v42 = vpack.c.bf16 %v259_v37, %v258_v36  ;;  %v261_v47 = vld [vmem:[%s3436_s1 + $0x28] sm:$0xff]  ;;  %v2725_v51 = vpack.c.bf16 %v2127_v44, %v2126_v43  ;;  %v2128_v53 = vld [vmem:[%s3436_s1 + $0x170] sm:$0xff]  ;;  %v2129_v54 = vld [vmem:[%s3436_s1 + $0x178] sm:$0xff]  ;;  %s2038_s11 = sshll.u32 %s3442_s19, 3 }
   0xf   : > { %2710 = vmatprep.subr.bf16.mxu0 %v2709_v18  ;;  %v2661_v52 = vpack.c.bf16 %v261_v47, %v260_v46  ;;  %v262_v56 = vld [vmem:[%s3436_s1 + $0x30] sm:$0xff]  ;;  %v263_v57 = vld [vmem:[%s3436_s1 + $0x38] sm:$0xff]  ;;  %v2729_v61 = vpack.c.bf16 %v2129_v54, %v2128_v53  ;;  %v2140_v63 = vld [vmem:[%s3436_s1 + $0x180] sm:$0xff]  ;;  %s241_s14 = scalar_lea.vmem %s3439_s4, %s2038_s11  ;;  %s245_s17 = scalar_lea.vmem %s3440_s5, %s2038_s11 }
  0x10   : > { %s2980_s30 = scalar_lea.vmem %s3435_s0, %s2869_s21  ;;  %v2665_v62 = vpack.c.bf16 %v263_v57, %v262_v56  ;;  %v2141_v0 = vld [vmem:[%s3436_s1 + $0x188] sm:$0xff]  ;;  %v2068_v2 = vld [vmem:[%s3436_s1 + $0x80] sm:$0xff]  ;;  %v2142_v13 = vld [vmem:[%s3436_s1 + $0x190] sm:$0xff] }
  0x11   : > { %v264_v23 = vld [vmem:[%s2980_s30 + $0x1] sm:$0xff]  ;;  %v922_v24 = vld [vmem:[%s2980_s30 + $0xb] sm:$0xff]  ;;  %2648 = vmatpush3.bf16.msra.mxu1 %v2645_v17  ;;  %v923_v38 = vld [vmem:[%s2980_s30 + $0x13] sm:$0xff]  ;;  %v2733_v7 = vpack.c.bf16 %v2141_v0, %v2140_v63 }
  0x12   : > { %2374 = vmatprep.mubr.msk.f32.mxu1 %vm283_vm0, %v264_v23  ;;  %2498 = vmatprep.mubr.msk.f32.mxu0 %vm283_vm0, %v922_v24  ;;  %v265_v35 = vld [vmem:[%s2980_s30 + $0x9] sm:$0xff]  ;;  %v266_v39 = vld [vmem:[%s2980_s30 + $0x11] sm:$0xff]  ;;  %v924_v40 = vld [vmem:[%s2980_s30 + $0x1b] sm:$0xff] }
  0x13   : > { %2712 = vmatpush3.bf16.msra.mxu0 %v2709_v18  ;;  %2650 = vmatprep.subr.bf16.mxu1 %v2649_v25  ;;  %v267_v45 = vld [vmem:[%s2980_s30 + $0x19] sm:$0xff]  ;;  %v925_v48 = vld [vmem:[%s2980_s30 + $0x23] sm:$0xff]  ;;  %v926_v50 = vld [vmem:[%s2980_s30 + $0x2b] sm:$0xff] }
  0x14   : > { %2714 = vmatprep.subr.bf16.mxu0 %v2713_v26  ;;  %v268_v49 = vld [vmem:[%s2980_s30 + $0x21] sm:$0xff]  ;;  %v269_v55 = vld [vmem:[%s2980_s30 + $0x29] sm:$0xff]  ;;  %v927_v58 = vld [vmem:[%s2980_s30 + $0x33] sm:$0xff] }
  0x15   : > { %2652 = vmatpush3.bf16.msra.mxu1 %v2649_v25  ;;  %v270_v59 = vld [vmem:[%s2980_s30 + $0x31] sm:$0xff]  ;;  %v928_v60 = vld [vmem:[%s2980_s30 + $0x3b] sm:$0xff]  ;;  %v2069_v3 = vld [vmem:[%s3436_s1 + $0x88] sm:$0xff] }
  0x16   : > { %2654 = vmatprep.subr.bf16.mxu1 %v2653_v31  ;;  %v271_v1 = vld [vmem:[%s2980_s30 + $0x39] sm:$0xff]  ;;  %v929_v4 = vld [vmem:[%s2980_s30 + $0x43] sm:$0xff]  ;;  %v930_v6 = vld [vmem:[%s2980_s30 + $0x4b] sm:$0xff]  ;;  %v2669_v8 = vpack.c.bf16 %v2069_v3, %v2068_v2 }
  0x17   : > { %2716 = vmatpush3.bf16.msra.mxu0 %v2713_v26  ;;  %v272_v5 = vld [vmem:[%s2980_s30 + $0x41] sm:$0xff]  ;;  %v273_v9 = vld [vmem:[%s2980_s30 + $0x49] sm:$0xff]  ;;  %v931_v10 = vld [vmem:[%s2980_s30 + $0x53] sm:$0xff] }
  0x18   : > { %2718 = vmatprep.subr.bf16.mxu0 %v2717_v32  ;;  %2375 = vmatmul.mubr.msk.f32.vlgmr.msra.gmra.mrb[0].mxu1 %vm283_vm0, %v265_v35  ;;  %v246_v11 = vld [vmem:[%s2980_s30] sm:$0xff]  ;;  %v1096_v12 = vld [vmem:[%s2980_s30 + $0xc] sm:$0xff]  ;;  %v2143_v14 = vld [vmem:[%s3436_s1 + $0x198] sm:$0xff] }
  0x19   : > { %2377 = vmatprep.mubr.msk.f32.mxu1 %vm283_vm0, %v266_v39  ;;  %2656 = vmatpush3.bf16.msra.mxu1 %v2653_v31  ;;  %v247_v15 = vld [vmem:[%s2980_s30 + $0x8] sm:$0xff]  ;;  %v2070_v16 = vld [vmem:[%s3436_s1 + $0x90] sm:$0xff]  ;;  %v2071_v17 = vld [vmem:[%s3436_s1 + $0x98] sm:$0xff]  ;;  %v2737_v21 = vpack.c.bf16 %v2143_v14, %v2142_v13 }
  0x1a   : > { %2499 = vmatmul.mubr.msk.f32.vlgmr.msra.gmra.mrb[0].mxu0 %vm283_vm0, %v923_v38  ;;  %2658 = vmatprep.subr.bf16.mxu1 %v2657_v42  ;;  %v3103_v18 = vld [vmem:[%s2980_s30 + $0x14] sm:$0xff]  ;;  %v3107_v20 = vld [vmem:[%s2980_s30 + $0x1c] sm:$0xff]  ;;  %v2673_v22 = vpack.c.bf16 %v2071_v17, %v2070_v16  ;;  %v2145_v24 = vld [vmem:[%s3436_s1 + $0x1a8] sm:$0xff] }
  0x1b   : > { %2720 = vmatpush3.bf16.msra.mxu0 %v2717_v32  ;;  %2501 = vmatprep.mubr.msk.f32.mxu0 %vm283_vm0, %v924_v40  ;;  %v248_v19 = vld [vmem:[%s2980_s30 + $0x10] sm:$0xff]  ;;  %v2144_v23 = vld [vmem:[%s3436_s1 + $0x1a0] sm:$0xff]  ;;  %v249_v25 = vld [vmem:[%s2980_s30 + $0x18] sm:$0xff] }
  0x1c   : > { %2722 = vmatprep.subr.bf16.mxu0 %v2721_v41  ;;  %2378 = vmatmul.mubr.msk.f32.gmra.mrb[2].mxu1 %vm283_vm0, %v267_v45  ;;  %v2072_v26 = vld [vmem:[%s3436_s1 + $0xa0] sm:$0xff]  ;;  %v2073_v27 = vld [vmem:[%s3436_s1 + $0xa8] sm:$0xff]  ;;  %v2741_v31 = vpack.c.bf16 %v2145_v24, %v2144_v23  ;;  %v2146_v33 = vld [vmem:[%s3436_s1 + $0x1b0] sm:$0xff] }
  0x1d   : > { %2380 = vmatprep.mubr.msk.f32.mxu1 %vm283_vm0, %v268_v49  ;;  %2660 = vmatpush3.bf16.msra.mxu1 %v2657_v42  ;;  %v3129_v28 = vld [vmem:[%s2980_s30 + $0x24] sm:$0xff]  ;;  %v3133_v30 = vld [vmem:[%s2980_s30 + $0x2c] sm:$0xff]  ;;  %v2677_v32 = vpack.c.bf16 %v2073_v27, %v2072_v26  ;;  %v2147_v34 = vld [vmem:[%s3436_s1 + $0x1b8] sm:$0xff] }
  0x1e   : > { %2502 = vmatmul.mubr.msk.f32.gmra.mrb[2].mxu0 %vm283_vm0, %v925_v48  ;;  %2662 = vmatprep.subr.bf16.mxu1 %v2661_v52  ;;  %v250_v29 = vld [vmem:[%s2980_s30 + $0x20] sm:$0xff]  ;;  %v251_v35 = vld [vmem:[%s2980_s30 + $0x28] sm:$0xff]  ;;  %v2074_v36 = vld [vmem:[%s3436_s1 + $0xb0] sm:$0xff] }
  0x1f   : > { %2724 = vmatpush3.bf16.msra.mxu0 %v2721_v41  ;;  %2504 = vmatprep.mubr.msk.f32.mxu0 %vm283_vm0, %v926_v50  ;;  %v2075_v37 = vld [vmem:[%s3436_s1 + $0xb8] sm:$0xff]  ;;  %v252_v39 = vld [vmem:[%s2980_s30 + $0x30] sm:$0xff]  ;;  %v2745_v41 = vpack.c.bf16 %v2147_v34, %v2146_v33  ;;  %v2158_v43 = vld [vmem:[%s3436_s1 + $0x1c0] sm:$0xff] }
  0x20   : > { %2726 = vmatprep.subr.bf16.mxu0 %v2725_v51  ;;  %2381 = vmatmul.mubr.msk.f32.gmra.mrb[4].mxu1 %vm283_vm0, %v269_v55  ;;  %v3155_v38 = vld [vmem:[%s2980_s30 + $0x34] sm:$0xff]  ;;  %v3159_v40 = vld [vmem:[%s2980_s30 + $0x3c] sm:$0xff]  ;;  %v2681_v42 = vpack.c.bf16 %v2075_v37, %v2074_v36  ;;  %v2159_v44 = vld [vmem:[%s3436_s1 + $0x1c8] sm:$0xff] }
  0x21   : > { %2383 = vmatprep.mubr.msk.f32.mxu1 %vm283_vm0, %v270_v59  ;;  %2664 = vmatpush3.bf16.msra.mxu1 %v2661_v52  ;;  %v253_v45 = vld [vmem:[%s2980_s30 + $0x38] sm:$0xff]  ;;  %v2086_v46 = vld [vmem:[%s3436_s1 + $0xc0] sm:$0xff]  ;;  %v2087_v47 = vld [vmem:[%s3436_s1 + $0xc8] sm:$0xff] }
  0x22   : > { %2505 = vmatmul.mubr.msk.f32.gmra.mrb[4].mxu0 %vm283_vm0, %v927_v58  ;;  %2666 = vmatprep.subr.bf16.mxu1 %v2665_v62  ;;  %v3181_v48 = vld [vmem:[%s2980_s30 + $0x44] sm:$0xff]  ;;  %v3185_v50 = vld [vmem:[%s2980_s30 + $0x4c] sm:$0xff]  ;;  %v2685_v52 = vpack.c.bf16 %v2087_v47, %v2086_v46  ;;  %v3195_v54 = vld [vmem:[%s2980_s30 + $0x54] sm:$0xff] }
  0x23   : > { %2507 = vmatprep.mubr.msk.f32.mxu0 %vm283_vm0, %v928_v60  ;;  %2728 = vmatpush3.bf16.msra.mxu0 %v2725_v51  ;;  %v254_v49 = vld [vmem:[%s2980_s30 + $0x40] sm:$0xff]  ;;  %v2749_v51 = vpack.c.bf16 %v2159_v44, %v2158_v43  ;;  %v255_v53 = vld [vmem:[%s2980_s30 + $0x48] sm:$0xff]  ;;  %v2160_v57 = vld [vmem:[%s3436_s1 + $0x1d0] sm:$0xff] }
  0x24   : > { %2730 = vmatprep.subr.bf16.mxu0 %v2729_v61  ;;  %2384 = vmatmul.mubr.msk.f32.gmra.mrb[6].mxu1 %vm283_vm0, %v271_v1  ;;  %v574_v55 = vld [vmem:[%s2980_s30 + $0x2] sm:$0xff]  ;;  %v2161_v58 = vld [vmem:[%s3436_s1 + $0x1d8] sm:$0xff]  ;;  %v1794_v59 = vld [vmem:[%s3437_s2 + $0x10] sm:$0xff] }
  0x25   : > { %2386 = vmatprep.mubr.msk.f32.mxu1 %vm283_vm0, %v272_v5  ;;  %2668 = vmatpush3.bf16.msra.mxu1 %v2665_v62  ;;  %v1792_v56 = vld [vmem:[%s3437_s2] sm:$0xff]  ;;  %v3215_v60 = vld [vmem:[%s2980_s30 + $0xa] sm:$0xff]  ;;  %v2089_v62 = vld [vmem:[%s3436_s1 + $0xd8] sm:$0xff]  ;;  %v2753_v0 = vpack.c.bf16 %v2161_v58, %v2160_v57 }
  0x26   : > { %2508 = vmatmul.mubr.msk.f32.gmra.mrb[6].mxu0 %vm283_vm0, %v929_v4  ;;  %2670 = vmatprep.subr.bf16.mxu1 %v2669_v8  ;;  %v3226_v63 = vld [vmem:[%s2980_s30 + $0x12] sm:$0xff]  ;;  %v2162_v2 = vld [vmem:[%s3436_s1 + $0x1e0] sm:$0xff]  ;;  %v2163_v3 = vld [vmem:[%s3436_s1 + $0x1e8] sm:$0xff] }
  0x27   : > { %2510 = vmatprep.mubr.msk.f32.mxu0 %vm283_vm0, %v930_v6  ;;  %2732 = vmatpush3.bf16.msra.mxu0 %v2729_v61  ;;  %v2088_v61 = vld [vmem:[%s3436_s1 + $0xd0] sm:$0xff]  ;;  %v3241_v4 = vld [vmem:[%s2980_s30 + $0x1a] sm:$0xff]  ;;  %v2091_v6 = vld [vmem:[%s3436_s1 + $0xe8] sm:$0xff] }
  0x28   : > { %2734 = vmatprep.subr.bf16.mxu0 %v2733_v7  ;;  %2387 = vmatmul.mubr.msk.f32.gmra.mrb[8].mxu1 %vm283_vm0, %v273_v9  ;;  %v2689_v1 = vpack.c.bf16 %v2089_v62, %v2088_v61  ;;  %v2090_v5 = vld [vmem:[%s3436_s1 + $0xe0] sm:$0xff]  ;;  %v2092_v13 = vld [vmem:[%s3436_s1 + $0xf0] sm:$0xff]  ;;  %v2093_v14 = vld [vmem:[%s3436_s1 + $0xf8] sm:$0xff] }
  0x29   : > { %2405 = vmatprep.mubr.msk.f32.mxu1 %vm283_vm0, %v246_v11  ;;  %1804 = vperm.xlu0 %2880, %v1792_v56   ;;  %v2693_v9 = vpack.c.bf16 %v2091_v6, %v2090_v5  ;;  %v2165_v11 = vld [vmem:[%s3436_s1 + $0x1f8] sm:$0xff]  ;;  %v2697_v17 = vpack.c.bf16 %v2093_v14, %v2092_v13  ;;  %v583_v23 = vld [vmem:[%s2980_s30 + $0x4a] sm:$0xff]  ;;  %v2180_v33 = vld [vmem:[%s3436_s1 + $0x220] sm:$0xff] }
  0x2a   : > { %2511 = vmatmul.mubr.msk.f32.gmra.mrb[8].mxu0 %vm283_vm0, %v931_v10  ;;  %1814 = vperm.xlu1 %2881, %v1794_v59   ;;  %v2164_v10 = vld [vmem:[%s3436_s1 + $0x1f0] sm:$0xff]  ;;  %v1279_v24 = vld [vmem:[%s2980_s30 + $0x5c] sm:$0xff]  ;;  %v1793_v26 = vld [vmem:[%s3437_s2 + $0x8] sm:$0xff] }
  0x2b   : > { %2529 = vmatprep.mubr.msk.f32.mxu0 %vm283_vm0, %v1096_v12  ;;  %v3267_v12 = vld [vmem:[%s2980_s30 + $0x2a] sm:$0xff]  ;;  %v2761_v16 = vpack.c.bf16 %v2165_v11, %v2164_v10  ;;  %v1448_v36 = vld [vmem:[%s2980_s30 + $0x35] sm:$0xff]  ;;  %v1800_v57 = vld [vmem:[%s3437_s2 + $0x40] sm:$0xff] }
  0x2c   : > { %2406 = vmatmul.mubr.msk.f32.vlgmr.msra.gmra.mrb[0].mxu1 %vm283_vm0, %v247_v15  ;;  %v3278_v15 = vld [vmem:[%s2980_s30 + $0x32] sm:$0xff]  ;;  %v2181_v34 = vld [vmem:[%s3436_s1 + $0x228] sm:$0xff]  ;;  %v1627_v58 = vld [vmem:[%s2980_s30 + $0x5e] sm:$0xff] }
  0x2d   : > { %2408 = vmatprep.mubr.msk.f32.mxu1 %vm283_vm0, %v248_v19  ;;  %2672 = vmatpush3.bf16.msra.mxu1 %v2669_v8  ;;  %v2757_v8 = vpack.c.bf16 %v2163_v3, %v2162_v2  ;;  %v2177_v19 = vld [vmem:[%s3436_s1 + $0x208] sm:$0xff]  ;;  %v2178_v27 = vld [vmem:[%s3436_s1 + $0x210] sm:$0xff]  ;;  %v2773_v37 = vpack.c.bf16 %v2181_v34, %v2180_v33  ;;  %v1623_v62 = vld [vmem:[%s2980_s30 + $0x3e] sm:$0xff] }
  0x2e   : > { %2530 = vmatmul.mubr.msk.f32.vlgmr.msra.gmra.mrb[0].mxu0 %vm283_vm0, %v3103_v18  ;;  %2674 = vmatprep.subr.bf16.mxu1 %v2673_v22  ;;  %v1451_v43 = vld [vmem:[%s2980_s30 + $0x4d] sm:$0xff]  ;;  %v1452_v44 = vld [vmem:[%s2980_s30 + $0x55] sm:$0xff] }
  0x2f   : > { %2736 = vmatpush3.bf16.msra.mxu0 %v2733_v7  ;;  %2532 = vmatprep.mubr.msk.f32.mxu0 %vm283_vm0, %v3107_v20  ;;  %v3252_v7 = vld [vmem:[%s2980_s30 + $0x22] sm:$0xff]  ;;  %v757_v46 = vld [vmem:[%s2980_s30 + $0x52] sm:$0xff] }
  0x30   : > { %2738 = vmatprep.subr.bf16.mxu0 %v2737_v21  ;;  %2409 = vmatmul.mubr.msk.f32.gmra.mrb[2].mxu1 %vm283_vm0, %v249_v25  ;;  %v1444_v25 = vld [vmem:[%s2980_s30 + $0x15] sm:$0xff]  ;;  %v1797_v47 = vld [vmem:[%s3437_s2 + $0x28] sm:$0xff] }
  0x31   : > { %2411 = vmatprep.mubr.msk.f32.mxu1 %vm283_vm0, %v250_v29  ;;  %2676 = vmatpush3.bf16.msra.mxu1 %v2673_v22  ;;  %v1795_v29 = vld [vmem:[%s3437_s2 + $0x18] sm:$0xff]  ;;  %v1620_v56 = vld [vmem:[%s2980_s30 + $0x26] sm:$0xff] }
  0x32   : > { %2533 = vmatmul.mubr.msk.f32.gmra.mrb[2].mxu0 %vm283_vm0, %v3129_v28  ;;  %2678 = vmatprep.subr.bf16.mxu1 %v2677_v32  ;;  %v1801_v59 = vld [vmem:[%s3437_s2 + $0x48] sm:$0xff]  ;;  %v1622_v61 = vld [vmem:[%s2980_s30 + $0x36] sm:$0xff] }
  0x33   : > { %2740 = vmatpush3.bf16.msra.mxu0 %v2737_v21  ;;  %2535 = vmatprep.mubr.msk.f32.mxu0 %vm283_vm0, %v3133_v30  ;;  %v3296_v21 = vld [vmem:[%s2980_s30 + $0x42] sm:$0xff] }
  0x34   : > { %2742 = vmatprep.subr.bf16.mxu0 %v2741_v31  ;;  %2412 = vmatmul.mubr.msk.f32.gmra.mrb[4].mxu1 %vm283_vm0, %v251_v35  ;;  %v1447_v35 = vld [vmem:[%s2980_s30 + $0x2d] sm:$0xff] }
  0x35   : > { %2414 = vmatprep.mubr.msk.f32.mxu1 %vm283_vm0, %v252_v39  ;;  %2680 = vmatpush3.bf16.msra.mxu1 %v2677_v32  ;;  %v2183_v39 = vld [vmem:[%s3436_s1 + $0x238] sm:$0xff] }
  0x36   : > { %2536 = vmatmul.mubr.msk.f32.gmra.mrb[4].mxu0 %vm283_vm0, %v3155_v38  ;;  %2682 = vmatprep.subr.bf16.mxu1 %v2681_v42 }
  0x37   : > { %2538 = vmatprep.mubr.msk.f32.mxu0 %vm283_vm0, %v3159_v40  ;;  %2744 = vmatpush3.bf16.msra.mxu0 %v2741_v31  ;;  %v1446_v31 = vld [vmem:[%s2980_s30 + $0x25] sm:$0xff] }
  0x38   : > { %2746 = vmatprep.subr.bf16.mxu0 %v2745_v41  ;;  %2415 = vmatmul.mubr.msk.f32.gmra.mrb[6].mxu1 %vm283_vm0, %v253_v45  ;;  %v1796_v45 = vld [vmem:[%s3437_s2 + $0x20] sm:$0xff] }
  0x39   : > { %2417 = vmatprep.mubr.msk.f32.mxu1 %vm283_vm0, %v254_v49  ;;  %2684 = vmatpush3.bf16.msra.mxu1 %v2681_v42  ;;  %v1624_v49 = vld [vmem:[%s2980_s30 + $0x46] sm:$0xff] }
  0x3a   : > { %2539 = vmatmul.mubr.msk.f32.gmra.mrb[6].mxu0 %vm283_vm0, %v3181_v48  ;;  %2686 = vmatprep.subr.bf16.mxu1 %v2685_v52 }
  0x3b   : > { %2541 = vmatprep.mubr.msk.f32.mxu0 %vm283_vm0, %v3185_v50  ;;  %2748 = vmatpush3.bf16.msra.mxu0 %v2745_v41  ;;  %v1450_v41 = vld [vmem:[%s2980_s30 + $0x45] sm:$0xff] }
  0x3c   : > { %2750 = vmatprep.subr.bf16.mxu0 %v2749_v51  ;;  %2418 = vmatmul.mubr.msk.f32.gmra.mrb[8].mxu1 %vm283_vm0, %v255_v53  ;;  %v1799_v53 = vld [vmem:[%s3437_s2 + $0x38] sm:$0xff] }
  0x3d   : > { %2436 = vmatprep.mubr.msk.f32.mxu1 %vm283_vm0, %v574_v55  ;;  %1809 = vperm.xlu0 %2880, %v1793_v26   ;;  %v1626_v55 = vld [vmem:[%s2980_s30 + $0x56] sm:$0xff] }
  0x3e   : > { %2542 = vmatmul.mubr.msk.f32.gmra.mrb[8].mxu0 %vm283_vm0, %v3195_v54  ;;  %1819 = vperm.xlu1 %2881, %v1795_v29  }
  0x3f   : > { %2560 = vmatprep.mubr.msk.f32.mxu0 %vm283_vm0, %v3103_v18  ;;  %v2176_v18 = vld [vmem:[%s3436_s1 + $0x200] sm:$0xff] }
  0x40   : > { %2437 = vmatmul.mubr.msk.f32.vlgmr.msra.gmra.mrb[0].mxu1 %vm283_vm0, %v3215_v60  ;;  %v2765_v22 = vpack.c.bf16 %v2177_v19, %v2176_v18 }
  0x41   : > { %2439 = vmatprep.mubr.msk.f32.mxu1 %vm283_vm0, %v3226_v63  ;;  %2688 = vmatpush3.bf16.msra.mxu1 %v2685_v52  ;;  %v1625_v52 = vld [vmem:[%s2980_s30 + $0x4e] sm:$0xff] }
  0x42   : > { %2561 = vmatmul.mubr.msk.f32.vlgmr.msra.gmra.mrb[0].mxu0 %vm283_vm0, %v3107_v20  ;;  %2690 = vmatprep.subr.bf16.mxu1 %v2689_v1  ;;  %v581_v20 = vld [vmem:[%s2980_s30 + $0x3a] sm:$0xff] }
  0x43   : > { %2752 = vmatpush3.bf16.msra.mxu0 %v2749_v51  ;;  %2563 = vmatprep.mubr.msk.f32.mxu0 %vm283_vm0, %v3129_v28  ;;  %v2179_v28 = vld [vmem:[%s3436_s1 + $0x218] sm:$0xff]  ;;  %v1798_v51 = vld [vmem:[%s3437_s2 + $0x30] sm:$0xff] }
  0x44   : > { %2754 = vmatprep.subr.bf16.mxu0 %v2753_v0  ;;  %2440 = vmatmul.mubr.msk.f32.gmra.mrb[2].mxu1 %vm283_vm0, %v3241_v4  ;;  %v2769_v32 = vpack.c.bf16 %v2179_v28, %v2178_v27 }
  0x45   : > { %2442 = vmatprep.mubr.msk.f32.mxu1 %vm283_vm0, %v3252_v7  ;;  %2692 = vmatpush3.bf16.msra.mxu1 %v2689_v1 }
  0x46   : > { %2564 = vmatmul.mubr.msk.f32.gmra.mrb[2].mxu0 %vm283_vm0, %v3133_v30  ;;  %2694 = vmatprep.subr.bf16.mxu1 %v2693_v9  ;;  %v1445_v30 = vld [vmem:[%s2980_s30 + $0x1d] sm:$0xff] }
  0x47   : > { %2756 = vmatpush3.bf16.msra.mxu0 %v2753_v0  ;;  %2566 = vmatprep.mubr.msk.f32.mxu0 %vm283_vm0, %v3155_v38  ;;  %v2182_v38 = vld [vmem:[%s3436_s1 + $0x230] sm:$0xff] }
  0x48   : > { %2758 = vmatprep.subr.bf16.mxu0 %v2757_v8  ;;  %2443 = vmatmul.mubr.msk.f32.gmra.mrb[4].mxu1 %vm283_vm0, %v3267_v12  ;;  %v2777_v42 = vpack.c.bf16 %v2183_v39, %v2182_v38 }
  0x49   : > { %2445 = vmatprep.mubr.msk.f32.mxu1 %vm283_vm0, %v3278_v15  ;;  %2696 = vmatpush3.bf16.msra.mxu1 %v2693_v9 }
  0x4a   : > { %2567 = vmatmul.mubr.msk.f32.gmra.mrb[4].mxu0 %vm283_vm0, %v3159_v40  ;;  %2698 = vmatprep.subr.bf16.mxu1 %v2697_v17  ;;  %v1449_v40 = vld [vmem:[%s2980_s30 + $0x3d] sm:$0xff] }
  0x4b   : > { %2569 = vmatprep.mubr.msk.f32.mxu0 %vm283_vm0, %v3181_v48  ;;  %2760 = vmatpush3.bf16.msra.mxu0 %v2757_v8  ;;  %v1453_v48 = vld [vmem:[%s2980_s30 + $0x5d] sm:$0xff] }
  0x4c   : > { %2762 = vmatprep.subr.bf16.mxu0 %v2761_v16  ;;  %2446 = vmatmul.mubr.msk.f32.gmra.mrb[6].mxu1 %vm283_vm0, %v581_v20 }
  0x4d   : > { %2448 = vmatprep.mubr.msk.f32.mxu1 %vm283_vm0, %v3296_v21  ;;  %2700 = vmatpush3.bf16.msra.mxu1 %v2697_v17 }
  0x4e   : > { %2570 = vmatmul.mubr.msk.f32.gmra.mrb[6].mxu0 %vm283_vm0, %v3185_v50  ;;  %2781 = vmatprep.subr.bf16.mxu1 %v2765_v22  ;;  %v1618_v50 = vld [vmem:[%s2980_s30 + $0x16] sm:$0xff] }
  0x4f   : > { %2572 = vmatprep.mubr.msk.f32.mxu0 %vm283_vm0, %v3195_v54  ;;  %2764 = vmatpush3.bf16.msra.mxu0 %v2761_v16  ;;  %v1619_v54 = vld [vmem:[%s2980_s30 + $0x1e] sm:$0xff] }
  0x50   : > { %2766 = vmatprep.subr.bf16.mxu0 %v2765_v22  ;;  %2449 = vmatmul.mubr.msk.f32.gmra.mrb[8].mxu1 %vm283_vm0, %v583_v23 }
  0x51   : > { %2467 = vmatprep.mubr.msk.f32.mxu1 %vm283_vm0, %v3215_v60  ;;  %1824 = vperm.xlu0 %2880, %v1796_v45   ;;  %v1621_v60 = vld [vmem:[%s2980_s30 + $0x2e] sm:$0xff]  ;;  %s2870_s30 = smul.u32 80, %s3442_s19 }
  0x52   : > { %2573 = vmatmul.mubr.msk.f32.gmra.mrb[8].mxu0 %vm283_vm0, %v1279_v24  ;;  %1829 = vperm.xlu1 %2881, %v1797_v47  }
  0x53   : > { %2591 = vmatprep.mubr.msk.f32.mxu0 %vm283_vm0, %v1444_v25  ;;  %s3413_s10 = scalar_lea.vmem %s3438_s3, %s2870_s30 }
  0x54   : > { %2468 = vmatmul.mubr.msk.f32.vlgmr.msra.gmra.mrb[0].mxu1 %vm283_vm0, %v3226_v63 }
  0x55   : > { %2470 = vmatprep.mubr.msk.f32.mxu1 %vm283_vm0, %v3241_v4  ;;  %2785 = vmatpush3.bf16.msra.mxu1 %v2765_v22 }
  0x56   : > { %2592 = vmatmul.mubr.msk.f32.vlgmr.msra.gmra.mrb[0].mxu0 %vm283_vm0, %v1445_v30  ;;  %2782 = vmatprep.subr.bf16.mxu1 %v2769_v32 }
  0x57   : > { %2768 = vmatpush3.bf16.msra.mxu0 %v2765_v22  ;;  %2594 = vmatprep.mubr.msk.f32.mxu0 %vm283_vm0, %v1446_v31 }
  0x58   : > { %2770 = vmatprep.subr.bf16.mxu0 %v2769_v32  ;;  %2471 = vmatmul.mubr.msk.f32.gmra.mrb[2].mxu1 %vm283_vm0, %v3252_v7 }
  0x59   : > { %2473 = vmatprep.mubr.msk.f32.mxu1 %vm283_vm0, %v3267_v12  ;;  %2786 = vmatpush3.bf16.msra.mxu1 %v2769_v32 }
  0x5a   : > { %2595 = vmatmul.mubr.msk.f32.gmra.mrb[2].mxu0 %vm283_vm0, %v1447_v35  ;;  %2783 = vmatprep.subr.bf16.mxu1 %v2773_v37 }
  0x5b   : > { %2772 = vmatpush3.bf16.msra.mxu0 %v2769_v32  ;;  %2597 = vmatprep.mubr.msk.f32.mxu0 %vm283_vm0, %v1448_v36 }
  0x5c   : > { %2774 = vmatprep.subr.bf16.mxu0 %v2773_v37  ;;  %2474 = vmatmul.mubr.msk.f32.gmra.mrb[4].mxu1 %vm283_vm0, %v3278_v15 }
  0x5d   : > { %2476 = vmatprep.mubr.msk.f32.mxu1 %vm283_vm0, %v581_v20  ;;  %2787 = vmatpush3.bf16.msra.mxu1 %v2773_v37 }
  0x5e   : > { %2598 = vmatmul.mubr.msk.f32.gmra.mrb[4].mxu0 %vm283_vm0, %v1449_v40  ;;  %2784 = vmatprep.subr.bf16.mxu1 %v2777_v42 }
  0x5f   : > { %2600 = vmatprep.mubr.msk.f32.mxu0 %vm283_vm0, %v1450_v41  ;;  %2776 = vmatpush3.bf16.msra.mxu0 %v2773_v37 }
  0x60   : > { %2778 = vmatprep.subr.bf16.mxu0 %v2777_v42  ;;  %2477 = vmatmul.mubr.msk.f32.gmra.mrb[6].mxu1 %vm283_vm0, %v3296_v21 }
  0x61   : > { %2479 = vmatprep.mubr.msk.f32.mxu1 %vm283_vm0, %v583_v23  ;;  %2788 = vmatpush3.bf16.msra.mxu1 %v2777_v42 }
  0x62   : > { %2601 = vmatmul.mubr.msk.f32.gmra.mrb[6].mxu0 %vm283_vm0, %v1451_v43  ;;  %1834 = vperm.xlu0 %2880, %v1798_v51  }
  0x63   : > { %2603 = vmatprep.mubr.msk.f32.mxu0 %vm283_vm0, %v1452_v44  ;;  %2780 = vmatpush3.bf16.msra.mxu0 %v2777_v42 }
  0x64   : > { %2480 = vmatmul.mubr.msk.f32.gmra.mrb[8].mxu1 %vm283_vm0, %v757_v46  ;;  %1839 = vperm.xlu1 %2881, %v1799_v53  }
  0x65   : > { %2631 = vmatprep.mubr.msk.f32.mxu1 %vm283_vm0, %v1624_v49 }
  0x66   : > { %2604 = vmatmul.mubr.msk.f32.gmra.mrb[8].mxu0 %vm283_vm0, %v1453_v48  ;;  %1844 = vperm.xlu0 %2880, %v1800_v57  }
  0x67   : > { %2622 = vmatprep.mubr.msk.f32.mxu0 %vm283_vm0, %v1618_v50 }
  0x68   : > { %2632 = vmatmul.mubr.msk.f32.vlgmr.msra.gmra.mrb[10].mxu1 %vm283_vm0, %v1625_v52  ;;  %1849 = vperm.xlu1 %2881, %v1801_v59  }
  0x69   : > { %2634 = vmatprep.mubr.msk.f32.mxu1 %vm283_vm0, %v1626_v55 }
  0x6a   : > { %2623 = vmatmul.mubr.msk.f32.vlgmr.msra.gmra.mrb[0].mxu0 %vm283_vm0, %v1619_v54 }
  0x6b   : > { %2625 = vmatprep.mubr.msk.f32.mxu0 %vm283_vm0, %v1620_v56 }
  0x6c   : > { %2635 = vmatmul.mubr.msk.f32.gmra.mrb[12].mxu1 %vm283_vm0, %v1627_v58 }
  0x6e   : > { %2626 = vmatmul.mubr.msk.f32.gmra.mrb[2].mxu0 %vm283_vm0, %v1621_v60 }
  0x6f   : > { %2628 = vmatprep.mubr.msk.f32.mxu0 %vm283_vm0, %v1622_v61 }
  0x72   : > { %2629 = vmatmul.mubr.msk.f32.gmra.mrb[4].mxu0 %vm283_vm0, %v1623_v62 }
  0xa8   : > { %v1805_v2 = vpop.permute.xlu0 %1804 }
  0xa9   : > { %v1815_v0 = vpop.permute.xlu1 %1814 }
  0xbc   : > { %v1810_v7 = vpop.permute.xlu0 %1809 }
  0xbd   : > { %v1820_v5 = vpop.permute.xlu1 %1819 }
  0xd0   : > { %v1825_v15 = vpop.permute.xlu0 %1824 }
  0xd1   : > { %v1830_v10 = vpop.permute.xlu1 %1829 }
  0xe1   : > { %v1835_v24 = vpop.permute.xlu0 %1834 }
  0xe3   : > { %v1840_v22 = vpop.permute.xlu1 %1839 }
  0xe5   : > { %v1845_v48 = vpop.permute.xlu0 %1844 }
  0xe7   : > { %v1850_v37 = vpop.permute.xlu1 %1849 }
 0x127   : > { %v2469_v63 = vpop.f32.mrb[0].mxu1 }
 0x128   : > { %v863_v1 = vpop.f32.mrb[1].mxu1 }
 0x12b   : > { %v2472_v3 = vpop.f32.mrb[2].mxu1 }
 0x12c   : > { %v873_v4 = vpop.f32.mrb[3].mxu1 }
 0x12f   : > { %v2475_v6 = vpop.f32.mrb[4].mxu1 }
 0x130   : > { %v883_v8 = vpop.f32.mrb[5].mxu1 }
 0x133   : > { %v2478_v9 = vpop.f32.mrb[6].mxu1 }
 0x134   : > { %v893_v12 = vpop.f32.mrb[7].mxu1 }
 0x135   : > { %v2602_v11 = vpop.f32.mrb[6].mxu0 }
 0x136   : > { %v2795_v13 = vadd.f32 %v2602_v11, %v2478_v9  ;;  %v1589_v14 = vpop.f32.mrb[7].mxu0 }
 0x137   : > { %v2797_v16 = vadd.f32 %v1589_v14, %v893_v12  ;;  %v2481_v17 = vpop.f32.mrb[8].mxu1 }
 0x138   : > { %v903_v19 = vpop.f32.mrb[9].mxu1 }
 0x139   : > { %v2605_v18 = vpop.f32.mrb[8].mxu0 }
 0x13a   : > { %v2799_v20 = vadd.f32 %v2605_v18, %v2481_v17  ;;  %v1599_v21 = vpop.f32.mrb[9].mxu0 }
 0x13b   : > { %v2801_v23 = vadd.f32 %v1599_v21, %v903_v19  ;;  %v2633_v25 = vpop.f32.mrb[10].mxu1 }
 0x13c   : > { %v2796_v27 = vadd.f32 %v2795_v13, %v2633_v25  ;;  %v1763_v28 = vpop.f32.mrb[11].mxu1 }
 0x13d   : > { %v2624_v26 = vpop.f32.mrb[0].mxu0  ;;  %v2798_v31 = vadd.f32 %v2797_v16, %v1763_v28 }
 0x13e   : > { %v2789_v29 = vadd.f32 %v2624_v26, %v2469_v63  ;;  %v1733_v30 = vpop.f32.mrb[1].mxu0  ;;  %v1859_v33 = vmul.f32 %v2796_v27, %v1840_v22 }
 0x13f   : > { %v2790_v32 = vadd.f32 %v1733_v30, %v863_v1  ;;  %v1858_v35 = vmul.f32 %v2798_v31, %v1835_v24  ;;  %v2636_v36 = vpop.f32.mrb[12].mxu1 }
 0x140   : > { %v1853_v34 = vmul.f32 %v2789_v29, %v1810_v7  ;;  %1869 = vst [vmem:[%s3413_s10 + $0x38] sm:$0xff] %v1859_v33  ;;  %v2800_v40 = vadd.f32 %v2799_v20, %v2636_v36  ;;  %v1773_v41 = vpop.f32.mrb[13].mxu1  ;;  %v1894_v13 = vmul.f32 %v1859_v33, %v1859_v33 }
 0x141   : > { %v1852_v38 = vmul.f32 %v2790_v32, %v1805_v2  ;;  %v2627_v39 = vpop.f32.mrb[2].mxu0  ;;  %1868 = vst [vmem:[%s3413_s10 + $0x30] sm:$0xff] %v1858_v35  ;;  %v2802_v45 = vadd.f32 %v2801_v23, %v1773_v41  ;;  %v1893_v11 = vmul.f32 %v1858_v35, %v1858_v35 }
 0x142   : > { %1863 = vst [vmem:[%s3413_s10 + $0x8] sm:$0xff] %v1853_v34  ;;  %v1888_v42 = vmul.f32 %v1853_v34, %v1853_v34  ;;  %v2791_v43 = vadd.f32 %v2627_v39, %v2472_v3  ;;  %v1743_v44 = vpop.f32.mrb[3].mxu0  ;;  %v1861_v50 = vmul.f32 %v2800_v40, %v1850_v37 }
 0x143   : > { %1862 = vst [vmem:[%s3413_s10] sm:$0xff] %v1852_v38  ;;  %v1872_v46 = vadd.f32 %v1853_v34, %v1852_v38  ;;  %v1887_v47 = vmul.f32 %v1852_v38, %v1852_v38  ;;  %v2792_v49 = vadd.f32 %v1743_v44, %v873_v4  ;;  %v1860_v52 = vmul.f32 %v2802_v45, %v1845_v48 }
 0x144   : > { %v1855_v51 = vmul.f32 %v2791_v43, %v1820_v5  ;;  %1871 = vst [vmem:[%s3413_s10 + $0x48] sm:$0xff] %v1861_v50 }
 0x145   : > { %v1897_v53 = vadd.f32 %v1888_v42, %v1887_v47  ;;  %v1854_v54 = vmul.f32 %v2792_v49, %v1815_v0  ;;  %v2630_v55 = vpop.f32.mrb[4].mxu0  ;;  %1870 = vst [vmem:[%s3413_s10 + $0x40] sm:$0xff] %v1860_v52 }
 0x146   : > { %1865 = vst [vmem:[%s3413_s10 + $0x18] sm:$0xff] %v1855_v51  ;;  %v2793_v56 = vadd.f32 %v2630_v55, %v2475_v6  ;;  %v1753_v57 = vpop.f32.mrb[5].mxu0  ;;  %v1890_v62 = vmul.f32 %v1855_v51, %v1855_v51 }
 0x147   : > { %1864 = vst [vmem:[%s3413_s10 + $0x10] sm:$0xff] %v1854_v54  ;;  %v1873_v58 = vadd.f32 %v1872_v46, %v1854_v54  ;;  %v1889_v59 = vmul.f32 %v1854_v54, %v1854_v54  ;;  %v2794_v60 = vadd.f32 %v1753_v57, %v883_v8 }
 0x148   : > { %v1857_v61 = vmul.f32 %v2793_v56, %v1830_v10  ;;  %v1895_v10 = vmul.f32 %v1860_v52, %v1860_v52 }
 0x149   : > { %v1898_v63 = vadd.f32 %v1897_v53, %v1889_v59  ;;  %v1856_v1 = vmul.f32 %v2794_v60, %v1825_v15  ;;  %v1874_v2 = vadd.f32 %v1873_v58, %v1855_v51  ;;  %v1896_v15 = vmul.f32 %v1861_v50, %v1861_v50 }
 0x14a   : > { %1867 = vst [vmem:[%s3413_s10 + $0x28] sm:$0xff] %v1857_v61  ;;  %v1892_v5 = vmul.f32 %v1857_v61, %v1857_v61 }
 0x14b   : > { %1866 = vst [vmem:[%s3413_s10 + $0x20] sm:$0xff] %v1856_v1  ;;  %v1875_v0 = vadd.f32 %v1874_v2, %v1856_v1  ;;  %v1891_v3 = vmul.f32 %v1856_v1, %v1856_v1  ;;  %v1899_v4 = vadd.f32 %v1898_v63, %v1890_v62 }
 0x14d   : > { %v1876_v7 = vadd.f32 %v1875_v0, %v1857_v61  ;;  %v1900_v9 = vadd.f32 %v1899_v4, %v1891_v3 }
 0x14f   : > { %v1877_v6 = vadd.f32 %v1876_v7, %v1858_v35  ;;  %v1901_v12 = vadd.f32 %v1900_v9, %v1892_v5 }
 0x151   : > { %v1878_v14 = vadd.f32 %v1877_v6, %v1859_v33  ;;  %v1902_v8 = vadd.f32 %v1901_v12, %v1893_v11 }
 0x153   : > { %v1879_v16 = vadd.f32 %v1878_v14, %v1860_v52  ;;  %v1903_v17 = vadd.f32 %v1902_v8, %v1894_v13 }
 0x155   : > { %v1880_v18 = vadd.f32 %v1879_v16, %v1861_v50  ;;  %v1904_v19 = vadd.f32 %v1903_v17, %v1895_v10 }
 0x157   : > { %v1881_v20 = vrot.slane %v1880_v18, 4  ;;  %v1905_v21 = vadd.f32 %v1904_v19, %v1896_v15 }
 0x159   : > { %v1882_v22 = vadd.f32 %v1881_v20, %v1880_v18  ;;  %v1906_v23 = vrot.slane %v1905_v21, 4 }
 0x15b   : > { %v1883_v24 = vrot.slane %v1882_v22, 2  ;;  %v1907_v25 = vadd.f32 %v1906_v23, %v1905_v21 }
 0x15d   : > { %v1884_v26 = vadd.f32 %v1883_v24, %v1882_v22  ;;  %v1908_v27 = vrot.slane %v1907_v25, 2 }
 0x15f   : > { %v1885_v28 = vrot.slane %v1884_v26, 1  ;;  %v1909_v29 = vadd.f32 %v1908_v27, %v1907_v25 }
 0x161   : > { %v1886_v30 = vadd.f32 %v1885_v28, %v1884_v26  ;;  %v1910_v31 = vrot.slane %v1909_v29, 1 }
 0x163   : > { %v1911_v32 = vadd.f32 %v1910_v31, %v1909_v29  ;;  %1912 = vst [vmem:[%s241_s14] sm:$0xff] %v1886_v30 }
 0x165   : > { %1913 = vst [vmem:[%s245_s17] sm:$0xff] %v1911_v32 }
 0x166 PF: > { %s16_s18 = sadd.s32 1, %s2888_s18  }
 0x167   : > { %p13_p4 = scmp.ge.s32.totalorder %s16_s18, 4  }
 0x169   :  { %15 = sbr.rel (!%p13_p4) target bundleno = 1 (0x1), region = 94 }

// kernel: vgg16bn_forward.14
= control target key start
LH: loop header
LB: loop body
LE: loop exit
PB: predicated region body
PF: predicated region fallthrough
CT: control target
= control target key end

     0   :  { %s3064_s18 = smov 0   ;;  %s3715_s0 = inlined_call_operand.vmem [shape: f32[2,102,128], index: 0, kind: input, shape index: {}]   ;;  %s3716_s1 = inlined_call_operand.vmem [shape: f32[9,128,128], index: 1, kind: input, shape index: {}]   ;;  %s3717_s2 = inlined_call_operand.vmem [shape: f32[80,1], index: 2, kind: input, shape index: {}]   ;;  %s3718_s3 = inlined_call_operand.vmem [shape: f32[2,80,128], index: 3, kind: output, shape index: {0}]   ;;  %s3719_s4 = inlined_call_operand.vmem [shape: f32[2,8,128], index: 4, kind: output, shape index: {1}]   ;;  %s3720_s5 = inlined_call_operand.vmem [shape: f32[2,8,128], index: 5, kind: output, shape index: {2}]  }
   0x1 LB: > { %s1832_s19 = sadd.s32 4294967295, %s3031_s18   ;;  %p1836_p0 = scmp.ge.s32.totalorder %s3031_s18, 1  ;;  %s3031_s18 = sphi %s3064_s18, %s16_s18  }
   0x2   : > { %p192_p1 = scmp.lt.s32.totalorder %s3031_s18, 3 }
   0x4   : > { %p193_p2 = pnand %p1836_p0, %p192_p1 }
   0x5   : > { %v1841_v0 = vld [vmem:[%s3716_s1 + $0x80] sm:$0xff] (!%p193_p2)  ;;  %v1842_v1 = vld [vmem:[%s3716_s1 + $0x88] sm:$0xff] (!%p193_p2)  ;;  %p228_p3 = scmp.lt.s32.totalorder (!%p193_p2), %s1832_s19, 1  ;;  %v1843_v5 = vld [vmem:[%s3716_s1 + $0x90] sm:$0xff] (!%p193_p2) }
   0x6   : > { %196 = sbr.rel (%p193_p2) target bundleno = 422 (0x1a6), region = 32  ;;  %v1889_v2 = vld [vmem:[%s3716_s1 + $0x200] sm:$0xff] (!%p193_p2)  ;;  %v2628_v3 = vpack.c.bf16 (!%p193_p2), %v1842_v1, %v1841_v0  ;;  %v1890_v4 = vld [vmem:[%s3716_s1 + $0x208] sm:$0xff] (!%p193_p2)  ;;  %v1844_v6 = vld [vmem:[%s3716_s1 + $0x98] sm:$0xff] (!%p193_p2) }
   0x7   : > { %v2756_v7 = vpack.c.bf16 (!%p193_p2), %v1890_v4, %v1889_v2  ;;  %v2632_v8 = vpack.c.bf16 (!%p193_p2), %v1844_v6, %v1843_v5  ;;  %v1891_v9 = vld [vmem:[%s3716_s1 + $0x210] sm:$0xff] (!%p193_p2)  ;;  %v1892_v10 = vld [vmem:[%s3716_s1 + $0x218] sm:$0xff] (!%p193_p2)  ;;  %v1845_v11 = vld [vmem:[%s3716_s1 + $0xa0] sm:$0xff] (!%p193_p2) }
   0x8   : > { %2629 = vmatprep.subr.bf16.mxu1 (!%p193_p2), %v2628_v3  ;;  %v2760_v12 = vpack.c.bf16 (!%p193_p2), %v1892_v10, %v1891_v9  ;;  %v1846_v13 = vld [vmem:[%s3716_s1 + $0xa8] sm:$0xff] (!%p193_p2)  ;;  %v1893_v14 = vld [vmem:[%s3716_s1 + $0x220] sm:$0xff] (!%p193_p2)  ;;  %v1847_v18 = vld [vmem:[%s3716_s1 + $0xb0] sm:$0xff] (!%p193_p2) }
   0x9   : > { %v1894_v15 = vld [vmem:[%s3716_s1 + $0x228] sm:$0xff] (!%p193_p2)  ;;  %2757 = vmatprep.subr.bf16.mxu0 (!%p193_p2), %v2756_v7  ;;  %2631 = vmatpush3.bf16.msra.mxu1 (!%p193_p2), %v2628_v3  ;;  %v2636_v16 = vpack.c.bf16 (!%p193_p2), %v1846_v13, %v1845_v11  ;;  %v1848_v19 = vld [vmem:[%s3716_s1 + $0xb8] sm:$0xff] (!%p193_p2)  ;;  %v1895_v20 = vld [vmem:[%s3716_s1 + $0x230] sm:$0xff] (!%p193_p2) }
   0xa   : > { %2759 = vmatpush3.bf16.msra.mxu0 (!%p193_p2), %v2756_v7  ;;  %2633 = vmatprep.subr.bf16.mxu1 (!%p193_p2), %v2632_v8  ;;  %v2764_v17 = vpack.c.bf16 (!%p193_p2), %v1894_v15, %v1893_v14  ;;  %v1896_v21 = vld [vmem:[%s3716_s1 + $0x238] sm:$0xff] (!%p193_p2)  ;;  %v2640_v22 = vpack.c.bf16 (!%p193_p2), %v1848_v19, %v1847_v18  ;;  %v1849_v24 = vld [vmem:[%s3716_s1 + $0xc0] sm:$0xff] (!%p193_p2)  ;;  %v1850_v25 = vld [vmem:[%s3716_s1 + $0xc8] sm:$0xff] (!%p193_p2) }
   0xb   : > { %2761 = vmatprep.subr.bf16.mxu0 (!%p193_p2), %v2760_v12  ;;  %v2768_v23 = vpack.c.bf16 (!%p193_p2), %v1896_v21, %v1895_v20  ;;  %v1897_v27 = vld [vmem:[%s3716_s1 + $0x240] sm:$0xff] (!%p193_p2)  ;;  %v1898_v28 = vld [vmem:[%s3716_s1 + $0x248] sm:$0xff] (!%p193_p2)  ;;  %v2644_v30 = vpack.c.bf16 (!%p193_p2), %v1850_v25, %v1849_v24  ;;  %v1851_v32 = vld [vmem:[%s3716_s1 + $0xd0] sm:$0xff] (!%p193_p2) }
   0xc   : > { %v2772_v31 = vpack.c.bf16 (!%p193_p2), %v1898_v28, %v1897_v27  ;;  %v1852_v33 = vld [vmem:[%s3716_s1 + $0xd8] sm:$0xff] (!%p193_p2)  ;;  %v1899_v34 = vld [vmem:[%s3716_s1 + $0x250] sm:$0xff] (!%p193_p2)  ;;  %v1853_v38 = vld [vmem:[%s3716_s1 + $0xe0] sm:$0xff] (!%p193_p2) }
   0xd   : > { %s3722_s19 = smov (!%p228_p3, %s1832_s19), 1  ;;  %2635 = vmatpush3.bf16.msra.mxu1 %v2632_v8  ;;  %v1900_v35 = vld [vmem:[%s3716_s1 + $0x258] sm:$0xff]  ;;  %v2648_v36 = vpack.c.bf16 %v1852_v33, %v1851_v32  ;;  %v1854_v39 = vld [vmem:[%s3716_s1 + $0xe8] sm:$0xff]  ;;  %v1901_v40 = vld [vmem:[%s3716_s1 + $0x260] sm:$0xff] }
   0xe   : > { %s3012_s21 = smul.u32 104, %s3722_s19  ;;  %2763 = vmatpush3.bf16.msra.mxu0 %v2760_v12  ;;  %2637 = vmatprep.subr.bf16.mxu1 %v2636_v16  ;;  %v2776_v37 = vpack.c.bf16 %v1900_v35, %v1899_v34  ;;  %v1902_v41 = vld [vmem:[%s3716_s1 + $0x268] sm:$0xff]  ;;  %v2652_v42 = vpack.c.bf16 %v1854_v39, %v1853_v38  ;;  %v1855_v44 = vld [vmem:[%s3716_s1 + $0xf0] sm:$0xff]  ;;  %v1856_v45 = vld [vmem:[%s3716_s1 + $0xf8] sm:$0xff]  ;;  %s1839_s25 = sshll.u32 %s3722_s19, 3 }
   0xf   : > { %2765 = vmatprep.subr.bf16.mxu0 %v2764_v17  ;;  %v2780_v43 = vpack.c.bf16 %v1902_v41, %v1901_v40  ;;  %v1903_v46 = vld [vmem:[%s3716_s1 + $0x270] sm:$0xff]  ;;  %v1904_v47 = vld [vmem:[%s3716_s1 + $0x278] sm:$0xff]  ;;  %v2656_v48 = vpack.c.bf16 %v1856_v45, %v1855_v44  ;;  %v256_v50 = vld [vmem:[%s3716_s1] sm:$0xff]  ;;  %s241_s28 = scalar_lea.vmem %s3719_s4, %s1839_s25  ;;  %s245_s6 = scalar_lea.vmem %s3720_s5, %s1839_s25 }
  0x10   : > { %s3126_s7 = scalar_lea.vmem %s3715_s0, %s3012_s21  ;;  %v2784_v49 = vpack.c.bf16 %v1904_v47, %v1903_v46  ;;  %v257_v51 = vld [vmem:[%s3716_s1 + $0x8] sm:$0xff]  ;;  %v1905_v52 = vld [vmem:[%s3716_s1 + $0x280] sm:$0xff]  ;;  %v258_v56 = vld [vmem:[%s3716_s1 + $0x10] sm:$0xff] }
  0x11   : > { %v272_v26 = vld [vmem:[%s3126_s7 + $0x1] sm:$0xff]  ;;  %v833_v29 = vld [vmem:[%s3126_s7 + $0xb] sm:$0xff]  ;;  %2639 = vmatpush3.bf16.msra.mxu1 %v2636_v16  ;;  %v2660_v54 = vpack.c.bf16 %v257_v51, %v256_v50  ;;  %v259_v57 = vld [vmem:[%s3716_s1 + $0x18] sm:$0xff] }
  0x12   : > { %2237 = vmatprep.mubr.f32.mxu1 %v272_v26  ;;  %2425 = vmatprep.mubr.f32.mxu0 %v833_v29  ;;  %v1906_v53 = vld [vmem:[%s3716_s1 + $0x288] sm:$0xff]  ;;  %v1907_v58 = vld [vmem:[%s3716_s1 + $0x290] sm:$0xff]  ;;  %v1908_v59 = vld [vmem:[%s3716_s1 + $0x298] sm:$0xff]  ;;  %v2664_v62 = vpack.c.bf16 %v259_v57, %v258_v56 }
  0x13   : > { %2767 = vmatpush3.bf16.msra.mxu0 %v2764_v17  ;;  %2641 = vmatprep.subr.bf16.mxu1 %v2640_v22  ;;  %v2788_v55 = vpack.c.bf16 %v1906_v53, %v1905_v52  ;;  %v273_v60 = vld [vmem:[%s3126_s7 + $0x9] sm:$0xff]  ;;  %v834_v61 = vld [vmem:[%s3126_s7 + $0x13] sm:$0xff]  ;;  %v2792_v63 = vpack.c.bf16 %v1908_v59, %v1907_v58  ;;  %v260_v0 = vld [vmem:[%s3716_s1 + $0x20] sm:$0xff]  ;;  %v3033_v52 = vmov 0  }
  0x14   : > { %2769 = vmatprep.subr.bf16.mxu0 %v2768_v23  ;;  %v261_v1 = vld [vmem:[%s3716_s1 + $0x28] sm:$0xff]  ;;  %v1909_v2 = vld [vmem:[%s3716_s1 + $0x2a0] sm:$0xff]  ;;  %v274_v4 = vld [vmem:[%s3126_s7 + $0x11] sm:$0xff]  ;;  %3023 = vset.pattern.permute.xlu0 %v3033_v52 }
  0x15   : > { %2643 = vmatpush3.bf16.msra.mxu1 %v2640_v22  ;;  %v1910_v3 = vld [vmem:[%s3716_s1 + $0x2a8] sm:$0xff]  ;;  %v835_v5 = vld [vmem:[%s3126_s7 + $0x1b] sm:$0xff]  ;;  %v2668_v7 = vpack.c.bf16 %v261_v1, %v260_v0  ;;  %v262_v10 = vld [vmem:[%s3716_s1 + $0x30] sm:$0xff]  ;;  %3024 = vset.pattern.permute.xlu1 %v3033_v52 }
  0x16   : > { %2645 = vmatprep.subr.bf16.mxu1 %v2644_v30  ;;  %v275_v6 = vld [vmem:[%s3126_s7 + $0x19] sm:$0xff]  ;;  %v836_v8 = vld [vmem:[%s3126_s7 + $0x23] sm:$0xff]  ;;  %v2796_v9 = vpack.c.bf16 %v1910_v3, %v1909_v2  ;;  %v1911_v12 = vld [vmem:[%s3716_s1 + $0x2b0] sm:$0xff] }
  0x17   : > { %2771 = vmatpush3.bf16.msra.mxu0 %v2768_v23  ;;  %v263_v11 = vld [vmem:[%s3716_s1 + $0x38] sm:$0xff]  ;;  %v276_v14 = vld [vmem:[%s3126_s7 + $0x21] sm:$0xff]  ;;  %v837_v15 = vld [vmem:[%s3126_s7 + $0x2b] sm:$0xff] }
  0x18   : > { %2773 = vmatprep.subr.bf16.mxu0 %v2772_v31  ;;  %v1912_v13 = vld [vmem:[%s3716_s1 + $0x2b8] sm:$0xff]  ;;  %v277_v16 = vld [vmem:[%s3126_s7 + $0x29] sm:$0xff]  ;;  %v2672_v17 = vpack.c.bf16 %v263_v11, %v262_v10  ;;  %v264_v20 = vld [vmem:[%s3716_s1 + $0x40] sm:$0xff] }
  0x19   : > { %2647 = vmatpush3.bf16.msra.mxu1 %v2644_v30  ;;  %v838_v18 = vld [vmem:[%s3126_s7 + $0x33] sm:$0xff]  ;;  %v2800_v19 = vpack.c.bf16 %v1912_v13, %v1911_v12  ;;  %v265_v21 = vld [vmem:[%s3716_s1 + $0x48] sm:$0xff]  ;;  %v1913_v22 = vld [vmem:[%s3716_s1 + $0x2c0] sm:$0xff] }
  0x1a   : > { %2649 = vmatprep.subr.bf16.mxu1 %v2648_v36  ;;  %v1914_v23 = vld [vmem:[%s3716_s1 + $0x2c8] sm:$0xff]  ;;  %v278_v24 = vld [vmem:[%s3126_s7 + $0x31] sm:$0xff]  ;;  %v839_v25 = vld [vmem:[%s3126_s7 + $0x3b] sm:$0xff]  ;;  %v2676_v27 = vpack.c.bf16 %v265_v21, %v264_v20 }
  0x1b   : > { %2775 = vmatpush3.bf16.msra.mxu0 %v2772_v31  ;;  %v279_v26 = vld [vmem:[%s3126_s7 + $0x39] sm:$0xff]  ;;  %v840_v28 = vld [vmem:[%s3126_s7 + $0x43] sm:$0xff]  ;;  %v2804_v29 = vpack.c.bf16 %v1914_v23, %v1913_v22  ;;  %v266_v30 = vld [vmem:[%s3716_s1 + $0x50] sm:$0xff] }
  0x1c   : > { %2777 = vmatprep.subr.bf16.mxu0 %v2776_v37  ;;  %v267_v31 = vld [vmem:[%s3716_s1 + $0x58] sm:$0xff]  ;;  %v1915_v32 = vld [vmem:[%s3716_s1 + $0x2d0] sm:$0xff]  ;;  %v280_v34 = vld [vmem:[%s3126_s7 + $0x41] sm:$0xff] }
  0x1d   : > { %2651 = vmatpush3.bf16.msra.mxu1 %v2648_v36  ;;  %v1916_v33 = vld [vmem:[%s3716_s1 + $0x2d8] sm:$0xff]  ;;  %v841_v35 = vld [vmem:[%s3126_s7 + $0x4b] sm:$0xff]  ;;  %v268_v40 = vld [vmem:[%s3716_s1 + $0x60] sm:$0xff] }
  0x1e   : > { %2653 = vmatprep.subr.bf16.mxu1 %v2652_v42  ;;  %v281_v36 = vld [vmem:[%s3126_s7 + $0x49] sm:$0xff]  ;;  %v842_v38 = vld [vmem:[%s3126_s7 + $0x53] sm:$0xff]  ;;  %v2808_v39 = vpack.c.bf16 %v1916_v33, %v1915_v32  ;;  %v246_v44 = vld [vmem:[%s3126_s7] sm:$0xff] }
  0x1f   : > { %2779 = vmatpush3.bf16.msra.mxu0 %v2776_v37  ;;  %v2680_v37 = vpack.c.bf16 %v267_v31, %v266_v30  ;;  %v269_v41 = vld [vmem:[%s3716_s1 + $0x68] sm:$0xff]  ;;  %v1919_v50 = vld [vmem:[%s3716_s1 + $0x2f0] sm:$0xff]  ;;  %v1920_v51 = vld [vmem:[%s3716_s1 + $0x2f8] sm:$0xff] }
  0x20   : > { %2781 = vmatprep.subr.bf16.mxu0 %v2780_v43  ;;  %v985_v45 = vld [vmem:[%s3126_s7 + $0xc] sm:$0xff]  ;;  %v2684_v46 = vpack.c.bf16 %v269_v41, %v268_v40  ;;  %v1921_v57 = vld [vmem:[%s3716_s1 + $0x300] sm:$0xff]  ;;  %v1924_v0 = vld [vmem:[%s3716_s1 + $0x318] sm:$0xff] }
  0x21   : > { %2655 = vmatpush3.bf16.msra.mxu1 %v2652_v42  ;;  %v1917_v42 = vld [vmem:[%s3716_s1 + $0x2e0] sm:$0xff]  ;;  %v1858_v56 = vld [vmem:[%s3716_s1 + $0x108] sm:$0xff]  ;;  %v3320_v2 = vld [vmem:[%s3126_s7 + $0x14] sm:$0xff] }
  0x22   : > { %2657 = vmatprep.subr.bf16.mxu1 %v2656_v48  ;;  %v1922_v58 = vld [vmem:[%s3716_s1 + $0x308] sm:$0xff]  ;;  %v3337_v10 = vld [vmem:[%s3126_s7 + $0x1c] sm:$0xff]  ;;  %v3363_v23 = vld [vmem:[%s3126_s7 + $0x34] sm:$0xff] }
  0x23   : > { %2783 = vmatpush3.bf16.msra.mxu0 %v2780_v43  ;;  %v1918_v43 = vld [vmem:[%s3716_s1 + $0x2e8] sm:$0xff]  ;;  %v249_v11 = vld [vmem:[%s3126_s7 + $0x18] sm:$0xff]  ;;  %v1595_v52 = vld [vmem:[%s3717_s2 + $0x10] sm:$0xff] }
  0x24   : > { %2785 = vmatprep.subr.bf16.mxu0 %v2784_v49  ;;  %v2812_v47 = vpack.c.bf16 %v1918_v43, %v1917_v42  ;;  %v247_v1 = vld [vmem:[%s3126_s7 + $0x8] sm:$0xff]  ;;  %v3381_v30 = vld [vmem:[%s3126_s7 + $0x3c] sm:$0xff]  ;;  %v3407_v43 = vld [vmem:[%s3126_s7 + $0x54] sm:$0xff]  ;;  %1615 = vperm.xlu1 %3024, %v1595_v52  }
  0x25   : > { %2659 = vmatpush3.bf16.msra.mxu1 %v2656_v48  ;;  %v270_v48 = vld [vmem:[%s3716_s1 + $0x70] sm:$0xff]  ;;  %v3341_v13 = vld [vmem:[%s3126_s7 + $0x24] sm:$0xff]  ;;  %v253_v31 = vld [vmem:[%s3126_s7 + $0x38] sm:$0xff] }
  0x26   : > { %2661 = vmatprep.subr.bf16.mxu1 %v2660_v54  ;;  %v3359_v20 = vld [vmem:[%s3126_s7 + $0x2c] sm:$0xff]  ;;  %v3385_v33 = vld [vmem:[%s3126_s7 + $0x44] sm:$0xff]  ;;  %v1289_v52 = vld [vmem:[%s3126_s7 + $0x15] sm:$0xff] }
  0x27   : > { %2787 = vmatpush3.bf16.msra.mxu0 %v2784_v49  ;;  %v271_v49 = vld [vmem:[%s3716_s1 + $0x78] sm:$0xff]  ;;  %v251_v21 = vld [vmem:[%s3126_s7 + $0x28] sm:$0xff] }
  0x28   : > { %2789 = vmatprep.subr.bf16.mxu0 %v2788_v55  ;;  %2238 = vmatmul.mubr.f32.vlgmr.msra.gmra.mrb[0].mxu1 %v273_v60  ;;  %v2688_v53 = vpack.c.bf16 %v271_v49, %v270_v48  ;;  %v2820_v60 = vpack.c.bf16 %v1922_v58, %v1921_v57  ;;  %v3403_v40 = vld [vmem:[%s3126_s7 + $0x4c] sm:$0xff]  ;;  %v529_v49 = vld [vmem:[%s3126_s7 + $0x2] sm:$0xff]  ;;  %v1936_v57 = vld [vmem:[%s3716_s1 + $0x378] sm:$0xff] }
  0x29   : > { %2663 = vmatpush3.bf16.msra.mxu1 %v2660_v54  ;;  %2240 = vmatprep.mubr.f32.mxu1 %v274_v4  ;;  %v2816_v54 = vpack.c.bf16 %v1920_v51, %v1919_v50  ;;  %v255_v41 = vld [vmem:[%s3126_s7 + $0x48] sm:$0xff]  ;;  %v1593_v50 = vld [vmem:[%s3717_s2] sm:$0xff] }
  0x2a   : > { %2426 = vmatmul.mubr.f32.vlgmr.msra.gmra.mrb[0].mxu0 %v834_v61  ;;  %2665 = vmatprep.subr.bf16.mxu1 %v2664_v62  ;;  %v1859_v61 = vld [vmem:[%s3716_s1 + $0x110] sm:$0xff]  ;;  %v1934_v48 = vld [vmem:[%s3716_s1 + $0x368] sm:$0xff] }
  0x2b   : > { %2791 = vmatpush3.bf16.msra.mxu0 %v2788_v55  ;;  %2428 = vmatprep.mubr.f32.mxu0 %v835_v5  ;;  %v1857_v55 = vld [vmem:[%s3716_s1 + $0x100] sm:$0xff]  ;;  %v1594_v58 = vld [vmem:[%s3717_s2 + $0x8] sm:$0xff] }
  0x2c   : > { %2793 = vmatprep.subr.bf16.mxu0 %v2792_v63  ;;  %2241 = vmatmul.mubr.f32.gmra.mrb[2].mxu1 %v275_v6  ;;  %v2692_v59 = vpack.c.bf16 %v1858_v56, %v1857_v55  ;;  %v1861_v5 = vld [vmem:[%s3716_s1 + $0x120] sm:$0xff]  ;;  %v1862_v6 = vld [vmem:[%s3716_s1 + $0x128] sm:$0xff]  ;;  %v1872_v55 = vld [vmem:[%s3716_s1 + $0x178] sm:$0xff] }
  0x2d   : > { %2667 = vmatpush3.bf16.msra.mxu1 %v2664_v62  ;;  %2243 = vmatprep.mubr.f32.mxu1 %v276_v14  ;;  %v1860_v62 = vld [vmem:[%s3716_s1 + $0x118] sm:$0xff]  ;;  %v2700_v12 = vpack.c.bf16 %v1862_v6, %v1861_v5  ;;  %v1935_v56 = vld [vmem:[%s3716_s1 + $0x370] sm:$0xff] }
  0x2e   : > { %2429 = vmatmul.mubr.f32.gmra.mrb[2].mxu0 %v836_v8  ;;  %2669 = vmatprep.subr.bf16.mxu1 %v2668_v7  ;;  %v2696_v3 = vpack.c.bf16 %v1860_v62, %v1859_v61  ;;  %v1926_v8 = vld [vmem:[%s3716_s1 + $0x328] sm:$0xff]  ;;  %v2848_v61 = vpack.c.bf16 %v1936_v57, %v1935_v56  ;;  %v1873_v62 = vld [vmem:[%s3716_s1 + $0x180] sm:$0xff]  ;;  %v1875_v6 = vld [vmem:[%s3716_s1 + $0x190] sm:$0xff] }
  0x2f   : > { %2795 = vmatpush3.bf16.msra.mxu0 %v2792_v63  ;;  %2431 = vmatprep.mubr.f32.mxu0 %v837_v15  ;;  %v1923_v63 = vld [vmem:[%s3716_s1 + $0x310] sm:$0xff]  ;;  %v1888_v57 = vld [vmem:[%s3716_s1 + $0x1f8] sm:$0xff] }
  0x30   : > { %2797 = vmatprep.subr.bf16.mxu0 %v2796_v9  ;;  %2244 = vmatmul.mubr.f32.gmra.mrb[4].mxu1 %v277_v16  ;;  %v2824_v4 = vpack.c.bf16 %v1924_v0, %v1923_v63  ;;  %v1863_v15 = vld [vmem:[%s3716_s1 + $0x130] sm:$0xff]  ;;  %v1864_v16 = vld [vmem:[%s3716_s1 + $0x138] sm:$0xff]  ;;  %v1874_v63 = vld [vmem:[%s3716_s1 + $0x188] sm:$0xff] }
  0x31   : > { %2671 = vmatpush3.bf16.msra.mxu1 %v2668_v7  ;;  %2246 = vmatprep.mubr.f32.mxu1 %v278_v24  ;;  %v1925_v7 = vld [vmem:[%s3716_s1 + $0x320] sm:$0xff]  ;;  %v2704_v22 = vpack.c.bf16 %v1864_v16, %v1863_v15 }
  0x32   : > { %2432 = vmatmul.mubr.f32.gmra.mrb[4].mxu0 %v838_v18  ;;  %2673 = vmatprep.subr.bf16.mxu1 %v2672_v17  ;;  %v2828_v14 = vpack.c.bf16 %v1926_v8, %v1925_v7  ;;  %v1928_v18 = vld [vmem:[%s3716_s1 + $0x338] sm:$0xff]  ;;  %v1937_v0 = vld [vmem:[%s3716_s1 + $0x380] sm:$0xff]  ;;  %v1939_v8 = vld [vmem:[%s3716_s1 + $0x390] sm:$0xff] }
  0x33   : > { %2799 = vmatpush3.bf16.msra.mxu0 %v2796_v9  ;;  %2434 = vmatprep.mubr.f32.mxu0 %v839_v25  ;;  %v248_v9 = vld [vmem:[%s3126_s7 + $0x10] sm:$0xff]  ;;  %v1865_v25 = vld [vmem:[%s3716_s1 + $0x140] sm:$0xff]  ;;  %v1876_v7 = vld [vmem:[%s3716_s1 + $0x198] sm:$0xff] }
  0x34   : > { %2801 = vmatprep.subr.bf16.mxu0 %v2800_v19  ;;  %2247 = vmatmul.mubr.f32.gmra.mrb[6].mxu1 %v279_v26  ;;  %v1866_v26 = vld [vmem:[%s3716_s1 + $0x148] sm:$0xff]  ;;  %v1877_v16 = vld [vmem:[%s3716_s1 + $0x1a0] sm:$0xff] }
  0x35   : > { %2675 = vmatpush3.bf16.msra.mxu1 %v2672_v17  ;;  %2249 = vmatprep.mubr.f32.mxu1 %v280_v34  ;;  %v1927_v17 = vld [vmem:[%s3716_s1 + $0x330] sm:$0xff]  ;;  %v2708_v32 = vpack.c.bf16 %v1866_v26, %v1865_v25 }
  0x36   : > { %2435 = vmatmul.mubr.f32.gmra.mrb[6].mxu0 %v840_v28  ;;  %2677 = vmatprep.subr.bf16.mxu1 %v2676_v27  ;;  %v2832_v24 = vpack.c.bf16 %v1928_v18, %v1927_v17  ;;  %v1930_v28 = vld [vmem:[%s3716_s1 + $0x348] sm:$0xff]  ;;  %v1941_v18 = vld [vmem:[%s3716_s1 + $0x3a0] sm:$0xff]  ;;  %v1879_v26 = vld [vmem:[%s3716_s1 + $0x1b0] sm:$0xff] }
  0x37   : > { %2803 = vmatpush3.bf16.msra.mxu0 %v2800_v19  ;;  %2437 = vmatprep.mubr.f32.mxu0 %v841_v35  ;;  %v250_v19 = vld [vmem:[%s3126_s7 + $0x20] sm:$0xff]  ;;  %v1867_v35 = vld [vmem:[%s3716_s1 + $0x150] sm:$0xff]  ;;  %v1878_v17 = vld [vmem:[%s3716_s1 + $0x1a8] sm:$0xff] }
  0x38   : > { %2805 = vmatprep.subr.bf16.mxu0 %v2804_v29  ;;  %2250 = vmatmul.mubr.f32.gmra.mrb[8].mxu1 %v281_v36  ;;  %v1868_v36 = vld [vmem:[%s3716_s1 + $0x158] sm:$0xff] }
  0x39   : > { %2679 = vmatpush3.bf16.msra.mxu1 %v2676_v27  ;;  %2284 = vmatprep.mubr.f32.mxu1 %v246_v44  ;;  %v1929_v27 = vld [vmem:[%s3716_s1 + $0x340] sm:$0xff]  ;;  %v2712_v42 = vpack.c.bf16 %v1868_v36, %v1867_v35  ;;  %v1882_v35 = vld [vmem:[%s3716_s1 + $0x1c8] sm:$0xff] }
  0x3a   : > { %2438 = vmatmul.mubr.f32.gmra.mrb[8].mxu0 %v842_v38  ;;  %2681 = vmatprep.subr.bf16.mxu1 %v2680_v37  ;;  %v2836_v34 = vpack.c.bf16 %v1930_v28, %v1929_v27  ;;  %v1932_v38 = vld [vmem:[%s3716_s1 + $0x358] sm:$0xff]  ;;  %v1946_v36 = vld [vmem:[%s3716_s1 + $0x3c8] sm:$0xff] }
  0x3b   : > { %2807 = vmatpush3.bf16.msra.mxu0 %v2804_v29  ;;  %2472 = vmatprep.mubr.f32.mxu0 %v985_v45  ;;  %v252_v29 = vld [vmem:[%s3126_s7 + $0x30] sm:$0xff]  ;;  %v1869_v45 = vld [vmem:[%s3716_s1 + $0x160] sm:$0xff]  ;;  %v1880_v27 = vld [vmem:[%s3716_s1 + $0x1b8] sm:$0xff] }
  0x3c   : > { %2809 = vmatprep.subr.bf16.mxu0 %v2808_v39  ;;  %1605 = vperm.xlu0 %3023, %v1593_v50   ;;  %v1944_v28 = vld [vmem:[%s3716_s1 + $0x3b8] sm:$0xff]  ;;  %v1886_v50 = vld [vmem:[%s3716_s1 + $0x1e8] sm:$0xff] }
  0x3d   : > { %2683 = vmatpush3.bf16.msra.mxu1 %v2680_v37  ;;  %v1931_v37 = vld [vmem:[%s3716_s1 + $0x350] sm:$0xff] }
  0x3e   : > { %2685 = vmatprep.subr.bf16.mxu1 %v2684_v46  ;;  %v2840_v44 = vpack.c.bf16 %v1932_v38, %v1931_v37  ;;  %v3543_v37 = vld [vmem:[%s3126_s7 + $0x32] sm:$0xff]  ;;  %v3547_v38 = vld [vmem:[%s3126_s7 + $0x3a] sm:$0xff] }
  0x3f   : > { %2811 = vmatpush3.bf16.msra.mxu0 %v2808_v39  ;;  %v254_v39 = vld [vmem:[%s3126_s7 + $0x40] sm:$0xff] }
  0x40   : > { %2813 = vmatprep.subr.bf16.mxu0 %v2812_v47  ;;  %1610 = vperm.xlu0 %3023, %v1594_v58   ;;  %v1951_v58 = vld [vmem:[%s3716_s1 + $0x3f0] sm:$0xff] }
  0x41   : > { %2687 = vmatpush3.bf16.msra.mxu1 %v2684_v46  ;;  %v1870_v46 = vld [vmem:[%s3716_s1 + $0x168] sm:$0xff] }
  0x42   : > { %2689 = vmatprep.subr.bf16.mxu1 %v2688_v53  ;;  %v2716_v51 = vpack.c.bf16 %v1870_v46, %v1869_v45  ;;  %v3565_v45 = vld [vmem:[%s3126_s7 + $0x42] sm:$0xff]  ;;  %v3569_v46 = vld [vmem:[%s3126_s7 + $0x4a] sm:$0xff] }
  0x43   : > { %2815 = vmatpush3.bf16.msra.mxu0 %v2812_v47  ;;  %v1933_v47 = vld [vmem:[%s3716_s1 + $0x360] sm:$0xff] }
  0x44   : > { %2817 = vmatprep.subr.bf16.mxu0 %v2816_v54 }
  0x45   : > { %2691 = vmatpush3.bf16.msra.mxu1 %v2688_v53  ;;  %v2844_v53 = vpack.c.bf16 %v1934_v48, %v1933_v47  ;;  %v1146_v48 = vld [vmem:[%s3126_s7 + $0x5c] sm:$0xff] }
  0x46   : > { %2693 = vmatprep.subr.bf16.mxu1 %v2692_v59 }
  0x47   : > { %2819 = vmatpush3.bf16.msra.mxu0 %v2816_v54  ;;  %v1871_v54 = vld [vmem:[%s3716_s1 + $0x170] sm:$0xff] }
  0x48   : > { %2821 = vmatprep.subr.bf16.mxu0 %v2820_v60  ;;  %2285 = vmatmul.mubr.f32.vlgmr.msra.gmra.mrb[0].mxu1 %v247_v1  ;;  %v1938_v1 = vld [vmem:[%s3716_s1 + $0x388] sm:$0xff] }
  0x49   : > { %2695 = vmatpush3.bf16.msra.mxu1 %v2692_v59  ;;  %2287 = vmatprep.mubr.f32.mxu1 %v248_v9  ;;  %v2720_v59 = vpack.c.bf16 %v1872_v55, %v1871_v54  ;;  %v2852_v5 = vpack.c.bf16 %v1938_v1, %v1937_v0  ;;  %v1940_v9 = vld [vmem:[%s3716_s1 + $0x398] sm:$0xff]  ;;  %v1601_v55 = vld [vmem:[%s3717_s2 + $0x40] sm:$0xff]  ;;  %v1954_v0 = vld [vmem:[%s3716_s1 + $0x408] sm:$0xff] }
  0x4a   : > { %2473 = vmatmul.mubr.f32.vlgmr.msra.gmra.mrb[0].mxu0 %v3320_v2  ;;  %2697 = vmatprep.subr.bf16.mxu1 %v2696_v3  ;;  %v2856_v15 = vpack.c.bf16 %v1940_v9, %v1939_v8  ;;  %v1958_v8 = vld [vmem:[%s3716_s1 + $0x428] sm:$0xff] }
  0x4b   : > { %2823 = vmatpush3.bf16.msra.mxu0 %v2820_v60  ;;  %2475 = vmatprep.mubr.f32.mxu0 %v3337_v10  ;;  %v1596_v60 = vld [vmem:[%s3717_s2 + $0x18] sm:$0xff]  ;;  %v1292_v9 = vld [vmem:[%s3126_s7 + $0x2d] sm:$0xff] }
  0x4c   : > { %2825 = vmatprep.subr.bf16.mxu0 %v2824_v4  ;;  %2288 = vmatmul.mubr.f32.gmra.mrb[2].mxu1 %v249_v11  ;;  %v3480_v11 = vld [vmem:[%s3126_s7 + $0xa] sm:$0xff] }
  0x4d   : > { %2699 = vmatpush3.bf16.msra.mxu1 %v2696_v3  ;;  %2290 = vmatprep.mubr.f32.mxu1 %v250_v19  ;;  %v2724_v3 = vpack.c.bf16 %v1874_v63, %v1873_v62  ;;  %v1942_v19 = vld [vmem:[%s3716_s1 + $0x3a8] sm:$0xff]  ;;  %v1953_v63 = vld [vmem:[%s3716_s1 + $0x400] sm:$0xff] }
  0x4e   : > { %2476 = vmatmul.mubr.f32.gmra.mrb[2].mxu0 %v3341_v13  ;;  %2701 = vmatprep.subr.bf16.mxu1 %v2700_v12  ;;  %v2860_v25 = vpack.c.bf16 %v1942_v19, %v1941_v18  ;;  %v2884_v1 = vpack.c.bf16 %v1954_v0, %v1953_v63  ;;  %v1295_v18 = vld [vmem:[%s3126_s7 + $0x45] sm:$0xff] }
  0x4f   : > { %2827 = vmatpush3.bf16.msra.mxu0 %v2824_v4  ;;  %2478 = vmatprep.mubr.f32.mxu0 %v3359_v20  ;;  %v1598_v4 = vld [vmem:[%s3717_s2 + $0x28] sm:$0xff]  ;;  %v1961_v19 = vld [vmem:[%s3716_s1 + $0x440] sm:$0xff] }
  0x50   : > { %2829 = vmatprep.subr.bf16.mxu0 %v2828_v14  ;;  %2291 = vmatmul.mubr.f32.gmra.mrb[4].mxu1 %v251_v21  ;;  %v3499_v21 = vld [vmem:[%s3126_s7 + $0x12] sm:$0xff] }
  0x51   : > { %2703 = vmatpush3.bf16.msra.mxu1 %v2700_v12  ;;  %2293 = vmatprep.mubr.f32.mxu1 %v252_v29  ;;  %v1599_v12 = vld [vmem:[%s3717_s2 + $0x30] sm:$0xff]  ;;  %v3521_v29 = vld [vmem:[%s3126_s7 + $0x22] sm:$0xff] }
  0x52   : > { %2479 = vmatmul.mubr.f32.gmra.mrb[4].mxu0 %v3363_v23  ;;  %2705 = vmatprep.subr.bf16.mxu1 %v2704_v22 }
  0x53   : > { %2831 = vmatpush3.bf16.msra.mxu0 %v2828_v14  ;;  %2481 = vmatprep.mubr.f32.mxu0 %v3381_v30  ;;  %v2728_v14 = vpack.c.bf16 %v1876_v7, %v1875_v6  ;;  %v1291_v6 = vld [vmem:[%s3126_s7 + $0x25] sm:$0xff] }
  0x54   : > { %2833 = vmatprep.subr.bf16.mxu0 %v2832_v24  ;;  %2294 = vmatmul.mubr.f32.gmra.mrb[6].mxu1 %v253_v31  ;;  %v3525_v31 = vld [vmem:[%s3126_s7 + $0x2a] sm:$0xff]  ;;  %v1957_v7 = vld [vmem:[%s3716_s1 + $0x420] sm:$0xff] }
  0x55   : > { %2707 = vmatpush3.bf16.msra.mxu1 %v2704_v22  ;;  %2296 = vmatprep.mubr.f32.mxu1 %v254_v39  ;;  %v3503_v22 = vld [vmem:[%s3126_s7 + $0x1a] sm:$0xff] }
  0x56   : > { %2482 = vmatmul.mubr.f32.gmra.mrb[6].mxu0 %v3385_v33  ;;  %2709 = vmatprep.subr.bf16.mxu1 %v2708_v32 }
  0x57   : > { %2835 = vmatpush3.bf16.msra.mxu0 %v2832_v24  ;;  %2484 = vmatprep.mubr.f32.mxu0 %v3403_v40  ;;  %v2732_v24 = vpack.c.bf16 %v1878_v17, %v1877_v16  ;;  %v1294_v16 = vld [vmem:[%s3126_s7 + $0x3d] sm:$0xff] }
  0x58   : > { %2837 = vmatprep.subr.bf16.mxu0 %v2836_v34  ;;  %2297 = vmatmul.mubr.f32.gmra.mrb[8].mxu1 %v255_v41 }
  0x59   : > { %2711 = vmatpush3.bf16.msra.mxu1 %v2708_v32  ;;  %2331 = vmatprep.mubr.f32.mxu1 %v529_v49  ;;  %v2736_v32 = vpack.c.bf16 %v1880_v27, %v1879_v26  ;;  %v1964_v26 = vld [vmem:[%s3716_s1 + $0x458] sm:$0xff] }
  0x5a   : > { %2485 = vmatmul.mubr.f32.gmra.mrb[8].mxu0 %v3407_v43  ;;  %2713 = vmatprep.subr.bf16.mxu1 %v2712_v42  ;;  %v1297_v27 = vld [vmem:[%s3126_s7 + $0x55] sm:$0xff] }
  0x5b   : > { %2839 = vmatpush3.bf16.msra.mxu0 %v2836_v34  ;;  %2519 = vmatprep.mubr.f32.mxu0 %v3320_v2  ;;  %v1597_v2 = vld [vmem:[%s3717_s2 + $0x20] sm:$0xff] }
  0x5c   : > { %2841 = vmatprep.subr.bf16.mxu0 %v2840_v44  ;;  %1620 = vperm.xlu1 %3024, %v1596_v60   ;;  %v1602_v60 = vld [vmem:[%s3717_s2 + $0x48] sm:$0xff] }
  0x5d   : > { %2715 = vmatpush3.bf16.msra.mxu1 %v2712_v42  ;;  %1625 = vperm.xlu0 %3023, %v1597_v2   ;;  %v1884_v42 = vld [vmem:[%s3716_s1 + $0x1d8] sm:$0xff]  ;;  %v1955_v2 = vld [vmem:[%s3716_s1 + $0x410] sm:$0xff] }
  0x5e   : > { %2717 = vmatprep.subr.bf16.mxu1 %v2716_v51 }
  0x5f   : > { %2843 = vmatpush3.bf16.msra.mxu0 %v2840_v44  ;;  %v1948_v44 = vld [vmem:[%s3716_s1 + $0x3d8] sm:$0xff] }
  0x60   : > { %2845 = vmatprep.subr.bf16.mxu0 %v2844_v53  ;;  %1630 = vperm.xlu1 %3024, %v1598_v4   ;;  %v1290_v4 = vld [vmem:[%s3126_s7 + $0x1d] sm:$0xff] }
  0x61   : > { %2719 = vmatpush3.bf16.msra.mxu1 %v2716_v51  ;;  %1635 = vperm.xlu0 %3023, %v1599_v12   ;;  %v1950_v51 = vld [vmem:[%s3716_s1 + $0x3e8] sm:$0xff]  ;;  %v1293_v12 = vld [vmem:[%s3126_s7 + $0x35] sm:$0xff] }
  0x62   : > { %2721 = vmatprep.subr.bf16.mxu1 %v2720_v59 }
  0x63   : > { %2847 = vmatpush3.bf16.msra.mxu0 %v2844_v53  ;;  %v1600_v53 = vld [vmem:[%s3717_s2 + $0x38] sm:$0xff] }
  0x64   : > { %2849 = vmatprep.subr.bf16.mxu0 %v2848_v61  ;;  %1640 = vperm.xlu1 %3024, %v1600_v53  }
  0x65   : > { %2723 = vmatpush3.bf16.msra.mxu1 %v2720_v59  ;;  %v1952_v59 = vld [vmem:[%s3716_s1 + $0x3f8] sm:$0xff]  ;;  %1645 = vperm.xlu0 %3023, %v1601_v55  }
  0x66   : > { %2725 = vmatprep.subr.bf16.mxu1 %v2724_v3  ;;  %v2880_v62 = vpack.c.bf16 %v1952_v59, %v1951_v58 }
  0x67   : > { %2851 = vmatpush3.bf16.msra.mxu0 %v2848_v61 }
  0x68   : > { %2853 = vmatprep.subr.bf16.mxu0 %v2852_v5  ;;  %2332 = vmatmul.mubr.f32.vlgmr.msra.gmra.mrb[0].mxu1 %v3480_v11 }
  0x69   : > { %2727 = vmatpush3.bf16.msra.mxu1 %v2724_v3  ;;  %2334 = vmatprep.mubr.f32.mxu1 %v3499_v21  ;;  %v1956_v3 = vld [vmem:[%s3716_s1 + $0x418] sm:$0xff] }
  0x6a   : > { %2520 = vmatmul.mubr.f32.vlgmr.msra.gmra.mrb[0].mxu0 %v3337_v10  ;;  %2729 = vmatprep.subr.bf16.mxu1 %v2728_v14  ;;  %v1943_v10 = vld [vmem:[%s3716_s1 + $0x3b0] sm:$0xff] }
  0x6b   : > { %2855 = vmatpush3.bf16.msra.mxu0 %v2852_v5  ;;  %2522 = vmatprep.mubr.f32.mxu0 %v3341_v13  ;;  %v2864_v34 = vpack.c.bf16 %v1944_v28, %v1943_v10  ;;  %v1881_v13 = vld [vmem:[%s3716_s1 + $0x1c0] sm:$0xff]  ;;  %v2888_v5 = vpack.c.bf16 %v1956_v3, %v1955_v2  ;;  %v690_v10 = vld [vmem:[%s3126_s7 + $0x52] sm:$0xff] }
  0x6c   : > { %2857 = vmatprep.subr.bf16.mxu0 %v2856_v15  ;;  %2335 = vmatmul.mubr.f32.gmra.mrb[2].mxu1 %v3503_v22  ;;  %v2740_v39 = vpack.c.bf16 %v1882_v35, %v1881_v13  ;;  %v1298_v28 = vld [vmem:[%s3126_s7 + $0x5d] sm:$0xff]  ;;  %v1447_v13 = vld [vmem:[%s3126_s7 + $0x46] sm:$0xff] }
  0x6d   : > { %2731 = vmatpush3.bf16.msra.mxu1 %v2728_v14  ;;  %2337 = vmatprep.mubr.f32.mxu1 %v3521_v29  ;;  %v1959_v14 = vld [vmem:[%s3716_s1 + $0x430] sm:$0xff] }
  0x6e   : > { %2523 = vmatmul.mubr.f32.gmra.mrb[2].mxu0 %v3359_v20  ;;  %2733 = vmatprep.subr.bf16.mxu1 %v2732_v24  ;;  %v1945_v20 = vld [vmem:[%s3716_s1 + $0x3c0] sm:$0xff] }
  0x6f   : > { %2859 = vmatpush3.bf16.msra.mxu0 %v2856_v15  ;;  %2525 = vmatprep.mubr.f32.mxu0 %v3363_v23  ;;  %v2868_v41 = vpack.c.bf16 %v1946_v36, %v1945_v20  ;;  %v1883_v23 = vld [vmem:[%s3716_s1 + $0x1d0] sm:$0xff]  ;;  %v1960_v15 = vld [vmem:[%s3716_s1 + $0x438] sm:$0xff] }
  0x70   : > { %2861 = vmatprep.subr.bf16.mxu0 %v2860_v25  ;;  %2338 = vmatmul.mubr.f32.gmra.mrb[4].mxu1 %v3525_v31  ;;  %v2744_v47 = vpack.c.bf16 %v1884_v42, %v1883_v23  ;;  %v2896_v17 = vpack.c.bf16 %v1960_v15, %v1959_v14  ;;  %v1967_v20 = vld [vmem:[%s3716_s1 + $0x470] sm:$0xff]  ;;  %v1968_v36 = vld [vmem:[%s3716_s1 + $0x478] sm:$0xff]  ;;  %v1443_v23 = vld [vmem:[%s3126_s7 + $0x26] sm:$0xff] }
  0x71   : > { %2735 = vmatpush3.bf16.msra.mxu1 %v2732_v24  ;;  %2340 = vmatprep.mubr.f32.mxu1 %v3543_v37  ;;  %v1450_v42 = vld [vmem:[%s3126_s7 + $0x5e] sm:$0xff] }
  0x72   : > { %2526 = vmatmul.mubr.f32.gmra.mrb[4].mxu0 %v3381_v30  ;;  %2737 = vmatprep.subr.bf16.mxu1 %v2736_v32  ;;  %v1947_v30 = vld [vmem:[%s3716_s1 + $0x3d0] sm:$0xff] }
  0x73   : > { %2863 = vmatpush3.bf16.msra.mxu0 %v2860_v25  ;;  %2528 = vmatprep.mubr.f32.mxu0 %v3385_v33  ;;  %v2872_v49 = vpack.c.bf16 %v1948_v44, %v1947_v30  ;;  %v1885_v33 = vld [vmem:[%s3716_s1 + $0x1e0] sm:$0xff]  ;;  %v1963_v25 = vld [vmem:[%s3716_s1 + $0x450] sm:$0xff] }
  0x74   : > { %2865 = vmatprep.subr.bf16.mxu0 %v2864_v34  ;;  %2341 = vmatmul.mubr.f32.gmra.mrb[6].mxu1 %v3547_v38  ;;  %v2748_v54 = vpack.c.bf16 %v1886_v50, %v1885_v33  ;;  %v1444_v30 = vld [vmem:[%s3126_s7 + $0x2e] sm:$0xff]  ;;  %v1445_v44 = vld [vmem:[%s3126_s7 + $0x36] sm:$0xff] }
  0x75   : > { %2739 = vmatpush3.bf16.msra.mxu1 %v2736_v32  ;;  %2343 = vmatprep.mubr.f32.mxu1 %v3565_v45  ;;  %v1966_v32 = vld [vmem:[%s3716_s1 + $0x468] sm:$0xff] }
  0x76   : > { %2529 = vmatmul.mubr.f32.gmra.mrb[6].mxu0 %v3403_v40  ;;  %2741 = vmatprep.subr.bf16.mxu1 %v2740_v39  ;;  %v1949_v40 = vld [vmem:[%s3716_s1 + $0x3e0] sm:$0xff] }
  0x77   : > { %2867 = vmatpush3.bf16.msra.mxu0 %v2864_v34  ;;  %2531 = vmatprep.mubr.f32.mxu0 %v3407_v43  ;;  %v2876_v56 = vpack.c.bf16 %v1950_v51, %v1949_v40  ;;  %v1887_v43 = vld [vmem:[%s3716_s1 + $0x1f0] sm:$0xff] }
  0x78   : > { %2869 = vmatprep.subr.bf16.mxu0 %v2868_v41  ;;  %2344 = vmatmul.mubr.f32.gmra.mrb[8].mxu1 %v3569_v46  ;;  %v2752_v61 = vpack.c.bf16 %v1888_v57, %v1887_v43  ;;  %v1441_v34 = vld [vmem:[%s3126_s7 + $0x16] sm:$0xff] }
  0x79   : > { %2743 = vmatpush3.bf16.msra.mxu1 %v2740_v39  ;;  %2378 = vmatprep.mubr.f32.mxu1 %v3480_v11  ;;  %v2892_v11 = vpack.c.bf16 %v1958_v8, %v1957_v7  ;;  %v1442_v39 = vld [vmem:[%s3126_s7 + $0x1e] sm:$0xff] }
  0x7a   : > { %2532 = vmatmul.mubr.f32.gmra.mrb[8].mxu0 %v1146_v48  ;;  %2745 = vmatprep.subr.bf16.mxu1 %v2744_v47 }
  0x7b   : > { %2871 = vmatpush3.bf16.msra.mxu0 %v2868_v41  ;;  %2566 = vmatprep.mubr.f32.mxu0 %v1289_v52  ;;  %v1449_v41 = vld [vmem:[%s3126_s7 + $0x56] sm:$0xff] }
  0x7c   : > { %2873 = vmatprep.subr.bf16.mxu0 %v2872_v49  ;;  %1650 = vperm.xlu1 %3024, %v1602_v60  }
  0x7d   : > { %2747 = vmatpush3.bf16.msra.mxu1 %v2744_v47 }
  0x7e   : > { %2749 = vmatprep.subr.bf16.mxu1 %v2748_v54 }
  0x7f   : > { %2875 = vmatpush3.bf16.msra.mxu0 %v2872_v49 }
  0x80   : > { %2877 = vmatprep.subr.bf16.mxu0 %v2876_v56 }
  0x81   : > { %2751 = vmatpush3.bf16.msra.mxu1 %v2748_v54 }
  0x82   : > { %2753 = vmatprep.subr.bf16.mxu1 %v2752_v61 }
  0x83   : > { %2879 = vmatpush3.bf16.msra.mxu0 %v2876_v56 }
  0x84   : > { %2881 = vmatprep.subr.bf16.mxu0 %v2880_v62 }
  0x85   : > { %2755 = vmatpush3.bf16.msra.mxu1 %v2752_v61 }
  0x86   : > { %2916 = vmatprep.subr.bf16.mxu1 %v2884_v1 }
  0x87   : > { %2883 = vmatpush3.bf16.msra.mxu0 %v2880_v62 }
  0x88   : > { %2885 = vmatprep.subr.bf16.mxu0 %v2884_v1  ;;  %2379 = vmatmul.mubr.f32.vlgmr.msra.gmra.mrb[0].mxu1 %v3499_v21  ;;  %v1962_v21 = vld [vmem:[%s3716_s1 + $0x448] sm:$0xff] }
  0x89   : > { %2924 = vmatpush3.bf16.msra.mxu1 %v2884_v1  ;;  %2381 = vmatprep.mubr.f32.mxu1 %v3503_v22  ;;  %v1296_v22 = vld [vmem:[%s3126_s7 + $0x4d] sm:$0xff]  ;;  %v2900_v24 = vpack.c.bf16 %v1962_v21, %v1961_v19 }
  0x8a   : > { %2567 = vmatmul.mubr.f32.vlgmr.msra.gmra.mrb[0].mxu0 %v1290_v4  ;;  %2917 = vmatprep.subr.bf16.mxu1 %v2888_v5 }
  0x8b   : > { %2887 = vmatpush3.bf16.msra.mxu0 %v2884_v1  ;;  %2569 = vmatprep.mubr.f32.mxu0 %v1291_v6 }
  0x8c   : > { %2889 = vmatprep.subr.bf16.mxu0 %v2888_v5  ;;  %2382 = vmatmul.mubr.f32.gmra.mrb[2].mxu1 %v3521_v29  ;;  %v2904_v29 = vpack.c.bf16 %v1964_v26, %v1963_v25 }
  0x8d   : > { %2925 = vmatpush3.bf16.msra.mxu1 %v2888_v5  ;;  %2384 = vmatprep.mubr.f32.mxu1 %v3525_v31  ;;  %v1965_v31 = vld [vmem:[%s3716_s1 + $0x460] sm:$0xff] }
  0x8e   : > { %2570 = vmatmul.mubr.f32.gmra.mrb[2].mxu0 %v1292_v9  ;;  %2918 = vmatprep.subr.bf16.mxu1 %v2892_v11  ;;  %v2908_v35 = vpack.c.bf16 %v1966_v32, %v1965_v31 }
  0x8f   : > { %2891 = vmatpush3.bf16.msra.mxu0 %v2888_v5  ;;  %2572 = vmatprep.mubr.f32.mxu0 %v1293_v12 }
  0x90   : > { %2893 = vmatprep.subr.bf16.mxu0 %v2892_v11  ;;  %2385 = vmatmul.mubr.f32.gmra.mrb[4].mxu1 %v3543_v37  ;;  %v2912_v37 = vpack.c.bf16 %v1968_v36, %v1967_v20 }
  0x91   : > { %2926 = vmatpush3.bf16.msra.mxu1 %v2892_v11  ;;  %2387 = vmatprep.mubr.f32.mxu1 %v3547_v38  ;;  %v1448_v38 = vld [vmem:[%s3126_s7 + $0x4e] sm:$0xff] }
  0x92   : > { %2573 = vmatmul.mubr.f32.gmra.mrb[4].mxu0 %v1294_v16  ;;  %2919 = vmatprep.subr.bf16.mxu1 %v2896_v17 }
  0x93   : > { %2895 = vmatpush3.bf16.msra.mxu0 %v2892_v11  ;;  %2575 = vmatprep.mubr.f32.mxu0 %v1295_v18 }
  0x94   : > { %2897 = vmatprep.subr.bf16.mxu0 %v2896_v17  ;;  %2388 = vmatmul.mubr.f32.gmra.mrb[6].mxu1 %v3565_v45  ;;  %v1446_v45 = vld [vmem:[%s3126_s7 + $0x3e] sm:$0xff]  ;;  %s3013_s7 = smul.u32 80, %s3722_s19 }
  0x95   : > { %2927 = vmatpush3.bf16.msra.mxu1 %v2896_v17  ;;  %2390 = vmatprep.mubr.f32.mxu1 %v3569_v46 }
  0x96   : > { %2576 = vmatmul.mubr.f32.gmra.mrb[6].mxu0 %v1296_v22  ;;  %2920 = vmatprep.subr.bf16.mxu1 %v2900_v24  ;;  %s3692_s24 = scalar_lea.vmem %s3718_s3, %s3013_s7 }
  0x97   : > { %2899 = vmatpush3.bf16.msra.mxu0 %v2896_v17  ;;  %2578 = vmatprep.mubr.f32.mxu0 %v1297_v27 }
  0x98   : > { %2901 = vmatprep.subr.bf16.mxu0 %v2900_v24  ;;  %2391 = vmatmul.mubr.f32.gmra.mrb[8].mxu1 %v690_v10 }
  0x99   : > { %2928 = vmatpush3.bf16.msra.mxu1 %v2900_v24  ;;  %2622 = vmatprep.mubr.f32.mxu1 %v1447_v13 }
  0x9a   : > { %2579 = vmatmul.mubr.f32.gmra.mrb[8].mxu0 %v1298_v28  ;;  %2921 = vmatprep.subr.bf16.mxu1 %v2904_v29 }
  0x9b   : > { %2903 = vmatpush3.bf16.msra.mxu0 %v2900_v24  ;;  %2613 = vmatprep.mubr.f32.mxu0 %v1441_v34 }
  0x9c   : > { %2905 = vmatprep.subr.bf16.mxu0 %v2904_v29 }
  0x9d   : > { %2929 = vmatpush3.bf16.msra.mxu1 %v2904_v29 }
  0x9e   : > { %2922 = vmatprep.subr.bf16.mxu1 %v2908_v35 }
  0x9f   : > { %2907 = vmatpush3.bf16.msra.mxu0 %v2904_v29 }
  0xa0   : > { %2909 = vmatprep.subr.bf16.mxu0 %v2908_v35 }
  0xa1   : > { %2930 = vmatpush3.bf16.msra.mxu1 %v2908_v35 }
  0xa2   : > { %2923 = vmatprep.subr.bf16.mxu1 %v2912_v37 }
  0xa3   : > { %2911 = vmatpush3.bf16.msra.mxu0 %v2908_v35  ;;  %v1616_v51 = vpop.permute.xlu1 %1615 }
  0xa4   : > { %2913 = vmatprep.subr.bf16.mxu0 %v2912_v37 }
  0xa5   : > { %2931 = vmatpush3.bf16.msra.mxu1 %v2912_v37 }
  0xa7   : > { %2915 = vmatpush3.bf16.msra.mxu0 %v2912_v37 }
  0xa8   : > { %2623 = vmatmul.mubr.f32.vlgmr.msra.gmra.mrb[10].mxu1 %v1448_v38 }
  0xa9   : > { %2625 = vmatprep.mubr.f32.mxu1 %v1449_v41 }
  0xaa   : > { %2614 = vmatmul.mubr.f32.vlgmr.msra.gmra.mrb[0].mxu0 %v1442_v39 }
  0xab   : > { %2616 = vmatprep.mubr.f32.mxu0 %v1443_v23 }
  0xac   : > { %2626 = vmatmul.mubr.f32.gmra.mrb[12].mxu1 %v1450_v42 }
  0xae   : > { %2617 = vmatmul.mubr.f32.gmra.mrb[2].mxu0 %v1444_v30 }
  0xaf   : > { %2619 = vmatprep.mubr.f32.mxu0 %v1445_v44 }
  0xb2   : > { %2620 = vmatmul.mubr.f32.gmra.mrb[4].mxu0 %v1446_v45 }
  0xbb   : > { %v1606_v56 = vpop.permute.xlu0 %1605 }
  0xbf   : > { %v1611_v0 = vpop.permute.xlu0 %1610 }
  0xdb   : > { %v1621_v62 = vpop.permute.xlu1 %1620 }
  0xdc   : > { %v1626_v2 = vpop.permute.xlu0 %1625 }
  0xdf   : > { %v1631_v1 = vpop.permute.xlu1 %1630 }
  0xe0   : > { %v1636_v4 = vpop.permute.xlu0 %1635 }
  0xe3   : > { %v1641_v3 = vpop.permute.xlu1 %1640 }
  0xe4   : > { %v1646_v29 = vpop.permute.xlu0 %1645 }
  0xfb   : > { %v1651_v19 = vpop.permute.xlu1 %1650 }
 0x15b   : > { %v2380_v46 = vpop.f32.mrb[0].mxu1 }
 0x15c   : > { %v774_v47 = vpop.f32.mrb[1].mxu1 }
 0x15f   : > { %v2383_v48 = vpop.f32.mrb[2].mxu1 }
 0x160   : > { %v784_v49 = vpop.f32.mrb[3].mxu1 }
 0x163   : > { %v2386_v33 = vpop.f32.mrb[4].mxu1 }
 0x164   : > { %v3686_v50 = vpop.f32.mrb[5].mxu1 }
 0x167   : > { %v2389_v40 = vpop.f32.mrb[6].mxu1 }
 0x168   : > { %v804_v53 = vpop.f32.mrb[7].mxu1 }
 0x169   : > { %v2577_v52 = vpop.f32.mrb[6].mxu0 }
 0x16a   : > { %v2938_v54 = vadd.f32 %v2577_v52, %v2389_v40  ;;  %v1412_v55 = vpop.f32.mrb[7].mxu0 }
 0x16b   : > { %v2940_v43 = vadd.f32 %v1412_v55, %v804_v53  ;;  %v2392_v57 = vpop.f32.mrb[8].mxu1 }
 0x16c   : > { %v814_v59 = vpop.f32.mrb[9].mxu1 }
 0x16d   : > { %v2580_v58 = vpop.f32.mrb[8].mxu0 }
 0x16e   : > { %v2942_v60 = vadd.f32 %v2580_v58, %v2392_v57  ;;  %v1422_v61 = vpop.f32.mrb[9].mxu0 }
 0x16f   : > { %v2944_v63 = vadd.f32 %v1422_v61, %v814_v59 }
 0x17b   : > { %v2624_v5 = vpop.f32.mrb[10].mxu1 }
 0x17c   : > { %v2939_v7 = vadd.f32 %v2938_v54, %v2624_v5  ;;  %v1564_v8 = vpop.f32.mrb[11].mxu1 }
 0x17d   : > { %v2615_v6 = vpop.f32.mrb[0].mxu0  ;;  %v2941_v12 = vadd.f32 %v2940_v43, %v1564_v8 }
 0x17e   : > { %v2932_v9 = vadd.f32 %v2615_v6, %v2380_v46  ;;  %v1534_v11 = vpop.f32.mrb[1].mxu0  ;;  %v1660_v14 = vmul.f32 %v2939_v7, %v1641_v3 }
 0x17f   : > { %v2933_v15 = vadd.f32 %v1534_v11, %v774_v47  ;;  %v1659_v17 = vmul.f32 %v2941_v12, %v1636_v4  ;;  %v2627_v18 = vpop.f32.mrb[12].mxu1 }
 0x180   : > { %v1654_v16 = vmul.f32 %v2932_v9, %v1611_v0  ;;  %1670 = vst [vmem:[%s3692_s24 + $0x38] sm:$0xff] %v1660_v14  ;;  %v2943_v24 = vadd.f32 %v2942_v60, %v2627_v18  ;;  %v1574_v25 = vpop.f32.mrb[13].mxu1  ;;  %v1695_v43 = vmul.f32 %v1660_v14, %v1660_v14 }
 0x181   : > { %v1653_v21 = vmul.f32 %v2933_v15, %v1606_v56  ;;  %v2618_v22 = vpop.f32.mrb[2].mxu0  ;;  %1669 = vst [vmem:[%s3692_s24 + $0x30] sm:$0xff] %v1659_v17  ;;  %v2945_v28 = vadd.f32 %v2944_v63, %v1574_v25 }
 0x182   : > { %1664 = vst [vmem:[%s3692_s24 + $0x8] sm:$0xff] %v1654_v16  ;;  %v1689_v26 = vmul.f32 %v1654_v16, %v1654_v16  ;;  %v2934_v27 = vadd.f32 %v2618_v22, %v2383_v48  ;;  %v1544_v10 = vpop.f32.mrb[3].mxu0  ;;  %v1662_v34 = vmul.f32 %v2943_v24, %v1651_v19 }
 0x183   : > { %1663 = vst [vmem:[%s3692_s24] sm:$0xff] %v1653_v21  ;;  %v1673_v31 = vadd.f32 %v1654_v16, %v1653_v21  ;;  %v1688_v32 = vmul.f32 %v1653_v21, %v1653_v21  ;;  %v2935_v13 = vadd.f32 %v1544_v10, %v784_v49  ;;  %v1661_v20 = vmul.f32 %v2945_v28, %v1646_v29 }
 0x184   : > { %v1656_v35 = vmul.f32 %v2934_v27, %v1621_v62  ;;  %1672 = vst [vmem:[%s3692_s24 + $0x48] sm:$0xff] %v1662_v34  ;;  %v1697_v61 = vmul.f32 %v1662_v34, %v1662_v34 }
 0x185   : > { %v1698_v36 = vadd.f32 %v1689_v26, %v1688_v32  ;;  %v1655_v37 = vmul.f32 %v2935_v13, %v1616_v51  ;;  %v2621_v38 = vpop.f32.mrb[4].mxu0  ;;  %1671 = vst [vmem:[%s3692_s24 + $0x40] sm:$0xff] %v1661_v20  ;;  %v1696_v58 = vmul.f32 %v1661_v20, %v1661_v20 }
 0x186   : > { %1666 = vst [vmem:[%s3692_s24 + $0x18] sm:$0xff] %v1656_v35  ;;  %v2936_v39 = vadd.f32 %v2621_v38, %v2386_v33  ;;  %v1554_v41 = vpop.f32.mrb[5].mxu0  ;;  %v1691_v45 = vmul.f32 %v1656_v35, %v1656_v35  ;;  %v1694_v33 = vmul.f32 %v1659_v17, %v1659_v17 }
 0x187   : > { %1665 = vst [vmem:[%s3692_s24 + $0x10] sm:$0xff] %v1655_v37  ;;  %v1674_v23 = vadd.f32 %v1673_v31, %v1655_v37  ;;  %v1690_v42 = vmul.f32 %v1655_v37, %v1655_v37  ;;  %v2937_v30 = vadd.f32 %v1554_v41, %v3686_v50 }
 0x188   : > { %v1658_v44 = vmul.f32 %v2936_v39, %v1631_v1 }
 0x189   : > { %v1699_v46 = vadd.f32 %v1698_v36, %v1690_v42  ;;  %v1657_v47 = vmul.f32 %v2937_v30, %v1626_v2  ;;  %v1675_v48 = vadd.f32 %v1674_v23, %v1656_v35 }
 0x18a   : > { %1668 = vst [vmem:[%s3692_s24 + $0x28] sm:$0xff] %v1658_v44  ;;  %v1693_v52 = vmul.f32 %v1658_v44, %v1658_v44 }
 0x18b   : > { %1667 = vst [vmem:[%s3692_s24 + $0x20] sm:$0xff] %v1657_v47  ;;  %v1676_v49 = vadd.f32 %v1675_v48, %v1657_v47  ;;  %v1692_v40 = vmul.f32 %v1657_v47, %v1657_v47  ;;  %v1700_v51 = vadd.f32 %v1699_v46, %v1691_v45 }
 0x18d   : > { %v1677_v53 = vadd.f32 %v1676_v49, %v1658_v44  ;;  %v1701_v54 = vadd.f32 %v1700_v51, %v1692_v40 }
 0x18f   : > { %v1678_v55 = vadd.f32 %v1677_v53, %v1659_v17  ;;  %v1702_v56 = vadd.f32 %v1701_v54, %v1693_v52 }
 0x191   : > { %v1679_v57 = vadd.f32 %v1678_v55, %v1660_v14  ;;  %v1703_v50 = vadd.f32 %v1702_v56, %v1694_v33 }
 0x193   : > { %v1680_v59 = vadd.f32 %v1679_v57, %v1661_v20  ;;  %v1704_v60 = vadd.f32 %v1703_v50, %v1695_v43 }
 0x195   : > { %v1681_v62 = vadd.f32 %v1680_v59, %v1662_v34  ;;  %v1705_v63 = vadd.f32 %v1704_v60, %v1696_v58 }
 0x197   : > { %v1682_v0 = vrot.slane %v1681_v62, 4  ;;  %v1706_v1 = vadd.f32 %v1705_v63, %v1697_v61 }
 0x199   : > { %v1683_v2 = vadd.f32 %v1682_v0, %v1681_v62  ;;  %v1707_v3 = vrot.slane %v1706_v1, 4 }
 0x19b   : > { %v1684_v4 = vrot.slane %v1683_v2, 2  ;;  %v1708_v5 = vadd.f32 %v1707_v3, %v1706_v1 }
 0x19d   : > { %v1685_v6 = vadd.f32 %v1684_v4, %v1683_v2  ;;  %v1709_v7 = vrot.slane %v1708_v5, 2 }
 0x19f   : > { %v1686_v8 = vrot.slane %v1685_v6, 1  ;;  %v1710_v9 = vadd.f32 %v1709_v7, %v1708_v5 }
 0x1a1   : > { %v1687_v11 = vadd.f32 %v1686_v8, %v1685_v6  ;;  %v1711_v12 = vrot.slane %v1710_v9, 1 }
 0x1a3   : > { %v1712_v14 = vadd.f32 %v1711_v12, %v1710_v9  ;;  %1713 = vst [vmem:[%s241_s28] sm:$0xff] %v1687_v11 }
 0x1a5   : > { %1714 = vst [vmem:[%s245_s6] sm:$0xff] %v1712_v14 }
 0x1a6 PF: > { %s16_s18 = sadd.s32 1, %s3031_s18  }
 0x1a7   : > { %p13_p4 = scmp.ge.s32.totalorder %s16_s18, 4  }
 0x1a9   :  { %15 = sbr.rel (!%p13_p4) target bundleno = 1 (0x1), region = 94 }

// kernel: vgg16bn_forward.15
= control target key start
LH: loop header
LB: loop body
LE: loop exit
PB: predicated region body
PF: predicated region fallthrough
CT: control target
= control target key end

     0   :  { %8 = vsyncpa [#allocation3], 0  ;;  %s662_s0 = inlined_call_operand.vmem [shape: f32[2,8,5,256], index: 0, kind: input, shape index: {}]   ;;  %s663_s1 = inlined_call_operand.vmem [shape: f32[1,256], index: 1, kind: input, shape index: {}]   ;;  %s664_s2 = inlined_call_operand.vmem [shape: f32[1,256], index: 2, kind: input, shape index: {}]   ;;  %s665_s3 = inlined_call_operand.hbm [shape: f32[2,4,4,128], index: 3, kind: output, shape index: {}]  }
   0x1   :  { %10 = vsyncpa [#allocation3 + $0x1], 0  ;;  %s491_s12 = smov 0   ;;  %s493_s13 = smov 0  }
   0x2   :  { %s495_s14 = smov 0   ;;  %s497_s15 = smov 0  }
   0x3 LB: > { %s512_s16 = sadd.s32 4294967295, %s466_s15   ;;  %s349_s17 = sadd.s32 4294967294, %s466_s15   ;;  %s466_s15 = sphi %s497_s15, %s671_s15   ;;  %s462_s14 = sphi %s495_s14, %s670_s14   ;;  %s458_s13 = sphi %s493_s13, %s669_s13   ;;  %s454_s12 = sphi %s491_s12, %s668_s12  }
   0x4   : > { %s516_s18 = sadd.s32 1, %s466_s15   ;;  %s91_s19 = sadd.s32 1, %s462_s14 }
   0x5   : > { %s88_s20 = ssub.s32 %s466_s15, %s516_s18  ;;  %p101_p0 = scmp.ne.s32.totalorder %s462_s14, %s458_s13 }
   0x6   : > { %p89_p1 = scmp.eq.s32.totalorder %s88_s20, 0  ;;  %p102_p2 = scmp.eq.s32.totalorder %s512_s16, 1 }
   0x7   : > { %p107_p3 = scmp.ne.s32.totalorder %s458_s13, %s454_s12  ;;  %p108_p4 = scmp.eq.s32.totalorder %s349_s17, 1 }
   0x8   : > { %s527_s21 = scalar_select %p89_p1, %s462_s14, %s91_s19  }
   0x9   : > { %p529_p5 = por %p102_p2, %p101_p0  ;;  %p533_p6 = por %p108_p4, %p107_p3 }
   0xa   : > { %p352_p7 = scmp.ge.s32.totalorder %s466_s15, 1  ;;  %p140_p8 = scmp.lt.s32.totalorder %s466_s15, 3 }
   0xc   : > { %p141_p9 = pnand %p352_p7, %p140_p8 }
   0xd   : > { %p164_p10 = scmp.lt.s32.totalorder (!%p141_p9), %s512_s16, 1  ;;  %v187_v0 = vlaneseq (!%p141_p9)  ;;  %v185_v2 = vld [vmem:[%s663_s1] sm:$0x3] (!%p141_p9)  ;;  %s161_s6 = sand.u32 (!%p141_p9), 1, %s458_s13  }
   0xe   : > { %144 = sbr.rel (%p141_p9) target bundleno = 62 (0x3e), region = 32  ;;  %v213_v3 = vld [vmem:[%s664_s2] sm:$0x3] (!%p141_p9)  ;;  %s353_s7 = sshll.u32 (!%p141_p9), %s161_s6, 4 }
   0xf   : > { %v188_v1 = vshrl.u32 (!%p141_p9), %v187_v0, 7  ;;  %s163_s8 = scalar_lea.vmem (!%p141_p9), [#allocation2], %s353_s7  ;;  %s362_s10 = sshll.u32 (!%p141_p9), %s512_s16, 8 }
  0x10   : > { %s287_s9 = sshll.u32 (!%p141_p9), %s163_s8, 4  ;;  %s617_s19 = scalar_lea.hbm (!%p141_p9), %s665_s3, %s362_s10  ;;  %s612_s9 = int_to_ptr.vmem [resolvable:$true] %s287_s9 }
  0x11   : > { %v189_v4 = vsub.s32 (!%p141_p9), 0, %v188_v1  ;;  %v193_v5 = vsub.s32 (!%p141_p9), 1, %v188_v1  ;;  %s621_s20 = scalar_lea.sflag (!%p141_p9), [#allocation3], %s161_s6 }
  0x13   : > { %v552_v6 = vrot.slane (!%p141_p9), %v185_v2, %v189_v4  ;;  %v554_v7 = vrot.slane (!%p141_p9), %v185_v2, %v193_v5  ;;  %v556_v8 = vrot.slane (!%p141_p9), %v213_v3, %v189_v4  ;;  %v558_v9 = vrot.slane (!%p141_p9), %v213_v3, %v193_v5 }
  0x15   : > { %s165_s24 = scalar_select %p164_p10, %s512_s16, 1 }
  0x16   : > { %s404_s16 = scalar_lea.vmem %s612_s9, 256 }
  0x17   : > { %s361_s29 = sshll.u32 %s165_s24, 7  ;;  %p405_p11 = scmp.ne.s32.totalorder %s612_s9, %s404_s16 }
  0x18   : > { %s550_s5 = scalar_lea.vmem %s662_s0, %s361_s29  ;;  %s468_s24 = smov [#allocation2]  }
  0x19   : > { %v169_v10 = vld [vmem:[%s550_s5] sm:$0x1f]  ;;  %v170_v11 = vld [vmem:[%s550_s5 + $0x8] sm:$0x1f]  ;;  %v171_v12 = vld [vmem:[%s550_s5 + $0x10] sm:$0x1f]  ;;  %p406_p12 = pnand %p405_p11, %p529_p5 }
  0x1a   : > { %v172_v13 = vld [vmem:[%s550_s5 + $0x18] sm:$0x1f]  ;;  %v197_v14 = vmul.f32 %v552_v6, %v169_v10  ;;  %v198_v15 = vmul.f32 %v554_v7, %v170_v11  ;;  %v199_v16 = vmul.f32 %v552_v6, %v171_v12  ;;  %v173_v17 = vld [vmem:[%s550_s5 + $0x20] sm:$0x1f]  ;;  %v174_v18 = vld [vmem:[%s550_s5 + $0x28] sm:$0x1f] }
  0x1b   : > { %v200_v19 = vmul.f32 %v554_v7, %v172_v13  ;;  %v175_v20 = vld [vmem:[%s550_s5 + $0x30] sm:$0x1f]  ;;  %v176_v21 = vld [vmem:[%s550_s5 + $0x38] sm:$0x1f]  ;;  %v201_v22 = vmul.f32 %v552_v6, %v173_v17  ;;  %v202_v23 = vmul.f32 %v554_v7, %v174_v18  ;;  %v177_v32 = vld [vmem:[%s550_s5 + $0x40] sm:$0x1f]  ;;  %p407_p13 = pneg %p406_p12 }
  0x1c   : > { %v225_v24 = vadd.f32 %v556_v8, %v197_v14  ;;  %v226_v25 = vadd.f32 %v558_v9, %v198_v15  ;;  %v227_v26 = vadd.f32 %v556_v8, %v199_v16  ;;  %v203_v27 = vmul.f32 %v552_v6, %v175_v20  ;;  %v178_v33 = vld [vmem:[%s550_s5 + $0x48] sm:$0x1f]  ;;  %v179_v34 = vld [vmem:[%s550_s5 + $0x50] sm:$0x1f]  ;;  %v180_v39 = vld [vmem:[%s550_s5 + $0x58] sm:$0x1f] }
  0x1d   : > { %v228_v28 = vadd.f32 %v558_v9, %v200_v19  ;;  %v204_v29 = vmul.f32 %v554_v7, %v176_v21  ;;  %v229_v30 = vadd.f32 %v556_v8, %v201_v22  ;;  %v230_v31 = vadd.f32 %v558_v9, %v202_v23  ;;  %v181_v44 = vld [vmem:[%s550_s5 + $0x60] sm:$0x1f]  ;;  %v182_v49 = vld [vmem:[%s550_s5 + $0x68] sm:$0x1f]  ;;  %v183_v54 = vld [vmem:[%s550_s5 + $0x70] sm:$0x1f] }
  0x1e   : > { %v241_v35 = vmax.f32 %v225_v24, 0.0  ;;  %v242_v36 = vmax.f32 %v226_v25, 0.0  ;;  %v243_v37 = vmax.f32 %v227_v26, 0.0  ;;  %v231_v38 = vadd.f32 %v556_v8, %v203_v27  ;;  %v184_v58 = vld [vmem:[%s550_s5 + $0x78] sm:$0x1f]  ;;  %s408_s25 = sshll.u32 %s468_s24, 4  ;;  %s409_s25 = int_to_ptr.vmem [resolvable:$false] %s408_s25 }
  0x1f   : > { %v244_v40 = vmax.f32 %v228_v28, 0.0  ;;  %v232_v41 = vadd.f32 %v558_v9, %v204_v29  ;;  %v245_v42 = vmax.f32 %v229_v30, 0.0  ;;  %v246_v43 = vmax.f32 %v230_v31, 0.0  ;;  %s410_s26 = scalar_lea.vmem %s409_s25, 512  ;;  %p411_p0 = scmp.lt.s32.totalorder %s612_s9, %s409_s25 }
  0x20   : > { %v257_v45 = vmax.f32 %v241_v35, %v242_v36  ;;  %v247_v46 = vmax.f32 %v231_v38, 0.0  ;;  %v205_v47 = vmul.f32 %v552_v6, %v177_v32  ;;  %v206_v48 = vmul.f32 %v554_v7, %v178_v33  ;;  %p412_p1 = scmp.lt.s32.totalorder %s410_s26, %s404_s16 }
  0x21   : > { %v258_v50 = vmax.f32 %v243_v37, %v244_v40  ;;  %v248_v51 = vmax.f32 %v232_v41, 0.0  ;;  %v259_v52 = vmax.f32 %v245_v42, %v246_v43  ;;  %v207_v53 = vmul.f32 %v552_v6, %v179_v34 }
  0x22   : > { %v208_v55 = vmul.f32 %v554_v7, %v180_v39  ;;  %v233_v56 = vadd.f32 %v556_v8, %v205_v47  ;;  %v234_v57 = vadd.f32 %v558_v9, %v206_v48  ;;  %v209_v59 = vmul.f32 %v552_v6, %v181_v44  ;;  %p413_p2 = por %p412_p1, %p411_p0 }
  0x23   : > { %v265_v60 = vmax.f32 %v257_v45, %v258_v50  ;;  %v260_v61 = vmax.f32 %v247_v46, %v248_v51  ;;  %v235_v62 = vadd.f32 %v556_v8, %v207_v53  ;;  %v210_v63 = vmul.f32 %v554_v7, %v182_v49 }
  0x24   : > { %v236_v0 = vadd.f32 %v558_v9, %v208_v55  ;;  %v249_v1 = vmax.f32 %v233_v56, 0.0  ;;  %v250_v2 = vmax.f32 %v234_v57, 0.0  ;;  %v211_v3 = vmul.f32 %v552_v6, %v183_v54  ;;  %p414_p3 = pnand %p413_p2, %p407_p13 }
  0x25   : > { %269 = vst [vmem:[%s163_s8] sm:$0xf] %v265_v60  ;;  %v266_v4 = vmax.f32 %v259_v52, %v260_v61  ;;  %v251_v5 = vmax.f32 %v235_v62, 0.0  ;;  %v212_v10 = vmul.f32 %v554_v7, %v184_v58  ;;  %v237_v11 = vadd.f32 %v556_v8, %v209_v59 }
  0x26   : > { %v252_v12 = vmax.f32 %v236_v0, 0.0  ;;  %v261_v13 = vmax.f32 %v249_v1, %v250_v2  ;;  %v238_v14 = vadd.f32 %v558_v9, %v210_v63  ;;  %v239_v15 = vadd.f32 %v556_v8, %v211_v3 }
  0x27   : > { %270 = vst [vmem:[%s163_s8 + $0x4] sm:$0xf] %v266_v4  ;;  %v240_v16 = vadd.f32 %v558_v9, %v212_v10  ;;  %v253_v6 = vmax.f32 %v237_v11, 0.0 }
  0x28   : > { %v262_v17 = vmax.f32 %v251_v5, %v252_v12  ;;  %v254_v18 = vmax.f32 %v238_v14, 0.0  ;;  %v255_v19 = vmax.f32 %v239_v15, 0.0 }
  0x29   : > { %v256_v20 = vmax.f32 %v240_v16, 0.0 }
  0x2a   : > { %v267_v7 = vmax.f32 %v261_v13, %v262_v17  ;;  %v263_v21 = vmax.f32 %v253_v6, %v254_v18 }
  0x2b   : > { %v264_v22 = vmax.f32 %v255_v19, %v256_v20 }
  0x2c   : > { %271 = vst [vmem:[%s163_s8 + $0x8] sm:$0xf] %v267_v7 }
  0x2d   : > { %v268_v8 = vmax.f32 %v263_v21, %v264_v22 }
  0x2f   : > { %272 = vst [vmem:[%s163_s8 + $0xc] sm:$0xf] %v268_v8 }
  0x30   : > { %417 = shalt.err (!%p414_p3)
}
  0x31   : > { %s418_s27 = scalar_lea.hbm %s617_s19, 256  ;;  %s422_s30 = scalar_lea.hbm %s665_s3, 512 }
  0x32   : > { %p419_p4 = scmp.ne.s32.totalorder %s617_s19, %s418_s27  ;;  %p423_p9 = scmp.lt.u32.totalorder %s617_s19, %s665_s3 }
  0x33   : > { %p424_p10 = scmp.lt.u32.totalorder %s422_s30, %s418_s27  ;;  %p426_p12 = scmp.lt.u32.totalorder %s418_s27, %s617_s19 }
  0x34   : > { %p420_p7 = pnand %p419_p4, %p529_p5 }
  0x35   : > { %p425_p11 = por %p424_p10, %p423_p9 }
  0x36   : > { %p421_p8 = pneg %p420_p7 }
  0x37   : > { %p427_p13 = por %p426_p12, %p425_p11 }
  0x39   : > { %p428_p0 = pnand %p427_p13, %p421_p8 }
  0x3b   : > { %431 = shalt.err (!%p428_p0)
}
  0x3c   : > { %s469_s6 = smov 64   ;;  %s470_s7 = smov 4  }
  0x3d   : > { %363 = dma.vmem_to_hbm [thread:$0]  (%p529_p5), %s612_s9, 256, %s617_s19, %s621_s20, %s469_s6, %s469_s6, %s470_s7  }
  0x3e PF: > { %p369_p1 = scmp.ge.s32.totalorder %s466_s15, 2  ;;  %s302_s8 = sand.u32 1, %s454_s12  }
  0x3f   : > { %s303_s10 = scalar_lea.sflag [#allocation3], %s302_s8 }
  0x40   : > { %p366_p2 = pnand %p369_p1, %p533_p6 }
  0x42   : > { %449 = dma.done.wait (!%p366_p2), %s303_s10, 256  }
  0x43   : > { %451 = vsyncadd (!%p366_p2), %s303_s10, 4294967040  ;;  %p13_p3 = scmp.ge.s32.totalorder %s516_s18, 4   ;;  %s668_s12 = smov %s458_s13 }
  0x44   : > { %s669_s13 = smov %s462_s14  ;;  %s670_s14 = smov %s527_s21 }
  0x45   : > { %s671_s15 = smov %s516_s18  ;;  %15 = sbr.rel (!%p13_p3) target bundleno = 3 (0x3), region = 67 }
  0x4c   :  { %308 = vsyncpa [#allocation3], 1 }
  0x4d   :  { %310 = vsyncpa [#allocation3 + $0x1], 1 }

</bundles_post_ra>
